<compile_context>
chip_gen: v7x
topology: tpu7x:2x2x1
jax: 0.10.0
libtpu: 0.0.40
codegen_flags: <defaults>
</compile_context>

<pallas_src>
import functools

import jax
import jax.numpy as jnp
from jax.experimental import pallas as pl
from jax.experimental.pallas import tpu as pltpu


def _reflect_pad1(plane, H, W):
    """Reflection-pad a (H, W) plane by 1 on each side, entirely in registers."""
    pr = jnp.concatenate([plane[1:2, :], plane, plane[H - 2:H - 1, :]], axis=0)
    return jnp.concatenate([pr[:, 1:2], pr, pr[:, W - 2:W - 1]], axis=1)


def _conv3x3_kernel(w_ref, x_ref, o_ref, *, cin, cout_total, co_block, use_bias):
    """kernel_size=3 path: reflection pad 1 + 3x3 valid conv, all cout per grid step.

    w_ref: SMEM (cout*cin*9 [+ cout],) flat conv weights (+ bias)   [scalar prefetch]
    x_ref: VMEM (1, cin, H, W)       input block for this batch element
    o_ref: VMEM (1, co_block, H, W)  fused output block
    """
    H, W = x_ref.shape[2], x_ref.shape[3]
    co0 = pl.program_id(1) * co_block

    accs = [jnp.zeros((H, W), jnp.float32) for _ in range(co_block)]
    for ci in range(cin):
        pp = _reflect_pad1(x_ref[0, ci], H, W)               # (H+2, W+2), registers only
        # Hoisted shifts: 3 lane-axis column shifts + 9 sublane row slices per ci,
        # reused by every output channel.
        cols = [pp[:, dj:dj + W] for dj in range(3)]         # each (H+2, W)
        taps = [[cols[dj][di:di + H, :] for dj in range(3)] for di in range(3)]
        for c in range(co_block):
            wb = ((co0 + c) * cin + ci) * 9
            a = accs[c]
            for di in range(3):
                for dj in range(3):
                    wv = w_ref[wb + di * 3 + dj]             # cheap SMEM scalar load
                    a = a + wv * taps[di][dj]                # VPU broadcast FMA
            accs[c] = a

    for c in range(co_block):
        a = accs[c]
        if use_bias:
            a = a + w_ref[cout_total * cin * 9 + co0 + c]
        o_ref[0, c] = a.astype(o_ref.dtype)


def _conv1x1_pad1_kernel(w_ref, x_ref, o_ref, *, cin, cout_total, co_block, use_bias):
    """kernel_size=1 path: 1x1 conv with zero padding=1 (PyTorch module quirk).

    Border outputs equal the bias (zero-padded input through a 1x1 conv), interior is
    w.x + bias. The whole fused (co_block, H+2, W+2) block is written with one store.
    """
    H, W = x_ref.shape[2], x_ref.shape[3]
    co0 = pl.program_id(1) * co_block

    planes, bcols, brows = [], [], []
    for c in range(co_block):
        acc = jnp.zeros((H, W), jnp.float32)
        for ci in range(cin):
            acc = acc + w_ref[(co0 + c) * cin + ci] * x_ref[0, ci]
        if use_bias:
            b = w_ref[cout_total * cin + co0 + c]
            acc = acc + b
            bcols.append(jnp.full((1, H, 1), b, jnp.float32))
            brows.append(jnp.full((1, 1, W + 2), b, jnp.float32))
        planes.append(acc[None])

    stack = jnp.concatenate(planes, axis=0)                  # (co_block, H, W)
    if use_bias:
        bcol = jnp.concatenate(bcols, axis=0)                # (co_block, H, 1)
        brow = jnp.concatenate(brows, axis=0)                # (co_block, 1, W+2)
    else:
        bcol = jnp.zeros((co_block, H, 1), jnp.float32)
        brow = jnp.zeros((co_block, 1, W + 2), jnp.float32)
    full = jnp.concatenate([bcol, stack, bcol], axis=2)      # (co_block, H, W+2)
    full = jnp.concatenate([brow, full, brow], axis=1)       # (co_block, H+2, W+2)
    o_ref[0] = full.astype(o_ref.dtype)                      # single fused store


def conv2d(x, weight, bias=None, *, kernel_size=3, stride=1):
    """Forward of the PyTorch Conv2D module. x: (N, Cin, H, W) NCHW; returns NCHW."""
    if stride != 1:
        raise NotImplementedError("stride != 1 not implemented")
    x = jnp.asarray(x, jnp.float32)
    N, cin, H, W = x.shape
    cout = weight.shape[0]
    use_bias = bias is not None
    if kernel_size == 3 and (H < 2 or W < 2):
        raise ValueError("ReflectionPad2d(1) requires H >= 2 and W >= 2")

    flat = [jnp.asarray(weight, jnp.float32).reshape(-1)]
    if use_bias:
        flat.append(jnp.asarray(bias, jnp.float32).reshape(-1))
    scalars = jnp.concatenate(flat) if use_bias else flat[0]

    # v7x megacore: keep >= 2 parallel grid steps. Batch provides them when N >= 2;
    # for N == 1 split the fused out-channel block in two.
    co_blocks = 2 if (N == 1 and cout % 2 == 0) else 1
    co_block = cout // co_blocks

    if kernel_size == 3:
        kern = functools.partial(_conv3x3_kernel, cin=cin, cout_total=cout,
                                 co_block=co_block, use_bias=use_bias)
        Ho, Wo = H, W
        flops = 2 * N * cout * cin * 9 * H * W
    elif kernel_size == 1:
        kern = functools.partial(_conv1x1_pad1_kernel, cin=cin, cout_total=cout,
                                 co_block=co_block, use_bias=use_bias)
        Ho, Wo = H + 2, W + 2
        flops = 2 * N * cout * cin * H * W
    else:
        raise NotImplementedError("Conv2D module only uses kernel_size in {1, 3}")

    bytes_accessed = 4 * (x.size + int(scalars.size) + N * cout * Ho * Wo)
    cost = pl.CostEstimate(flops=flops, transcendentals=0,
                           bytes_accessed=bytes_accessed)

    grid_spec = pltpu.PrefetchScalarGridSpec(
        num_scalar_prefetch=1,
        grid=(N, co_blocks),
        in_specs=[
            # Constant over the cout-block axis -> not re-fetched per inner step.
            pl.BlockSpec((1, cin, H, W), lambda n, c, ws: (n, 0, 0, 0)),
        ],
        out_specs=pl.BlockSpec((1, co_block, Ho, Wo), lambda n, c, ws: (n, c, 0, 0)),
    )
    return pl.pallas_call(
        kern,
        grid_spec=grid_spec,
        out_shape=jax.ShapeDtypeStruct((N, cout, Ho, Wo), jnp.float32),
        compiler_params=pltpu.CompilerParams(
            dimension_semantics=("parallel", "parallel")),
        cost_estimate=cost,
    )(scalars, x)


def _reference(x, weight, bias, kernel_size, stride=1):
    """Pure-JAX/XLA reference of the exact PyTorch forward (for sanity checking)."""
    if kernel_size == 3:
        xin = jnp.pad(x, ((0, 0), (0, 0), (1, 1), (1, 1)), mode="reflect")
        padding = "VALID"
    else:
        xin = x
        padding = ((1, 1), (1, 1))
    out = jax.lax.conv_general_dilated(
        xin, weight, window_strides=(stride, stride), padding=padding,
        dimension_numbers=("NCHW", "OIHW", "NCHW"))
    if bias is not None:
        out = out + bias.reshape(1, -1, 1, 1)
    return out


if __name__ == "__main__":
    key = jax.random.PRNGKey(0)
    kx, kw3, kw1, kb = jax.random.split(key, 4)
    N, Cin, Cout, H, W = 2, 4, 8, 16, 16

    x = jax.random.normal(kx, (N, Cin, H, W), jnp.float32)

    # Default module config: kernel_size=3 (reflection pad), stride=1, use_bias=False.
    # trunc_normal_(std=0.02) approximated by 0.02 * normal (deterministic synthetic init).
    w3 = 0.02 * jax.random.normal(kw3, (Cout, Cin, 3, 3), jnp.float32)
    out3 = jax.block_until_ready(conv2d(x, w3, kernel_size=3))
    ref3 = _reference(x, w3, None, 3)
    assert out3.shape == (N, Cout, H, W), out3.shape
    assert jnp.allclose(out3, ref3, rtol=1e-4, atol=1e-5), float(jnp.max(jnp.abs(out3 - ref3)))

    # kernel_size=1 path (Conv2d padding=1 quirk), with bias enabled.
    w1 = 0.02 * jax.random.normal(kw1, (Cout, Cin, 1, 1), jnp.float32)
    b1 = 0.02 * jax.random.normal(kb, (Cout,), jnp.float32)
    out1 = jax.block_until_ready(conv2d(x, w1, b1, kernel_size=1))
    ref1 = _reference(x, w1, b1, 1)
    assert out1.shape == (N, Cout, H + 2, W + 2), out1.shape
    assert jnp.allclose(out1, ref1, rtol=1e-4, atol=1e-5), float(jnp.max(jnp.abs(out1 - ref1)))

    print("KERNEL_OK")
</pallas_src>

<mosaic_0001>
module attributes {stable_mosaic.version = 11 : i64} {
  func.func @_conv3x3_kernel(%arg0: i32, %arg1: i32, %arg2: memref<288xf32, #tpu.memory_space<smem>>, %arg3: memref<1x4x16x16xf32, #tpu.memory_space<vmem>>, %arg4: memref<1x8x16x16xf32, #tpu.memory_space<vmem>>) attributes {dimension_semantics = [#tpu.dimension_semantics<parallel>, #tpu.dimension_semantics<parallel>], iteration_bounds = array<i64: 2, 1>, scalar_prefetch = 1 : i64, scratch_operands = 0 : i64, tpu.core_type = #tpu.core_type<tc>, window_params = [{transform_indices = @transform_0, window_bounds = array<i64: 1, 4, 16, 16>}, {transform_indices = @transform_1, window_bounds = array<i64: 1, 8, 16, 16>}]} {
    %c8_i32 = arith.constant 8 : i32
    %0 = arith.muli %arg1, %c8_i32 : i32
    %cst = arith.constant 0.000000e+00 : f32
    %1 = vector.broadcast %cst : f32 to vector<16x16xf32>
    %cst_0 = arith.constant 0.000000e+00 : f32
    %2 = vector.broadcast %cst_0 : f32 to vector<16x16xf32>
    %cst_1 = arith.constant 0.000000e+00 : f32
    %3 = vector.broadcast %cst_1 : f32 to vector<16x16xf32>
    %cst_2 = arith.constant 0.000000e+00 : f32
    %4 = vector.broadcast %cst_2 : f32 to vector<16x16xf32>
    %cst_3 = arith.constant 0.000000e+00 : f32
    %5 = vector.broadcast %cst_3 : f32 to vector<16x16xf32>
    %cst_4 = arith.constant 0.000000e+00 : f32
    %6 = vector.broadcast %cst_4 : f32 to vector<16x16xf32>
    %cst_5 = arith.constant 0.000000e+00 : f32
    %7 = vector.broadcast %cst_5 : f32 to vector<16x16xf32>
    %cst_6 = arith.constant 0.000000e+00 : f32
    %8 = vector.broadcast %cst_6 : f32 to vector<16x16xf32>
    %c0 = arith.constant 0 : index
    %c0_7 = arith.constant 0 : index
    %c0_8 = arith.constant 0 : index
    %c0_9 = arith.constant 0 : index
    %9 = vector.load %arg3[%c0, %c0_7, %c0_8, %c0_9] : memref<1x4x16x16xf32, #tpu.memory_space<vmem>>, vector<1x1x16x16xf32>
    %10 = vector.shape_cast %9 : vector<1x1x16x16xf32> to vector<16x16xf32>
    %11 = vector.extract_strided_slice %10 {offsets = [1, 0], sizes = [1, 16], strides = [1, 1]} : vector<16x16xf32> to vector<1x16xf32>
    %12 = vector.extract_strided_slice %10 {offsets = [14, 0], sizes = [1, 16], strides = [1, 1]} : vector<16x16xf32> to vector<1x16xf32>
    %13 = tpu.concatenate %11, %10, %12 in 0 : vector<1x16xf32>, vector<16x16xf32>, vector<1x16xf32> -> vector<18x16xf32>
    %14 = vector.extract_strided_slice %13 {offsets = [0, 1], sizes = [18, 1], strides = [1, 1]} : vector<18x16xf32> to vector<18x1xf32>
    %15 = vector.extract_strided_slice %13 {offsets = [0, 14], sizes = [18, 1], strides = [1, 1]} : vector<18x16xf32> to vector<18x1xf32>
    %16 = tpu.concatenate %14, %13, %15 in 1 : vector<18x1xf32>, vector<18x16xf32>, vector<18x1xf32> -> vector<18x18xf32>
    %17 = vector.extract_strided_slice %16 {offsets = [0, 0], sizes = [18, 16], strides = [1, 1]} : vector<18x18xf32> to vector<18x16xf32>
    %18 = vector.extract_strided_slice %16 {offsets = [0, 1], sizes = [18, 16], strides = [1, 1]} : vector<18x18xf32> to vector<18x16xf32>
    %19 = vector.extract_strided_slice %16 {offsets = [0, 2], sizes = [18, 16], strides = [1, 1]} : vector<18x18xf32> to vector<18x16xf32>
    %20 = vector.extract_strided_slice %17 {offsets = [0, 0], sizes = [16, 16], strides = [1, 1]} : vector<18x16xf32> to vector<16x16xf32>
    %21 = vector.extract_strided_slice %18 {offsets = [0, 0], sizes = [16, 16], strides = [1, 1]} : vector<18x16xf32> to vector<16x16xf32>
    %22 = vector.extract_strided_slice %19 {offsets = [0, 0], sizes = [16, 16], strides = [1, 1]} : vector<18x16xf32> to vector<16x16xf32>
    %23 = vector.extract_strided_slice %17 {offsets = [1, 0], sizes = [16, 16], strides = [1, 1]} : vector<18x16xf32> to vector<16x16xf32>
    %24 = vector.extract_strided_slice %18 {offsets = [1, 0], sizes = [16, 16], strides = [1, 1]} : vector<18x16xf32> to vector<16x16xf32>
    %25 = vector.extract_strided_slice %19 {offsets = [1, 0], sizes = [16, 16], strides = [1, 1]} : vector<18x16xf32> to vector<16x16xf32>
    %26 = vector.extract_strided_slice %17 {offsets = [2, 0], sizes = [16, 16], strides = [1, 1]} : vector<18x16xf32> to vector<16x16xf32>
    %27 = vector.extract_strided_slice %18 {offsets = [2, 0], sizes = [16, 16], strides = [1, 1]} : vector<18x16xf32> to vector<16x16xf32>
    %28 = vector.extract_strided_slice %19 {offsets = [2, 0], sizes = [16, 16], strides = [1, 1]} : vector<18x16xf32> to vector<16x16xf32>
    %c0_i32 = arith.constant 0 : i32
    %29 = arith.addi %0, %c0_i32 : i32
    %c4_i32 = arith.constant 4 : i32
    %30 = arith.muli %29, %c4_i32 : i32
    %c0_i32_10 = arith.constant 0 : i32
    %31 = arith.addi %30, %c0_i32_10 : i32
    %c9_i32 = arith.constant 9 : i32
    %32 = arith.muli %31, %c9_i32 : i32
    %c0_i32_11 = arith.constant 0 : i32
    %33 = arith.addi %32, %c0_i32_11 : i32
    %c0_i32_12 = arith.constant 0 : i32
    %34 = arith.addi %33, %c0_i32_12 : i32
    %35 = arith.index_cast %34 : i32 to index
    %36 = memref.load %arg2[%35] : memref<288xf32, #tpu.memory_space<smem>>
    %37 = vector.broadcast %36 : f32 to vector<16x16xf32>
    %38 = arith.mulf %37, %20 : vector<16x16xf32>
    %39 = arith.addf %1, %38 : vector<16x16xf32>
    %c0_i32_13 = arith.constant 0 : i32
    %40 = arith.addi %32, %c0_i32_13 : i32
    %c1_i32 = arith.constant 1 : i32
    %41 = arith.addi %40, %c1_i32 : i32
    %42 = arith.index_cast %41 : i32 to index
    %43 = memref.load %arg2[%42] : memref<288xf32, #tpu.memory_space<smem>>
    %44 = vector.broadcast %43 : f32 to vector<16x16xf32>
    %45 = arith.mulf %44, %21 : vector<16x16xf32>
    %46 = arith.addf %39, %45 : vector<16x16xf32>
    %c0_i32_14 = arith.constant 0 : i32
    %47 = arith.addi %32, %c0_i32_14 : i32
    %c2_i32 = arith.constant 2 : i32
    %48 = arith.addi %47, %c2_i32 : i32
    %49 = arith.index_cast %48 : i32 to index
    %50 = memref.load %arg2[%49] : memref<288xf32, #tpu.memory_space<smem>>
    %51 = vector.broadcast %50 : f32 to vector<16x16xf32>
    %52 = arith.mulf %51, %22 : vector<16x16xf32>
    %53 = arith.addf %46, %52 : vector<16x16xf32>
    %c3_i32 = arith.constant 3 : i32
    %54 = arith.addi %32, %c3_i32 : i32
    %c0_i32_15 = arith.constant 0 : i32
    %55 = arith.addi %54, %c0_i32_15 : i32
    %56 = arith.index_cast %55 : i32 to index
    %57 = memref.load %arg2[%56] : memref<288xf32, #tpu.memory_space<smem>>
    %58 = vector.broadcast %57 : f32 to vector<16x16xf32>
    %59 = arith.mulf %58, %23 : vector<16x16xf32>
    %60 = arith.addf %53, %59 : vector<16x16xf32>
    %c3_i32_16 = arith.constant 3 : i32
    %61 = arith.addi %32, %c3_i32_16 : i32
    %c1_i32_17 = arith.constant 1 : i32
    %62 = arith.addi %61, %c1_i32_17 : i32
    %63 = arith.index_cast %62 : i32 to index
    %64 = memref.load %arg2[%63] : memref<288xf32, #tpu.memory_space<smem>>
    %65 = vector.broadcast %64 : f32 to vector<16x16xf32>
    %66 = arith.mulf %65, %24 : vector<16x16xf32>
    %67 = arith.addf %60, %66 : vector<16x16xf32>
    %c3_i32_18 = arith.constant 3 : i32
    %68 = arith.addi %32, %c3_i32_18 : i32
    %c2_i32_19 = arith.constant 2 : i32
    %69 = arith.addi %68, %c2_i32_19 : i32
    %70 = arith.index_cast %69 : i32 to index
    %71 = memref.load %arg2[%70] : memref<288xf32, #tpu.memory_space<smem>>
    %72 = vector.broadcast %71 : f32 to vector<16x16xf32>
    %73 = arith.mulf %72, %25 : vector<16x16xf32>
    %74 = arith.addf %67, %73 : vector<16x16xf32>
    %c6_i32 = arith.constant 6 : i32
    %75 = arith.addi %32, %c6_i32 : i32
    %c0_i32_20 = arith.constant 0 : i32
    %76 = arith.addi %75, %c0_i32_20 : i32
    %77 = arith.index_cast %76 : i32 to index
    %78 = memref.load %arg2[%77] : memref<288xf32, #tpu.memory_space<smem>>
    %79 = vector.broadcast %78 : f32 to vector<16x16xf32>
    %80 = arith.mulf %79, %26 : vector<16x16xf32>
    %81 = arith.addf %74, %80 : vector<16x16xf32>
    %c6_i32_21 = arith.constant 6 : i32
    %82 = arith.addi %32, %c6_i32_21 : i32
    %c1_i32_22 = arith.constant 1 : i32
    %83 = arith.addi %82, %c1_i32_22 : i32
    %84 = arith.index_cast %83 : i32 to index
    %85 = memref.load %arg2[%84] : memref<288xf32, #tpu.memory_space<smem>>
    %86 = vector.broadcast %85 : f32 to vector<16x16xf32>
    %87 = arith.mulf %86, %27 : vector<16x16xf32>
    %88 = arith.addf %81, %87 : vector<16x16xf32>
    %c6_i32_23 = arith.constant 6 : i32
    %89 = arith.addi %32, %c6_i32_23 : i32
    %c2_i32_24 = arith.constant 2 : i32
    %90 = arith.addi %89, %c2_i32_24 : i32
    %91 = arith.index_cast %90 : i32 to index
    %92 = memref.load %arg2[%91] : memref<288xf32, #tpu.memory_space<smem>>
    %93 = vector.broadcast %92 : f32 to vector<16x16xf32>
    %94 = arith.mulf %93, %28 : vector<16x16xf32>
    %95 = arith.addf %88, %94 : vector<16x16xf32>
    %c1_i32_25 = arith.constant 1 : i32
    %96 = arith.addi %0, %c1_i32_25 : i32
    %c4_i32_26 = arith.constant 4 : i32
    %97 = arith.muli %96, %c4_i32_26 : i32
    %c0_i32_27 = arith.constant 0 : i32
    %98 = arith.addi %97, %c0_i32_27 : i32
    %c9_i32_28 = arith.constant 9 : i32
    %99 = arith.muli %98, %c9_i32_28 : i32
    %c0_i32_29 = arith.constant 0 : i32
    %100 = arith.addi %99, %c0_i32_29 : i32
    %c0_i32_30 = arith.constant 0 : i32
    %101 = arith.addi %100, %c0_i32_30 : i32
    %102 = arith.index_cast %101 : i32 to index
    %103 = memref.load %arg2[%102] : memref<288xf32, #tpu.memory_space<smem>>
    %104 = vector.broadcast %103 : f32 to vector<16x16xf32>
    %105 = arith.mulf %104, %20 : vector<16x16xf32>
    %106 = arith.addf %2, %105 : vector<16x16xf32>
    %c0_i32_31 = arith.constant 0 : i32
    %107 = arith.addi %99, %c0_i32_31 : i32
    %c1_i32_32 = arith.constant 1 : i32
    %108 = arith.addi %107, %c1_i32_32 : i32
    %109 = arith.index_cast %108 : i32 to index
    %110 = memref.load %arg2[%109] : memref<288xf32, #tpu.memory_space<smem>>
    %111 = vector.broadcast %110 : f32 to vector<16x16xf32>
    %112 = arith.mulf %111, %21 : vector<16x16xf32>
    %113 = arith.addf %106, %112 : vector<16x16xf32>
    %c0_i32_33 = arith.constant 0 : i32
    %114 = arith.addi %99, %c0_i32_33 : i32
    %c2_i32_34 = arith.constant 2 : i32
    %115 = arith.addi %114, %c2_i32_34 : i32
    %116 = arith.index_cast %115 : i32 to index
    %117 = memref.load %arg2[%116] : memref<288xf32, #tpu.memory_space<smem>>
    %118 = vector.broadcast %117 : f32 to vector<16x16xf32>
    %119 = arith.mulf %118, %22 : vector<16x16xf32>
    %120 = arith.addf %113, %119 : vector<16x16xf32>
    %c3_i32_35 = arith.constant 3 : i32
    %121 = arith.addi %99, %c3_i32_35 : i32
    %c0_i32_36 = arith.constant 0 : i32
    %122 = arith.addi %121, %c0_i32_36 : i32
    %123 = arith.index_cast %122 : i32 to index
    %124 = memref.load %arg2[%123] : memref<288xf32, #tpu.memory_space<smem>>
    %125 = vector.broadcast %124 : f32 to vector<16x16xf32>
    %126 = arith.mulf %125, %23 : vector<16x16xf32>
    %127 = arith.addf %120, %126 : vector<16x16xf32>
    %c3_i32_37 = arith.constant 3 : i32
    %128 = arith.addi %99, %c3_i32_37 : i32
    %c1_i32_38 = arith.constant 1 : i32
    %129 = arith.addi %128, %c1_i32_38 : i32
    %130 = arith.index_cast %129 : i32 to index
    %131 = memref.load %arg2[%130] : memref<288xf32, #tpu.memory_space<smem>>
    %132 = vector.broadcast %131 : f32 to vector<16x16xf32>
    %133 = arith.mulf %132, %24 : vector<16x16xf32>
    %134 = arith.addf %127, %133 : vector<16x16xf32>
    %c3_i32_39 = arith.constant 3 : i32
    %135 = arith.addi %99, %c3_i32_39 : i32
    %c2_i32_40 = arith.constant 2 : i32
    %136 = arith.addi %135, %c2_i32_40 : i32
    %137 = arith.index_cast %136 : i32 to index
    %138 = memref.load %arg2[%137] : memref<288xf32, #tpu.memory_space<smem>>
    %139 = vector.broadcast %138 : f32 to vector<16x16xf32>
    %140 = arith.mulf %139, %25 : vector<16x16xf32>
    %141 = arith.addf %134, %140 : vector<16x16xf32>
    %c6_i32_41 = arith.constant 6 : i32
    %142 = arith.addi %99, %c6_i32_41 : i32
    %c0_i32_42 = arith.constant 0 : i32
    %143 = arith.addi %142, %c0_i32_42 : i32
    %144 = arith.index_cast %143 : i32 to index
    %145 = memref.load %arg2[%144] : memref<288xf32, #tpu.memory_space<smem>>
    %146 = vector.broadcast %145 : f32 to vector<16x16xf32>
    %147 = arith.mulf %146, %26 : vector<16x16xf32>
    %148 = arith.addf %141, %147 : vector<16x16xf32>
    %c6_i32_43 = arith.constant 6 : i32
    %149 = arith.addi %99, %c6_i32_43 : i32
    %c1_i32_44 = arith.constant 1 : i32
    %150 = arith.addi %149, %c1_i32_44 : i32
    %151 = arith.index_cast %150 : i32 to index
    %152 = memref.load %arg2[%151] : memref<288xf32, #tpu.memory_space<smem>>
    %153 = vector.broadcast %152 : f32 to vector<16x16xf32>
    %154 = arith.mulf %153, %27 : vector<16x16xf32>
    %155 = arith.addf %148, %154 : vector<16x16xf32>
    %c6_i32_45 = arith.constant 6 : i32
    %156 = arith.addi %99, %c6_i32_45 : i32
    %c2_i32_46 = arith.constant 2 : i32
    %157 = arith.addi %156, %c2_i32_46 : i32
    %158 = arith.index_cast %157 : i32 to index
    %159 = memref.load %arg2[%158] : memref<288xf32, #tpu.memory_space<smem>>
    %160 = vector.broadcast %159 : f32 to vector<16x16xf32>
    %161 = arith.mulf %160, %28 : vector<16x16xf32>
    %162 = arith.addf %155, %161 : vector<16x16xf32>
    %c2_i32_47 = arith.constant 2 : i32
    %163 = arith.addi %0, %c2_i32_47 : i32
    %c4_i32_48 = arith.constant 4 : i32
    %164 = arith.muli %163, %c4_i32_48 : i32
    %c0_i32_49 = arith.constant 0 : i32
    %165 = arith.addi %164, %c0_i32_49 : i32
    %c9_i32_50 = arith.constant 9 : i32
    %166 = arith.muli %165, %c9_i32_50 : i32
    %c0_i32_51 = arith.constant 0 : i32
    %167 = arith.addi %166, %c0_i32_51 : i32
    %c0_i32_52 = arith.constant 0 : i32
    %168 = arith.addi %167, %c0_i32_52 : i32
    %169 = arith.index_cast %168 : i32 to index
    %170 = memref.load %arg2[%169] : memref<288xf32, #tpu.memory_space<smem>>
    %171 = vector.broadcast %170 : f32 to vector<16x16xf32>
    %172 = arith.mulf %171, %20 : vector<16x16xf32>
    %173 = arith.addf %3, %172 : vector<16x16xf32>
    %c0_i32_53 = arith.constant 0 : i32
    %174 = arith.addi %166, %c0_i32_53 : i32
    %c1_i32_54 = arith.constant 1 : i32
    %175 = arith.addi %174, %c1_i32_54 : i32
    %176 = arith.index_cast %175 : i32 to index
    %177 = memref.load %arg2[%176] : memref<288xf32, #tpu.memory_space<smem>>
    %178 = vector.broadcast %177 : f32 to vector<16x16xf32>
    %179 = arith.mulf %178, %21 : vector<16x16xf32>
    %180 = arith.addf %173, %179 : vector<16x16xf32>
    %c0_i32_55 = arith.constant 0 : i32
    %181 = arith.addi %166, %c0_i32_55 : i32
    %c2_i32_56 = arith.constant 2 : i32
    %182 = arith.addi %181, %c2_i32_56 : i32
    %183 = arith.index_cast %182 : i32 to index
    %184 = memref.load %arg2[%183] : memref<288xf32, #tpu.memory_space<smem>>
    %185 = vector.broadcast %184 : f32 to vector<16x16xf32>
    %186 = arith.mulf %185, %22 : vector<16x16xf32>
    %187 = arith.addf %180, %186 : vector<16x16xf32>
    %c3_i32_57 = arith.constant 3 : i32
    %188 = arith.addi %166, %c3_i32_57 : i32
    %c0_i32_58 = arith.constant 0 : i32
    %189 = arith.addi %188, %c0_i32_58 : i32
    %190 = arith.index_cast %189 : i32 to index
    %191 = memref.load %arg2[%190] : memref<288xf32, #tpu.memory_space<smem>>
    %192 = vector.broadcast %191 : f32 to vector<16x16xf32>
    %193 = arith.mulf %192, %23 : vector<16x16xf32>
    %194 = arith.addf %187, %193 : vector<16x16xf32>
    %c3_i32_59 = arith.constant 3 : i32
    %195 = arith.addi %166, %c3_i32_59 : i32
    %c1_i32_60 = arith.constant 1 : i32
    %196 = arith.addi %195, %c1_i32_60 : i32
    %197 = arith.index_cast %196 : i32 to index
    %198 = memref.load %arg2[%197] : memref<288xf32, #tpu.memory_space<smem>>
    %199 = vector.broadcast %198 : f32 to vector<16x16xf32>
    %200 = arith.mulf %199, %24 : vector<16x16xf32>
    %201 = arith.addf %194, %200 : vector<16x16xf32>
    %c3_i32_61 = arith.constant 3 : i32
    %202 = arith.addi %166, %c3_i32_61 : i32
    %c2_i32_62 = arith.constant 2 : i32
    %203 = arith.addi %202, %c2_i32_62 : i32
    %204 = arith.index_cast %203 : i32 to index
    %205 = memref.load %arg2[%204] : memref<288xf32, #tpu.memory_space<smem>>
    %206 = vector.broadcast %205 : f32 to vector<16x16xf32>
    %207 = arith.mulf %206, %25 : vector<16x16xf32>
    %208 = arith.addf %201, %207 : vector<16x16xf32>
    %c6_i32_63 = arith.constant 6 : i32
    %209 = arith.addi %166, %c6_i32_63 : i32
    %c0_i32_64 = arith.constant 0 : i32
    %210 = arith.addi %209, %c0_i32_64 : i32
    %211 = arith.index_cast %210 : i32 to index
    %212 = memref.load %arg2[%211] : memref<288xf32, #tpu.memory_space<smem>>
    %213 = vector.broadcast %212 : f32 to vector<16x16xf32>
    %214 = arith.mulf %213, %26 : vector<16x16xf32>
    %215 = arith.addf %208, %214 : vector<16x16xf32>
    %c6_i32_65 = arith.constant 6 : i32
    %216 = arith.addi %166, %c6_i32_65 : i32
    %c1_i32_66 = arith.constant 1 : i32
    %217 = arith.addi %216, %c1_i32_66 : i32
    %218 = arith.index_cast %217 : i32 to index
    %219 = memref.load %arg2[%218] : memref<288xf32, #tpu.memory_space<smem>>
    %220 = vector.broadcast %219 : f32 to vector<16x16xf32>
    %221 = arith.mulf %220, %27 : vector<16x16xf32>
    %222 = arith.addf %215, %221 : vector<16x16xf32>
    %c6_i32_67 = arith.constant 6 : i32
    %223 = arith.addi %166, %c6_i32_67 : i32
    %c2_i32_68 = arith.constant 2 : i32
    %224 = arith.addi %223, %c2_i32_68 : i32
    %225 = arith.index_cast %224 : i32 to index
    %226 = memref.load %arg2[%225] : memref<288xf32, #tpu.memory_space<smem>>
    %227 = vector.broadcast %226 : f32 to vector<16x16xf32>
    %228 = arith.mulf %227, %28 : vector<16x16xf32>
    %229 = arith.addf %222, %228 : vector<16x16xf32>
    %c3_i32_69 = arith.constant 3 : i32
    %230 = arith.addi %0, %c3_i32_69 : i32
    %c4_i32_70 = arith.constant 4 : i32
    %231 = arith.muli %230, %c4_i32_70 : i32
    %c0_i32_71 = arith.constant 0 : i32
    %232 = arith.addi %231, %c0_i32_71 : i32
    %c9_i32_72 = arith.constant 9 : i32
    %233 = arith.muli %232, %c9_i32_72 : i32
    %c0_i32_73 = arith.constant 0 : i32
    %234 = arith.addi %233, %c0_i32_73 : i32
    %c0_i32_74 = arith.constant 0 : i32
    %235 = arith.addi %234, %c0_i32_74 : i32
    %236 = arith.index_cast %235 : i32 to index
    %237 = memref.load %arg2[%236] : memref<288xf32, #tpu.memory_space<smem>>
    %238 = vector.broadcast %237 : f32 to vector<16x16xf32>
    %239 = arith.mulf %238, %20 : vector<16x16xf32>
    %240 = arith.addf %4, %239 : vector<16x16xf32>
    %c0_i32_75 = arith.constant 0 : i32
    %241 = arith.addi %233, %c0_i32_75 : i32
    %c1_i32_76 = arith.constant 1 : i32
    %242 = arith.addi %241, %c1_i32_76 : i32
    %243 = arith.index_cast %242 : i32 to index
    %244 = memref.load %arg2[%243] : memref<288xf32, #tpu.memory_space<smem>>
    %245 = vector.broadcast %244 : f32 to vector<16x16xf32>
    %246 = arith.mulf %245, %21 : vector<16x16xf32>
    %247 = arith.addf %240, %246 : vector<16x16xf32>
    %c0_i32_77 = arith.constant 0 : i32
    %248 = arith.addi %233, %c0_i32_77 : i32
    %c2_i32_78 = arith.constant 2 : i32
    %249 = arith.addi %248, %c2_i32_78 : i32
    %250 = arith.index_cast %249 : i32 to index
    %251 = memref.load %arg2[%250] : memref<288xf32, #tpu.memory_space<smem>>
    %252 = vector.broadcast %251 : f32 to vector<16x16xf32>
    %253 = arith.mulf %252, %22 : vector<16x16xf32>
    %254 = arith.addf %247, %253 : vector<16x16xf32>
    %c3_i32_79 = arith.constant 3 : i32
    %255 = arith.addi %233, %c3_i32_79 : i32
    %c0_i32_80 = arith.constant 0 : i32
    %256 = arith.addi %255, %c0_i32_80 : i32
    %257 = arith.index_cast %256 : i32 to index
    %258 = memref.load %arg2[%257] : memref<288xf32, #tpu.memory_space<smem>>
    %259 = vector.broadcast %258 : f32 to vector<16x16xf32>
    %260 = arith.mulf %259, %23 : vector<16x16xf32>
    %261 = arith.addf %254, %260 : vector<16x16xf32>
    %c3_i32_81 = arith.constant 3 : i32
    %262 = arith.addi %233, %c3_i32_81 : i32
    %c1_i32_82 = arith.constant 1 : i32
    %263 = arith.addi %262, %c1_i32_82 : i32
    %264 = arith.index_cast %263 : i32 to index
    %265 = memref.load %arg2[%264] : memref<288xf32, #tpu.memory_space<smem>>
    %266 = vector.broadcast %265 : f32 to vector<16x16xf32>
    %267 = arith.mulf %266, %24 : vector<16x16xf32>
    %268 = arith.addf %261, %267 : vector<16x16xf32>
    %c3_i32_83 = arith.constant 3 : i32
    %269 = arith.addi %233, %c3_i32_83 : i32
    %c2_i32_84 = arith.constant 2 : i32
    %270 = arith.addi %269, %c2_i32_84 : i32
    %271 = arith.index_cast %270 : i32 to index
    %272 = memref.load %arg2[%271] : memref<288xf32, #tpu.memory_space<smem>>
    %273 = vector.broadcast %272 : f32 to vector<16x16xf32>
    %274 = arith.mulf %273, %25 : vector<16x16xf32>
    %275 = arith.addf %268, %274 : vector<16x16xf32>
    %c6_i32_85 = arith.constant 6 : i32
    %276 = arith.addi %233, %c6_i32_85 : i32
    %c0_i32_86 = arith.constant 0 : i32
    %277 = arith.addi %276, %c0_i32_86 : i32
    %278 = arith.index_cast %277 : i32 to index
    %279 = memref.load %arg2[%278] : memref<288xf32, #tpu.memory_space<smem>>
    %280 = vector.broadcast %279 : f32 to vector<16x16xf32>
    %281 = arith.mulf %280, %26 : vector<16x16xf32>
    %282 = arith.addf %275, %281 : vector<16x16xf32>
    %c6_i32_87 = arith.constant 6 : i32
    %283 = arith.addi %233, %c6_i32_87 : i32
    %c1_i32_88 = arith.constant 1 : i32
    %284 = arith.addi %283, %c1_i32_88 : i32
    %285 = arith.index_cast %284 : i32 to index
    %286 = memref.load %arg2[%285] : memref<288xf32, #tpu.memory_space<smem>>
    %287 = vector.broadcast %286 : f32 to vector<16x16xf32>
    %288 = arith.mulf %287, %27 : vector<16x16xf32>
    %289 = arith.addf %282, %288 : vector<16x16xf32>
    %c6_i32_89 = arith.constant 6 : i32
    %290 = arith.addi %233, %c6_i32_89 : i32
    %c2_i32_90 = arith.constant 2 : i32
    %291 = arith.addi %290, %c2_i32_90 : i32
    %292 = arith.index_cast %291 : i32 to index
    %293 = memref.load %arg2[%292] : memref<288xf32, #tpu.memory_space<smem>>
    %294 = vector.broadcast %293 : f32 to vector<16x16xf32>
    %295 = arith.mulf %294, %28 : vector<16x16xf32>
    %296 = arith.addf %289, %295 : vector<16x16xf32>
    %c4_i32_91 = arith.constant 4 : i32
    %297 = arith.addi %0, %c4_i32_91 : i32
    %c4_i32_92 = arith.constant 4 : i32
    %298 = arith.muli %297, %c4_i32_92 : i32
    %c0_i32_93 = arith.constant 0 : i32
    %299 = arith.addi %298, %c0_i32_93 : i32
    %c9_i32_94 = arith.constant 9 : i32
    %300 = arith.muli %299, %c9_i32_94 : i32
    %c0_i32_95 = arith.constant 0 : i32
    %301 = arith.addi %300, %c0_i32_95 : i32
    %c0_i32_96 = arith.constant 0 : i32
    %302 = arith.addi %301, %c0_i32_96 : i32
    %303 = arith.index_cast %302 : i32 to index
    %304 = memref.load %arg2[%303] : memref<288xf32, #tpu.memory_space<smem>>
    %305 = vector.broadcast %304 : f32 to vector<16x16xf32>
    %306 = arith.mulf %305, %20 : vector<16x16xf32>
    %307 = arith.addf %5, %306 : vector<16x16xf32>
    %c0_i32_97 = arith.constant 0 : i32
    %308 = arith.addi %300, %c0_i32_97 : i32
    %c1_i32_98 = arith.constant 1 : i32
    %309 = arith.addi %308, %c1_i32_98 : i32
    %310 = arith.index_cast %309 : i32 to index
    %311 = memref.load %arg2[%310] : memref<288xf32, #tpu.memory_space<smem>>
    %312 = vector.broadcast %311 : f32 to vector<16x16xf32>
    %313 = arith.mulf %312, %21 : vector<16x16xf32>
    %314 = arith.addf %307, %313 : vector<16x16xf32>
    %c0_i32_99 = arith.constant 0 : i32
    %315 = arith.addi %300, %c0_i32_99 : i32
    %c2_i32_100 = arith.constant 2 : i32
    %316 = arith.addi %315, %c2_i32_100 : i32
    %317 = arith.index_cast %316 : i32 to index
    %318 = memref.load %arg2[%317] : memref<288xf32, #tpu.memory_space<smem>>
    %319 = vector.broadcast %318 : f32 to vector<16x16xf32>
    %320 = arith.mulf %319, %22 : vector<16x16xf32>
    %321 = arith.addf %314, %320 : vector<16x16xf32>
    %c3_i32_101 = arith.constant 3 : i32
    %322 = arith.addi %300, %c3_i32_101 : i32
    %c0_i32_102 = arith.constant 0 : i32
    %323 = arith.addi %322, %c0_i32_102 : i32
    %324 = arith.index_cast %323 : i32 to index
    %325 = memref.load %arg2[%324] : memref<288xf32, #tpu.memory_space<smem>>
    %326 = vector.broadcast %325 : f32 to vector<16x16xf32>
    %327 = arith.mulf %326, %23 : vector<16x16xf32>
    %328 = arith.addf %321, %327 : vector<16x16xf32>
    %c3_i32_103 = arith.constant 3 : i32
    %329 = arith.addi %300, %c3_i32_103 : i32
    %c1_i32_104 = arith.constant 1 : i32
    %330 = arith.addi %329, %c1_i32_104 : i32
    %331 = arith.index_cast %330 : i32 to index
    %332 = memref.load %arg2[%331] : memref<288xf32, #tpu.memory_space<smem>>
    %333 = vector.broadcast %332 : f32 to vector<16x16xf32>
    %334 = arith.mulf %333, %24 : vector<16x16xf32>
    %335 = arith.addf %328, %334 : vector<16x16xf32>
    %c3_i32_105 = arith.constant 3 : i32
    %336 = arith.addi %300, %c3_i32_105 : i32
    %c2_i32_106 = arith.constant 2 : i32
    %337 = arith.addi %336, %c2_i32_106 : i32
    %338 = arith.index_cast %337 : i32 to index
    %339 = memref.load %arg2[%338] : memref<288xf32, #tpu.memory_space<smem>>
    %340 = vector.broadcast %339 : f32 to vector<16x16xf32>
    %341 = arith.mulf %340, %25 : vector<16x16xf32>
    %342 = arith.addf %335, %341 : vector<16x16xf32>
    %c6_i32_107 = arith.constant 6 : i32
    %343 = arith.addi %300, %c6_i32_107 : i32
    %c0_i32_108 = arith.constant 0 : i32
    %344 = arith.addi %343, %c0_i32_108 : i32
    %345 = arith.index_cast %344 : i32 to index
    %346 = memref.load %arg2[%345] : memref<288xf32, #tpu.memory_space<smem>>
    %347 = vector.broadcast %346 : f32 to vector<16x16xf32>
    %348 = arith.mulf %347, %26 : vector<16x16xf32>
    %349 = arith.addf %342, %348 : vector<16x16xf32>
    %c6_i32_109 = arith.constant 6 : i32
    %350 = arith.addi %300, %c6_i32_109 : i32
    %c1_i32_110 = arith.constant 1 : i32
    %351 = arith.addi %350, %c1_i32_110 : i32
    %352 = arith.index_cast %351 : i32 to index
    %353 = memref.load %arg2[%352] : memref<288xf32, #tpu.memory_space<smem>>
    %354 = vector.broadcast %353 : f32 to vector<16x16xf32>
    %355 = arith.mulf %354, %27 : vector<16x16xf32>
    %356 = arith.addf %349, %355 : vector<16x16xf32>
    %c6_i32_111 = arith.constant 6 : i32
    %357 = arith.addi %300, %c6_i32_111 : i32
    %c2_i32_112 = arith.constant 2 : i32
    %358 = arith.addi %357, %c2_i32_112 : i32
    %359 = arith.index_cast %358 : i32 to index
    %360 = memref.load %arg2[%359] : memref<288xf32, #tpu.memory_space<smem>>
    %361 = vector.broadcast %360 : f32 to vector<16x16xf32>
    %362 = arith.mulf %361, %28 : vector<16x16xf32>
    %363 = arith.addf %356, %362 : vector<16x16xf32>
    %c5_i32 = arith.constant 5 : i32
    %364 = arith.addi %0, %c5_i32 : i32
    %c4_i32_113 = arith.constant 4 : i32
    %365 = arith.muli %364, %c4_i32_113 : i32
    %c0_i32_114 = arith.constant 0 : i32
    %366 = arith.addi %365, %c0_i32_114 : i32
    %c9_i32_115 = arith.constant 9 : i32
    %367 = arith.muli %366, %c9_i32_115 : i32
    %c0_i32_116 = arith.constant 0 : i32
    %368 = arith.addi %367, %c0_i32_116 : i32
    %c0_i32_117 = arith.constant 0 : i32
    %369 = arith.addi %368, %c0_i32_117 : i32
    %370 = arith.index_cast %369 : i32 to index
    %371 = memref.load %arg2[%370] : memref<288xf32, #tpu.memory_space<smem>>
    %372 = vector.broadcast %371 : f32 to vector<16x16xf32>
    %373 = arith.mulf %372, %20 : vector<16x16xf32>
    %374 = arith.addf %6, %373 : vector<16x16xf32>
    %c0_i32_118 = arith.constant 0 : i32
    %375 = arith.addi %367, %c0_i32_118 : i32
    %c1_i32_119 = arith.constant 1 : i32
    %376 = arith.addi %375, %c1_i32_119 : i32
    %377 = arith.index_cast %376 : i32 to index
    %378 = memref.load %arg2[%377] : memref<288xf32, #tpu.memory_space<smem>>
    %379 = vector.broadcast %378 : f32 to vector<16x16xf32>
    %380 = arith.mulf %379, %21 : vector<16x16xf32>
    %381 = arith.addf %374, %380 : vector<16x16xf32>
    %c0_i32_120 = arith.constant 0 : i32
    %382 = arith.addi %367, %c0_i32_120 : i32
    %c2_i32_121 = arith.constant 2 : i32
    %383 = arith.addi %382, %c2_i32_121 : i32
    %384 = arith.index_cast %383 : i32 to index
    %385 = memref.load %arg2[%384] : memref<288xf32, #tpu.memory_space<smem>>
    %386 = vector.broadcast %385 : f32 to vector<16x16xf32>
    %387 = arith.mulf %386, %22 : vector<16x16xf32>
    %388 = arith.addf %381, %387 : vector<16x16xf32>
    %c3_i32_122 = arith.constant 3 : i32
    %389 = arith.addi %367, %c3_i32_122 : i32
    %c0_i32_123 = arith.constant 0 : i32
    %390 = arith.addi %389, %c0_i32_123 : i32
    %391 = arith.index_cast %390 : i32 to index
    %392 = memref.load %arg2[%391] : memref<288xf32, #tpu.memory_space<smem>>
    %393 = vector.broadcast %392 : f32 to vector<16x16xf32>
    %394 = arith.mulf %393, %23 : vector<16x16xf32>
    %395 = arith.addf %388, %394 : vector<16x16xf32>
    %c3_i32_124 = arith.constant 3 : i32
    %396 = arith.addi %367, %c3_i32_124 : i32
    %c1_i32_125 = arith.constant 1 : i32
    %397 = arith.addi %396, %c1_i32_125 : i32
    %398 = arith.index_cast %397 : i32 to index
    %399 = memref.load %arg2[%398] : memref<288xf32, #tpu.memory_space<smem>>
    %400 = vector.broadcast %399 : f32 to vector<16x16xf32>
    %401 = arith.mulf %400, %24 : vector<16x16xf32>
    %402 = arith.addf %395, %401 : vector<16x16xf32>
    %c3_i32_126 = arith.constant 3 : i32
    %403 = arith.addi %367, %c3_i32_126 : i32
    %c2_i32_127 = arith.constant 2 : i32
    %404 = arith.addi %403, %c2_i32_127 : i32
    %405 = arith.index_cast %404 : i32 to index
    %406 = memref.load %arg2[%405] : memref<288xf32, #tpu.memory_space<smem>>
    %407 = vector.broadcast %406 : f32 to vector<16x16xf32>
    %408 = arith.mulf %407, %25 : vector<16x16xf32>
    %409 = arith.addf %402, %408 : vector<16x16xf32>
    %c6_i32_128 = arith.constant 6 : i32
    %410 = arith.addi %367, %c6_i32_128 : i32
    %c0_i32_129 = arith.constant 0 : i32
    %411 = arith.addi %410, %c0_i32_129 : i32
    %412 = arith.index_cast %411 : i32 to index
    %413 = memref.load %arg2[%412] : memref<288xf32, #tpu.memory_space<smem>>
    %414 = vector.broadcast %413 : f32 to vector<16x16xf32>
    %415 = arith.mulf %414, %26 : vector<16x16xf32>
    %416 = arith.addf %409, %415 : vector<16x16xf32>
    %c6_i32_130 = arith.constant 6 : i32
    %417 = arith.addi %367, %c6_i32_130 : i32
    %c1_i32_131 = arith.constant 1 : i32
    %418 = arith.addi %417, %c1_i32_131 : i32
    %419 = arith.index_cast %418 : i32 to index
    %420 = memref.load %arg2[%419] : memref<288xf32, #tpu.memory_space<smem>>
    %421 = vector.broadcast %420 : f32 to vector<16x16xf32>
    %422 = arith.mulf %421, %27 : vector<16x16xf32>
    %423 = arith.addf %416, %422 : vector<16x16xf32>
    %c6_i32_132 = arith.constant 6 : i32
    %424 = arith.addi %367, %c6_i32_132 : i32
    %c2_i32_133 = arith.constant 2 : i32
    %425 = arith.addi %424, %c2_i32_133 : i32
    %426 = arith.index_cast %425 : i32 to index
    %427 = memref.load %arg2[%426] : memref<288xf32, #tpu.memory_space<smem>>
    %428 = vector.broadcast %427 : f32 to vector<16x16xf32>
    %429 = arith.mulf %428, %28 : vector<16x16xf32>
    %430 = arith.addf %423, %429 : vector<16x16xf32>
    %c6_i32_134 = arith.constant 6 : i32
    %431 = arith.addi %0, %c6_i32_134 : i32
    %c4_i32_135 = arith.constant 4 : i32
    %432 = arith.muli %431, %c4_i32_135 : i32
    %c0_i32_136 = arith.constant 0 : i32
    %433 = arith.addi %432, %c0_i32_136 : i32
    %c9_i32_137 = arith.constant 9 : i32
    %434 = arith.muli %433, %c9_i32_137 : i32
    %c0_i32_138 = arith.constant 0 : i32
    %435 = arith.addi %434, %c0_i32_138 : i32
    %c0_i32_139 = arith.constant 0 : i32
    %436 = arith.addi %435, %c0_i32_139 : i32
    %437 = arith.index_cast %436 : i32 to index
    %438 = memref.load %arg2[%437] : memref<288xf32, #tpu.memory_space<smem>>
    %439 = vector.broadcast %438 : f32 to vector<16x16xf32>
    %440 = arith.mulf %439, %20 : vector<16x16xf32>
    %441 = arith.addf %7, %440 : vector<16x16xf32>
    %c0_i32_140 = arith.constant 0 : i32
    %442 = arith.addi %434, %c0_i32_140 : i32
    %c1_i32_141 = arith.constant 1 : i32
    %443 = arith.addi %442, %c1_i32_141 : i32
    %444 = arith.index_cast %443 : i32 to index
    %445 = memref.load %arg2[%444] : memref<288xf32, #tpu.memory_space<smem>>
    %446 = vector.broadcast %445 : f32 to vector<16x16xf32>
    %447 = arith.mulf %446, %21 : vector<16x16xf32>
    %448 = arith.addf %441, %447 : vector<16x16xf32>
    %c0_i32_142 = arith.constant 0 : i32
    %449 = arith.addi %434, %c0_i32_142 : i32
    %c2_i32_143 = arith.constant 2 : i32
    %450 = arith.addi %449, %c2_i32_143 : i32
    %451 = arith.index_cast %450 : i32 to index
    %452 = memref.load %arg2[%451] : memref<288xf32, #tpu.memory_space<smem>>
    %453 = vector.broadcast %452 : f32 to vector<16x16xf32>
    %454 = arith.mulf %453, %22 : vector<16x16xf32>
    %455 = arith.addf %448, %454 : vector<16x16xf32>
    %c3_i32_144 = arith.constant 3 : i32
    %456 = arith.addi %434, %c3_i32_144 : i32
    %c0_i32_145 = arith.constant 0 : i32
    %457 = arith.addi %456, %c0_i32_145 : i32
    %458 = arith.index_cast %457 : i32 to index
    %459 = memref.load %arg2[%458] : memref<288xf32, #tpu.memory_space<smem>>
    %460 = vector.broadcast %459 : f32 to vector<16x16xf32>
    %461 = arith.mulf %460, %23 : vector<16x16xf32>
    %462 = arith.addf %455, %461 : vector<16x16xf32>
    %c3_i32_146 = arith.constant 3 : i32
    %463 = arith.addi %434, %c3_i32_146 : i32
    %c1_i32_147 = arith.constant 1 : i32
    %464 = arith.addi %463, %c1_i32_147 : i32
    %465 = arith.index_cast %464 : i32 to index
    %466 = memref.load %arg2[%465] : memref<288xf32, #tpu.memory_space<smem>>
    %467 = vector.broadcast %466 : f32 to vector<16x16xf32>
    %468 = arith.mulf %467, %24 : vector<16x16xf32>
    %469 = arith.addf %462, %468 : vector<16x16xf32>
    %c3_i32_148 = arith.constant 3 : i32
    %470 = arith.addi %434, %c3_i32_148 : i32
    %c2_i32_149 = arith.constant 2 : i32
    %471 = arith.addi %470, %c2_i32_149 : i32
    %472 = arith.index_cast %471 : i32 to index
    %473 = memref.load %arg2[%472] : memref<288xf32, #tpu.memory_space<smem>>
    %474 = vector.broadcast %473 : f32 to vector<16x16xf32>
    %475 = arith.mulf %474, %25 : vector<16x16xf32>
    %476 = arith.addf %469, %475 : vector<16x16xf32>
    %c6_i32_150 = arith.constant 6 : i32
    %477 = arith.addi %434, %c6_i32_150 : i32
    %c0_i32_151 = arith.constant 0 : i32
    %478 = arith.addi %477, %c0_i32_151 : i32
    %479 = arith.index_cast %478 : i32 to index
    %480 = memref.load %arg2[%479] : memref<288xf32, #tpu.memory_space<smem>>
    %481 = vector.broadcast %480 : f32 to vector<16x16xf32>
    %482 = arith.mulf %481, %26 : vector<16x16xf32>
    %483 = arith.addf %476, %482 : vector<16x16xf32>
    %c6_i32_152 = arith.constant 6 : i32
    %484 = arith.addi %434, %c6_i32_152 : i32
    %c1_i32_153 = arith.constant 1 : i32
    %485 = arith.addi %484, %c1_i32_153 : i32
    %486 = arith.index_cast %485 : i32 to index
    %487 = memref.load %arg2[%486] : memref<288xf32, #tpu.memory_space<smem>>
    %488 = vector.broadcast %487 : f32 to vector<16x16xf32>
    %489 = arith.mulf %488, %27 : vector<16x16xf32>
    %490 = arith.addf %483, %489 : vector<16x16xf32>
    %c6_i32_154 = arith.constant 6 : i32
    %491 = arith.addi %434, %c6_i32_154 : i32
    %c2_i32_155 = arith.constant 2 : i32
    %492 = arith.addi %491, %c2_i32_155 : i32
    %493 = arith.index_cast %492 : i32 to index
    %494 = memref.load %arg2[%493] : memref<288xf32, #tpu.memory_space<smem>>
    %495 = vector.broadcast %494 : f32 to vector<16x16xf32>
    %496 = arith.mulf %495, %28 : vector<16x16xf32>
    %497 = arith.addf %490, %496 : vector<16x16xf32>
    %c7_i32 = arith.constant 7 : i32
    %498 = arith.addi %0, %c7_i32 : i32
    %c4_i32_156 = arith.constant 4 : i32
    %499 = arith.muli %498, %c4_i32_156 : i32
    %c0_i32_157 = arith.constant 0 : i32
    %500 = arith.addi %499, %c0_i32_157 : i32
    %c9_i32_158 = arith.constant 9 : i32
    %501 = arith.muli %500, %c9_i32_158 : i32
    %c0_i32_159 = arith.constant 0 : i32
    %502 = arith.addi %501, %c0_i32_159 : i32
    %c0_i32_160 = arith.constant 0 : i32
    %503 = arith.addi %502, %c0_i32_160 : i32
    %504 = arith.index_cast %503 : i32 to index
    %505 = memref.load %arg2[%504] : memref<288xf32, #tpu.memory_space<smem>>
    %506 = vector.broadcast %505 : f32 to vector<16x16xf32>
    %507 = arith.mulf %506, %20 : vector<16x16xf32>
    %508 = arith.addf %8, %507 : vector<16x16xf32>
    %c0_i32_161 = arith.constant 0 : i32
    %509 = arith.addi %501, %c0_i32_161 : i32
    %c1_i32_162 = arith.constant 1 : i32
    %510 = arith.addi %509, %c1_i32_162 : i32
    %511 = arith.index_cast %510 : i32 to index
    %512 = memref.load %arg2[%511] : memref<288xf32, #tpu.memory_space<smem>>
    %513 = vector.broadcast %512 : f32 to vector<16x16xf32>
    %514 = arith.mulf %513, %21 : vector<16x16xf32>
    %515 = arith.addf %508, %514 : vector<16x16xf32>
    %c0_i32_163 = arith.constant 0 : i32
    %516 = arith.addi %501, %c0_i32_163 : i32
    %c2_i32_164 = arith.constant 2 : i32
    %517 = arith.addi %516, %c2_i32_164 : i32
    %518 = arith.index_cast %517 : i32 to index
    %519 = memref.load %arg2[%518] : memref<288xf32, #tpu.memory_space<smem>>
    %520 = vector.broadcast %519 : f32 to vector<16x16xf32>
    %521 = arith.mulf %520, %22 : vector<16x16xf32>
    %522 = arith.addf %515, %521 : vector<16x16xf32>
    %c3_i32_165 = arith.constant 3 : i32
    %523 = arith.addi %501, %c3_i32_165 : i32
    %c0_i32_166 = arith.constant 0 : i32
    %524 = arith.addi %523, %c0_i32_166 : i32
    %525 = arith.index_cast %524 : i32 to index
    %526 = memref.load %arg2[%525] : memref<288xf32, #tpu.memory_space<smem>>
    %527 = vector.broadcast %526 : f32 to vector<16x16xf32>
    %528 = arith.mulf %527, %23 : vector<16x16xf32>
    %529 = arith.addf %522, %528 : vector<16x16xf32>
    %c3_i32_167 = arith.constant 3 : i32
    %530 = arith.addi %501, %c3_i32_167 : i32
    %c1_i32_168 = arith.constant 1 : i32
    %531 = arith.addi %530, %c1_i32_168 : i32
    %532 = arith.index_cast %531 : i32 to index
    %533 = memref.load %arg2[%532] : memref<288xf32, #tpu.memory_space<smem>>
    %534 = vector.broadcast %533 : f32 to vector<16x16xf32>
    %535 = arith.mulf %534, %24 : vector<16x16xf32>
    %536 = arith.addf %529, %535 : vector<16x16xf32>
    %c3_i32_169 = arith.constant 3 : i32
    %537 = arith.addi %501, %c3_i32_169 : i32
    %c2_i32_170 = arith.constant 2 : i32
    %538 = arith.addi %537, %c2_i32_170 : i32
    %539 = arith.index_cast %538 : i32 to index
    %540 = memref.load %arg2[%539] : memref<288xf32, #tpu.memory_space<smem>>
    %541 = vector.broadcast %540 : f32 to vector<16x16xf32>
    %542 = arith.mulf %541, %25 : vector<16x16xf32>
    %543 = arith.addf %536, %542 : vector<16x16xf32>
    %c6_i32_171 = arith.constant 6 : i32
    %544 = arith.addi %501, %c6_i32_171 : i32
    %c0_i32_172 = arith.constant 0 : i32
    %545 = arith.addi %544, %c0_i32_172 : i32
    %546 = arith.index_cast %545 : i32 to index
    %547 = memref.load %arg2[%546] : memref<288xf32, #tpu.memory_space<smem>>
    %548 = vector.broadcast %547 : f32 to vector<16x16xf32>
    %549 = arith.mulf %548, %26 : vector<16x16xf32>
    %550 = arith.addf %543, %549 : vector<16x16xf32>
    %c6_i32_173 = arith.constant 6 : i32
    %551 = arith.addi %501, %c6_i32_173 : i32
    %c1_i32_174 = arith.constant 1 : i32
    %552 = arith.addi %551, %c1_i32_174 : i32
    %553 = arith.index_cast %552 : i32 to index
    %554 = memref.load %arg2[%553] : memref<288xf32, #tpu.memory_space<smem>>
    %555 = vector.broadcast %554 : f32 to vector<16x16xf32>
    %556 = arith.mulf %555, %27 : vector<16x16xf32>
    %557 = arith.addf %550, %556 : vector<16x16xf32>
    %c6_i32_175 = arith.constant 6 : i32
    %558 = arith.addi %501, %c6_i32_175 : i32
    %c2_i32_176 = arith.constant 2 : i32
    %559 = arith.addi %558, %c2_i32_176 : i32
    %560 = arith.index_cast %559 : i32 to index
    %561 = memref.load %arg2[%560] : memref<288xf32, #tpu.memory_space<smem>>
    %562 = vector.broadcast %561 : f32 to vector<16x16xf32>
    %563 = arith.mulf %562, %28 : vector<16x16xf32>
    %564 = arith.addf %557, %563 : vector<16x16xf32>
    %c0_177 = arith.constant 0 : index
    %c1 = arith.constant 1 : index
    %c0_178 = arith.constant 0 : index
    %c0_179 = arith.constant 0 : index
    %565 = vector.load %arg3[%c0_177, %c1, %c0_178, %c0_179] : memref<1x4x16x16xf32, #tpu.memory_space<vmem>>, vector<1x1x16x16xf32>
    %566 = vector.shape_cast %565 : vector<1x1x16x16xf32> to vector<16x16xf32>
    %567 = vector.extract_strided_slice %566 {offsets = [1, 0], sizes = [1, 16], strides = [1, 1]} : vector<16x16xf32> to vector<1x16xf32>
    %568 = vector.extract_strided_slice %566 {offsets = [14, 0], sizes = [1, 16], strides = [1, 1]} : vector<16x16xf32> to vector<1x16xf32>
    %569 = tpu.concatenate %567, %566, %568 in 0 : vector<1x16xf32>, vector<16x16xf32>, vector<1x16xf32> -> vector<18x16xf32>
    %570 = vector.extract_strided_slice %569 {offsets = [0, 1], sizes = [18, 1], strides = [1, 1]} : vector<18x16xf32> to vector<18x1xf32>
    %571 = vector.extract_strided_slice %569 {offsets = [0, 14], sizes = [18, 1], strides = [1, 1]} : vector<18x16xf32> to vector<18x1xf32>
    %572 = tpu.concatenate %570, %569, %571 in 1 : vector<18x1xf32>, vector<18x16xf32>, vector<18x1xf32> -> vector<18x18xf32>
    %573 = vector.extract_strided_slice %572 {offsets = [0, 0], sizes = [18, 16], strides = [1, 1]} : vector<18x18xf32> to vector<18x16xf32>
    %574 = vector.extract_strided_slice %572 {offsets = [0, 1], sizes = [18, 16], strides = [1, 1]} : vector<18x18xf32> to vector<18x16xf32>
    %575 = vector.extract_strided_slice %572 {offsets = [0, 2], sizes = [18, 16], strides = [1, 1]} : vector<18x18xf32> to vector<18x16xf32>
    %576 = vector.extract_strided_slice %573 {offsets = [0, 0], sizes = [16, 16], strides = [1, 1]} : vector<18x16xf32> to vector<16x16xf32>
    %577 = vector.extract_strided_slice %574 {offsets = [0, 0], sizes = [16, 16], strides = [1, 1]} : vector<18x16xf32> to vector<16x16xf32>
    %578 = vector.extract_strided_slice %575 {offsets = [0, 0], sizes = [16, 16], strides = [1, 1]} : vector<18x16xf32> to vector<16x16xf32>
    %579 = vector.extract_strided_slice %573 {offsets = [1, 0], sizes = [16, 16], strides = [1, 1]} : vector<18x16xf32> to vector<16x16xf32>
    %580 = vector.extract_strided_slice %574 {offsets = [1, 0], sizes = [16, 16], strides = [1, 1]} : vector<18x16xf32> to vector<16x16xf32>
    %581 = vector.extract_strided_slice %575 {offsets = [1, 0], sizes = [16, 16], strides = [1, 1]} : vector<18x16xf32> to vector<16x16xf32>
    %582 = vector.extract_strided_slice %573 {offsets = [2, 0], sizes = [16, 16], strides = [1, 1]} : vector<18x16xf32> to vector<16x16xf32>
    %583 = vector.extract_strided_slice %574 {offsets = [2, 0], sizes = [16, 16], strides = [1, 1]} : vector<18x16xf32> to vector<16x16xf32>
    %584 = vector.extract_strided_slice %575 {offsets = [2, 0], sizes = [16, 16], strides = [1, 1]} : vector<18x16xf32> to vector<16x16xf32>
    %c0_i32_180 = arith.constant 0 : i32
    %585 = arith.addi %0, %c0_i32_180 : i32
    %c4_i32_181 = arith.constant 4 : i32
    %586 = arith.muli %585, %c4_i32_181 : i32
    %c1_i32_182 = arith.constant 1 : i32
    %587 = arith.addi %586, %c1_i32_182 : i32
    %c9_i32_183 = arith.constant 9 : i32
    %588 = arith.muli %587, %c9_i32_183 : i32
    %c0_i32_184 = arith.constant 0 : i32
    %589 = arith.addi %588, %c0_i32_184 : i32
    %c0_i32_185 = arith.constant 0 : i32
    %590 = arith.addi %589, %c0_i32_185 : i32
    %591 = arith.index_cast %590 : i32 to index
    %592 = memref.load %arg2[%591] : memref<288xf32, #tpu.memory_space<smem>>
    %593 = vector.broadcast %592 : f32 to vector<16x16xf32>
    %594 = arith.mulf %593, %576 : vector<16x16xf32>
    %595 = arith.addf %95, %594 : vector<16x16xf32>
    %c0_i32_186 = arith.constant 0 : i32
    %596 = arith.addi %588, %c0_i32_186 : i32
    %c1_i32_187 = arith.constant 1 : i32
    %597 = arith.addi %596, %c1_i32_187 : i32
    %598 = arith.index_cast %597 : i32 to index
    %599 = memref.load %arg2[%598] : memref<288xf32, #tpu.memory_space<smem>>
    %600 = vector.broadcast %599 : f32 to vector<16x16xf32>
    %601 = arith.mulf %600, %577 : vector<16x16xf32>
    %602 = arith.addf %595, %601 : vector<16x16xf32>
    %c0_i32_188 = arith.constant 0 : i32
    %603 = arith.addi %588, %c0_i32_188 : i32
    %c2_i32_189 = arith.constant 2 : i32
    %604 = arith.addi %603, %c2_i32_189 : i32
    %605 = arith.index_cast %604 : i32 to index
    %606 = memref.load %arg2[%605] : memref<288xf32, #tpu.memory_space<smem>>
    %607 = vector.broadcast %606 : f32 to vector<16x16xf32>
    %608 = arith.mulf %607, %578 : vector<16x16xf32>
    %609 = arith.addf %602, %608 : vector<16x16xf32>
    %c3_i32_190 = arith.constant 3 : i32
    %610 = arith.addi %588, %c3_i32_190 : i32
    %c0_i32_191 = arith.constant 0 : i32
    %611 = arith.addi %610, %c0_i32_191 : i32
    %612 = arith.index_cast %611 : i32 to index
    %613 = memref.load %arg2[%612] : memref<288xf32, #tpu.memory_space<smem>>
    %614 = vector.broadcast %613 : f32 to vector<16x16xf32>
    %615 = arith.mulf %614, %579 : vector<16x16xf32>
    %616 = arith.addf %609, %615 : vector<16x16xf32>
    %c3_i32_192 = arith.constant 3 : i32
    %617 = arith.addi %588, %c3_i32_192 : i32
    %c1_i32_193 = arith.constant 1 : i32
    %618 = arith.addi %617, %c1_i32_193 : i32
    %619 = arith.index_cast %618 : i32 to index
    %620 = memref.load %arg2[%619] : memref<288xf32, #tpu.memory_space<smem>>
    %621 = vector.broadcast %620 : f32 to vector<16x16xf32>
    %622 = arith.mulf %621, %580 : vector<16x16xf32>
    %623 = arith.addf %616, %622 : vector<16x16xf32>
    %c3_i32_194 = arith.constant 3 : i32
    %624 = arith.addi %588, %c3_i32_194 : i32
    %c2_i32_195 = arith.constant 2 : i32
    %625 = arith.addi %624, %c2_i32_195 : i32
    %626 = arith.index_cast %625 : i32 to index
    %627 = memref.load %arg2[%626] : memref<288xf32, #tpu.memory_space<smem>>
    %628 = vector.broadcast %627 : f32 to vector<16x16xf32>
    %629 = arith.mulf %628, %581 : vector<16x16xf32>
    %630 = arith.addf %623, %629 : vector<16x16xf32>
    %c6_i32_196 = arith.constant 6 : i32
    %631 = arith.addi %588, %c6_i32_196 : i32
    %c0_i32_197 = arith.constant 0 : i32
    %632 = arith.addi %631, %c0_i32_197 : i32
    %633 = arith.index_cast %632 : i32 to index
    %634 = memref.load %arg2[%633] : memref<288xf32, #tpu.memory_space<smem>>
    %635 = vector.broadcast %634 : f32 to vector<16x16xf32>
    %636 = arith.mulf %635, %582 : vector<16x16xf32>
    %637 = arith.addf %630, %636 : vector<16x16xf32>
    %c6_i32_198 = arith.constant 6 : i32
    %638 = arith.addi %588, %c6_i32_198 : i32
    %c1_i32_199 = arith.constant 1 : i32
    %639 = arith.addi %638, %c1_i32_199 : i32
    %640 = arith.index_cast %639 : i32 to index
    %641 = memref.load %arg2[%640] : memref<288xf32, #tpu.memory_space<smem>>
    %642 = vector.broadcast %641 : f32 to vector<16x16xf32>
    %643 = arith.mulf %642, %583 : vector<16x16xf32>
    %644 = arith.addf %637, %643 : vector<16x16xf32>
    %c6_i32_200 = arith.constant 6 : i32
    %645 = arith.addi %588, %c6_i32_200 : i32
    %c2_i32_201 = arith.constant 2 : i32
    %646 = arith.addi %645, %c2_i32_201 : i32
    %647 = arith.index_cast %646 : i32 to index
    %648 = memref.load %arg2[%647] : memref<288xf32, #tpu.memory_space<smem>>
    %649 = vector.broadcast %648 : f32 to vector<16x16xf32>
    %650 = arith.mulf %649, %584 : vector<16x16xf32>
    %651 = arith.addf %644, %650 : vector<16x16xf32>
    %c1_i32_202 = arith.constant 1 : i32
    %652 = arith.addi %0, %c1_i32_202 : i32
    %c4_i32_203 = arith.constant 4 : i32
    %653 = arith.muli %652, %c4_i32_203 : i32
    %c1_i32_204 = arith.constant 1 : i32
    %654 = arith.addi %653, %c1_i32_204 : i32
    %c9_i32_205 = arith.constant 9 : i32
    %655 = arith.muli %654, %c9_i32_205 : i32
    %c0_i32_206 = arith.constant 0 : i32
    %656 = arith.addi %655, %c0_i32_206 : i32
    %c0_i32_207 = arith.constant 0 : i32
    %657 = arith.addi %656, %c0_i32_207 : i32
    %658 = arith.index_cast %657 : i32 to index
    %659 = memref.load %arg2[%658] : memref<288xf32, #tpu.memory_space<smem>>
    %660 = vector.broadcast %659 : f32 to vector<16x16xf32>
    %661 = arith.mulf %660, %576 : vector<16x16xf32>
    %662 = arith.addf %162, %661 : vector<16x16xf32>
    %c0_i32_208 = arith.constant 0 : i32
    %663 = arith.addi %655, %c0_i32_208 : i32
    %c1_i32_209 = arith.constant 1 : i32
    %664 = arith.addi %663, %c1_i32_209 : i32
    %665 = arith.index_cast %664 : i32 to index
    %666 = memref.load %arg2[%665] : memref<288xf32, #tpu.memory_space<smem>>
    %667 = vector.broadcast %666 : f32 to vector<16x16xf32>
    %668 = arith.mulf %667, %577 : vector<16x16xf32>
    %669 = arith.addf %662, %668 : vector<16x16xf32>
    %c0_i32_210 = arith.constant 0 : i32
    %670 = arith.addi %655, %c0_i32_210 : i32
    %c2_i32_211 = arith.constant 2 : i32
    %671 = arith.addi %670, %c2_i32_211 : i32
    %672 = arith.index_cast %671 : i32 to index
    %673 = memref.load %arg2[%672] : memref<288xf32, #tpu.memory_space<smem>>
    %674 = vector.broadcast %673 : f32 to vector<16x16xf32>
    %675 = arith.mulf %674, %578 : vector<16x16xf32>
    %676 = arith.addf %669, %675 : vector<16x16xf32>
    %c3_i32_212 = arith.constant 3 : i32
    %677 = arith.addi %655, %c3_i32_212 : i32
    %c0_i32_213 = arith.constant 0 : i32
    %678 = arith.addi %677, %c0_i32_213 : i32
    %679 = arith.index_cast %678 : i32 to index
    %680 = memref.load %arg2[%679] : memref<288xf32, #tpu.memory_space<smem>>
    %681 = vector.broadcast %680 : f32 to vector<16x16xf32>
    %682 = arith.mulf %681, %579 : vector<16x16xf32>
    %683 = arith.addf %676, %682 : vector<16x16xf32>
    %c3_i32_214 = arith.constant 3 : i32
    %684 = arith.addi %655, %c3_i32_214 : i32
    %c1_i32_215 = arith.constant 1 : i32
    %685 = arith.addi %684, %c1_i32_215 : i32
    %686 = arith.index_cast %685 : i32 to index
    %687 = memref.load %arg2[%686] : memref<288xf32, #tpu.memory_space<smem>>
    %688 = vector.broadcast %687 : f32 to vector<16x16xf32>
    %689 = arith.mulf %688, %580 : vector<16x16xf32>
    %690 = arith.addf %683, %689 : vector<16x16xf32>
    %c3_i32_216 = arith.constant 3 : i32
    %691 = arith.addi %655, %c3_i32_216 : i32
    %c2_i32_217 = arith.constant 2 : i32
    %692 = arith.addi %691, %c2_i32_217 : i32
    %693 = arith.index_cast %692 : i32 to index
    %694 = memref.load %arg2[%693] : memref<288xf32, #tpu.memory_space<smem>>
    %695 = vector.broadcast %694 : f32 to vector<16x16xf32>
    %696 = arith.mulf %695, %581 : vector<16x16xf32>
    %697 = arith.addf %690, %696 : vector<16x16xf32>
    %c6_i32_218 = arith.constant 6 : i32
    %698 = arith.addi %655, %c6_i32_218 : i32
    %c0_i32_219 = arith.constant 0 : i32
    %699 = arith.addi %698, %c0_i32_219 : i32
    %700 = arith.index_cast %699 : i32 to index
    %701 = memref.load %arg2[%700] : memref<288xf32, #tpu.memory_space<smem>>
    %702 = vector.broadcast %701 : f32 to vector<16x16xf32>
    %703 = arith.mulf %702, %582 : vector<16x16xf32>
    %704 = arith.addf %697, %703 : vector<16x16xf32>
    %c6_i32_220 = arith.constant 6 : i32
    %705 = arith.addi %655, %c6_i32_220 : i32
    %c1_i32_221 = arith.constant 1 : i32
    %706 = arith.addi %705, %c1_i32_221 : i32
    %707 = arith.index_cast %706 : i32 to index
    %708 = memref.load %arg2[%707] : memref<288xf32, #tpu.memory_space<smem>>
    %709 = vector.broadcast %708 : f32 to vector<16x16xf32>
    %710 = arith.mulf %709, %583 : vector<16x16xf32>
    %711 = arith.addf %704, %710 : vector<16x16xf32>
    %c6_i32_222 = arith.constant 6 : i32
    %712 = arith.addi %655, %c6_i32_222 : i32
    %c2_i32_223 = arith.constant 2 : i32
    %713 = arith.addi %712, %c2_i32_223 : i32
    %714 = arith.index_cast %713 : i32 to index
    %715 = memref.load %arg2[%714] : memref<288xf32, #tpu.memory_space<smem>>
    %716 = vector.broadcast %715 : f32 to vector<16x16xf32>
    %717 = arith.mulf %716, %584 : vector<16x16xf32>
    %718 = arith.addf %711, %717 : vector<16x16xf32>
    %c2_i32_224 = arith.constant 2 : i32
    %719 = arith.addi %0, %c2_i32_224 : i32
    %c4_i32_225 = arith.constant 4 : i32
    %720 = arith.muli %719, %c4_i32_225 : i32
    %c1_i32_226 = arith.constant 1 : i32
    %721 = arith.addi %720, %c1_i32_226 : i32
    %c9_i32_227 = arith.constant 9 : i32
    %722 = arith.muli %721, %c9_i32_227 : i32
    %c0_i32_228 = arith.constant 0 : i32
    %723 = arith.addi %722, %c0_i32_228 : i32
    %c0_i32_229 = arith.constant 0 : i32
    %724 = arith.addi %723, %c0_i32_229 : i32
    %725 = arith.index_cast %724 : i32 to index
    %726 = memref.load %arg2[%725] : memref<288xf32, #tpu.memory_space<smem>>
    %727 = vector.broadcast %726 : f32 to vector<16x16xf32>
    %728 = arith.mulf %727, %576 : vector<16x16xf32>
    %729 = arith.addf %229, %728 : vector<16x16xf32>
    %c0_i32_230 = arith.constant 0 : i32
    %730 = arith.addi %722, %c0_i32_230 : i32
    %c1_i32_231 = arith.constant 1 : i32
    %731 = arith.addi %730, %c1_i32_231 : i32
    %732 = arith.index_cast %731 : i32 to index
    %733 = memref.load %arg2[%732] : memref<288xf32, #tpu.memory_space<smem>>
    %734 = vector.broadcast %733 : f32 to vector<16x16xf32>
    %735 = arith.mulf %734, %577 : vector<16x16xf32>
    %736 = arith.addf %729, %735 : vector<16x16xf32>
    %c0_i32_232 = arith.constant 0 : i32
    %737 = arith.addi %722, %c0_i32_232 : i32
    %c2_i32_233 = arith.constant 2 : i32
    %738 = arith.addi %737, %c2_i32_233 : i32
    %739 = arith.index_cast %738 : i32 to index
    %740 = memref.load %arg2[%739] : memref<288xf32, #tpu.memory_space<smem>>
    %741 = vector.broadcast %740 : f32 to vector<16x16xf32>
    %742 = arith.mulf %741, %578 : vector<16x16xf32>
    %743 = arith.addf %736, %742 : vector<16x16xf32>
    %c3_i32_234 = arith.constant 3 : i32
    %744 = arith.addi %722, %c3_i32_234 : i32
    %c0_i32_235 = arith.constant 0 : i32
    %745 = arith.addi %744, %c0_i32_235 : i32
    %746 = arith.index_cast %745 : i32 to index
    %747 = memref.load %arg2[%746] : memref<288xf32, #tpu.memory_space<smem>>
    %748 = vector.broadcast %747 : f32 to vector<16x16xf32>
    %749 = arith.mulf %748, %579 : vector<16x16xf32>
    %750 = arith.addf %743, %749 : vector<16x16xf32>
    %c3_i32_236 = arith.constant 3 : i32
    %751 = arith.addi %722, %c3_i32_236 : i32
    %c1_i32_237 = arith.constant 1 : i32
    %752 = arith.addi %751, %c1_i32_237 : i32
    %753 = arith.index_cast %752 : i32 to index
    %754 = memref.load %arg2[%753] : memref<288xf32, #tpu.memory_space<smem>>
    %755 = vector.broadcast %754 : f32 to vector<16x16xf32>
    %756 = arith.mulf %755, %580 : vector<16x16xf32>
    %757 = arith.addf %750, %756 : vector<16x16xf32>
    %c3_i32_238 = arith.constant 3 : i32
    %758 = arith.addi %722, %c3_i32_238 : i32
    %c2_i32_239 = arith.constant 2 : i32
    %759 = arith.addi %758, %c2_i32_239 : i32
    %760 = arith.index_cast %759 : i32 to index
    %761 = memref.load %arg2[%760] : memref<288xf32, #tpu.memory_space<smem>>
    %762 = vector.broadcast %761 : f32 to vector<16x16xf32>
    %763 = arith.mulf %762, %581 : vector<16x16xf32>
    %764 = arith.addf %757, %763 : vector<16x16xf32>
    %c6_i32_240 = arith.constant 6 : i32
    %765 = arith.addi %722, %c6_i32_240 : i32
    %c0_i32_241 = arith.constant 0 : i32
    %766 = arith.addi %765, %c0_i32_241 : i32
    %767 = arith.index_cast %766 : i32 to index
    %768 = memref.load %arg2[%767] : memref<288xf32, #tpu.memory_space<smem>>
    %769 = vector.broadcast %768 : f32 to vector<16x16xf32>
    %770 = arith.mulf %769, %582 : vector<16x16xf32>
    %771 = arith.addf %764, %770 : vector<16x16xf32>
    %c6_i32_242 = arith.constant 6 : i32
    %772 = arith.addi %722, %c6_i32_242 : i32
    %c1_i32_243 = arith.constant 1 : i32
    %773 = arith.addi %772, %c1_i32_243 : i32
    %774 = arith.index_cast %773 : i32 to index
    %775 = memref.load %arg2[%774] : memref<288xf32, #tpu.memory_space<smem>>
    %776 = vector.broadcast %775 : f32 to vector<16x16xf32>
    %777 = arith.mulf %776, %583 : vector<16x16xf32>
    %778 = arith.addf %771, %777 : vector<16x16xf32>
    %c6_i32_244 = arith.constant 6 : i32
    %779 = arith.addi %722, %c6_i32_244 : i32
    %c2_i32_245 = arith.constant 2 : i32
    %780 = arith.addi %779, %c2_i32_245 : i32
    %781 = arith.index_cast %780 : i32 to index
    %782 = memref.load %arg2[%781] : memref<288xf32, #tpu.memory_space<smem>>
    %783 = vector.broadcast %782 : f32 to vector<16x16xf32>
    %784 = arith.mulf %783, %584 : vector<16x16xf32>
    %785 = arith.addf %778, %784 : vector<16x16xf32>
    %c3_i32_246 = arith.constant 3 : i32
    %786 = arith.addi %0, %c3_i32_246 : i32
    %c4_i32_247 = arith.constant 4 : i32
    %787 = arith.muli %786, %c4_i32_247 : i32
    %c1_i32_248 = arith.constant 1 : i32
    %788 = arith.addi %787, %c1_i32_248 : i32
    %c9_i32_249 = arith.constant 9 : i32
    %789 = arith.muli %788, %c9_i32_249 : i32
    %c0_i32_250 = arith.constant 0 : i32
    %790 = arith.addi %789, %c0_i32_250 : i32
    %c0_i32_251 = arith.constant 0 : i32
    %791 = arith.addi %790, %c0_i32_251 : i32
    %792 = arith.index_cast %791 : i32 to index
    %793 = memref.load %arg2[%792] : memref<288xf32, #tpu.memory_space<smem>>
    %794 = vector.broadcast %793 : f32 to vector<16x16xf32>
    %795 = arith.mulf %794, %576 : vector<16x16xf32>
    %796 = arith.addf %296, %795 : vector<16x16xf32>
    %c0_i32_252 = arith.constant 0 : i32
    %797 = arith.addi %789, %c0_i32_252 : i32
    %c1_i32_253 = arith.constant 1 : i32
    %798 = arith.addi %797, %c1_i32_253 : i32
    %799 = arith.index_cast %798 : i32 to index
    %800 = memref.load %arg2[%799] : memref<288xf32, #tpu.memory_space<smem>>
    %801 = vector.broadcast %800 : f32 to vector<16x16xf32>
    %802 = arith.mulf %801, %577 : vector<16x16xf32>
    %803 = arith.addf %796, %802 : vector<16x16xf32>
    %c0_i32_254 = arith.constant 0 : i32
    %804 = arith.addi %789, %c0_i32_254 : i32
    %c2_i32_255 = arith.constant 2 : i32
    %805 = arith.addi %804, %c2_i32_255 : i32
    %806 = arith.index_cast %805 : i32 to index
    %807 = memref.load %arg2[%806] : memref<288xf32, #tpu.memory_space<smem>>
    %808 = vector.broadcast %807 : f32 to vector<16x16xf32>
    %809 = arith.mulf %808, %578 : vector<16x16xf32>
    %810 = arith.addf %803, %809 : vector<16x16xf32>
    %c3_i32_256 = arith.constant 3 : i32
    %811 = arith.addi %789, %c3_i32_256 : i32
    %c0_i32_257 = arith.constant 0 : i32
    %812 = arith.addi %811, %c0_i32_257 : i32
    %813 = arith.index_cast %812 : i32 to index
    %814 = memref.load %arg2[%813] : memref<288xf32, #tpu.memory_space<smem>>
    %815 = vector.broadcast %814 : f32 to vector<16x16xf32>
    %816 = arith.mulf %815, %579 : vector<16x16xf32>
    %817 = arith.addf %810, %816 : vector<16x16xf32>
    %c3_i32_258 = arith.constant 3 : i32
    %818 = arith.addi %789, %c3_i32_258 : i32
    %c1_i32_259 = arith.constant 1 : i32
    %819 = arith.addi %818, %c1_i32_259 : i32
    %820 = arith.index_cast %819 : i32 to index
    %821 = memref.load %arg2[%820] : memref<288xf32, #tpu.memory_space<smem>>
    %822 = vector.broadcast %821 : f32 to vector<16x16xf32>
    %823 = arith.mulf %822, %580 : vector<16x16xf32>
    %824 = arith.addf %817, %823 : vector<16x16xf32>
    %c3_i32_260 = arith.constant 3 : i32
    %825 = arith.addi %789, %c3_i32_260 : i32
    %c2_i32_261 = arith.constant 2 : i32
    %826 = arith.addi %825, %c2_i32_261 : i32
    %827 = arith.index_cast %826 : i32 to index
    %828 = memref.load %arg2[%827] : memref<288xf32, #tpu.memory_space<smem>>
    %829 = vector.broadcast %828 : f32 to vector<16x16xf32>
    %830 = arith.mulf %829, %581 : vector<16x16xf32>
    %831 = arith.addf %824, %830 : vector<16x16xf32>
    %c6_i32_262 = arith.constant 6 : i32
    %832 = arith.addi %789, %c6_i32_262 : i32
    %c0_i32_263 = arith.constant 0 : i32
    %833 = arith.addi %832, %c0_i32_263 : i32
    %834 = arith.index_cast %833 : i32 to index
    %835 = memref.load %arg2[%834] : memref<288xf32, #tpu.memory_space<smem>>
    %836 = vector.broadcast %835 : f32 to vector<16x16xf32>
    %837 = arith.mulf %836, %582 : vector<16x16xf32>
    %838 = arith.addf %831, %837 : vector<16x16xf32>
    %c6_i32_264 = arith.constant 6 : i32
    %839 = arith.addi %789, %c6_i32_264 : i32
    %c1_i32_265 = arith.constant 1 : i32
    %840 = arith.addi %839, %c1_i32_265 : i32
    %841 = arith.index_cast %840 : i32 to index
    %842 = memref.load %arg2[%841] : memref<288xf32, #tpu.memory_space<smem>>
    %843 = vector.broadcast %842 : f32 to vector<16x16xf32>
    %844 = arith.mulf %843, %583 : vector<16x16xf32>
    %845 = arith.addf %838, %844 : vector<16x16xf32>
    %c6_i32_266 = arith.constant 6 : i32
    %846 = arith.addi %789, %c6_i32_266 : i32
    %c2_i32_267 = arith.constant 2 : i32
    %847 = arith.addi %846, %c2_i32_267 : i32
    %848 = arith.index_cast %847 : i32 to index
    %849 = memref.load %arg2[%848] : memref<288xf32, #tpu.memory_space<smem>>
    %850 = vector.broadcast %849 : f32 to vector<16x16xf32>
    %851 = arith.mulf %850, %584 : vector<16x16xf32>
    %852 = arith.addf %845, %851 : vector<16x16xf32>
    %c4_i32_268 = arith.constant 4 : i32
    %853 = arith.addi %0, %c4_i32_268 : i32
    %c4_i32_269 = arith.constant 4 : i32
    %854 = arith.muli %853, %c4_i32_269 : i32
    %c1_i32_270 = arith.constant 1 : i32
    %855 = arith.addi %854, %c1_i32_270 : i32
    %c9_i32_271 = arith.constant 9 : i32
    %856 = arith.muli %855, %c9_i32_271 : i32
    %c0_i32_272 = arith.constant 0 : i32
    %857 = arith.addi %856, %c0_i32_272 : i32
    %c0_i32_273 = arith.constant 0 : i32
    %858 = arith.addi %857, %c0_i32_273 : i32
    %859 = arith.index_cast %858 : i32 to index
    %860 = memref.load %arg2[%859] : memref<288xf32, #tpu.memory_space<smem>>
    %861 = vector.broadcast %860 : f32 to vector<16x16xf32>
    %862 = arith.mulf %861, %576 : vector<16x16xf32>
    %863 = arith.addf %363, %862 : vector<16x16xf32>
    %c0_i32_274 = arith.constant 0 : i32
    %864 = arith.addi %856, %c0_i32_274 : i32
    %c1_i32_275 = arith.constant 1 : i32
    %865 = arith.addi %864, %c1_i32_275 : i32
    %866 = arith.index_cast %865 : i32 to index
    %867 = memref.load %arg2[%866] : memref<288xf32, #tpu.memory_space<smem>>
    %868 = vector.broadcast %867 : f32 to vector<16x16xf32>
    %869 = arith.mulf %868, %577 : vector<16x16xf32>
    %870 = arith.addf %863, %869 : vector<16x16xf32>
    %c0_i32_276 = arith.constant 0 : i32
    %871 = arith.addi %856, %c0_i32_276 : i32
    %c2_i32_277 = arith.constant 2 : i32
    %872 = arith.addi %871, %c2_i32_277 : i32
    %873 = arith.index_cast %872 : i32 to index
    %874 = memref.load %arg2[%873] : memref<288xf32, #tpu.memory_space<smem>>
    %875 = vector.broadcast %874 : f32 to vector<16x16xf32>
    %876 = arith.mulf %875, %578 : vector<16x16xf32>
    %877 = arith.addf %870, %876 : vector<16x16xf32>
    %c3_i32_278 = arith.constant 3 : i32
    %878 = arith.addi %856, %c3_i32_278 : i32
    %c0_i32_279 = arith.constant 0 : i32
    %879 = arith.addi %878, %c0_i32_279 : i32
    %880 = arith.index_cast %879 : i32 to index
    %881 = memref.load %arg2[%880] : memref<288xf32, #tpu.memory_space<smem>>
    %882 = vector.broadcast %881 : f32 to vector<16x16xf32>
    %883 = arith.mulf %882, %579 : vector<16x16xf32>
    %884 = arith.addf %877, %883 : vector<16x16xf32>
    %c3_i32_280 = arith.constant 3 : i32
    %885 = arith.addi %856, %c3_i32_280 : i32
    %c1_i32_281 = arith.constant 1 : i32
    %886 = arith.addi %885, %c1_i32_281 : i32
    %887 = arith.index_cast %886 : i32 to index
    %888 = memref.load %arg2[%887] : memref<288xf32, #tpu.memory_space<smem>>
    %889 = vector.broadcast %888 : f32 to vector<16x16xf32>
    %890 = arith.mulf %889, %580 : vector<16x16xf32>
    %891 = arith.addf %884, %890 : vector<16x16xf32>
    %c3_i32_282 = arith.constant 3 : i32
    %892 = arith.addi %856, %c3_i32_282 : i32
    %c2_i32_283 = arith.constant 2 : i32
    %893 = arith.addi %892, %c2_i32_283 : i32
    %894 = arith.index_cast %893 : i32 to index
    %895 = memref.load %arg2[%894] : memref<288xf32, #tpu.memory_space<smem>>
    %896 = vector.broadcast %895 : f32 to vector<16x16xf32>
    %897 = arith.mulf %896, %581 : vector<16x16xf32>
    %898 = arith.addf %891, %897 : vector<16x16xf32>
    %c6_i32_284 = arith.constant 6 : i32
    %899 = arith.addi %856, %c6_i32_284 : i32
    %c0_i32_285 = arith.constant 0 : i32
    %900 = arith.addi %899, %c0_i32_285 : i32
    %901 = arith.index_cast %900 : i32 to index
    %902 = memref.load %arg2[%901] : memref<288xf32, #tpu.memory_space<smem>>
    %903 = vector.broadcast %902 : f32 to vector<16x16xf32>
    %904 = arith.mulf %903, %582 : vector<16x16xf32>
    %905 = arith.addf %898, %904 : vector<16x16xf32>
    %c6_i32_286 = arith.constant 6 : i32
    %906 = arith.addi %856, %c6_i32_286 : i32
    %c1_i32_287 = arith.constant 1 : i32
    %907 = arith.addi %906, %c1_i32_287 : i32
    %908 = arith.index_cast %907 : i32 to index
    %909 = memref.load %arg2[%908] : memref<288xf32, #tpu.memory_space<smem>>
    %910 = vector.broadcast %909 : f32 to vector<16x16xf32>
    %911 = arith.mulf %910, %583 : vector<16x16xf32>
    %912 = arith.addf %905, %911 : vector<16x16xf32>
    %c6_i32_288 = arith.constant 6 : i32
    %913 = arith.addi %856, %c6_i32_288 : i32
    %c2_i32_289 = arith.constant 2 : i32
    %914 = arith.addi %913, %c2_i32_289 : i32
    %915 = arith.index_cast %914 : i32 to index
    %916 = memref.load %arg2[%915] : memref<288xf32, #tpu.memory_space<smem>>
    %917 = vector.broadcast %916 : f32 to vector<16x16xf32>
    %918 = arith.mulf %917, %584 : vector<16x16xf32>
    %919 = arith.addf %912, %918 : vector<16x16xf32>
    %c5_i32_290 = arith.constant 5 : i32
    %920 = arith.addi %0, %c5_i32_290 : i32
    %c4_i32_291 = arith.constant 4 : i32
    %921 = arith.muli %920, %c4_i32_291 : i32
    %c1_i32_292 = arith.constant 1 : i32
    %922 = arith.addi %921, %c1_i32_292 : i32
    %c9_i32_293 = arith.constant 9 : i32
    %923 = arith.muli %922, %c9_i32_293 : i32
    %c0_i32_294 = arith.constant 0 : i32
    %924 = arith.addi %923, %c0_i32_294 : i32
    %c0_i32_295 = arith.constant 0 : i32
    %925 = arith.addi %924, %c0_i32_295 : i32
    %926 = arith.index_cast %925 : i32 to index
    %927 = memref.load %arg2[%926] : memref<288xf32, #tpu.memory_space<smem>>
    %928 = vector.broadcast %927 : f32 to vector<16x16xf32>
    %929 = arith.mulf %928, %576 : vector<16x16xf32>
    %930 = arith.addf %430, %929 : vector<16x16xf32>
    %c0_i32_296 = arith.constant 0 : i32
    %931 = arith.addi %923, %c0_i32_296 : i32
    %c1_i32_297 = arith.constant 1 : i32
    %932 = arith.addi %931, %c1_i32_297 : i32
    %933 = arith.index_cast %932 : i32 to index
    %934 = memref.load %arg2[%933] : memref<288xf32, #tpu.memory_space<smem>>
    %935 = vector.broadcast %934 : f32 to vector<16x16xf32>
    %936 = arith.mulf %935, %577 : vector<16x16xf32>
    %937 = arith.addf %930, %936 : vector<16x16xf32>
    %c0_i32_298 = arith.constant 0 : i32
    %938 = arith.addi %923, %c0_i32_298 : i32
    %c2_i32_299 = arith.constant 2 : i32
    %939 = arith.addi %938, %c2_i32_299 : i32
    %940 = arith.index_cast %939 : i32 to index
    %941 = memref.load %arg2[%940] : memref<288xf32, #tpu.memory_space<smem>>
    %942 = vector.broadcast %941 : f32 to vector<16x16xf32>
    %943 = arith.mulf %942, %578 : vector<16x16xf32>
    %944 = arith.addf %937, %943 : vector<16x16xf32>
    %c3_i32_300 = arith.constant 3 : i32
    %945 = arith.addi %923, %c3_i32_300 : i32
    %c0_i32_301 = arith.constant 0 : i32
    %946 = arith.addi %945, %c0_i32_301 : i32
    %947 = arith.index_cast %946 : i32 to index
    %948 = memref.load %arg2[%947] : memref<288xf32, #tpu.memory_space<smem>>
    %949 = vector.broadcast %948 : f32 to vector<16x16xf32>
    %950 = arith.mulf %949, %579 : vector<16x16xf32>
    %951 = arith.addf %944, %950 : vector<16x16xf32>
    %c3_i32_302 = arith.constant 3 : i32
    %952 = arith.addi %923, %c3_i32_302 : i32
    %c1_i32_303 = arith.constant 1 : i32
    %953 = arith.addi %952, %c1_i32_303 : i32
    %954 = arith.index_cast %953 : i32 to index
    %955 = memref.load %arg2[%954] : memref<288xf32, #tpu.memory_space<smem>>
    %956 = vector.broadcast %955 : f32 to vector<16x16xf32>
    %957 = arith.mulf %956, %580 : vector<16x16xf32>
    %958 = arith.addf %951, %957 : vector<16x16xf32>
    %c3_i32_304 = arith.constant 3 : i32
    %959 = arith.addi %923, %c3_i32_304 : i32
    %c2_i32_305 = arith.constant 2 : i32
    %960 = arith.addi %959, %c2_i32_305 : i32
    %961 = arith.index_cast %960 : i32 to index
    %962 = memref.load %arg2[%961] : memref<288xf32, #tpu.memory_space<smem>>
    %963 = vector.broadcast %962 : f32 to vector<16x16xf32>
    %964 = arith.mulf %963, %581 : vector<16x16xf32>
    %965 = arith.addf %958, %964 : vector<16x16xf32>
    %c6_i32_306 = arith.constant 6 : i32
    %966 = arith.addi %923, %c6_i32_306 : i32
    %c0_i32_307 = arith.constant 0 : i32
    %967 = arith.addi %966, %c0_i32_307 : i32
    %968 = arith.index_cast %967 : i32 to index
    %969 = memref.load %arg2[%968] : memref<288xf32, #tpu.memory_space<smem>>
    %970 = vector.broadcast %969 : f32 to vector<16x16xf32>
    %971 = arith.mulf %970, %582 : vector<16x16xf32>
    %972 = arith.addf %965, %971 : vector<16x16xf32>
    %c6_i32_308 = arith.constant 6 : i32
    %973 = arith.addi %923, %c6_i32_308 : i32
    %c1_i32_309 = arith.constant 1 : i32
    %974 = arith.addi %973, %c1_i32_309 : i32
    %975 = arith.index_cast %974 : i32 to index
    %976 = memref.load %arg2[%975] : memref<288xf32, #tpu.memory_space<smem>>
    %977 = vector.broadcast %976 : f32 to vector<16x16xf32>
    %978 = arith.mulf %977, %583 : vector<16x16xf32>
    %979 = arith.addf %972, %978 : vector<16x16xf32>
    %c6_i32_310 = arith.constant 6 : i32
    %980 = arith.addi %923, %c6_i32_310 : i32
    %c2_i32_311 = arith.constant 2 : i32
    %981 = arith.addi %980, %c2_i32_311 : i32
    %982 = arith.index_cast %981 : i32 to index
    %983 = memref.load %arg2[%982] : memref<288xf32, #tpu.memory_space<smem>>
    %984 = vector.broadcast %983 : f32 to vector<16x16xf32>
    %985 = arith.mulf %984, %584 : vector<16x16xf32>
    %986 = arith.addf %979, %985 : vector<16x16xf32>
    %c6_i32_312 = arith.constant 6 : i32
    %987 = arith.addi %0, %c6_i32_312 : i32
    %c4_i32_313 = arith.constant 4 : i32
    %988 = arith.muli %987, %c4_i32_313 : i32
    %c1_i32_314 = arith.constant 1 : i32
    %989 = arith.addi %988, %c1_i32_314 : i32
    %c9_i32_315 = arith.constant 9 : i32
    %990 = arith.muli %989, %c9_i32_315 : i32
    %c0_i32_316 = arith.constant 0 : i32
    %991 = arith.addi %990, %c0_i32_316 : i32
    %c0_i32_317 = arith.constant 0 : i32
    %992 = arith.addi %991, %c0_i32_317 : i32
    %993 = arith.index_cast %992 : i32 to index
    %994 = memref.load %arg2[%993] : memref<288xf32, #tpu.memory_space<smem>>
    %995 = vector.broadcast %994 : f32 to vector<16x16xf32>
    %996 = arith.mulf %995, %576 : vector<16x16xf32>
    %997 = arith.addf %497, %996 : vector<16x16xf32>
    %c0_i32_318 = arith.constant 0 : i32
    %998 = arith.addi %990, %c0_i32_318 : i32
    %c1_i32_319 = arith.constant 1 : i32
    %999 = arith.addi %998, %c1_i32_319 : i32
    %1000 = arith.index_cast %999 : i32 to index
    %1001 = memref.load %arg2[%1000] : memref<288xf32, #tpu.memory_space<smem>>
    %1002 = vector.broadcast %1001 : f32 to vector<16x16xf32>
    %1003 = arith.mulf %1002, %577 : vector<16x16xf32>
    %1004 = arith.addf %997, %1003 : vector<16x16xf32>
    %c0_i32_320 = arith.constant 0 : i32
    %1005 = arith.addi %990, %c0_i32_320 : i32
    %c2_i32_321 = arith.constant 2 : i32
    %1006 = arith.addi %1005, %c2_i32_321 : i32
    %1007 = arith.index_cast %1006 : i32 to index
    %1008 = memref.load %arg2[%1007] : memref<288xf32, #tpu.memory_space<smem>>
    %1009 = vector.broadcast %1008 : f32 to vector<16x16xf32>
    %1010 = arith.mulf %1009, %578 : vector<16x16xf32>
    %1011 = arith.addf %1004, %1010 : vector<16x16xf32>
    %c3_i32_322 = arith.constant 3 : i32
    %1012 = arith.addi %990, %c3_i32_322 : i32
    %c0_i32_323 = arith.constant 0 : i32
    %1013 = arith.addi %1012, %c0_i32_323 : i32
    %1014 = arith.index_cast %1013 : i32 to index
    %1015 = memref.load %arg2[%1014] : memref<288xf32, #tpu.memory_space<smem>>
    %1016 = vector.broadcast %1015 : f32 to vector<16x16xf32>
    %1017 = arith.mulf %1016, %579 : vector<16x16xf32>
    %1018 = arith.addf %1011, %1017 : vector<16x16xf32>
    %c3_i32_324 = arith.constant 3 : i32
    %1019 = arith.addi %990, %c3_i32_324 : i32
    %c1_i32_325 = arith.constant 1 : i32
    %1020 = arith.addi %1019, %c1_i32_325 : i32
    %1021 = arith.index_cast %1020 : i32 to index
    %1022 = memref.load %arg2[%1021] : memref<288xf32, #tpu.memory_space<smem>>
    %1023 = vector.broadcast %1022 : f32 to vector<16x16xf32>
    %1024 = arith.mulf %1023, %580 : vector<16x16xf32>
    %1025 = arith.addf %1018, %1024 : vector<16x16xf32>
    %c3_i32_326 = arith.constant 3 : i32
    %1026 = arith.addi %990, %c3_i32_326 : i32
    %c2_i32_327 = arith.constant 2 : i32
    %1027 = arith.addi %1026, %c2_i32_327 : i32
    %1028 = arith.index_cast %1027 : i32 to index
    %1029 = memref.load %arg2[%1028] : memref<288xf32, #tpu.memory_space<smem>>
    %1030 = vector.broadcast %1029 : f32 to vector<16x16xf32>
    %1031 = arith.mulf %1030, %581 : vector<16x16xf32>
    %1032 = arith.addf %1025, %1031 : vector<16x16xf32>
    %c6_i32_328 = arith.constant 6 : i32
    %1033 = arith.addi %990, %c6_i32_328 : i32
    %c0_i32_329 = arith.constant 0 : i32
    %1034 = arith.addi %1033, %c0_i32_329 : i32
    %1035 = arith.index_cast %1034 : i32 to index
    %1036 = memref.load %arg2[%1035] : memref<288xf32, #tpu.memory_space<smem>>
    %1037 = vector.broadcast %1036 : f32 to vector<16x16xf32>
    %1038 = arith.mulf %1037, %582 : vector<16x16xf32>
    %1039 = arith.addf %1032, %1038 : vector<16x16xf32>
    %c6_i32_330 = arith.constant 6 : i32
    %1040 = arith.addi %990, %c6_i32_330 : i32
    %c1_i32_331 = arith.constant 1 : i32
    %1041 = arith.addi %1040, %c1_i32_331 : i32
    %1042 = arith.index_cast %1041 : i32 to index
    %1043 = memref.load %arg2[%1042] : memref<288xf32, #tpu.memory_space<smem>>
    %1044 = vector.broadcast %1043 : f32 to vector<16x16xf32>
    %1045 = arith.mulf %1044, %583 : vector<16x16xf32>
    %1046 = arith.addf %1039, %1045 : vector<16x16xf32>
    %c6_i32_332 = arith.constant 6 : i32
    %1047 = arith.addi %990, %c6_i32_332 : i32
    %c2_i32_333 = arith.constant 2 : i32
    %1048 = arith.addi %1047, %c2_i32_333 : i32
    %1049 = arith.index_cast %1048 : i32 to index
    %1050 = memref.load %arg2[%1049] : memref<288xf32, #tpu.memory_space<smem>>
    %1051 = vector.broadcast %1050 : f32 to vector<16x16xf32>
    %1052 = arith.mulf %1051, %584 : vector<16x16xf32>
    %1053 = arith.addf %1046, %1052 : vector<16x16xf32>
    %c7_i32_334 = arith.constant 7 : i32
    %1054 = arith.addi %0, %c7_i32_334 : i32
    %c4_i32_335 = arith.constant 4 : i32
    %1055 = arith.muli %1054, %c4_i32_335 : i32
    %c1_i32_336 = arith.constant 1 : i32
    %1056 = arith.addi %1055, %c1_i32_336 : i32
    %c9_i32_337 = arith.constant 9 : i32
    %1057 = arith.muli %1056, %c9_i32_337 : i32
    %c0_i32_338 = arith.constant 0 : i32
    %1058 = arith.addi %1057, %c0_i32_338 : i32
    %c0_i32_339 = arith.constant 0 : i32
    %1059 = arith.addi %1058, %c0_i32_339 : i32
    %1060 = arith.index_cast %1059 : i32 to index
    %1061 = memref.load %arg2[%1060] : memref<288xf32, #tpu.memory_space<smem>>
    %1062 = vector.broadcast %1061 : f32 to vector<16x16xf32>
    %1063 = arith.mulf %1062, %576 : vector<16x16xf32>
    %1064 = arith.addf %564, %1063 : vector<16x16xf32>
    %c0_i32_340 = arith.constant 0 : i32
    %1065 = arith.addi %1057, %c0_i32_340 : i32
    %c1_i32_341 = arith.constant 1 : i32
    %1066 = arith.addi %1065, %c1_i32_341 : i32
    %1067 = arith.index_cast %1066 : i32 to index
    %1068 = memref.load %arg2[%1067] : memref<288xf32, #tpu.memory_space<smem>>
    %1069 = vector.broadcast %1068 : f32 to vector<16x16xf32>
    %1070 = arith.mulf %1069, %577 : vector<16x16xf32>
    %1071 = arith.addf %1064, %1070 : vector<16x16xf32>
    %c0_i32_342 = arith.constant 0 : i32
    %1072 = arith.addi %1057, %c0_i32_342 : i32
    %c2_i32_343 = arith.constant 2 : i32
    %1073 = arith.addi %1072, %c2_i32_343 : i32
    %1074 = arith.index_cast %1073 : i32 to index
    %1075 = memref.load %arg2[%1074] : memref<288xf32, #tpu.memory_space<smem>>
    %1076 = vector.broadcast %1075 : f32 to vector<16x16xf32>
    %1077 = arith.mulf %1076, %578 : vector<16x16xf32>
    %1078 = arith.addf %1071, %1077 : vector<16x16xf32>
    %c3_i32_344 = arith.constant 3 : i32
    %1079 = arith.addi %1057, %c3_i32_344 : i32
    %c0_i32_345 = arith.constant 0 : i32
    %1080 = arith.addi %1079, %c0_i32_345 : i32
    %1081 = arith.index_cast %1080 : i32 to index
    %1082 = memref.load %arg2[%1081] : memref<288xf32, #tpu.memory_space<smem>>
    %1083 = vector.broadcast %1082 : f32 to vector<16x16xf32>
    %1084 = arith.mulf %1083, %579 : vector<16x16xf32>
    %1085 = arith.addf %1078, %1084 : vector<16x16xf32>
    %c3_i32_346 = arith.constant 3 : i32
    %1086 = arith.addi %1057, %c3_i32_346 : i32
    %c1_i32_347 = arith.constant 1 : i32
    %1087 = arith.addi %1086, %c1_i32_347 : i32
    %1088 = arith.index_cast %1087 : i32 to index
    %1089 = memref.load %arg2[%1088] : memref<288xf32, #tpu.memory_space<smem>>
    %1090 = vector.broadcast %1089 : f32 to vector<16x16xf32>
    %1091 = arith.mulf %1090, %580 : vector<16x16xf32>
    %1092 = arith.addf %1085, %1091 : vector<16x16xf32>
    %c3_i32_348 = arith.constant 3 : i32
    %1093 = arith.addi %1057, %c3_i32_348 : i32
    %c2_i32_349 = arith.constant 2 : i32
    %1094 = arith.addi %1093, %c2_i32_349 : i32
    %1095 = arith.index_cast %1094 : i32 to index
    %1096 = memref.load %arg2[%1095] : memref<288xf32, #tpu.memory_space<smem>>
    %1097 = vector.broadcast %1096 : f32 to vector<16x16xf32>
    %1098 = arith.mulf %1097, %581 : vector<16x16xf32>
    %1099 = arith.addf %1092, %1098 : vector<16x16xf32>
    %c6_i32_350 = arith.constant 6 : i32
    %1100 = arith.addi %1057, %c6_i32_350 : i32
    %c0_i32_351 = arith.constant 0 : i32
    %1101 = arith.addi %1100, %c0_i32_351 : i32
    %1102 = arith.index_cast %1101 : i32 to index
    %1103 = memref.load %arg2[%1102] : memref<288xf32, #tpu.memory_space<smem>>
    %1104 = vector.broadcast %1103 : f32 to vector<16x16xf32>
    %1105 = arith.mulf %1104, %582 : vector<16x16xf32>
    %1106 = arith.addf %1099, %1105 : vector<16x16xf32>
    %c6_i32_352 = arith.constant 6 : i32
    %1107 = arith.addi %1057, %c6_i32_352 : i32
    %c1_i32_353 = arith.constant 1 : i32
    %1108 = arith.addi %1107, %c1_i32_353 : i32
    %1109 = arith.index_cast %1108 : i32 to index
    %1110 = memref.load %arg2[%1109] : memref<288xf32, #tpu.memory_space<smem>>
    %1111 = vector.broadcast %1110 : f32 to vector<16x16xf32>
    %1112 = arith.mulf %1111, %583 : vector<16x16xf32>
    %1113 = arith.addf %1106, %1112 : vector<16x16xf32>
    %c6_i32_354 = arith.constant 6 : i32
    %1114 = arith.addi %1057, %c6_i32_354 : i32
    %c2_i32_355 = arith.constant 2 : i32
    %1115 = arith.addi %1114, %c2_i32_355 : i32
    %1116 = arith.index_cast %1115 : i32 to index
    %1117 = memref.load %arg2[%1116] : memref<288xf32, #tpu.memory_space<smem>>
    %1118 = vector.broadcast %1117 : f32 to vector<16x16xf32>
    %1119 = arith.mulf %1118, %584 : vector<16x16xf32>
    %1120 = arith.addf %1113, %1119 : vector<16x16xf32>
    %c0_356 = arith.constant 0 : index
    %c2 = arith.constant 2 : index
    %c0_357 = arith.constant 0 : index
    %c0_358 = arith.constant 0 : index
    %1121 = vector.load %arg3[%c0_356, %c2, %c0_357, %c0_358] : memref<1x4x16x16xf32, #tpu.memory_space<vmem>>, vector<1x1x16x16xf32>
    %1122 = vector.shape_cast %1121 : vector<1x1x16x16xf32> to vector<16x16xf32>
    %1123 = vector.extract_strided_slice %1122 {offsets = [1, 0], sizes = [1, 16], strides = [1, 1]} : vector<16x16xf32> to vector<1x16xf32>
    %1124 = vector.extract_strided_slice %1122 {offsets = [14, 0], sizes = [1, 16], strides = [1, 1]} : vector<16x16xf32> to vector<1x16xf32>
    %1125 = tpu.concatenate %1123, %1122, %1124 in 0 : vector<1x16xf32>, vector<16x16xf32>, vector<1x16xf32> -> vector<18x16xf32>
    %1126 = vector.extract_strided_slice %1125 {offsets = [0, 1], sizes = [18, 1], strides = [1, 1]} : vector<18x16xf32> to vector<18x1xf32>
    %1127 = vector.extract_strided_slice %1125 {offsets = [0, 14], sizes = [18, 1], strides = [1, 1]} : vector<18x16xf32> to vector<18x1xf32>
    %1128 = tpu.concatenate %1126, %1125, %1127 in 1 : vector<18x1xf32>, vector<18x16xf32>, vector<18x1xf32> -> vector<18x18xf32>
    %1129 = vector.extract_strided_slice %1128 {offsets = [0, 0], sizes = [18, 16], strides = [1, 1]} : vector<18x18xf32> to vector<18x16xf32>
    %1130 = vector.extract_strided_slice %1128 {offsets = [0, 1], sizes = [18, 16], strides = [1, 1]} : vector<18x18xf32> to vector<18x16xf32>
    %1131 = vector.extract_strided_slice %1128 {offsets = [0, 2], sizes = [18, 16], strides = [1, 1]} : vector<18x18xf32> to vector<18x16xf32>
    %1132 = vector.extract_strided_slice %1129 {offsets = [0, 0], sizes = [16, 16], strides = [1, 1]} : vector<18x16xf32> to vector<16x16xf32>
    %1133 = vector.extract_strided_slice %1130 {offsets = [0, 0], sizes = [16, 16], strides = [1, 1]} : vector<18x16xf32> to vector<16x16xf32>
    %1134 = vector.extract_strided_slice %1131 {offsets = [0, 0], sizes = [16, 16], strides = [1, 1]} : vector<18x16xf32> to vector<16x16xf32>
    %1135 = vector.extract_strided_slice %1129 {offsets = [1, 0], sizes = [16, 16], strides = [1, 1]} : vector<18x16xf32> to vector<16x16xf32>
    %1136 = vector.extract_strided_slice %1130 {offsets = [1, 0], sizes = [16, 16], strides = [1, 1]} : vector<18x16xf32> to vector<16x16xf32>
    %1137 = vector.extract_strided_slice %1131 {offsets = [1, 0], sizes = [16, 16], strides = [1, 1]} : vector<18x16xf32> to vector<16x16xf32>
    %1138 = vector.extract_strided_slice %1129 {offsets = [2, 0], sizes = [16, 16], strides = [1, 1]} : vector<18x16xf32> to vector<16x16xf32>
    %1139 = vector.extract_strided_slice %1130 {offsets = [2, 0], sizes = [16, 16], strides = [1, 1]} : vector<18x16xf32> to vector<16x16xf32>
    %1140 = vector.extract_strided_slice %1131 {offsets = [2, 0], sizes = [16, 16], strides = [1, 1]} : vector<18x16xf32> to vector<16x16xf32>
    %c0_i32_359 = arith.constant 0 : i32
    %1141 = arith.addi %0, %c0_i32_359 : i32
    %c4_i32_360 = arith.constant 4 : i32
    %1142 = arith.muli %1141, %c4_i32_360 : i32
    %c2_i32_361 = arith.constant 2 : i32
    %1143 = arith.addi %1142, %c2_i32_361 : i32
    %c9_i32_362 = arith.constant 9 : i32
    %1144 = arith.muli %1143, %c9_i32_362 : i32
    %c0_i32_363 = arith.constant 0 : i32
    %1145 = arith.addi %1144, %c0_i32_363 : i32
    %c0_i32_364 = arith.constant 0 : i32
    %1146 = arith.addi %1145, %c0_i32_364 : i32
    %1147 = arith.index_cast %1146 : i32 to index
    %1148 = memref.load %arg2[%1147] : memref<288xf32, #tpu.memory_space<smem>>
    %1149 = vector.broadcast %1148 : f32 to vector<16x16xf32>
    %1150 = arith.mulf %1149, %1132 : vector<16x16xf32>
    %1151 = arith.addf %651, %1150 : vector<16x16xf32>
    %c0_i32_365 = arith.constant 0 : i32
    %1152 = arith.addi %1144, %c0_i32_365 : i32
    %c1_i32_366 = arith.constant 1 : i32
    %1153 = arith.addi %1152, %c1_i32_366 : i32
    %1154 = arith.index_cast %1153 : i32 to index
    %1155 = memref.load %arg2[%1154] : memref<288xf32, #tpu.memory_space<smem>>
    %1156 = vector.broadcast %1155 : f32 to vector<16x16xf32>
    %1157 = arith.mulf %1156, %1133 : vector<16x16xf32>
    %1158 = arith.addf %1151, %1157 : vector<16x16xf32>
    %c0_i32_367 = arith.constant 0 : i32
    %1159 = arith.addi %1144, %c0_i32_367 : i32
    %c2_i32_368 = arith.constant 2 : i32
    %1160 = arith.addi %1159, %c2_i32_368 : i32
    %1161 = arith.index_cast %1160 : i32 to index
    %1162 = memref.load %arg2[%1161] : memref<288xf32, #tpu.memory_space<smem>>
    %1163 = vector.broadcast %1162 : f32 to vector<16x16xf32>
    %1164 = arith.mulf %1163, %1134 : vector<16x16xf32>
    %1165 = arith.addf %1158, %1164 : vector<16x16xf32>
    %c3_i32_369 = arith.constant 3 : i32
    %1166 = arith.addi %1144, %c3_i32_369 : i32
    %c0_i32_370 = arith.constant 0 : i32
    %1167 = arith.addi %1166, %c0_i32_370 : i32
    %1168 = arith.index_cast %1167 : i32 to index
    %1169 = memref.load %arg2[%1168] : memref<288xf32, #tpu.memory_space<smem>>
    %1170 = vector.broadcast %1169 : f32 to vector<16x16xf32>
    %1171 = arith.mulf %1170, %1135 : vector<16x16xf32>
    %1172 = arith.addf %1165, %1171 : vector<16x16xf32>
    %c3_i32_371 = arith.constant 3 : i32
    %1173 = arith.addi %1144, %c3_i32_371 : i32
    %c1_i32_372 = arith.constant 1 : i32
    %1174 = arith.addi %1173, %c1_i32_372 : i32
    %1175 = arith.index_cast %1174 : i32 to index
    %1176 = memref.load %arg2[%1175] : memref<288xf32, #tpu.memory_space<smem>>
    %1177 = vector.broadcast %1176 : f32 to vector<16x16xf32>
    %1178 = arith.mulf %1177, %1136 : vector<16x16xf32>
    %1179 = arith.addf %1172, %1178 : vector<16x16xf32>
    %c3_i32_373 = arith.constant 3 : i32
    %1180 = arith.addi %1144, %c3_i32_373 : i32
    %c2_i32_374 = arith.constant 2 : i32
    %1181 = arith.addi %1180, %c2_i32_374 : i32
    %1182 = arith.index_cast %1181 : i32 to index
    %1183 = memref.load %arg2[%1182] : memref<288xf32, #tpu.memory_space<smem>>
    %1184 = vector.broadcast %1183 : f32 to vector<16x16xf32>
    %1185 = arith.mulf %1184, %1137 : vector<16x16xf32>
    %1186 = arith.addf %1179, %1185 : vector<16x16xf32>
    %c6_i32_375 = arith.constant 6 : i32
    %1187 = arith.addi %1144, %c6_i32_375 : i32
    %c0_i32_376 = arith.constant 0 : i32
    %1188 = arith.addi %1187, %c0_i32_376 : i32
    %1189 = arith.index_cast %1188 : i32 to index
    %1190 = memref.load %arg2[%1189] : memref<288xf32, #tpu.memory_space<smem>>
    %1191 = vector.broadcast %1190 : f32 to vector<16x16xf32>
    %1192 = arith.mulf %1191, %1138 : vector<16x16xf32>
    %1193 = arith.addf %1186, %1192 : vector<16x16xf32>
    %c6_i32_377 = arith.constant 6 : i32
    %1194 = arith.addi %1144, %c6_i32_377 : i32
    %c1_i32_378 = arith.constant 1 : i32
    %1195 = arith.addi %1194, %c1_i32_378 : i32
    %1196 = arith.index_cast %1195 : i32 to index
    %1197 = memref.load %arg2[%1196] : memref<288xf32, #tpu.memory_space<smem>>
    %1198 = vector.broadcast %1197 : f32 to vector<16x16xf32>
    %1199 = arith.mulf %1198, %1139 : vector<16x16xf32>
    %1200 = arith.addf %1193, %1199 : vector<16x16xf32>
    %c6_i32_379 = arith.constant 6 : i32
    %1201 = arith.addi %1144, %c6_i32_379 : i32
    %c2_i32_380 = arith.constant 2 : i32
    %1202 = arith.addi %1201, %c2_i32_380 : i32
    %1203 = arith.index_cast %1202 : i32 to index
    %1204 = memref.load %arg2[%1203] : memref<288xf32, #tpu.memory_space<smem>>
    %1205 = vector.broadcast %1204 : f32 to vector<16x16xf32>
    %1206 = arith.mulf %1205, %1140 : vector<16x16xf32>
    %1207 = arith.addf %1200, %1206 : vector<16x16xf32>
    %c1_i32_381 = arith.constant 1 : i32
    %1208 = arith.addi %0, %c1_i32_381 : i32
    %c4_i32_382 = arith.constant 4 : i32
    %1209 = arith.muli %1208, %c4_i32_382 : i32
    %c2_i32_383 = arith.constant 2 : i32
    %1210 = arith.addi %1209, %c2_i32_383 : i32
    %c9_i32_384 = arith.constant 9 : i32
    %1211 = arith.muli %1210, %c9_i32_384 : i32
    %c0_i32_385 = arith.constant 0 : i32
    %1212 = arith.addi %1211, %c0_i32_385 : i32
    %c0_i32_386 = arith.constant 0 : i32
    %1213 = arith.addi %1212, %c0_i32_386 : i32
    %1214 = arith.index_cast %1213 : i32 to index
    %1215 = memref.load %arg2[%1214] : memref<288xf32, #tpu.memory_space<smem>>
    %1216 = vector.broadcast %1215 : f32 to vector<16x16xf32>
    %1217 = arith.mulf %1216, %1132 : vector<16x16xf32>
    %1218 = arith.addf %718, %1217 : vector<16x16xf32>
    %c0_i32_387 = arith.constant 0 : i32
    %1219 = arith.addi %1211, %c0_i32_387 : i32
    %c1_i32_388 = arith.constant 1 : i32
    %1220 = arith.addi %1219, %c1_i32_388 : i32
    %1221 = arith.index_cast %1220 : i32 to index
    %1222 = memref.load %arg2[%1221] : memref<288xf32, #tpu.memory_space<smem>>
    %1223 = vector.broadcast %1222 : f32 to vector<16x16xf32>
    %1224 = arith.mulf %1223, %1133 : vector<16x16xf32>
    %1225 = arith.addf %1218, %1224 : vector<16x16xf32>
    %c0_i32_389 = arith.constant 0 : i32
    %1226 = arith.addi %1211, %c0_i32_389 : i32
    %c2_i32_390 = arith.constant 2 : i32
    %1227 = arith.addi %1226, %c2_i32_390 : i32
    %1228 = arith.index_cast %1227 : i32 to index
    %1229 = memref.load %arg2[%1228] : memref<288xf32, #tpu.memory_space<smem>>
    %1230 = vector.broadcast %1229 : f32 to vector<16x16xf32>
    %1231 = arith.mulf %1230, %1134 : vector<16x16xf32>
    %1232 = arith.addf %1225, %1231 : vector<16x16xf32>
    %c3_i32_391 = arith.constant 3 : i32
    %1233 = arith.addi %1211, %c3_i32_391 : i32
    %c0_i32_392 = arith.constant 0 : i32
    %1234 = arith.addi %1233, %c0_i32_392 : i32
    %1235 = arith.index_cast %1234 : i32 to index
    %1236 = memref.load %arg2[%1235] : memref<288xf32, #tpu.memory_space<smem>>
    %1237 = vector.broadcast %1236 : f32 to vector<16x16xf32>
    %1238 = arith.mulf %1237, %1135 : vector<16x16xf32>
    %1239 = arith.addf %1232, %1238 : vector<16x16xf32>
    %c3_i32_393 = arith.constant 3 : i32
    %1240 = arith.addi %1211, %c3_i32_393 : i32
    %c1_i32_394 = arith.constant 1 : i32
    %1241 = arith.addi %1240, %c1_i32_394 : i32
    %1242 = arith.index_cast %1241 : i32 to index
    %1243 = memref.load %arg2[%1242] : memref<288xf32, #tpu.memory_space<smem>>
    %1244 = vector.broadcast %1243 : f32 to vector<16x16xf32>
    %1245 = arith.mulf %1244, %1136 : vector<16x16xf32>
    %1246 = arith.addf %1239, %1245 : vector<16x16xf32>
    %c3_i32_395 = arith.constant 3 : i32
    %1247 = arith.addi %1211, %c3_i32_395 : i32
    %c2_i32_396 = arith.constant 2 : i32
    %1248 = arith.addi %1247, %c2_i32_396 : i32
    %1249 = arith.index_cast %1248 : i32 to index
    %1250 = memref.load %arg2[%1249] : memref<288xf32, #tpu.memory_space<smem>>
    %1251 = vector.broadcast %1250 : f32 to vector<16x16xf32>
    %1252 = arith.mulf %1251, %1137 : vector<16x16xf32>
    %1253 = arith.addf %1246, %1252 : vector<16x16xf32>
    %c6_i32_397 = arith.constant 6 : i32
    %1254 = arith.addi %1211, %c6_i32_397 : i32
    %c0_i32_398 = arith.constant 0 : i32
    %1255 = arith.addi %1254, %c0_i32_398 : i32
    %1256 = arith.index_cast %1255 : i32 to index
    %1257 = memref.load %arg2[%1256] : memref<288xf32, #tpu.memory_space<smem>>
    %1258 = vector.broadcast %1257 : f32 to vector<16x16xf32>
    %1259 = arith.mulf %1258, %1138 : vector<16x16xf32>
    %1260 = arith.addf %1253, %1259 : vector<16x16xf32>
    %c6_i32_399 = arith.constant 6 : i32
    %1261 = arith.addi %1211, %c6_i32_399 : i32
    %c1_i32_400 = arith.constant 1 : i32
    %1262 = arith.addi %1261, %c1_i32_400 : i32
    %1263 = arith.index_cast %1262 : i32 to index
    %1264 = memref.load %arg2[%1263] : memref<288xf32, #tpu.memory_space<smem>>
    %1265 = vector.broadcast %1264 : f32 to vector<16x16xf32>
    %1266 = arith.mulf %1265, %1139 : vector<16x16xf32>
    %1267 = arith.addf %1260, %1266 : vector<16x16xf32>
    %c6_i32_401 = arith.constant 6 : i32
    %1268 = arith.addi %1211, %c6_i32_401 : i32
    %c2_i32_402 = arith.constant 2 : i32
    %1269 = arith.addi %1268, %c2_i32_402 : i32
    %1270 = arith.index_cast %1269 : i32 to index
    %1271 = memref.load %arg2[%1270] : memref<288xf32, #tpu.memory_space<smem>>
    %1272 = vector.broadcast %1271 : f32 to vector<16x16xf32>
    %1273 = arith.mulf %1272, %1140 : vector<16x16xf32>
    %1274 = arith.addf %1267, %1273 : vector<16x16xf32>
    %c2_i32_403 = arith.constant 2 : i32
    %1275 = arith.addi %0, %c2_i32_403 : i32
    %c4_i32_404 = arith.constant 4 : i32
    %1276 = arith.muli %1275, %c4_i32_404 : i32
    %c2_i32_405 = arith.constant 2 : i32
    %1277 = arith.addi %1276, %c2_i32_405 : i32
    %c9_i32_406 = arith.constant 9 : i32
    %1278 = arith.muli %1277, %c9_i32_406 : i32
    %c0_i32_407 = arith.constant 0 : i32
    %1279 = arith.addi %1278, %c0_i32_407 : i32
    %c0_i32_408 = arith.constant 0 : i32
    %1280 = arith.addi %1279, %c0_i32_408 : i32
    %1281 = arith.index_cast %1280 : i32 to index
    %1282 = memref.load %arg2[%1281] : memref<288xf32, #tpu.memory_space<smem>>
    %1283 = vector.broadcast %1282 : f32 to vector<16x16xf32>
    %1284 = arith.mulf %1283, %1132 : vector<16x16xf32>
    %1285 = arith.addf %785, %1284 : vector<16x16xf32>
    %c0_i32_409 = arith.constant 0 : i32
    %1286 = arith.addi %1278, %c0_i32_409 : i32
    %c1_i32_410 = arith.constant 1 : i32
    %1287 = arith.addi %1286, %c1_i32_410 : i32
    %1288 = arith.index_cast %1287 : i32 to index
    %1289 = memref.load %arg2[%1288] : memref<288xf32, #tpu.memory_space<smem>>
    %1290 = vector.broadcast %1289 : f32 to vector<16x16xf32>
    %1291 = arith.mulf %1290, %1133 : vector<16x16xf32>
    %1292 = arith.addf %1285, %1291 : vector<16x16xf32>
    %c0_i32_411 = arith.constant 0 : i32
    %1293 = arith.addi %1278, %c0_i32_411 : i32
    %c2_i32_412 = arith.constant 2 : i32
    %1294 = arith.addi %1293, %c2_i32_412 : i32
    %1295 = arith.index_cast %1294 : i32 to index
    %1296 = memref.load %arg2[%1295] : memref<288xf32, #tpu.memory_space<smem>>
    %1297 = vector.broadcast %1296 : f32 to vector<16x16xf32>
    %1298 = arith.mulf %1297, %1134 : vector<16x16xf32>
    %1299 = arith.addf %1292, %1298 : vector<16x16xf32>
    %c3_i32_413 = arith.constant 3 : i32
    %1300 = arith.addi %1278, %c3_i32_413 : i32
    %c0_i32_414 = arith.constant 0 : i32
    %1301 = arith.addi %1300, %c0_i32_414 : i32
    %1302 = arith.index_cast %1301 : i32 to index
    %1303 = memref.load %arg2[%1302] : memref<288xf32, #tpu.memory_space<smem>>
    %1304 = vector.broadcast %1303 : f32 to vector<16x16xf32>
    %1305 = arith.mulf %1304, %1135 : vector<16x16xf32>
    %1306 = arith.addf %1299, %1305 : vector<16x16xf32>
    %c3_i32_415 = arith.constant 3 : i32
    %1307 = arith.addi %1278, %c3_i32_415 : i32
    %c1_i32_416 = arith.constant 1 : i32
    %1308 = arith.addi %1307, %c1_i32_416 : i32
    %1309 = arith.index_cast %1308 : i32 to index
    %1310 = memref.load %arg2[%1309] : memref<288xf32, #tpu.memory_space<smem>>
    %1311 = vector.broadcast %1310 : f32 to vector<16x16xf32>
    %1312 = arith.mulf %1311, %1136 : vector<16x16xf32>
    %1313 = arith.addf %1306, %1312 : vector<16x16xf32>
    %c3_i32_417 = arith.constant 3 : i32
    %1314 = arith.addi %1278, %c3_i32_417 : i32
    %c2_i32_418 = arith.constant 2 : i32
    %1315 = arith.addi %1314, %c2_i32_418 : i32
    %1316 = arith.index_cast %1315 : i32 to index
    %1317 = memref.load %arg2[%1316] : memref<288xf32, #tpu.memory_space<smem>>
    %1318 = vector.broadcast %1317 : f32 to vector<16x16xf32>
    %1319 = arith.mulf %1318, %1137 : vector<16x16xf32>
    %1320 = arith.addf %1313, %1319 : vector<16x16xf32>
    %c6_i32_419 = arith.constant 6 : i32
    %1321 = arith.addi %1278, %c6_i32_419 : i32
    %c0_i32_420 = arith.constant 0 : i32
    %1322 = arith.addi %1321, %c0_i32_420 : i32
    %1323 = arith.index_cast %1322 : i32 to index
    %1324 = memref.load %arg2[%1323] : memref<288xf32, #tpu.memory_space<smem>>
    %1325 = vector.broadcast %1324 : f32 to vector<16x16xf32>
    %1326 = arith.mulf %1325, %1138 : vector<16x16xf32>
    %1327 = arith.addf %1320, %1326 : vector<16x16xf32>
    %c6_i32_421 = arith.constant 6 : i32
    %1328 = arith.addi %1278, %c6_i32_421 : i32
    %c1_i32_422 = arith.constant 1 : i32
    %1329 = arith.addi %1328, %c1_i32_422 : i32
    %1330 = arith.index_cast %1329 : i32 to index
    %1331 = memref.load %arg2[%1330] : memref<288xf32, #tpu.memory_space<smem>>
    %1332 = vector.broadcast %1331 : f32 to vector<16x16xf32>
    %1333 = arith.mulf %1332, %1139 : vector<16x16xf32>
    %1334 = arith.addf %1327, %1333 : vector<16x16xf32>
    %c6_i32_423 = arith.constant 6 : i32
    %1335 = arith.addi %1278, %c6_i32_423 : i32
    %c2_i32_424 = arith.constant 2 : i32
    %1336 = arith.addi %1335, %c2_i32_424 : i32
    %1337 = arith.index_cast %1336 : i32 to index
    %1338 = memref.load %arg2[%1337] : memref<288xf32, #tpu.memory_space<smem>>
    %1339 = vector.broadcast %1338 : f32 to vector<16x16xf32>
    %1340 = arith.mulf %1339, %1140 : vector<16x16xf32>
    %1341 = arith.addf %1334, %1340 : vector<16x16xf32>
    %c3_i32_425 = arith.constant 3 : i32
    %1342 = arith.addi %0, %c3_i32_425 : i32
    %c4_i32_426 = arith.constant 4 : i32
    %1343 = arith.muli %1342, %c4_i32_426 : i32
    %c2_i32_427 = arith.constant 2 : i32
    %1344 = arith.addi %1343, %c2_i32_427 : i32
    %c9_i32_428 = arith.constant 9 : i32
    %1345 = arith.muli %1344, %c9_i32_428 : i32
    %c0_i32_429 = arith.constant 0 : i32
    %1346 = arith.addi %1345, %c0_i32_429 : i32
    %c0_i32_430 = arith.constant 0 : i32
    %1347 = arith.addi %1346, %c0_i32_430 : i32
    %1348 = arith.index_cast %1347 : i32 to index
    %1349 = memref.load %arg2[%1348] : memref<288xf32, #tpu.memory_space<smem>>
    %1350 = vector.broadcast %1349 : f32 to vector<16x16xf32>
    %1351 = arith.mulf %1350, %1132 : vector<16x16xf32>
    %1352 = arith.addf %852, %1351 : vector<16x16xf32>
    %c0_i32_431 = arith.constant 0 : i32
    %1353 = arith.addi %1345, %c0_i32_431 : i32
    %c1_i32_432 = arith.constant 1 : i32
    %1354 = arith.addi %1353, %c1_i32_432 : i32
    %1355 = arith.index_cast %1354 : i32 to index
    %1356 = memref.load %arg2[%1355] : memref<288xf32, #tpu.memory_space<smem>>
    %1357 = vector.broadcast %1356 : f32 to vector<16x16xf32>
    %1358 = arith.mulf %1357, %1133 : vector<16x16xf32>
    %1359 = arith.addf %1352, %1358 : vector<16x16xf32>
    %c0_i32_433 = arith.constant 0 : i32
    %1360 = arith.addi %1345, %c0_i32_433 : i32
    %c2_i32_434 = arith.constant 2 : i32
    %1361 = arith.addi %1360, %c2_i32_434 : i32
    %1362 = arith.index_cast %1361 : i32 to index
    %1363 = memref.load %arg2[%1362] : memref<288xf32, #tpu.memory_space<smem>>
    %1364 = vector.broadcast %1363 : f32 to vector<16x16xf32>
    %1365 = arith.mulf %1364, %1134 : vector<16x16xf32>
    %1366 = arith.addf %1359, %1365 : vector<16x16xf32>
    %c3_i32_435 = arith.constant 3 : i32
    %1367 = arith.addi %1345, %c3_i32_435 : i32
    %c0_i32_436 = arith.constant 0 : i32
    %1368 = arith.addi %1367, %c0_i32_436 : i32
    %1369 = arith.index_cast %1368 : i32 to index
    %1370 = memref.load %arg2[%1369] : memref<288xf32, #tpu.memory_space<smem>>
    %1371 = vector.broadcast %1370 : f32 to vector<16x16xf32>
    %1372 = arith.mulf %1371, %1135 : vector<16x16xf32>
    %1373 = arith.addf %1366, %1372 : vector<16x16xf32>
    %c3_i32_437 = arith.constant 3 : i32
    %1374 = arith.addi %1345, %c3_i32_437 : i32
    %c1_i32_438 = arith.constant 1 : i32
    %1375 = arith.addi %1374, %c1_i32_438 : i32
    %1376 = arith.index_cast %1375 : i32 to index
    %1377 = memref.load %arg2[%1376] : memref<288xf32, #tpu.memory_space<smem>>
    %1378 = vector.broadcast %1377 : f32 to vector<16x16xf32>
    %1379 = arith.mulf %1378, %1136 : vector<16x16xf32>
    %1380 = arith.addf %1373, %1379 : vector<16x16xf32>
    %c3_i32_439 = arith.constant 3 : i32
    %1381 = arith.addi %1345, %c3_i32_439 : i32
    %c2_i32_440 = arith.constant 2 : i32
    %1382 = arith.addi %1381, %c2_i32_440 : i32
    %1383 = arith.index_cast %1382 : i32 to index
    %1384 = memref.load %arg2[%1383] : memref<288xf32, #tpu.memory_space<smem>>
    %1385 = vector.broadcast %1384 : f32 to vector<16x16xf32>
    %1386 = arith.mulf %1385, %1137 : vector<16x16xf32>
    %1387 = arith.addf %1380, %1386 : vector<16x16xf32>
    %c6_i32_441 = arith.constant 6 : i32
    %1388 = arith.addi %1345, %c6_i32_441 : i32
    %c0_i32_442 = arith.constant 0 : i32
    %1389 = arith.addi %1388, %c0_i32_442 : i32
    %1390 = arith.index_cast %1389 : i32 to index
    %1391 = memref.load %arg2[%1390] : memref<288xf32, #tpu.memory_space<smem>>
    %1392 = vector.broadcast %1391 : f32 to vector<16x16xf32>
    %1393 = arith.mulf %1392, %1138 : vector<16x16xf32>
    %1394 = arith.addf %1387, %1393 : vector<16x16xf32>
    %c6_i32_443 = arith.constant 6 : i32
    %1395 = arith.addi %1345, %c6_i32_443 : i32
    %c1_i32_444 = arith.constant 1 : i32
    %1396 = arith.addi %1395, %c1_i32_444 : i32
    %1397 = arith.index_cast %1396 : i32 to index
    %1398 = memref.load %arg2[%1397] : memref<288xf32, #tpu.memory_space<smem>>
    %1399 = vector.broadcast %1398 : f32 to vector<16x16xf32>
    %1400 = arith.mulf %1399, %1139 : vector<16x16xf32>
    %1401 = arith.addf %1394, %1400 : vector<16x16xf32>
    %c6_i32_445 = arith.constant 6 : i32
    %1402 = arith.addi %1345, %c6_i32_445 : i32
    %c2_i32_446 = arith.constant 2 : i32
    %1403 = arith.addi %1402, %c2_i32_446 : i32
    %1404 = arith.index_cast %1403 : i32 to index
    %1405 = memref.load %arg2[%1404] : memref<288xf32, #tpu.memory_space<smem>>
    %1406 = vector.broadcast %1405 : f32 to vector<16x16xf32>
    %1407 = arith.mulf %1406, %1140 : vector<16x16xf32>
    %1408 = arith.addf %1401, %1407 : vector<16x16xf32>
    %c4_i32_447 = arith.constant 4 : i32
    %1409 = arith.addi %0, %c4_i32_447 : i32
    %c4_i32_448 = arith.constant 4 : i32
    %1410 = arith.muli %1409, %c4_i32_448 : i32
    %c2_i32_449 = arith.constant 2 : i32
    %1411 = arith.addi %1410, %c2_i32_449 : i32
    %c9_i32_450 = arith.constant 9 : i32
    %1412 = arith.muli %1411, %c9_i32_450 : i32
    %c0_i32_451 = arith.constant 0 : i32
    %1413 = arith.addi %1412, %c0_i32_451 : i32
    %c0_i32_452 = arith.constant 0 : i32
    %1414 = arith.addi %1413, %c0_i32_452 : i32
    %1415 = arith.index_cast %1414 : i32 to index
    %1416 = memref.load %arg2[%1415] : memref<288xf32, #tpu.memory_space<smem>>
    %1417 = vector.broadcast %1416 : f32 to vector<16x16xf32>
    %1418 = arith.mulf %1417, %1132 : vector<16x16xf32>
    %1419 = arith.addf %919, %1418 : vector<16x16xf32>
    %c0_i32_453 = arith.constant 0 : i32
    %1420 = arith.addi %1412, %c0_i32_453 : i32
    %c1_i32_454 = arith.constant 1 : i32
    %1421 = arith.addi %1420, %c1_i32_454 : i32
    %1422 = arith.index_cast %1421 : i32 to index
    %1423 = memref.load %arg2[%1422] : memref<288xf32, #tpu.memory_space<smem>>
    %1424 = vector.broadcast %1423 : f32 to vector<16x16xf32>
    %1425 = arith.mulf %1424, %1133 : vector<16x16xf32>
    %1426 = arith.addf %1419, %1425 : vector<16x16xf32>
    %c0_i32_455 = arith.constant 0 : i32
    %1427 = arith.addi %1412, %c0_i32_455 : i32
    %c2_i32_456 = arith.constant 2 : i32
    %1428 = arith.addi %1427, %c2_i32_456 : i32
    %1429 = arith.index_cast %1428 : i32 to index
    %1430 = memref.load %arg2[%1429] : memref<288xf32, #tpu.memory_space<smem>>
    %1431 = vector.broadcast %1430 : f32 to vector<16x16xf32>
    %1432 = arith.mulf %1431, %1134 : vector<16x16xf32>
    %1433 = arith.addf %1426, %1432 : vector<16x16xf32>
    %c3_i32_457 = arith.constant 3 : i32
    %1434 = arith.addi %1412, %c3_i32_457 : i32
    %c0_i32_458 = arith.constant 0 : i32
    %1435 = arith.addi %1434, %c0_i32_458 : i32
    %1436 = arith.index_cast %1435 : i32 to index
    %1437 = memref.load %arg2[%1436] : memref<288xf32, #tpu.memory_space<smem>>
    %1438 = vector.broadcast %1437 : f32 to vector<16x16xf32>
    %1439 = arith.mulf %1438, %1135 : vector<16x16xf32>
    %1440 = arith.addf %1433, %1439 : vector<16x16xf32>
    %c3_i32_459 = arith.constant 3 : i32
    %1441 = arith.addi %1412, %c3_i32_459 : i32
    %c1_i32_460 = arith.constant 1 : i32
    %1442 = arith.addi %1441, %c1_i32_460 : i32
    %1443 = arith.index_cast %1442 : i32 to index
    %1444 = memref.load %arg2[%1443] : memref<288xf32, #tpu.memory_space<smem>>
    %1445 = vector.broadcast %1444 : f32 to vector<16x16xf32>
    %1446 = arith.mulf %1445, %1136 : vector<16x16xf32>
    %1447 = arith.addf %1440, %1446 : vector<16x16xf32>
    %c3_i32_461 = arith.constant 3 : i32
    %1448 = arith.addi %1412, %c3_i32_461 : i32
    %c2_i32_462 = arith.constant 2 : i32
    %1449 = arith.addi %1448, %c2_i32_462 : i32
    %1450 = arith.index_cast %1449 : i32 to index
    %1451 = memref.load %arg2[%1450] : memref<288xf32, #tpu.memory_space<smem>>
    %1452 = vector.broadcast %1451 : f32 to vector<16x16xf32>
    %1453 = arith.mulf %1452, %1137 : vector<16x16xf32>
    %1454 = arith.addf %1447, %1453 : vector<16x16xf32>
    %c6_i32_463 = arith.constant 6 : i32
    %1455 = arith.addi %1412, %c6_i32_463 : i32
    %c0_i32_464 = arith.constant 0 : i32
    %1456 = arith.addi %1455, %c0_i32_464 : i32
    %1457 = arith.index_cast %1456 : i32 to index
    %1458 = memref.load %arg2[%1457] : memref<288xf32, #tpu.memory_space<smem>>
    %1459 = vector.broadcast %1458 : f32 to vector<16x16xf32>
    %1460 = arith.mulf %1459, %1138 : vector<16x16xf32>
    %1461 = arith.addf %1454, %1460 : vector<16x16xf32>
    %c6_i32_465 = arith.constant 6 : i32
    %1462 = arith.addi %1412, %c6_i32_465 : i32
    %c1_i32_466 = arith.constant 1 : i32
    %1463 = arith.addi %1462, %c1_i32_466 : i32
    %1464 = arith.index_cast %1463 : i32 to index
    %1465 = memref.load %arg2[%1464] : memref<288xf32, #tpu.memory_space<smem>>
    %1466 = vector.broadcast %1465 : f32 to vector<16x16xf32>
    %1467 = arith.mulf %1466, %1139 : vector<16x16xf32>
    %1468 = arith.addf %1461, %1467 : vector<16x16xf32>
    %c6_i32_467 = arith.constant 6 : i32
    %1469 = arith.addi %1412, %c6_i32_467 : i32
    %c2_i32_468 = arith.constant 2 : i32
    %1470 = arith.addi %1469, %c2_i32_468 : i32
    %1471 = arith.index_cast %1470 : i32 to index
    %1472 = memref.load %arg2[%1471] : memref<288xf32, #tpu.memory_space<smem>>
    %1473 = vector.broadcast %1472 : f32 to vector<16x16xf32>
    %1474 = arith.mulf %1473, %1140 : vector<16x16xf32>
    %1475 = arith.addf %1468, %1474 : vector<16x16xf32>
    %c5_i32_469 = arith.constant 5 : i32
    %1476 = arith.addi %0, %c5_i32_469 : i32
    %c4_i32_470 = arith.constant 4 : i32
    %1477 = arith.muli %1476, %c4_i32_470 : i32
    %c2_i32_471 = arith.constant 2 : i32
    %1478 = arith.addi %1477, %c2_i32_471 : i32
    %c9_i32_472 = arith.constant 9 : i32
    %1479 = arith.muli %1478, %c9_i32_472 : i32
    %c0_i32_473 = arith.constant 0 : i32
    %1480 = arith.addi %1479, %c0_i32_473 : i32
    %c0_i32_474 = arith.constant 0 : i32
    %1481 = arith.addi %1480, %c0_i32_474 : i32
    %1482 = arith.index_cast %1481 : i32 to index
    %1483 = memref.load %arg2[%1482] : memref<288xf32, #tpu.memory_space<smem>>
    %1484 = vector.broadcast %1483 : f32 to vector<16x16xf32>
    %1485 = arith.mulf %1484, %1132 : vector<16x16xf32>
    %1486 = arith.addf %986, %1485 : vector<16x16xf32>
    %c0_i32_475 = arith.constant 0 : i32
    %1487 = arith.addi %1479, %c0_i32_475 : i32
    %c1_i32_476 = arith.constant 1 : i32
    %1488 = arith.addi %1487, %c1_i32_476 : i32
    %1489 = arith.index_cast %1488 : i32 to index
    %1490 = memref.load %arg2[%1489] : memref<288xf32, #tpu.memory_space<smem>>
    %1491 = vector.broadcast %1490 : f32 to vector<16x16xf32>
    %1492 = arith.mulf %1491, %1133 : vector<16x16xf32>
    %1493 = arith.addf %1486, %1492 : vector<16x16xf32>
    %c0_i32_477 = arith.constant 0 : i32
    %1494 = arith.addi %1479, %c0_i32_477 : i32
    %c2_i32_478 = arith.constant 2 : i32
    %1495 = arith.addi %1494, %c2_i32_478 : i32
    %1496 = arith.index_cast %1495 : i32 to index
    %1497 = memref.load %arg2[%1496] : memref<288xf32, #tpu.memory_space<smem>>
    %1498 = vector.broadcast %1497 : f32 to vector<16x16xf32>
    %1499 = arith.mulf %1498, %1134 : vector<16x16xf32>
    %1500 = arith.addf %1493, %1499 : vector<16x16xf32>
    %c3_i32_479 = arith.constant 3 : i32
    %1501 = arith.addi %1479, %c3_i32_479 : i32
    %c0_i32_480 = arith.constant 0 : i32
    %1502 = arith.addi %1501, %c0_i32_480 : i32
    %1503 = arith.index_cast %1502 : i32 to index
    %1504 = memref.load %arg2[%1503] : memref<288xf32, #tpu.memory_space<smem>>
    %1505 = vector.broadcast %1504 : f32 to vector<16x16xf32>
    %1506 = arith.mulf %1505, %1135 : vector<16x16xf32>
    %1507 = arith.addf %1500, %1506 : vector<16x16xf32>
    %c3_i32_481 = arith.constant 3 : i32
    %1508 = arith.addi %1479, %c3_i32_481 : i32
    %c1_i32_482 = arith.constant 1 : i32
    %1509 = arith.addi %1508, %c1_i32_482 : i32
    %1510 = arith.index_cast %1509 : i32 to index
    %1511 = memref.load %arg2[%1510] : memref<288xf32, #tpu.memory_space<smem>>
    %1512 = vector.broadcast %1511 : f32 to vector<16x16xf32>
    %1513 = arith.mulf %1512, %1136 : vector<16x16xf32>
    %1514 = arith.addf %1507, %1513 : vector<16x16xf32>
    %c3_i32_483 = arith.constant 3 : i32
    %1515 = arith.addi %1479, %c3_i32_483 : i32
    %c2_i32_484 = arith.constant 2 : i32
    %1516 = arith.addi %1515, %c2_i32_484 : i32
    %1517 = arith.index_cast %1516 : i32 to index
    %1518 = memref.load %arg2[%1517] : memref<288xf32, #tpu.memory_space<smem>>
    %1519 = vector.broadcast %1518 : f32 to vector<16x16xf32>
    %1520 = arith.mulf %1519, %1137 : vector<16x16xf32>
    %1521 = arith.addf %1514, %1520 : vector<16x16xf32>
    %c6_i32_485 = arith.constant 6 : i32
    %1522 = arith.addi %1479, %c6_i32_485 : i32
    %c0_i32_486 = arith.constant 0 : i32
    %1523 = arith.addi %1522, %c0_i32_486 : i32
    %1524 = arith.index_cast %1523 : i32 to index
    %1525 = memref.load %arg2[%1524] : memref<288xf32, #tpu.memory_space<smem>>
    %1526 = vector.broadcast %1525 : f32 to vector<16x16xf32>
    %1527 = arith.mulf %1526, %1138 : vector<16x16xf32>
    %1528 = arith.addf %1521, %1527 : vector<16x16xf32>
    %c6_i32_487 = arith.constant 6 : i32
    %1529 = arith.addi %1479, %c6_i32_487 : i32
    %c1_i32_488 = arith.constant 1 : i32
    %1530 = arith.addi %1529, %c1_i32_488 : i32
    %1531 = arith.index_cast %1530 : i32 to index
    %1532 = memref.load %arg2[%1531] : memref<288xf32, #tpu.memory_space<smem>>
    %1533 = vector.broadcast %1532 : f32 to vector<16x16xf32>
    %1534 = arith.mulf %1533, %1139 : vector<16x16xf32>
    %1535 = arith.addf %1528, %1534 : vector<16x16xf32>
    %c6_i32_489 = arith.constant 6 : i32
    %1536 = arith.addi %1479, %c6_i32_489 : i32
    %c2_i32_490 = arith.constant 2 : i32
    %1537 = arith.addi %1536, %c2_i32_490 : i32
    %1538 = arith.index_cast %1537 : i32 to index
    %1539 = memref.load %arg2[%1538] : memref<288xf32, #tpu.memory_space<smem>>
    %1540 = vector.broadcast %1539 : f32 to vector<16x16xf32>
    %1541 = arith.mulf %1540, %1140 : vector<16x16xf32>
    %1542 = arith.addf %1535, %1541 : vector<16x16xf32>
    %c6_i32_491 = arith.constant 6 : i32
    %1543 = arith.addi %0, %c6_i32_491 : i32
    %c4_i32_492 = arith.constant 4 : i32
    %1544 = arith.muli %1543, %c4_i32_492 : i32
    %c2_i32_493 = arith.constant 2 : i32
    %1545 = arith.addi %1544, %c2_i32_493 : i32
    %c9_i32_494 = arith.constant 9 : i32
    %1546 = arith.muli %1545, %c9_i32_494 : i32
    %c0_i32_495 = arith.constant 0 : i32
    %1547 = arith.addi %1546, %c0_i32_495 : i32
    %c0_i32_496 = arith.constant 0 : i32
    %1548 = arith.addi %1547, %c0_i32_496 : i32
    %1549 = arith.index_cast %1548 : i32 to index
    %1550 = memref.load %arg2[%1549] : memref<288xf32, #tpu.memory_space<smem>>
    %1551 = vector.broadcast %1550 : f32 to vector<16x16xf32>
    %1552 = arith.mulf %1551, %1132 : vector<16x16xf32>
    %1553 = arith.addf %1053, %1552 : vector<16x16xf32>
    %c0_i32_497 = arith.constant 0 : i32
    %1554 = arith.addi %1546, %c0_i32_497 : i32
    %c1_i32_498 = arith.constant 1 : i32
    %1555 = arith.addi %1554, %c1_i32_498 : i32
    %1556 = arith.index_cast %1555 : i32 to index
    %1557 = memref.load %arg2[%1556] : memref<288xf32, #tpu.memory_space<smem>>
    %1558 = vector.broadcast %1557 : f32 to vector<16x16xf32>
    %1559 = arith.mulf %1558, %1133 : vector<16x16xf32>
    %1560 = arith.addf %1553, %1559 : vector<16x16xf32>
    %c0_i32_499 = arith.constant 0 : i32
    %1561 = arith.addi %1546, %c0_i32_499 : i32
    %c2_i32_500 = arith.constant 2 : i32
    %1562 = arith.addi %1561, %c2_i32_500 : i32
    %1563 = arith.index_cast %1562 : i32 to index
    %1564 = memref.load %arg2[%1563] : memref<288xf32, #tpu.memory_space<smem>>
    %1565 = vector.broadcast %1564 : f32 to vector<16x16xf32>
    %1566 = arith.mulf %1565, %1134 : vector<16x16xf32>
    %1567 = arith.addf %1560, %1566 : vector<16x16xf32>
    %c3_i32_501 = arith.constant 3 : i32
    %1568 = arith.addi %1546, %c3_i32_501 : i32
    %c0_i32_502 = arith.constant 0 : i32
    %1569 = arith.addi %1568, %c0_i32_502 : i32
    %1570 = arith.index_cast %1569 : i32 to index
    %1571 = memref.load %arg2[%1570] : memref<288xf32, #tpu.memory_space<smem>>
    %1572 = vector.broadcast %1571 : f32 to vector<16x16xf32>
    %1573 = arith.mulf %1572, %1135 : vector<16x16xf32>
    %1574 = arith.addf %1567, %1573 : vector<16x16xf32>
    %c3_i32_503 = arith.constant 3 : i32
    %1575 = arith.addi %1546, %c3_i32_503 : i32
    %c1_i32_504 = arith.constant 1 : i32
    %1576 = arith.addi %1575, %c1_i32_504 : i32
    %1577 = arith.index_cast %1576 : i32 to index
    %1578 = memref.load %arg2[%1577] : memref<288xf32, #tpu.memory_space<smem>>
    %1579 = vector.broadcast %1578 : f32 to vector<16x16xf32>
    %1580 = arith.mulf %1579, %1136 : vector<16x16xf32>
    %1581 = arith.addf %1574, %1580 : vector<16x16xf32>
    %c3_i32_505 = arith.constant 3 : i32
    %1582 = arith.addi %1546, %c3_i32_505 : i32
    %c2_i32_506 = arith.constant 2 : i32
    %1583 = arith.addi %1582, %c2_i32_506 : i32
    %1584 = arith.index_cast %1583 : i32 to index
    %1585 = memref.load %arg2[%1584] : memref<288xf32, #tpu.memory_space<smem>>
    %1586 = vector.broadcast %1585 : f32 to vector<16x16xf32>
    %1587 = arith.mulf %1586, %1137 : vector<16x16xf32>
    %1588 = arith.addf %1581, %1587 : vector<16x16xf32>
    %c6_i32_507 = arith.constant 6 : i32
    %1589 = arith.addi %1546, %c6_i32_507 : i32
    %c0_i32_508 = arith.constant 0 : i32
    %1590 = arith.addi %1589, %c0_i32_508 : i32
    %1591 = arith.index_cast %1590 : i32 to index
    %1592 = memref.load %arg2[%1591] : memref<288xf32, #tpu.memory_space<smem>>
    %1593 = vector.broadcast %1592 : f32 to vector<16x16xf32>
    %1594 = arith.mulf %1593, %1138 : vector<16x16xf32>
    %1595 = arith.addf %1588, %1594 : vector<16x16xf32>
    %c6_i32_509 = arith.constant 6 : i32
    %1596 = arith.addi %1546, %c6_i32_509 : i32
    %c1_i32_510 = arith.constant 1 : i32
    %1597 = arith.addi %1596, %c1_i32_510 : i32
    %1598 = arith.index_cast %1597 : i32 to index
    %1599 = memref.load %arg2[%1598] : memref<288xf32, #tpu.memory_space<smem>>
    %1600 = vector.broadcast %1599 : f32 to vector<16x16xf32>
    %1601 = arith.mulf %1600, %1139 : vector<16x16xf32>
    %1602 = arith.addf %1595, %1601 : vector<16x16xf32>
    %c6_i32_511 = arith.constant 6 : i32
    %1603 = arith.addi %1546, %c6_i32_511 : i32
    %c2_i32_512 = arith.constant 2 : i32
    %1604 = arith.addi %1603, %c2_i32_512 : i32
    %1605 = arith.index_cast %1604 : i32 to index
    %1606 = memref.load %arg2[%1605] : memref<288xf32, #tpu.memory_space<smem>>
    %1607 = vector.broadcast %1606 : f32 to vector<16x16xf32>
    %1608 = arith.mulf %1607, %1140 : vector<16x16xf32>
    %1609 = arith.addf %1602, %1608 : vector<16x16xf32>
    %c7_i32_513 = arith.constant 7 : i32
    %1610 = arith.addi %0, %c7_i32_513 : i32
    %c4_i32_514 = arith.constant 4 : i32
    %1611 = arith.muli %1610, %c4_i32_514 : i32
    %c2_i32_515 = arith.constant 2 : i32
    %1612 = arith.addi %1611, %c2_i32_515 : i32
    %c9_i32_516 = arith.constant 9 : i32
    %1613 = arith.muli %1612, %c9_i32_516 : i32
    %c0_i32_517 = arith.constant 0 : i32
    %1614 = arith.addi %1613, %c0_i32_517 : i32
    %c0_i32_518 = arith.constant 0 : i32
    %1615 = arith.addi %1614, %c0_i32_518 : i32
    %1616 = arith.index_cast %1615 : i32 to index
    %1617 = memref.load %arg2[%1616] : memref<288xf32, #tpu.memory_space<smem>>
    %1618 = vector.broadcast %1617 : f32 to vector<16x16xf32>
    %1619 = arith.mulf %1618, %1132 : vector<16x16xf32>
    %1620 = arith.addf %1120, %1619 : vector<16x16xf32>
    %c0_i32_519 = arith.constant 0 : i32
    %1621 = arith.addi %1613, %c0_i32_519 : i32
    %c1_i32_520 = arith.constant 1 : i32
    %1622 = arith.addi %1621, %c1_i32_520 : i32
    %1623 = arith.index_cast %1622 : i32 to index
    %1624 = memref.load %arg2[%1623] : memref<288xf32, #tpu.memory_space<smem>>
    %1625 = vector.broadcast %1624 : f32 to vector<16x16xf32>
    %1626 = arith.mulf %1625, %1133 : vector<16x16xf32>
    %1627 = arith.addf %1620, %1626 : vector<16x16xf32>
    %c0_i32_521 = arith.constant 0 : i32
    %1628 = arith.addi %1613, %c0_i32_521 : i32
    %c2_i32_522 = arith.constant 2 : i32
    %1629 = arith.addi %1628, %c2_i32_522 : i32
    %1630 = arith.index_cast %1629 : i32 to index
    %1631 = memref.load %arg2[%1630] : memref<288xf32, #tpu.memory_space<smem>>
    %1632 = vector.broadcast %1631 : f32 to vector<16x16xf32>
    %1633 = arith.mulf %1632, %1134 : vector<16x16xf32>
    %1634 = arith.addf %1627, %1633 : vector<16x16xf32>
    %c3_i32_523 = arith.constant 3 : i32
    %1635 = arith.addi %1613, %c3_i32_523 : i32
    %c0_i32_524 = arith.constant 0 : i32
    %1636 = arith.addi %1635, %c0_i32_524 : i32
    %1637 = arith.index_cast %1636 : i32 to index
    %1638 = memref.load %arg2[%1637] : memref<288xf32, #tpu.memory_space<smem>>
    %1639 = vector.broadcast %1638 : f32 to vector<16x16xf32>
    %1640 = arith.mulf %1639, %1135 : vector<16x16xf32>
    %1641 = arith.addf %1634, %1640 : vector<16x16xf32>
    %c3_i32_525 = arith.constant 3 : i32
    %1642 = arith.addi %1613, %c3_i32_525 : i32
    %c1_i32_526 = arith.constant 1 : i32
    %1643 = arith.addi %1642, %c1_i32_526 : i32
    %1644 = arith.index_cast %1643 : i32 to index
    %1645 = memref.load %arg2[%1644] : memref<288xf32, #tpu.memory_space<smem>>
    %1646 = vector.broadcast %1645 : f32 to vector<16x16xf32>
    %1647 = arith.mulf %1646, %1136 : vector<16x16xf32>
    %1648 = arith.addf %1641, %1647 : vector<16x16xf32>
    %c3_i32_527 = arith.constant 3 : i32
    %1649 = arith.addi %1613, %c3_i32_527 : i32
    %c2_i32_528 = arith.constant 2 : i32
    %1650 = arith.addi %1649, %c2_i32_528 : i32
    %1651 = arith.index_cast %1650 : i32 to index
    %1652 = memref.load %arg2[%1651] : memref<288xf32, #tpu.memory_space<smem>>
    %1653 = vector.broadcast %1652 : f32 to vector<16x16xf32>
    %1654 = arith.mulf %1653, %1137 : vector<16x16xf32>
    %1655 = arith.addf %1648, %1654 : vector<16x16xf32>
    %c6_i32_529 = arith.constant 6 : i32
    %1656 = arith.addi %1613, %c6_i32_529 : i32
    %c0_i32_530 = arith.constant 0 : i32
    %1657 = arith.addi %1656, %c0_i32_530 : i32
    %1658 = arith.index_cast %1657 : i32 to index
    %1659 = memref.load %arg2[%1658] : memref<288xf32, #tpu.memory_space<smem>>
    %1660 = vector.broadcast %1659 : f32 to vector<16x16xf32>
    %1661 = arith.mulf %1660, %1138 : vector<16x16xf32>
    %1662 = arith.addf %1655, %1661 : vector<16x16xf32>
    %c6_i32_531 = arith.constant 6 : i32
    %1663 = arith.addi %1613, %c6_i32_531 : i32
    %c1_i32_532 = arith.constant 1 : i32
    %1664 = arith.addi %1663, %c1_i32_532 : i32
    %1665 = arith.index_cast %1664 : i32 to index
    %1666 = memref.load %arg2[%1665] : memref<288xf32, #tpu.memory_space<smem>>
    %1667 = vector.broadcast %1666 : f32 to vector<16x16xf32>
    %1668 = arith.mulf %1667, %1139 : vector<16x16xf32>
    %1669 = arith.addf %1662, %1668 : vector<16x16xf32>
    %c6_i32_533 = arith.constant 6 : i32
    %1670 = arith.addi %1613, %c6_i32_533 : i32
    %c2_i32_534 = arith.constant 2 : i32
    %1671 = arith.addi %1670, %c2_i32_534 : i32
    %1672 = arith.index_cast %1671 : i32 to index
    %1673 = memref.load %arg2[%1672] : memref<288xf32, #tpu.memory_space<smem>>
    %1674 = vector.broadcast %1673 : f32 to vector<16x16xf32>
    %1675 = arith.mulf %1674, %1140 : vector<16x16xf32>
    %1676 = arith.addf %1669, %1675 : vector<16x16xf32>
    %c0_535 = arith.constant 0 : index
    %c3 = arith.constant 3 : index
    %c0_536 = arith.constant 0 : index
    %c0_537 = arith.constant 0 : index
    %1677 = vector.load %arg3[%c0_535, %c3, %c0_536, %c0_537] : memref<1x4x16x16xf32, #tpu.memory_space<vmem>>, vector<1x1x16x16xf32>
    %1678 = vector.shape_cast %1677 : vector<1x1x16x16xf32> to vector<16x16xf32>
    %1679 = vector.extract_strided_slice %1678 {offsets = [1, 0], sizes = [1, 16], strides = [1, 1]} : vector<16x16xf32> to vector<1x16xf32>
    %1680 = vector.extract_strided_slice %1678 {offsets = [14, 0], sizes = [1, 16], strides = [1, 1]} : vector<16x16xf32> to vector<1x16xf32>
    %1681 = tpu.concatenate %1679, %1678, %1680 in 0 : vector<1x16xf32>, vector<16x16xf32>, vector<1x16xf32> -> vector<18x16xf32>
    %1682 = vector.extract_strided_slice %1681 {offsets = [0, 1], sizes = [18, 1], strides = [1, 1]} : vector<18x16xf32> to vector<18x1xf32>
    %1683 = vector.extract_strided_slice %1681 {offsets = [0, 14], sizes = [18, 1], strides = [1, 1]} : vector<18x16xf32> to vector<18x1xf32>
    %1684 = tpu.concatenate %1682, %1681, %1683 in 1 : vector<18x1xf32>, vector<18x16xf32>, vector<18x1xf32> -> vector<18x18xf32>
    %1685 = vector.extract_strided_slice %1684 {offsets = [0, 0], sizes = [18, 16], strides = [1, 1]} : vector<18x18xf32> to vector<18x16xf32>
    %1686 = vector.extract_strided_slice %1684 {offsets = [0, 1], sizes = [18, 16], strides = [1, 1]} : vector<18x18xf32> to vector<18x16xf32>
    %1687 = vector.extract_strided_slice %1684 {offsets = [0, 2], sizes = [18, 16], strides = [1, 1]} : vector<18x18xf32> to vector<18x16xf32>
    %1688 = vector.extract_strided_slice %1685 {offsets = [0, 0], sizes = [16, 16], strides = [1, 1]} : vector<18x16xf32> to vector<16x16xf32>
    %1689 = vector.extract_strided_slice %1686 {offsets = [0, 0], sizes = [16, 16], strides = [1, 1]} : vector<18x16xf32> to vector<16x16xf32>
    %1690 = vector.extract_strided_slice %1687 {offsets = [0, 0], sizes = [16, 16], strides = [1, 1]} : vector<18x16xf32> to vector<16x16xf32>
    %1691 = vector.extract_strided_slice %1685 {offsets = [1, 0], sizes = [16, 16], strides = [1, 1]} : vector<18x16xf32> to vector<16x16xf32>
    %1692 = vector.extract_strided_slice %1686 {offsets = [1, 0], sizes = [16, 16], strides = [1, 1]} : vector<18x16xf32> to vector<16x16xf32>
    %1693 = vector.extract_strided_slice %1687 {offsets = [1, 0], sizes = [16, 16], strides = [1, 1]} : vector<18x16xf32> to vector<16x16xf32>
    %1694 = vector.extract_strided_slice %1685 {offsets = [2, 0], sizes = [16, 16], strides = [1, 1]} : vector<18x16xf32> to vector<16x16xf32>
    %1695 = vector.extract_strided_slice %1686 {offsets = [2, 0], sizes = [16, 16], strides = [1, 1]} : vector<18x16xf32> to vector<16x16xf32>
    %1696 = vector.extract_strided_slice %1687 {offsets = [2, 0], sizes = [16, 16], strides = [1, 1]} : vector<18x16xf32> to vector<16x16xf32>
    %c0_i32_538 = arith.constant 0 : i32
    %1697 = arith.addi %0, %c0_i32_538 : i32
    %c4_i32_539 = arith.constant 4 : i32
    %1698 = arith.muli %1697, %c4_i32_539 : i32
    %c3_i32_540 = arith.constant 3 : i32
    %1699 = arith.addi %1698, %c3_i32_540 : i32
    %c9_i32_541 = arith.constant 9 : i32
    %1700 = arith.muli %1699, %c9_i32_541 : i32
    %c0_i32_542 = arith.constant 0 : i32
    %1701 = arith.addi %1700, %c0_i32_542 : i32
    %c0_i32_543 = arith.constant 0 : i32
    %1702 = arith.addi %1701, %c0_i32_543 : i32
    %1703 = arith.index_cast %1702 : i32 to index
    %1704 = memref.load %arg2[%1703] : memref<288xf32, #tpu.memory_space<smem>>
    %1705 = vector.broadcast %1704 : f32 to vector<16x16xf32>
    %1706 = arith.mulf %1705, %1688 : vector<16x16xf32>
    %1707 = arith.addf %1207, %1706 : vector<16x16xf32>
    %c0_i32_544 = arith.constant 0 : i32
    %1708 = arith.addi %1700, %c0_i32_544 : i32
    %c1_i32_545 = arith.constant 1 : i32
    %1709 = arith.addi %1708, %c1_i32_545 : i32
    %1710 = arith.index_cast %1709 : i32 to index
    %1711 = memref.load %arg2[%1710] : memref<288xf32, #tpu.memory_space<smem>>
    %1712 = vector.broadcast %1711 : f32 to vector<16x16xf32>
    %1713 = arith.mulf %1712, %1689 : vector<16x16xf32>
    %1714 = arith.addf %1707, %1713 : vector<16x16xf32>
    %c0_i32_546 = arith.constant 0 : i32
    %1715 = arith.addi %1700, %c0_i32_546 : i32
    %c2_i32_547 = arith.constant 2 : i32
    %1716 = arith.addi %1715, %c2_i32_547 : i32
    %1717 = arith.index_cast %1716 : i32 to index
    %1718 = memref.load %arg2[%1717] : memref<288xf32, #tpu.memory_space<smem>>
    %1719 = vector.broadcast %1718 : f32 to vector<16x16xf32>
    %1720 = arith.mulf %1719, %1690 : vector<16x16xf32>
    %1721 = arith.addf %1714, %1720 : vector<16x16xf32>
    %c3_i32_548 = arith.constant 3 : i32
    %1722 = arith.addi %1700, %c3_i32_548 : i32
    %c0_i32_549 = arith.constant 0 : i32
    %1723 = arith.addi %1722, %c0_i32_549 : i32
    %1724 = arith.index_cast %1723 : i32 to index
    %1725 = memref.load %arg2[%1724] : memref<288xf32, #tpu.memory_space<smem>>
    %1726 = vector.broadcast %1725 : f32 to vector<16x16xf32>
    %1727 = arith.mulf %1726, %1691 : vector<16x16xf32>
    %1728 = arith.addf %1721, %1727 : vector<16x16xf32>
    %c3_i32_550 = arith.constant 3 : i32
    %1729 = arith.addi %1700, %c3_i32_550 : i32
    %c1_i32_551 = arith.constant 1 : i32
    %1730 = arith.addi %1729, %c1_i32_551 : i32
    %1731 = arith.index_cast %1730 : i32 to index
    %1732 = memref.load %arg2[%1731] : memref<288xf32, #tpu.memory_space<smem>>
    %1733 = vector.broadcast %1732 : f32 to vector<16x16xf32>
    %1734 = arith.mulf %1733, %1692 : vector<16x16xf32>
    %1735 = arith.addf %1728, %1734 : vector<16x16xf32>
    %c3_i32_552 = arith.constant 3 : i32
    %1736 = arith.addi %1700, %c3_i32_552 : i32
    %c2_i32_553 = arith.constant 2 : i32
    %1737 = arith.addi %1736, %c2_i32_553 : i32
    %1738 = arith.index_cast %1737 : i32 to index
    %1739 = memref.load %arg2[%1738] : memref<288xf32, #tpu.memory_space<smem>>
    %1740 = vector.broadcast %1739 : f32 to vector<16x16xf32>
    %1741 = arith.mulf %1740, %1693 : vector<16x16xf32>
    %1742 = arith.addf %1735, %1741 : vector<16x16xf32>
    %c6_i32_554 = arith.constant 6 : i32
    %1743 = arith.addi %1700, %c6_i32_554 : i32
    %c0_i32_555 = arith.constant 0 : i32
    %1744 = arith.addi %1743, %c0_i32_555 : i32
    %1745 = arith.index_cast %1744 : i32 to index
    %1746 = memref.load %arg2[%1745] : memref<288xf32, #tpu.memory_space<smem>>
    %1747 = vector.broadcast %1746 : f32 to vector<16x16xf32>
    %1748 = arith.mulf %1747, %1694 : vector<16x16xf32>
    %1749 = arith.addf %1742, %1748 : vector<16x16xf32>
    %c6_i32_556 = arith.constant 6 : i32
    %1750 = arith.addi %1700, %c6_i32_556 : i32
    %c1_i32_557 = arith.constant 1 : i32
    %1751 = arith.addi %1750, %c1_i32_557 : i32
    %1752 = arith.index_cast %1751 : i32 to index
    %1753 = memref.load %arg2[%1752] : memref<288xf32, #tpu.memory_space<smem>>
    %1754 = vector.broadcast %1753 : f32 to vector<16x16xf32>
    %1755 = arith.mulf %1754, %1695 : vector<16x16xf32>
    %1756 = arith.addf %1749, %1755 : vector<16x16xf32>
    %c6_i32_558 = arith.constant 6 : i32
    %1757 = arith.addi %1700, %c6_i32_558 : i32
    %c2_i32_559 = arith.constant 2 : i32
    %1758 = arith.addi %1757, %c2_i32_559 : i32
    %1759 = arith.index_cast %1758 : i32 to index
    %1760 = memref.load %arg2[%1759] : memref<288xf32, #tpu.memory_space<smem>>
    %1761 = vector.broadcast %1760 : f32 to vector<16x16xf32>
    %1762 = arith.mulf %1761, %1696 : vector<16x16xf32>
    %1763 = arith.addf %1756, %1762 : vector<16x16xf32>
    %c1_i32_560 = arith.constant 1 : i32
    %1764 = arith.addi %0, %c1_i32_560 : i32
    %c4_i32_561 = arith.constant 4 : i32
    %1765 = arith.muli %1764, %c4_i32_561 : i32
    %c3_i32_562 = arith.constant 3 : i32
    %1766 = arith.addi %1765, %c3_i32_562 : i32
    %c9_i32_563 = arith.constant 9 : i32
    %1767 = arith.muli %1766, %c9_i32_563 : i32
    %c0_i32_564 = arith.constant 0 : i32
    %1768 = arith.addi %1767, %c0_i32_564 : i32
    %c0_i32_565 = arith.constant 0 : i32
    %1769 = arith.addi %1768, %c0_i32_565 : i32
    %1770 = arith.index_cast %1769 : i32 to index
    %1771 = memref.load %arg2[%1770] : memref<288xf32, #tpu.memory_space<smem>>
    %1772 = vector.broadcast %1771 : f32 to vector<16x16xf32>
    %1773 = arith.mulf %1772, %1688 : vector<16x16xf32>
    %1774 = arith.addf %1274, %1773 : vector<16x16xf32>
    %c0_i32_566 = arith.constant 0 : i32
    %1775 = arith.addi %1767, %c0_i32_566 : i32
    %c1_i32_567 = arith.constant 1 : i32
    %1776 = arith.addi %1775, %c1_i32_567 : i32
    %1777 = arith.index_cast %1776 : i32 to index
    %1778 = memref.load %arg2[%1777] : memref<288xf32, #tpu.memory_space<smem>>
    %1779 = vector.broadcast %1778 : f32 to vector<16x16xf32>
    %1780 = arith.mulf %1779, %1689 : vector<16x16xf32>
    %1781 = arith.addf %1774, %1780 : vector<16x16xf32>
    %c0_i32_568 = arith.constant 0 : i32
    %1782 = arith.addi %1767, %c0_i32_568 : i32
    %c2_i32_569 = arith.constant 2 : i32
    %1783 = arith.addi %1782, %c2_i32_569 : i32
    %1784 = arith.index_cast %1783 : i32 to index
    %1785 = memref.load %arg2[%1784] : memref<288xf32, #tpu.memory_space<smem>>
    %1786 = vector.broadcast %1785 : f32 to vector<16x16xf32>
    %1787 = arith.mulf %1786, %1690 : vector<16x16xf32>
    %1788 = arith.addf %1781, %1787 : vector<16x16xf32>
    %c3_i32_570 = arith.constant 3 : i32
    %1789 = arith.addi %1767, %c3_i32_570 : i32
    %c0_i32_571 = arith.constant 0 : i32
    %1790 = arith.addi %1789, %c0_i32_571 : i32
    %1791 = arith.index_cast %1790 : i32 to index
    %1792 = memref.load %arg2[%1791] : memref<288xf32, #tpu.memory_space<smem>>
    %1793 = vector.broadcast %1792 : f32 to vector<16x16xf32>
    %1794 = arith.mulf %1793, %1691 : vector<16x16xf32>
    %1795 = arith.addf %1788, %1794 : vector<16x16xf32>
    %c3_i32_572 = arith.constant 3 : i32
    %1796 = arith.addi %1767, %c3_i32_572 : i32
    %c1_i32_573 = arith.constant 1 : i32
    %1797 = arith.addi %1796, %c1_i32_573 : i32
    %1798 = arith.index_cast %1797 : i32 to index
    %1799 = memref.load %arg2[%1798] : memref<288xf32, #tpu.memory_space<smem>>
    %1800 = vector.broadcast %1799 : f32 to vector<16x16xf32>
    %1801 = arith.mulf %1800, %1692 : vector<16x16xf32>
    %1802 = arith.addf %1795, %1801 : vector<16x16xf32>
    %c3_i32_574 = arith.constant 3 : i32
    %1803 = arith.addi %1767, %c3_i32_574 : i32
    %c2_i32_575 = arith.constant 2 : i32
    %1804 = arith.addi %1803, %c2_i32_575 : i32
    %1805 = arith.index_cast %1804 : i32 to index
    %1806 = memref.load %arg2[%1805] : memref<288xf32, #tpu.memory_space<smem>>
    %1807 = vector.broadcast %1806 : f32 to vector<16x16xf32>
    %1808 = arith.mulf %1807, %1693 : vector<16x16xf32>
    %1809 = arith.addf %1802, %1808 : vector<16x16xf32>
    %c6_i32_576 = arith.constant 6 : i32
    %1810 = arith.addi %1767, %c6_i32_576 : i32
    %c0_i32_577 = arith.constant 0 : i32
    %1811 = arith.addi %1810, %c0_i32_577 : i32
    %1812 = arith.index_cast %1811 : i32 to index
    %1813 = memref.load %arg2[%1812] : memref<288xf32, #tpu.memory_space<smem>>
    %1814 = vector.broadcast %1813 : f32 to vector<16x16xf32>
    %1815 = arith.mulf %1814, %1694 : vector<16x16xf32>
    %1816 = arith.addf %1809, %1815 : vector<16x16xf32>
    %c6_i32_578 = arith.constant 6 : i32
    %1817 = arith.addi %1767, %c6_i32_578 : i32
    %c1_i32_579 = arith.constant 1 : i32
    %1818 = arith.addi %1817, %c1_i32_579 : i32
    %1819 = arith.index_cast %1818 : i32 to index
    %1820 = memref.load %arg2[%1819] : memref<288xf32, #tpu.memory_space<smem>>
    %1821 = vector.broadcast %1820 : f32 to vector<16x16xf32>
    %1822 = arith.mulf %1821, %1695 : vector<16x16xf32>
    %1823 = arith.addf %1816, %1822 : vector<16x16xf32>
    %c6_i32_580 = arith.constant 6 : i32
    %1824 = arith.addi %1767, %c6_i32_580 : i32
    %c2_i32_581 = arith.constant 2 : i32
    %1825 = arith.addi %1824, %c2_i32_581 : i32
    %1826 = arith.index_cast %1825 : i32 to index
    %1827 = memref.load %arg2[%1826] : memref<288xf32, #tpu.memory_space<smem>>
    %1828 = vector.broadcast %1827 : f32 to vector<16x16xf32>
    %1829 = arith.mulf %1828, %1696 : vector<16x16xf32>
    %1830 = arith.addf %1823, %1829 : vector<16x16xf32>
    %c2_i32_582 = arith.constant 2 : i32
    %1831 = arith.addi %0, %c2_i32_582 : i32
    %c4_i32_583 = arith.constant 4 : i32
    %1832 = arith.muli %1831, %c4_i32_583 : i32
    %c3_i32_584 = arith.constant 3 : i32
    %1833 = arith.addi %1832, %c3_i32_584 : i32
    %c9_i32_585 = arith.constant 9 : i32
    %1834 = arith.muli %1833, %c9_i32_585 : i32
    %c0_i32_586 = arith.constant 0 : i32
    %1835 = arith.addi %1834, %c0_i32_586 : i32
    %c0_i32_587 = arith.constant 0 : i32
    %1836 = arith.addi %1835, %c0_i32_587 : i32
    %1837 = arith.index_cast %1836 : i32 to index
    %1838 = memref.load %arg2[%1837] : memref<288xf32, #tpu.memory_space<smem>>
    %1839 = vector.broadcast %1838 : f32 to vector<16x16xf32>
    %1840 = arith.mulf %1839, %1688 : vector<16x16xf32>
    %1841 = arith.addf %1341, %1840 : vector<16x16xf32>
    %c0_i32_588 = arith.constant 0 : i32
    %1842 = arith.addi %1834, %c0_i32_588 : i32
    %c1_i32_589 = arith.constant 1 : i32
    %1843 = arith.addi %1842, %c1_i32_589 : i32
    %1844 = arith.index_cast %1843 : i32 to index
    %1845 = memref.load %arg2[%1844] : memref<288xf32, #tpu.memory_space<smem>>
    %1846 = vector.broadcast %1845 : f32 to vector<16x16xf32>
    %1847 = arith.mulf %1846, %1689 : vector<16x16xf32>
    %1848 = arith.addf %1841, %1847 : vector<16x16xf32>
    %c0_i32_590 = arith.constant 0 : i32
    %1849 = arith.addi %1834, %c0_i32_590 : i32
    %c2_i32_591 = arith.constant 2 : i32
    %1850 = arith.addi %1849, %c2_i32_591 : i32
    %1851 = arith.index_cast %1850 : i32 to index
    %1852 = memref.load %arg2[%1851] : memref<288xf32, #tpu.memory_space<smem>>
    %1853 = vector.broadcast %1852 : f32 to vector<16x16xf32>
    %1854 = arith.mulf %1853, %1690 : vector<16x16xf32>
    %1855 = arith.addf %1848, %1854 : vector<16x16xf32>
    %c3_i32_592 = arith.constant 3 : i32
    %1856 = arith.addi %1834, %c3_i32_592 : i32
    %c0_i32_593 = arith.constant 0 : i32
    %1857 = arith.addi %1856, %c0_i32_593 : i32
    %1858 = arith.index_cast %1857 : i32 to index
    %1859 = memref.load %arg2[%1858] : memref<288xf32, #tpu.memory_space<smem>>
    %1860 = vector.broadcast %1859 : f32 to vector<16x16xf32>
    %1861 = arith.mulf %1860, %1691 : vector<16x16xf32>
    %1862 = arith.addf %1855, %1861 : vector<16x16xf32>
    %c3_i32_594 = arith.constant 3 : i32
    %1863 = arith.addi %1834, %c3_i32_594 : i32
    %c1_i32_595 = arith.constant 1 : i32
    %1864 = arith.addi %1863, %c1_i32_595 : i32
    %1865 = arith.index_cast %1864 : i32 to index
    %1866 = memref.load %arg2[%1865] : memref<288xf32, #tpu.memory_space<smem>>
    %1867 = vector.broadcast %1866 : f32 to vector<16x16xf32>
    %1868 = arith.mulf %1867, %1692 : vector<16x16xf32>
    %1869 = arith.addf %1862, %1868 : vector<16x16xf32>
    %c3_i32_596 = arith.constant 3 : i32
    %1870 = arith.addi %1834, %c3_i32_596 : i32
    %c2_i32_597 = arith.constant 2 : i32
    %1871 = arith.addi %1870, %c2_i32_597 : i32
    %1872 = arith.index_cast %1871 : i32 to index
    %1873 = memref.load %arg2[%1872] : memref<288xf32, #tpu.memory_space<smem>>
    %1874 = vector.broadcast %1873 : f32 to vector<16x16xf32>
    %1875 = arith.mulf %1874, %1693 : vector<16x16xf32>
    %1876 = arith.addf %1869, %1875 : vector<16x16xf32>
    %c6_i32_598 = arith.constant 6 : i32
    %1877 = arith.addi %1834, %c6_i32_598 : i32
    %c0_i32_599 = arith.constant 0 : i32
    %1878 = arith.addi %1877, %c0_i32_599 : i32
    %1879 = arith.index_cast %1878 : i32 to index
    %1880 = memref.load %arg2[%1879] : memref<288xf32, #tpu.memory_space<smem>>
    %1881 = vector.broadcast %1880 : f32 to vector<16x16xf32>
    %1882 = arith.mulf %1881, %1694 : vector<16x16xf32>
    %1883 = arith.addf %1876, %1882 : vector<16x16xf32>
    %c6_i32_600 = arith.constant 6 : i32
    %1884 = arith.addi %1834, %c6_i32_600 : i32
    %c1_i32_601 = arith.constant 1 : i32
    %1885 = arith.addi %1884, %c1_i32_601 : i32
    %1886 = arith.index_cast %1885 : i32 to index
    %1887 = memref.load %arg2[%1886] : memref<288xf32, #tpu.memory_space<smem>>
    %1888 = vector.broadcast %1887 : f32 to vector<16x16xf32>
    %1889 = arith.mulf %1888, %1695 : vector<16x16xf32>
    %1890 = arith.addf %1883, %1889 : vector<16x16xf32>
    %c6_i32_602 = arith.constant 6 : i32
    %1891 = arith.addi %1834, %c6_i32_602 : i32
    %c2_i32_603 = arith.constant 2 : i32
    %1892 = arith.addi %1891, %c2_i32_603 : i32
    %1893 = arith.index_cast %1892 : i32 to index
    %1894 = memref.load %arg2[%1893] : memref<288xf32, #tpu.memory_space<smem>>
    %1895 = vector.broadcast %1894 : f32 to vector<16x16xf32>
    %1896 = arith.mulf %1895, %1696 : vector<16x16xf32>
    %1897 = arith.addf %1890, %1896 : vector<16x16xf32>
    %c3_i32_604 = arith.constant 3 : i32
    %1898 = arith.addi %0, %c3_i32_604 : i32
    %c4_i32_605 = arith.constant 4 : i32
    %1899 = arith.muli %1898, %c4_i32_605 : i32
    %c3_i32_606 = arith.constant 3 : i32
    %1900 = arith.addi %1899, %c3_i32_606 : i32
    %c9_i32_607 = arith.constant 9 : i32
    %1901 = arith.muli %1900, %c9_i32_607 : i32
    %c0_i32_608 = arith.constant 0 : i32
    %1902 = arith.addi %1901, %c0_i32_608 : i32
    %c0_i32_609 = arith.constant 0 : i32
    %1903 = arith.addi %1902, %c0_i32_609 : i32
    %1904 = arith.index_cast %1903 : i32 to index
    %1905 = memref.load %arg2[%1904] : memref<288xf32, #tpu.memory_space<smem>>
    %1906 = vector.broadcast %1905 : f32 to vector<16x16xf32>
    %1907 = arith.mulf %1906, %1688 : vector<16x16xf32>
    %1908 = arith.addf %1408, %1907 : vector<16x16xf32>
    %c0_i32_610 = arith.constant 0 : i32
    %1909 = arith.addi %1901, %c0_i32_610 : i32
    %c1_i32_611 = arith.constant 1 : i32
    %1910 = arith.addi %1909, %c1_i32_611 : i32
    %1911 = arith.index_cast %1910 : i32 to index
    %1912 = memref.load %arg2[%1911] : memref<288xf32, #tpu.memory_space<smem>>
    %1913 = vector.broadcast %1912 : f32 to vector<16x16xf32>
    %1914 = arith.mulf %1913, %1689 : vector<16x16xf32>
    %1915 = arith.addf %1908, %1914 : vector<16x16xf32>
    %c0_i32_612 = arith.constant 0 : i32
    %1916 = arith.addi %1901, %c0_i32_612 : i32
    %c2_i32_613 = arith.constant 2 : i32
    %1917 = arith.addi %1916, %c2_i32_613 : i32
    %1918 = arith.index_cast %1917 : i32 to index
    %1919 = memref.load %arg2[%1918] : memref<288xf32, #tpu.memory_space<smem>>
    %1920 = vector.broadcast %1919 : f32 to vector<16x16xf32>
    %1921 = arith.mulf %1920, %1690 : vector<16x16xf32>
    %1922 = arith.addf %1915, %1921 : vector<16x16xf32>
    %c3_i32_614 = arith.constant 3 : i32
    %1923 = arith.addi %1901, %c3_i32_614 : i32
    %c0_i32_615 = arith.constant 0 : i32
    %1924 = arith.addi %1923, %c0_i32_615 : i32
    %1925 = arith.index_cast %1924 : i32 to index
    %1926 = memref.load %arg2[%1925] : memref<288xf32, #tpu.memory_space<smem>>
    %1927 = vector.broadcast %1926 : f32 to vector<16x16xf32>
    %1928 = arith.mulf %1927, %1691 : vector<16x16xf32>
    %1929 = arith.addf %1922, %1928 : vector<16x16xf32>
    %c3_i32_616 = arith.constant 3 : i32
    %1930 = arith.addi %1901, %c3_i32_616 : i32
    %c1_i32_617 = arith.constant 1 : i32
    %1931 = arith.addi %1930, %c1_i32_617 : i32
    %1932 = arith.index_cast %1931 : i32 to index
    %1933 = memref.load %arg2[%1932] : memref<288xf32, #tpu.memory_space<smem>>
    %1934 = vector.broadcast %1933 : f32 to vector<16x16xf32>
    %1935 = arith.mulf %1934, %1692 : vector<16x16xf32>
    %1936 = arith.addf %1929, %1935 : vector<16x16xf32>
    %c3_i32_618 = arith.constant 3 : i32
    %1937 = arith.addi %1901, %c3_i32_618 : i32
    %c2_i32_619 = arith.constant 2 : i32
    %1938 = arith.addi %1937, %c2_i32_619 : i32
    %1939 = arith.index_cast %1938 : i32 to index
    %1940 = memref.load %arg2[%1939] : memref<288xf32, #tpu.memory_space<smem>>
    %1941 = vector.broadcast %1940 : f32 to vector<16x16xf32>
    %1942 = arith.mulf %1941, %1693 : vector<16x16xf32>
    %1943 = arith.addf %1936, %1942 : vector<16x16xf32>
    %c6_i32_620 = arith.constant 6 : i32
    %1944 = arith.addi %1901, %c6_i32_620 : i32
    %c0_i32_621 = arith.constant 0 : i32
    %1945 = arith.addi %1944, %c0_i32_621 : i32
    %1946 = arith.index_cast %1945 : i32 to index
    %1947 = memref.load %arg2[%1946] : memref<288xf32, #tpu.memory_space<smem>>
    %1948 = vector.broadcast %1947 : f32 to vector<16x16xf32>
    %1949 = arith.mulf %1948, %1694 : vector<16x16xf32>
    %1950 = arith.addf %1943, %1949 : vector<16x16xf32>
    %c6_i32_622 = arith.constant 6 : i32
    %1951 = arith.addi %1901, %c6_i32_622 : i32
    %c1_i32_623 = arith.constant 1 : i32
    %1952 = arith.addi %1951, %c1_i32_623 : i32
    %1953 = arith.index_cast %1952 : i32 to index
    %1954 = memref.load %arg2[%1953] : memref<288xf32, #tpu.memory_space<smem>>
    %1955 = vector.broadcast %1954 : f32 to vector<16x16xf32>
    %1956 = arith.mulf %1955, %1695 : vector<16x16xf32>
    %1957 = arith.addf %1950, %1956 : vector<16x16xf32>
    %c6_i32_624 = arith.constant 6 : i32
    %1958 = arith.addi %1901, %c6_i32_624 : i32
    %c2_i32_625 = arith.constant 2 : i32
    %1959 = arith.addi %1958, %c2_i32_625 : i32
    %1960 = arith.index_cast %1959 : i32 to index
    %1961 = memref.load %arg2[%1960] : memref<288xf32, #tpu.memory_space<smem>>
    %1962 = vector.broadcast %1961 : f32 to vector<16x16xf32>
    %1963 = arith.mulf %1962, %1696 : vector<16x16xf32>
    %1964 = arith.addf %1957, %1963 : vector<16x16xf32>
    %c4_i32_626 = arith.constant 4 : i32
    %1965 = arith.addi %0, %c4_i32_626 : i32
    %c4_i32_627 = arith.constant 4 : i32
    %1966 = arith.muli %1965, %c4_i32_627 : i32
    %c3_i32_628 = arith.constant 3 : i32
    %1967 = arith.addi %1966, %c3_i32_628 : i32
    %c9_i32_629 = arith.constant 9 : i32
    %1968 = arith.muli %1967, %c9_i32_629 : i32
    %c0_i32_630 = arith.constant 0 : i32
    %1969 = arith.addi %1968, %c0_i32_630 : i32
    %c0_i32_631 = arith.constant 0 : i32
    %1970 = arith.addi %1969, %c0_i32_631 : i32
    %1971 = arith.index_cast %1970 : i32 to index
    %1972 = memref.load %arg2[%1971] : memref<288xf32, #tpu.memory_space<smem>>
    %1973 = vector.broadcast %1972 : f32 to vector<16x16xf32>
    %1974 = arith.mulf %1973, %1688 : vector<16x16xf32>
    %1975 = arith.addf %1475, %1974 : vector<16x16xf32>
    %c0_i32_632 = arith.constant 0 : i32
    %1976 = arith.addi %1968, %c0_i32_632 : i32
    %c1_i32_633 = arith.constant 1 : i32
    %1977 = arith.addi %1976, %c1_i32_633 : i32
    %1978 = arith.index_cast %1977 : i32 to index
    %1979 = memref.load %arg2[%1978] : memref<288xf32, #tpu.memory_space<smem>>
    %1980 = vector.broadcast %1979 : f32 to vector<16x16xf32>
    %1981 = arith.mulf %1980, %1689 : vector<16x16xf32>
    %1982 = arith.addf %1975, %1981 : vector<16x16xf32>
    %c0_i32_634 = arith.constant 0 : i32
    %1983 = arith.addi %1968, %c0_i32_634 : i32
    %c2_i32_635 = arith.constant 2 : i32
    %1984 = arith.addi %1983, %c2_i32_635 : i32
    %1985 = arith.index_cast %1984 : i32 to index
    %1986 = memref.load %arg2[%1985] : memref<288xf32, #tpu.memory_space<smem>>
    %1987 = vector.broadcast %1986 : f32 to vector<16x16xf32>
    %1988 = arith.mulf %1987, %1690 : vector<16x16xf32>
    %1989 = arith.addf %1982, %1988 : vector<16x16xf32>
    %c3_i32_636 = arith.constant 3 : i32
    %1990 = arith.addi %1968, %c3_i32_636 : i32
    %c0_i32_637 = arith.constant 0 : i32
    %1991 = arith.addi %1990, %c0_i32_637 : i32
    %1992 = arith.index_cast %1991 : i32 to index
    %1993 = memref.load %arg2[%1992] : memref<288xf32, #tpu.memory_space<smem>>
    %1994 = vector.broadcast %1993 : f32 to vector<16x16xf32>
    %1995 = arith.mulf %1994, %1691 : vector<16x16xf32>
    %1996 = arith.addf %1989, %1995 : vector<16x16xf32>
    %c3_i32_638 = arith.constant 3 : i32
    %1997 = arith.addi %1968, %c3_i32_638 : i32
    %c1_i32_639 = arith.constant 1 : i32
    %1998 = arith.addi %1997, %c1_i32_639 : i32
    %1999 = arith.index_cast %1998 : i32 to index
    %2000 = memref.load %arg2[%1999] : memref<288xf32, #tpu.memory_space<smem>>
    %2001 = vector.broadcast %2000 : f32 to vector<16x16xf32>
    %2002 = arith.mulf %2001, %1692 : vector<16x16xf32>
    %2003 = arith.addf %1996, %2002 : vector<16x16xf32>
    %c3_i32_640 = arith.constant 3 : i32
    %2004 = arith.addi %1968, %c3_i32_640 : i32
    %c2_i32_641 = arith.constant 2 : i32
    %2005 = arith.addi %2004, %c2_i32_641 : i32
    %2006 = arith.index_cast %2005 : i32 to index
    %2007 = memref.load %arg2[%2006] : memref<288xf32, #tpu.memory_space<smem>>
    %2008 = vector.broadcast %2007 : f32 to vector<16x16xf32>
    %2009 = arith.mulf %2008, %1693 : vector<16x16xf32>
    %2010 = arith.addf %2003, %2009 : vector<16x16xf32>
    %c6_i32_642 = arith.constant 6 : i32
    %2011 = arith.addi %1968, %c6_i32_642 : i32
    %c0_i32_643 = arith.constant 0 : i32
    %2012 = arith.addi %2011, %c0_i32_643 : i32
    %2013 = arith.index_cast %2012 : i32 to index
    %2014 = memref.load %arg2[%2013] : memref<288xf32, #tpu.memory_space<smem>>
    %2015 = vector.broadcast %2014 : f32 to vector<16x16xf32>
    %2016 = arith.mulf %2015, %1694 : vector<16x16xf32>
    %2017 = arith.addf %2010, %2016 : vector<16x16xf32>
    %c6_i32_644 = arith.constant 6 : i32
    %2018 = arith.addi %1968, %c6_i32_644 : i32
    %c1_i32_645 = arith.constant 1 : i32
    %2019 = arith.addi %2018, %c1_i32_645 : i32
    %2020 = arith.index_cast %2019 : i32 to index
    %2021 = memref.load %arg2[%2020] : memref<288xf32, #tpu.memory_space<smem>>
    %2022 = vector.broadcast %2021 : f32 to vector<16x16xf32>
    %2023 = arith.mulf %2022, %1695 : vector<16x16xf32>
    %2024 = arith.addf %2017, %2023 : vector<16x16xf32>
    %c6_i32_646 = arith.constant 6 : i32
    %2025 = arith.addi %1968, %c6_i32_646 : i32
    %c2_i32_647 = arith.constant 2 : i32
    %2026 = arith.addi %2025, %c2_i32_647 : i32
    %2027 = arith.index_cast %2026 : i32 to index
    %2028 = memref.load %arg2[%2027] : memref<288xf32, #tpu.memory_space<smem>>
    %2029 = vector.broadcast %2028 : f32 to vector<16x16xf32>
    %2030 = arith.mulf %2029, %1696 : vector<16x16xf32>
    %2031 = arith.addf %2024, %2030 : vector<16x16xf32>
    %c5_i32_648 = arith.constant 5 : i32
    %2032 = arith.addi %0, %c5_i32_648 : i32
    %c4_i32_649 = arith.constant 4 : i32
    %2033 = arith.muli %2032, %c4_i32_649 : i32
    %c3_i32_650 = arith.constant 3 : i32
    %2034 = arith.addi %2033, %c3_i32_650 : i32
    %c9_i32_651 = arith.constant 9 : i32
    %2035 = arith.muli %2034, %c9_i32_651 : i32
    %c0_i32_652 = arith.constant 0 : i32
    %2036 = arith.addi %2035, %c0_i32_652 : i32
    %c0_i32_653 = arith.constant 0 : i32
    %2037 = arith.addi %2036, %c0_i32_653 : i32
    %2038 = arith.index_cast %2037 : i32 to index
    %2039 = memref.load %arg2[%2038] : memref<288xf32, #tpu.memory_space<smem>>
    %2040 = vector.broadcast %2039 : f32 to vector<16x16xf32>
    %2041 = arith.mulf %2040, %1688 : vector<16x16xf32>
    %2042 = arith.addf %1542, %2041 : vector<16x16xf32>
    %c0_i32_654 = arith.constant 0 : i32
    %2043 = arith.addi %2035, %c0_i32_654 : i32
    %c1_i32_655 = arith.constant 1 : i32
    %2044 = arith.addi %2043, %c1_i32_655 : i32
    %2045 = arith.index_cast %2044 : i32 to index
    %2046 = memref.load %arg2[%2045] : memref<288xf32, #tpu.memory_space<smem>>
    %2047 = vector.broadcast %2046 : f32 to vector<16x16xf32>
    %2048 = arith.mulf %2047, %1689 : vector<16x16xf32>
    %2049 = arith.addf %2042, %2048 : vector<16x16xf32>
    %c0_i32_656 = arith.constant 0 : i32
    %2050 = arith.addi %2035, %c0_i32_656 : i32
    %c2_i32_657 = arith.constant 2 : i32
    %2051 = arith.addi %2050, %c2_i32_657 : i32
    %2052 = arith.index_cast %2051 : i32 to index
    %2053 = memref.load %arg2[%2052] : memref<288xf32, #tpu.memory_space<smem>>
    %2054 = vector.broadcast %2053 : f32 to vector<16x16xf32>
    %2055 = arith.mulf %2054, %1690 : vector<16x16xf32>
    %2056 = arith.addf %2049, %2055 : vector<16x16xf32>
    %c3_i32_658 = arith.constant 3 : i32
    %2057 = arith.addi %2035, %c3_i32_658 : i32
    %c0_i32_659 = arith.constant 0 : i32
    %2058 = arith.addi %2057, %c0_i32_659 : i32
    %2059 = arith.index_cast %2058 : i32 to index
    %2060 = memref.load %arg2[%2059] : memref<288xf32, #tpu.memory_space<smem>>
    %2061 = vector.broadcast %2060 : f32 to vector<16x16xf32>
    %2062 = arith.mulf %2061, %1691 : vector<16x16xf32>
    %2063 = arith.addf %2056, %2062 : vector<16x16xf32>
    %c3_i32_660 = arith.constant 3 : i32
    %2064 = arith.addi %2035, %c3_i32_660 : i32
    %c1_i32_661 = arith.constant 1 : i32
    %2065 = arith.addi %2064, %c1_i32_661 : i32
    %2066 = arith.index_cast %2065 : i32 to index
    %2067 = memref.load %arg2[%2066] : memref<288xf32, #tpu.memory_space<smem>>
    %2068 = vector.broadcast %2067 : f32 to vector<16x16xf32>
    %2069 = arith.mulf %2068, %1692 : vector<16x16xf32>
    %2070 = arith.addf %2063, %2069 : vector<16x16xf32>
    %c3_i32_662 = arith.constant 3 : i32
    %2071 = arith.addi %2035, %c3_i32_662 : i32
    %c2_i32_663 = arith.constant 2 : i32
    %2072 = arith.addi %2071, %c2_i32_663 : i32
    %2073 = arith.index_cast %2072 : i32 to index
    %2074 = memref.load %arg2[%2073] : memref<288xf32, #tpu.memory_space<smem>>
    %2075 = vector.broadcast %2074 : f32 to vector<16x16xf32>
    %2076 = arith.mulf %2075, %1693 : vector<16x16xf32>
    %2077 = arith.addf %2070, %2076 : vector<16x16xf32>
    %c6_i32_664 = arith.constant 6 : i32
    %2078 = arith.addi %2035, %c6_i32_664 : i32
    %c0_i32_665 = arith.constant 0 : i32
    %2079 = arith.addi %2078, %c0_i32_665 : i32
    %2080 = arith.index_cast %2079 : i32 to index
    %2081 = memref.load %arg2[%2080] : memref<288xf32, #tpu.memory_space<smem>>
    %2082 = vector.broadcast %2081 : f32 to vector<16x16xf32>
    %2083 = arith.mulf %2082, %1694 : vector<16x16xf32>
    %2084 = arith.addf %2077, %2083 : vector<16x16xf32>
    %c6_i32_666 = arith.constant 6 : i32
    %2085 = arith.addi %2035, %c6_i32_666 : i32
    %c1_i32_667 = arith.constant 1 : i32
    %2086 = arith.addi %2085, %c1_i32_667 : i32
    %2087 = arith.index_cast %2086 : i32 to index
    %2088 = memref.load %arg2[%2087] : memref<288xf32, #tpu.memory_space<smem>>
    %2089 = vector.broadcast %2088 : f32 to vector<16x16xf32>
    %2090 = arith.mulf %2089, %1695 : vector<16x16xf32>
    %2091 = arith.addf %2084, %2090 : vector<16x16xf32>
    %c6_i32_668 = arith.constant 6 : i32
    %2092 = arith.addi %2035, %c6_i32_668 : i32
    %c2_i32_669 = arith.constant 2 : i32
    %2093 = arith.addi %2092, %c2_i32_669 : i32
    %2094 = arith.index_cast %2093 : i32 to index
    %2095 = memref.load %arg2[%2094] : memref<288xf32, #tpu.memory_space<smem>>
    %2096 = vector.broadcast %2095 : f32 to vector<16x16xf32>
    %2097 = arith.mulf %2096, %1696 : vector<16x16xf32>
    %2098 = arith.addf %2091, %2097 : vector<16x16xf32>
    %c6_i32_670 = arith.constant 6 : i32
    %2099 = arith.addi %0, %c6_i32_670 : i32
    %c4_i32_671 = arith.constant 4 : i32
    %2100 = arith.muli %2099, %c4_i32_671 : i32
    %c3_i32_672 = arith.constant 3 : i32
    %2101 = arith.addi %2100, %c3_i32_672 : i32
    %c9_i32_673 = arith.constant 9 : i32
    %2102 = arith.muli %2101, %c9_i32_673 : i32
    %c0_i32_674 = arith.constant 0 : i32
    %2103 = arith.addi %2102, %c0_i32_674 : i32
    %c0_i32_675 = arith.constant 0 : i32
    %2104 = arith.addi %2103, %c0_i32_675 : i32
    %2105 = arith.index_cast %2104 : i32 to index
    %2106 = memref.load %arg2[%2105] : memref<288xf32, #tpu.memory_space<smem>>
    %2107 = vector.broadcast %2106 : f32 to vector<16x16xf32>
    %2108 = arith.mulf %2107, %1688 : vector<16x16xf32>
    %2109 = arith.addf %1609, %2108 : vector<16x16xf32>
    %c0_i32_676 = arith.constant 0 : i32
    %2110 = arith.addi %2102, %c0_i32_676 : i32
    %c1_i32_677 = arith.constant 1 : i32
    %2111 = arith.addi %2110, %c1_i32_677 : i32
    %2112 = arith.index_cast %2111 : i32 to index
    %2113 = memref.load %arg2[%2112] : memref<288xf32, #tpu.memory_space<smem>>
    %2114 = vector.broadcast %2113 : f32 to vector<16x16xf32>
    %2115 = arith.mulf %2114, %1689 : vector<16x16xf32>
    %2116 = arith.addf %2109, %2115 : vector<16x16xf32>
    %c0_i32_678 = arith.constant 0 : i32
    %2117 = arith.addi %2102, %c0_i32_678 : i32
    %c2_i32_679 = arith.constant 2 : i32
    %2118 = arith.addi %2117, %c2_i32_679 : i32
    %2119 = arith.index_cast %2118 : i32 to index
    %2120 = memref.load %arg2[%2119] : memref<288xf32, #tpu.memory_space<smem>>
    %2121 = vector.broadcast %2120 : f32 to vector<16x16xf32>
    %2122 = arith.mulf %2121, %1690 : vector<16x16xf32>
    %2123 = arith.addf %2116, %2122 : vector<16x16xf32>
    %c3_i32_680 = arith.constant 3 : i32
    %2124 = arith.addi %2102, %c3_i32_680 : i32
    %c0_i32_681 = arith.constant 0 : i32
    %2125 = arith.addi %2124, %c0_i32_681 : i32
    %2126 = arith.index_cast %2125 : i32 to index
    %2127 = memref.load %arg2[%2126] : memref<288xf32, #tpu.memory_space<smem>>
    %2128 = vector.broadcast %2127 : f32 to vector<16x16xf32>
    %2129 = arith.mulf %2128, %1691 : vector<16x16xf32>
    %2130 = arith.addf %2123, %2129 : vector<16x16xf32>
    %c3_i32_682 = arith.constant 3 : i32
    %2131 = arith.addi %2102, %c3_i32_682 : i32
    %c1_i32_683 = arith.constant 1 : i32
    %2132 = arith.addi %2131, %c1_i32_683 : i32
    %2133 = arith.index_cast %2132 : i32 to index
    %2134 = memref.load %arg2[%2133] : memref<288xf32, #tpu.memory_space<smem>>
    %2135 = vector.broadcast %2134 : f32 to vector<16x16xf32>
    %2136 = arith.mulf %2135, %1692 : vector<16x16xf32>
    %2137 = arith.addf %2130, %2136 : vector<16x16xf32>
    %c3_i32_684 = arith.constant 3 : i32
    %2138 = arith.addi %2102, %c3_i32_684 : i32
    %c2_i32_685 = arith.constant 2 : i32
    %2139 = arith.addi %2138, %c2_i32_685 : i32
    %2140 = arith.index_cast %2139 : i32 to index
    %2141 = memref.load %arg2[%2140] : memref<288xf32, #tpu.memory_space<smem>>
    %2142 = vector.broadcast %2141 : f32 to vector<16x16xf32>
    %2143 = arith.mulf %2142, %1693 : vector<16x16xf32>
    %2144 = arith.addf %2137, %2143 : vector<16x16xf32>
    %c6_i32_686 = arith.constant 6 : i32
    %2145 = arith.addi %2102, %c6_i32_686 : i32
    %c0_i32_687 = arith.constant 0 : i32
    %2146 = arith.addi %2145, %c0_i32_687 : i32
    %2147 = arith.index_cast %2146 : i32 to index
    %2148 = memref.load %arg2[%2147] : memref<288xf32, #tpu.memory_space<smem>>
    %2149 = vector.broadcast %2148 : f32 to vector<16x16xf32>
    %2150 = arith.mulf %2149, %1694 : vector<16x16xf32>
    %2151 = arith.addf %2144, %2150 : vector<16x16xf32>
    %c6_i32_688 = arith.constant 6 : i32
    %2152 = arith.addi %2102, %c6_i32_688 : i32
    %c1_i32_689 = arith.constant 1 : i32
    %2153 = arith.addi %2152, %c1_i32_689 : i32
    %2154 = arith.index_cast %2153 : i32 to index
    %2155 = memref.load %arg2[%2154] : memref<288xf32, #tpu.memory_space<smem>>
    %2156 = vector.broadcast %2155 : f32 to vector<16x16xf32>
    %2157 = arith.mulf %2156, %1695 : vector<16x16xf32>
    %2158 = arith.addf %2151, %2157 : vector<16x16xf32>
    %c6_i32_690 = arith.constant 6 : i32
    %2159 = arith.addi %2102, %c6_i32_690 : i32
    %c2_i32_691 = arith.constant 2 : i32
    %2160 = arith.addi %2159, %c2_i32_691 : i32
    %2161 = arith.index_cast %2160 : i32 to index
    %2162 = memref.load %arg2[%2161] : memref<288xf32, #tpu.memory_space<smem>>
    %2163 = vector.broadcast %2162 : f32 to vector<16x16xf32>
    %2164 = arith.mulf %2163, %1696 : vector<16x16xf32>
    %2165 = arith.addf %2158, %2164 : vector<16x16xf32>
    %c7_i32_692 = arith.constant 7 : i32
    %2166 = arith.addi %0, %c7_i32_692 : i32
    %c4_i32_693 = arith.constant 4 : i32
    %2167 = arith.muli %2166, %c4_i32_693 : i32
    %c3_i32_694 = arith.constant 3 : i32
    %2168 = arith.addi %2167, %c3_i32_694 : i32
    %c9_i32_695 = arith.constant 9 : i32
    %2169 = arith.muli %2168, %c9_i32_695 : i32
    %c0_i32_696 = arith.constant 0 : i32
    %2170 = arith.addi %2169, %c0_i32_696 : i32
    %c0_i32_697 = arith.constant 0 : i32
    %2171 = arith.addi %2170, %c0_i32_697 : i32
    %2172 = arith.index_cast %2171 : i32 to index
    %2173 = memref.load %arg2[%2172] : memref<288xf32, #tpu.memory_space<smem>>
    %2174 = vector.broadcast %2173 : f32 to vector<16x16xf32>
    %2175 = arith.mulf %2174, %1688 : vector<16x16xf32>
    %2176 = arith.addf %1676, %2175 : vector<16x16xf32>
    %c0_i32_698 = arith.constant 0 : i32
    %2177 = arith.addi %2169, %c0_i32_698 : i32
    %c1_i32_699 = arith.constant 1 : i32
    %2178 = arith.addi %2177, %c1_i32_699 : i32
    %2179 = arith.index_cast %2178 : i32 to index
    %2180 = memref.load %arg2[%2179] : memref<288xf32, #tpu.memory_space<smem>>
    %2181 = vector.broadcast %2180 : f32 to vector<16x16xf32>
    %2182 = arith.mulf %2181, %1689 : vector<16x16xf32>
    %2183 = arith.addf %2176, %2182 : vector<16x16xf32>
    %c0_i32_700 = arith.constant 0 : i32
    %2184 = arith.addi %2169, %c0_i32_700 : i32
    %c2_i32_701 = arith.constant 2 : i32
    %2185 = arith.addi %2184, %c2_i32_701 : i32
    %2186 = arith.index_cast %2185 : i32 to index
    %2187 = memref.load %arg2[%2186] : memref<288xf32, #tpu.memory_space<smem>>
    %2188 = vector.broadcast %2187 : f32 to vector<16x16xf32>
    %2189 = arith.mulf %2188, %1690 : vector<16x16xf32>
    %2190 = arith.addf %2183, %2189 : vector<16x16xf32>
    %c3_i32_702 = arith.constant 3 : i32
    %2191 = arith.addi %2169, %c3_i32_702 : i32
    %c0_i32_703 = arith.constant 0 : i32
    %2192 = arith.addi %2191, %c0_i32_703 : i32
    %2193 = arith.index_cast %2192 : i32 to index
    %2194 = memref.load %arg2[%2193] : memref<288xf32, #tpu.memory_space<smem>>
    %2195 = vector.broadcast %2194 : f32 to vector<16x16xf32>
    %2196 = arith.mulf %2195, %1691 : vector<16x16xf32>
    %2197 = arith.addf %2190, %2196 : vector<16x16xf32>
    %c3_i32_704 = arith.constant 3 : i32
    %2198 = arith.addi %2169, %c3_i32_704 : i32
    %c1_i32_705 = arith.constant 1 : i32
    %2199 = arith.addi %2198, %c1_i32_705 : i32
    %2200 = arith.index_cast %2199 : i32 to index
    %2201 = memref.load %arg2[%2200] : memref<288xf32, #tpu.memory_space<smem>>
    %2202 = vector.broadcast %2201 : f32 to vector<16x16xf32>
    %2203 = arith.mulf %2202, %1692 : vector<16x16xf32>
    %2204 = arith.addf %2197, %2203 : vector<16x16xf32>
    %c3_i32_706 = arith.constant 3 : i32
    %2205 = arith.addi %2169, %c3_i32_706 : i32
    %c2_i32_707 = arith.constant 2 : i32
    %2206 = arith.addi %2205, %c2_i32_707 : i32
    %2207 = arith.index_cast %2206 : i32 to index
    %2208 = memref.load %arg2[%2207] : memref<288xf32, #tpu.memory_space<smem>>
    %2209 = vector.broadcast %2208 : f32 to vector<16x16xf32>
    %2210 = arith.mulf %2209, %1693 : vector<16x16xf32>
    %2211 = arith.addf %2204, %2210 : vector<16x16xf32>
    %c6_i32_708 = arith.constant 6 : i32
    %2212 = arith.addi %2169, %c6_i32_708 : i32
    %c0_i32_709 = arith.constant 0 : i32
    %2213 = arith.addi %2212, %c0_i32_709 : i32
    %2214 = arith.index_cast %2213 : i32 to index
    %2215 = memref.load %arg2[%2214] : memref<288xf32, #tpu.memory_space<smem>>
    %2216 = vector.broadcast %2215 : f32 to vector<16x16xf32>
    %2217 = arith.mulf %2216, %1694 : vector<16x16xf32>
    %2218 = arith.addf %2211, %2217 : vector<16x16xf32>
    %c6_i32_710 = arith.constant 6 : i32
    %2219 = arith.addi %2169, %c6_i32_710 : i32
    %c1_i32_711 = arith.constant 1 : i32
    %2220 = arith.addi %2219, %c1_i32_711 : i32
    %2221 = arith.index_cast %2220 : i32 to index
    %2222 = memref.load %arg2[%2221] : memref<288xf32, #tpu.memory_space<smem>>
    %2223 = vector.broadcast %2222 : f32 to vector<16x16xf32>
    %2224 = arith.mulf %2223, %1695 : vector<16x16xf32>
    %2225 = arith.addf %2218, %2224 : vector<16x16xf32>
    %c6_i32_712 = arith.constant 6 : i32
    %2226 = arith.addi %2169, %c6_i32_712 : i32
    %c2_i32_713 = arith.constant 2 : i32
    %2227 = arith.addi %2226, %c2_i32_713 : i32
    %2228 = arith.index_cast %2227 : i32 to index
    %2229 = memref.load %arg2[%2228] : memref<288xf32, #tpu.memory_space<smem>>
    %2230 = vector.broadcast %2229 : f32 to vector<16x16xf32>
    %2231 = arith.mulf %2230, %1696 : vector<16x16xf32>
    %2232 = arith.addf %2225, %2231 : vector<16x16xf32>
    %c0_714 = arith.constant 0 : index
    %c0_715 = arith.constant 0 : index
    %c0_716 = arith.constant 0 : index
    %c0_717 = arith.constant 0 : index
    %2233 = vector.load %arg4[%c0_714, %c0_715, %c0_716, %c0_717] : memref<1x8x16x16xf32, #tpu.memory_space<vmem>>, vector<1x1x16x16xf32>
    %2234 = vector.shape_cast %2233 : vector<1x1x16x16xf32> to vector<16x16xf32>
    %2235 = vector.shape_cast %1763 : vector<16x16xf32> to vector<1x1x16x16xf32>
    tpu.vector_store %arg4[%c0_714, %c0_715, %c0_716, %c0_717], %2235 {strides = array<i32>} : memref<1x8x16x16xf32, #tpu.memory_space<vmem>>, vector<1x1x16x16xf32>,
    %c0_718 = arith.constant 0 : index
    %c1_719 = arith.constant 1 : index
    %c0_720 = arith.constant 0 : index
    %c0_721 = arith.constant 0 : index
    %2236 = vector.load %arg4[%c0_718, %c1_719, %c0_720, %c0_721] : memref<1x8x16x16xf32, #tpu.memory_space<vmem>>, vector<1x1x16x16xf32>
    %2237 = vector.shape_cast %2236 : vector<1x1x16x16xf32> to vector<16x16xf32>
    %2238 = vector.shape_cast %1830 : vector<16x16xf32> to vector<1x1x16x16xf32>
    tpu.vector_store %arg4[%c0_718, %c1_719, %c0_720, %c0_721], %2238 {strides = array<i32>} : memref<1x8x16x16xf32, #tpu.memory_space<vmem>>, vector<1x1x16x16xf32>,
    %c0_722 = arith.constant 0 : index
    %c2_723 = arith.constant 2 : index
    %c0_724 = arith.constant 0 : index
    %c0_725 = arith.constant 0 : index
    %2239 = vector.load %arg4[%c0_722, %c2_723, %c0_724, %c0_725] : memref<1x8x16x16xf32, #tpu.memory_space<vmem>>, vector<1x1x16x16xf32>
    %2240 = vector.shape_cast %2239 : vector<1x1x16x16xf32> to vector<16x16xf32>
    %2241 = vector.shape_cast %1897 : vector<16x16xf32> to vector<1x1x16x16xf32>
    tpu.vector_store %arg4[%c0_722, %c2_723, %c0_724, %c0_725], %2241 {strides = array<i32>} : memref<1x8x16x16xf32, #tpu.memory_space<vmem>>, vector<1x1x16x16xf32>,
    %c0_726 = arith.constant 0 : index
    %c3_727 = arith.constant 3 : index
    %c0_728 = arith.constant 0 : index
    %c0_729 = arith.constant 0 : index
    %2242 = vector.load %arg4[%c0_726, %c3_727, %c0_728, %c0_729] : memref<1x8x16x16xf32, #tpu.memory_space<vmem>>, vector<1x1x16x16xf32>
    %2243 = vector.shape_cast %2242 : vector<1x1x16x16xf32> to vector<16x16xf32>
    %2244 = vector.shape_cast %1964 : vector<16x16xf32> to vector<1x1x16x16xf32>
    tpu.vector_store %arg4[%c0_726, %c3_727, %c0_728, %c0_729], %2244 {strides = array<i32>} : memref<1x8x16x16xf32, #tpu.memory_space<vmem>>, vector<1x1x16x16xf32>,
    %c0_730 = arith.constant 0 : index
    %c4 = arith.constant 4 : index
    %c0_731 = arith.constant 0 : index
    %c0_732 = arith.constant 0 : index
    %2245 = vector.load %arg4[%c0_730, %c4, %c0_731, %c0_732] : memref<1x8x16x16xf32, #tpu.memory_space<vmem>>, vector<1x1x16x16xf32>
    %2246 = vector.shape_cast %2245 : vector<1x1x16x16xf32> to vector<16x16xf32>
    %2247 = vector.shape_cast %2031 : vector<16x16xf32> to vector<1x1x16x16xf32>
    tpu.vector_store %arg4[%c0_730, %c4, %c0_731, %c0_732], %2247 {strides = array<i32>} : memref<1x8x16x16xf32, #tpu.memory_space<vmem>>, vector<1x1x16x16xf32>,
    %c0_733 = arith.constant 0 : index
    %c5 = arith.constant 5 : index
    %c0_734 = arith.constant 0 : index
    %c0_735 = arith.constant 0 : index
    %2248 = vector.load %arg4[%c0_733, %c5, %c0_734, %c0_735] : memref<1x8x16x16xf32, #tpu.memory_space<vmem>>, vector<1x1x16x16xf32>
    %2249 = vector.shape_cast %2248 : vector<1x1x16x16xf32> to vector<16x16xf32>
    %2250 = vector.shape_cast %2098 : vector<16x16xf32> to vector<1x1x16x16xf32>
    tpu.vector_store %arg4[%c0_733, %c5, %c0_734, %c0_735], %2250 {strides = array<i32>} : memref<1x8x16x16xf32, #tpu.memory_space<vmem>>, vector<1x1x16x16xf32>,
    %c0_736 = arith.constant 0 : index
    %c6 = arith.constant 6 : index
    %c0_737 = arith.constant 0 : index
    %c0_738 = arith.constant 0 : index
    %2251 = vector.load %arg4[%c0_736, %c6, %c0_737, %c0_738] : memref<1x8x16x16xf32, #tpu.memory_space<vmem>>, vector<1x1x16x16xf32>
    %2252 = vector.shape_cast %2251 : vector<1x1x16x16xf32> to vector<16x16xf32>
    %2253 = vector.shape_cast %2165 : vector<16x16xf32> to vector<1x1x16x16xf32>
    tpu.vector_store %arg4[%c0_736, %c6, %c0_737, %c0_738], %2253 {strides = array<i32>} : memref<1x8x16x16xf32, #tpu.memory_space<vmem>>, vector<1x1x16x16xf32>,
    %c0_739 = arith.constant 0 : index
    %c7 = arith.constant 7 : index
    %c0_740 = arith.constant 0 : index
    %c0_741 = arith.constant 0 : index
    %2254 = vector.load %arg4[%c0_739, %c7, %c0_740, %c0_741] : memref<1x8x16x16xf32, #tpu.memory_space<vmem>>, vector<1x1x16x16xf32>
    %2255 = vector.shape_cast %2254 : vector<1x1x16x16xf32> to vector<16x16xf32>
    %2256 = vector.shape_cast %2232 : vector<16x16xf32> to vector<1x1x16x16xf32>
    tpu.vector_store %arg4[%c0_739, %c7, %c0_740, %c0_741], %2256 {strides = array<i32>} : memref<1x8x16x16xf32, #tpu.memory_space<vmem>>, vector<1x1x16x16xf32>,
    return
  }
  func.func @transform_0(%arg0: i32, %arg1: i32, %arg2: memref<288xf32, #tpu.memory_space<smem>>) -> (i32, i32, i32, i32) {
    %c0_i32 = arith.constant 0 : i32
    %c0_i32_0 = arith.constant 0 : i32
    %c0_i32_1 = arith.constant 0 : i32
    %c0_i32_2 = arith.constant 0 : i32
    return %arg0, %c0_i32, %c0_i32_0, %c0_i32_1 : i32, i32, i32, i32
  }
  func.func @transform_1(%arg0: i32, %arg1: i32, %arg2: memref<288xf32, #tpu.memory_space<smem>>) -> (i32, i32, i32, i32) {
    %c0_i32 = arith.constant 0 : i32
    %c0_i32_0 = arith.constant 0 : i32
    %c0_i32_1 = arith.constant 0 : i32
    return %arg0, %arg1, %c0_i32, %c0_i32_0 : i32, i32, i32, i32
  }
}

</mosaic_0001>

<bundles_post_ra>
// kernel: tpu_custom_call.1
= control target key start
LH: loop header
LB: loop body
LE: loop exit
PB: predicated region body
PF: predicated region fallthrough
CT: control target
= control target key end

     0   :  { %s10192_s0 = inlined_call_operand.hbm [shape: f32[288], index: 0, kind: input, shape index: {}]   ;;  %s10193_s1 = inlined_call_operand.hbm [shape: f32[2,4,16,16], index: 1, kind: input, shape index: {}]   ;;  %s10194_s2 = inlined_call_operand.hbm [shape: f32[2,8,16,16], index: 2, kind: output, shape index: {}]  }
   0x1   :  { %10216 = sst [smem:[#allocation286_spill]] %s10193_s1  ;;  %s6075_s11 = scalar_lea.hbm %s10192_s0, 48 }
   0x2   :  { %p6076_p0 = scmp.ne.s32.totalorder %s10192_s0, %s6075_s11  ;;  %s6077_s16 = scalar_lea.hbm %s10192_s0, 64 }
   0x3   :  { %p6078_p1 = scmp.lt.u32.totalorder %s6077_s16, %s6075_s11  ;;  %p6079_p2 = scmp.lt.u32.totalorder %s6075_s11, %s10192_s0 }
   0x5   :  { %p6080_p3 = por %p6079_p2, %p6078_p1 }
   0x7   :  { %p6081_p4 = pnand %p6080_p3, %p6076_p0 }
   0x9   :  { %6084 = shalt.err (!%p6081_p4)  }
   0xa   :  { %s6201_s19 = smov [#allocation3]  }
   0xb   :  { %8 = dma.hbm_to_smem %s10192_s0, 48, %s6201_s19, [#allocation2] }
   0xc   :  { %6167 = dma.done.wait [#allocation2], 48 }
   0xd   :  { %6168 = vsyncadd [#allocation2], 4294967248 }
   0xe   :  { %10 = sfence }
   0xf   :  { %11 = vsyncpa [#allocation5], 0 }
  0x10   :  { %13 = vsyncpa [#allocation5 + $0x1], 0 }
  0x11   :  { %14 = vsyncpa [#allocation6], 0 }
  0x12   :  { %16 = vsyncpa [#allocation6 + $0x1], 0  ;;  %s6242_s22 = smov 0   ;;  %s6244_s23 = smov 0  }
  0x13   :  { %s6246_s24 = smov 0   ;;  %s6248_s25 = smov 0  }
  0x14   :  { %s6250_s26 = smov 0   ;;  %s6252_s27 = smov 0  }
  0x15 LB: > { %10217 = sst [smem:[#allocation11_spill]] %s6183_s23  ;;  %s5680_s0 = sadd.s32 4294967295, %s6199_s27   ;;  %s6199_s27 = sphi %s6252_s27, %s22_s27   ;;  %s6195_s26 = sphi %s6250_s26, %s10842_s26   ;;  %s6191_s25 = sphi %s6248_s25, %s10841_s25   ;;  %s6187_s24 = sphi %s6246_s24, %s10840_s24   ;;  %s6183_s23 = sphi %s6244_s23, %s10839_s23   ;;  %s6179_s22 = sphi %s6242_s22, %s10838_s22  }
  0x16   : > { %10218 = sst [smem:[#allocation12_spill]] %s6187_s24  ;;  %s5681_s28 = sadd.s32 4294967294, %s6199_s27  }
  0x17   : > { %10219 = sst [smem:[#allocation13_spill]] %s6195_s26  ;;  %s34_s29 = sadd.s32 1, %s6195_s26 }
  0x18   : > { %s41_s30 = sadd.s32 1, %s6187_s24  ;;  %p36_p5 = scmp.ge.s32.totalorder %s34_s29, 2 }
  0x19   : > { %p48_p6 = scmp.ne.s32.totalorder %s6187_s24, %s6183_s23  ;;  %p49_p7 = scmp.eq.s32.totalorder %s6199_s27, 0 }
  0x1a   : > { %p54_p8 = scmp.ne.s32.totalorder %s6183_s23, %s6179_s22  ;;  %s10844_s29 = smov (%p36_p5, %s34_s29), 0 }
  0x1b   : > { %10220 = sst [smem:[#allocation14_spill]] %s10844_s29  ;;  %p6283_p9 = por %p49_p7, %p48_p6 }
  0x1c   : > { %p55_p10 = scmp.eq.s32.totalorder %s5680_s0, 0  ;;  %s38_s4 = ssub.s32 %s6195_s26, %s10844_s29 }
  0x1d   : > { %p80_p11 = scmp.eq.s32.totalorder %s5680_s0, 1  ;;  %p39_p12 = scmp.eq.s32.totalorder %s38_s4, 0 }
  0x1e   : > { %p6289_p13 = por %p55_p10, %p54_p8  ;;  %p86_p1 = scmp.eq.s32.totalorder %s5681_s28, 1 }
  0x1f   : > { %p6293_p0 = por %p80_p11, %p48_p6  ;;  %p6016_p4 = scmp.lt.s32.totalorder %s6199_s27, 2 }
  0x20   : > { %s6298_s7 = scalar_select %p39_p12, %s6187_s24, %s41_s30  }
  0x21   : > { %s10223_s6 = scalar_select %p6293_p0, 1, 0 }
  0x22   : > { %10224 = sst [smem:[#allocation15_spill]] %s6298_s7  ;;  %p6300_p2 = por %p86_p1, %p54_p8 }
  0x23   : > { %s106_s9 = sand.u32 1, %s6187_s24   ;;  %s6002_s11 = sshll.u32 %s6195_s26, 10 }
  0x24   : > { %s10225_s8 = scalar_select %p6300_p2, 1, 0 }
  0x25   : > { %s5684_s10 = sshll.u32 %s106_s9, 6  ;;  %s10226_s1 = sld [smem:[#allocation286_spill]] }
  0x26   : > { %s110_s15 = scalar_lea.vmem [#allocation4], %s5684_s10  ;;  %p6317_p5 = pnand %p6016_p4, %p6283_p9 }
  0x27   : > { %s117_s16 = sshll.u32 %s110_s15, 4  ;;  %s6322_s18 = scalar_lea.sflag [#allocation5], %s106_s9  ;;  %s6313_s16 = int_to_ptr.vmem [resolvable:$true] %s117_s16 }
  0x28   : > { %p6087_p8 = pneg %p6317_p5 }
  0x2b   : > { %s6311_s14 = scalar_lea.hbm %s10226_s1, %s6002_s11  ;;  %s6090_s0 = scalar_lea.hbm %s10226_s1, 2048 }
  0x2c   : > { %s6085_s19 = scalar_lea.hbm %s6311_s14, 1024  ;;  %p6091_p9 = scmp.lt.u32.totalorder %s6311_s14, %s10226_s1 }
  0x2d   : > { %p6086_p7 = scmp.ne.s32.totalorder %s6311_s14, %s6085_s19  ;;  %p6092_p12 = scmp.lt.u32.totalorder %s6090_s0, %s6085_s19 }
  0x2e   : > { %p6094_p4 = scmp.lt.u32.totalorder %s6085_s19, %s6311_s14 }
  0x2f   : > { %p6088_p10 = pnand %p6087_p8, %p6086_p7  ;;  %p6093_p1 = por %p6092_p12, %p6091_p9 }
  0x31   : > { %p6089_p11 = pneg %p6088_p10  ;;  %p6095_p3 = por %p6094_p4, %p6093_p1 }
  0x33   : > { %p6096_p6 = pnand %p6095_p3, %p6089_p11 }
  0x35   : > { %6099 = shalt.err (!%p6096_p6)
}
  0x36   : > { %s6100_s3 = scalar_lea.vmem %s6313_s16, 1024  ;;  %s6202_s4 = smov [#allocation4]  }
  0x37   : > { %p6101_p7 = scmp.ne.s32.totalorder %s6313_s16, %s6100_s3  ;;  %s6105_s9 = sshll.u32 %s6202_s4, 4  ;;  %s6106_s9 = int_to_ptr.vmem [resolvable:$false] %s6105_s9 }
  0x38   : > { %s6107_s10 = scalar_lea.vmem %s6106_s9, 2048  ;;  %p6108_p0 = scmp.lt.s32.totalorder %s6313_s16, %s6106_s9 }
  0x39   : > { %p6103_p10 = pnand %p6101_p7, %p6087_p8  ;;  %p6109_p9 = scmp.lt.s32.totalorder %s6107_s10, %s6100_s3 }
  0x3b   : > { %p6104_p2 = pneg %p6103_p10  ;;  %p6110_p12 = por %p6109_p9, %p6108_p0 }
  0x3d   : > { %p6111_p1 = pnand %p6110_p12, %p6104_p2 }
  0x3f   : > { %6114 = shalt.err (!%p6111_p1)
}
  0x40   : > { %s6203_s11 = smov 128   ;;  %s6204_s12 = smov 8  }
  0x41   : > { %6011 = dma.hbm_to_vmem [thread:$0]  (!%p6317_p5), %s6311_s14, 1024, %s6313_s16, %s6322_s18, %s6203_s11, %s6203_s11, %s6204_s12  }
  0x42   : > { %p125_p3 = scmp.lt.s32.totalorder %s6199_s27, 3  ;;  %p10228_p6 = scmp.ge.s32.totalorder %s6199_s27, 1 }
  0x44   : > { %p126_p8 = pnand %p10228_p6, %p125_p3 }
  0x46   : > { %129 = sbr.rel (%p126_p8) target bundleno = 1501 (0x5dd), region = 24 }
  0x4d   : > { %s6354_s13 = sand.u32 1, %s6183_s23  }
  0x4e   : > { %s5688_s15 = sshll.u32 %s6354_s13, 6  ;;  %s132_s19 = scalar_lea.sflag [#allocation5], %s6354_s13 }
  0x4f   : > { %s6358_s20 = scalar_lea.vmem [#allocation4], %s5688_s15 }
  0x50   : > { %6170 = dma.done.wait (%p6289_p13), %s132_s19, 1024  }
  0x51   : > { %6172 = vsyncadd (%p6289_p13), %s132_s19, 4294966272  ;;  %v157_v0 = vld [vmem:[%s6358_s20 + $0x8] sm:$0xff]  ;;  %vm162_vm0 = vcmask 1040384   ;;  %v156_v1 = vld [vmem:[%s6358_s20] sm:$0xff]  ;;  %s10204_s14 = smov 127   ;;  %s6206_s5 = smov 1  }
  0x52   : > { %v164_v2 = vrot.slane %v157_v0, 7  ;;  %v168_v3 = vrot.slane %v157_v0, 5  ;;  %v159_v4 = vrot.slane %v156_v1, 1  ;;  %v163_v5 = vrot.slane %v156_v1, 7  ;;  %s6207_s16 = smov 3   ;;  %s5690_s17 = sld [smem:[#allocation3 + $0x1]] }
  0x53   : > { %s5691_s18 = sld [smem:[#allocation3 + $0x2]]  ;;  %vm201_vm1 = vcmask 7168   ;;  %vm205_vm2 = vcmask 138240   ;;  %s5699_s21 = sld [smem:[#allocation3 + $0x25]]  ;;  %vm255_vm3 = vcmask 1046528   ;;  %vm318_vm4 = vcmask 1045504  }
  0x54   : > { %v171_v6 = vsel %vm162_vm0, %v164_v2, %v168_v3  ;;  %v170_v7 = vsel %vm162_vm0, %v159_v4, %v163_v5  ;;  %v165_v8 = vsel %vm162_vm0, %v163_v5, %v164_v2  ;;  %s5700_s0 = sld [smem:[#allocation3 + $0x26]]  ;;  %s5708_s28 = sld [smem:[#allocation3 + $0x49]]  ;;  %vm5555_vm5 = vcmask 130048  }
  0x55   : > { %178 = vrot.lane.b32.xlu1 %v171_v6, %s10204_s14  ;;  %174 = vrot.lane.b32.xlu0 %v170_v7, %s10204_s14  ;;  %s10202_s30 = smov 126   ;;  %s5709_s3 = sld [smem:[#allocation3 + $0x4a]] }
  0x56   : > { %s5717_s4 = sld [smem:[#allocation3 + $0x6d]]  ;;  %s5718_s9 = sld [smem:[#allocation3 + $0x6e]] }
  0x57   : > { %s5726_s10 = sld [smem:[#allocation3 + $0x91]]  ;;  %s5693_s11 = sld [smem:[#allocation3 + $0x4]] }
  0x58   : > { %v218_v15 = vstv %s5690_s17  ;;  %s5727_s12 = sld [smem:[#allocation3 + $0x92]]  ;;  %s5694_s15 = sld [smem:[#allocation3 + $0x5]] }
  0x59   : > { %183 = vrot.lane.b32.xlu1 %v170_v7, %s6206_s5  ;;  %176 = vrot.lane.b32.xlu0 %v165_v8, %s10204_s14  ;;  %v233_v24 = vstv %s5691_s18  ;;  %v382_v27 = vstv %s5699_s21  ;;  %s5696_s19 = sld [smem:[#allocation3 + $0x7]]  ;;  %s5697_s17 = sld [smem:[#allocation3 + $0x8]] }
  0x5a   : > { %v397_v30 = vstv %s5700_s0  ;;  %v544_v33 = vstv %s5708_s28  ;;  %s5702_s18 = sld [smem:[#allocation3 + $0x28]]  ;;  %s5703_s21 = sld [smem:[#allocation3 + $0x29]] }
  0x5b   : > { %v559_v36 = vstv %s5709_s3  ;;  %s5705_s0 = sld [smem:[#allocation3 + $0x2b]]  ;;  %s5706_s28 = sld [smem:[#allocation3 + $0x2c]] }
  0x5c   : > { %v706_v39 = vstv %s5717_s4  ;;  %v721_v42 = vstv %s5718_s9  ;;  %s5711_s3 = sld [smem:[#allocation3 + $0x4c]]  ;;  %s5712_s4 = sld [smem:[#allocation3 + $0x4d]] }
  0x5d   : > { %187 = vrot.lane.b32.xlu1 %v171_v6, %s6206_s5  ;;  %185 = vrot.lane.b32.xlu0 %v165_v8, %s6206_s5  ;;  %v868_v47 = vstv %s5726_s10  ;;  %v267_v49 = vstv %s5693_s11  ;;  %s5714_s9 = sld [smem:[#allocation3 + $0x4f]]  ;;  %s5715_s10 = sld [smem:[#allocation3 + $0x50]] }
  0x5e   : > { %v883_v52 = vstv %s5727_s12  ;;  %v289_v56 = vstv %s5694_s15  ;;  %s5720_s11 = sld [smem:[#allocation3 + $0x70]]  ;;  %s5721_s12 = sld [smem:[#allocation3 + $0x71]] }
  0x5f   : > { %v330_v57 = vstv %s5696_s19  ;;  %v352_v2 = vstv %s5697_s17  ;;  %s5723_s15 = sld [smem:[#allocation3 + $0x73]]  ;;  %s5724_s19 = sld [smem:[#allocation3 + $0x74]] }
  0x60   : > { %s5729_s17 = sld [smem:[#allocation3 + $0x94]]  ;;  %s7848_s1 = sld [smem:[#allocation3 + $0xd8]] }
  0x61   : > { %194 = vrot.lane.b32.xlu1 %v165_v8, %s6207_s16  ;;  %192 = vrot.lane.b32.xlu0 %v170_v7, %s6207_s16  ;;  %s7850_s29 = sld [smem:[#allocation3 + $0xdb]]  ;;  %s7856_s26 = sld [smem:[#allocation3 + $0xde]] }
  0x62   : > { %s7858_s7 = sld [smem:[#allocation3 + $0xfc]]  ;;  %s7860_s24 = sld [smem:[#allocation3 + $0xff]] }
  0x63   : > { %s7862_s23 = sld [smem:[#allocation3 + $0x102]]  ;;  %p10835_p0 = scmp.ne.s32.totalorder %s10223_s6, 0 }
  0x65   : > { %196 = vrot.lane.b32.xlu0 %v171_v6, %s6207_s16 }
  0xc7   : > { %v6378_v9 = vpop.permute.xlu1 %178  ;;  %v175_v10 = vpop.permute.xlu0 %174 }
  0xcb   : > { %v184_v11 = vpop.permute.xlu1 %183  ;;  %v177_v12 = vpop.permute.xlu0 %176 }
  0xcc   : > { %v202_v16 = vsel %vm201_vm1, %v175_v10, %v184_v11  ;;  %v430_v11 = vstv %s5702_s18  ;;  %s5730_s18 = sld [smem:[#allocation3 + $0x95]] }
  0xcf   : > { %v188_v13 = vpop.permute.xlu1 %187  ;;  %v186_v14 = vpop.permute.xlu0 %185 }
  0xd0   : > { %v203_v17 = vsel %vm201_vm1, %v177_v12, %v186_v14  ;;  %v204_v46 = vsel %vm201_vm1, %v6378_v9, %v188_v13 }
  0xd3   : > { %v195_v18 = vpop.permute.xlu1 %194  ;;  %v193_v19 = vpop.permute.xlu0 %192 }
  0xd4   : > { %v6383_v20 = vsel %vm205_vm2, %v203_v17, %v195_v18  ;;  %v6386_v21 = vsel %vm205_vm2, %v202_v16, %v193_v19 }
  0xd5   : > { %v220_v22 = vmul.f32 %v218_v15, %v6383_v20  ;;  %v219_v23 = vmul.f32 %v218_v15, %v6386_v21  ;;  %v235_v25 = vmul.f32 %v233_v24, %v6383_v20  ;;  %v234_v26 = vmul.f32 %v233_v24, %v6386_v21 }
  0xd6   : > { %v384_v28 = vmul.f32 %v382_v27, %v6383_v20  ;;  %v383_v29 = vmul.f32 %v382_v27, %v6386_v21  ;;  %v399_v31 = vmul.f32 %v397_v30, %v6383_v20  ;;  %v398_v32 = vmul.f32 %v397_v30, %v6386_v21 }
  0xd7   : > { %225 = vrot.lane.b32.xlu0 %v220_v22, %s10204_s14  ;;  %223 = vrot.lane.b32.xlu1 %v219_v23, %s10204_s14  ;;  %v546_v34 = vmul.f32 %v544_v33, %v6383_v20  ;;  %v545_v35 = vmul.f32 %v544_v33, %v6386_v21  ;;  %v561_v37 = vmul.f32 %v559_v36, %v6383_v20  ;;  %v197_v43 = vpop.permute.xlu0 %196  ;;  %v452_v22 = vstv %s5703_s21  ;;  %s5732_s21 = sld [smem:[#allocation3 + $0x97]] }
  0xd8   : > { %v560_v38 = vmul.f32 %v559_v36, %v6386_v21  ;;  %v708_v40 = vmul.f32 %v706_v39, %v6383_v20  ;;  %v707_v41 = vmul.f32 %v706_v39, %v6386_v21  ;;  %v723_v44 = vmul.f32 %v721_v42, %v6383_v20 }
  0xd9   : > { %v722_v45 = vmul.f32 %v721_v42, %v6386_v21  ;;  %v6421_v48 = vsel %vm205_vm2, %v204_v46, %v197_v43  ;;  %v870_v50 = vmul.f32 %v868_v47, %v6383_v20  ;;  %v869_v51 = vmul.f32 %v868_v47, %v6386_v21 }
  0xda   : > { %v268_v53 = vmul.f32 %v267_v49, %v6386_v21  ;;  %v269_v54 = vmul.f32 %v267_v49, %v6383_v20  ;;  %v270_v55 = vmul.f32 %v267_v49, %v6421_v48  ;;  %v885_v58 = vmul.f32 %v883_v52, %v6383_v20 }
  0xdb   : > { %240 = vrot.lane.b32.xlu0 %v235_v25, %s10202_s30  ;;  %238 = vrot.lane.b32.xlu1 %v234_v26, %s10202_s30  ;;  %v884_v59 = vmul.f32 %v883_v52, %v6386_v21  ;;  %v290_v60 = vmul.f32 %v289_v56, %v6386_v21  ;;  %v291_v61 = vmul.f32 %v289_v56, %v6383_v20 }
  0xdc   : > { %v274_v62 = vrot.slane %v268_v53, 1  ;;  %v275_v63 = vrot.slane %v269_v54, 1  ;;  %v277_v0 = vrot.slane %v270_v55, 1  ;;  %v292_v1 = vmul.f32 %v289_v56, %v6421_v48 }
  0xdd   : > { %v296_v3 = vrot.slane %v290_v60, 1  ;;  %v297_v4 = vrot.slane %v291_v61, 1  ;;  %v331_v5 = vmul.f32 %v330_v57, %v6386_v21  ;;  %v332_v6 = vmul.f32 %v330_v57, %v6383_v20 }
  0xde   : > { %v276_v7 = vsel %vm255_vm3, %v274_v62, %v275_v63  ;;  %v278_v8 = vsel %vm255_vm3, %v275_v63, %v277_v0  ;;  %v299_v9 = vrot.slane %v292_v1, 1  ;;  %v333_v10 = vmul.f32 %v330_v57, %v6421_v48 }
  0xdf   : > { %389 = vrot.lane.b32.xlu0 %v384_v28, %s10204_s14  ;;  %387 = vrot.lane.b32.xlu1 %v383_v29, %s10204_s14  ;;  %v298_v12 = vsel %vm255_vm3, %v296_v3, %v297_v4  ;;  %v337_v13 = vrot.slane %v331_v5, 2  ;;  %v338_v14 = vrot.slane %v332_v6, 2  ;;  %v353_v15 = vmul.f32 %v352_v2, %v6386_v21 }
  0xe0   : > { %v300_v16 = vsel %vm255_vm3, %v297_v4, %v299_v9  ;;  %v340_v17 = vrot.slane %v333_v10, 2  ;;  %v354_v18 = vmul.f32 %v352_v2, %v6383_v20  ;;  %v355_v19 = vmul.f32 %v352_v2, %v6421_v48 }
  0xe1   : > { %v339_v23 = vsel %vm318_vm4, %v337_v13, %v338_v14  ;;  %v359_v24 = vrot.slane %v353_v15, 2  ;;  %v431_v25 = vmul.f32 %v430_v11, %v6386_v21  ;;  %v432_v26 = vmul.f32 %v430_v11, %v6383_v20 }
  0xe2   : > { %v341_v27 = vsel %vm318_vm4, %v338_v14, %v340_v17  ;;  %v360_v28 = vrot.slane %v354_v18, 2  ;;  %v362_v29 = vrot.slane %v355_v19, 2  ;;  %v433_v30 = vmul.f32 %v430_v11, %v6421_v48 }
  0xe3   : > { %404 = vrot.lane.b32.xlu0 %v399_v31, %s10202_s30  ;;  %402 = vrot.lane.b32.xlu1 %v398_v32, %s10202_s30  ;;  %v492_v31 = vstv %s5705_s0  ;;  %v437_v32 = vrot.slane %v431_v25, 1  ;;  %v438_v33 = vrot.slane %v432_v26, 1  ;;  %v455_v39 = vmul.f32 %v452_v22, %v6421_v48  ;;  %s5733_s0 = sld [smem:[#allocation3 + $0x98]] }
  0xe4   : > { %v361_v36 = vsel %vm318_vm4, %v359_v24, %v360_v28  ;;  %v494_v47 = vmul.f32 %v492_v31, %v6383_v20  ;;  %v495_v49 = vmul.f32 %v492_v31, %v6421_v48  ;;  %v654_v4 = vstv %s5714_s9  ;;  %s5739_s9 = sld [smem:[#allocation3 + $0xb9]] }
  0xe5   : > { %v462_v46 = vrot.slane %v455_v39, 1  ;;  %v676_v13 = vstv %s5715_s10  ;;  %v656_v17 = vmul.f32 %v654_v4, %v6383_v20  ;;  %v754_v24 = vstv %s5720_s11  ;;  %s5741_s10 = sld [smem:[#allocation3 + $0xbb]]  ;;  %s5742_s11 = sld [smem:[#allocation3 + $0xbc]] }
  0xe6   : > { %v500_v56 = vrot.slane %v494_v47, 2  ;;  %v502_v57 = vrot.slane %v495_v49, 2 }
  0xe7   : > { %551 = vrot.lane.b32.xlu0 %v546_v34, %s10204_s14  ;;  %549 = vrot.lane.b32.xlu1 %v545_v35, %s10204_s14  ;;  %v453_v34 = vmul.f32 %v452_v22, %v6386_v21  ;;  %v454_v35 = vmul.f32 %v452_v22, %v6383_v20  ;;  %v662_v26 = vrot.slane %v656_v17, 2 }
  0xe8   : > { %v503_v1 = vsel %vm318_vm4, %v500_v56, %v502_v57 }
  0xe9   : > { %v459_v42 = vrot.slane %v453_v34, 1  ;;  %v460_v43 = vrot.slane %v454_v35, 1 }
  0xeb   : > { %566 = vrot.lane.b32.xlu0 %v561_v37, %s10202_s30  ;;  %564 = vrot.lane.b32.xlu1 %v560_v38, %s10202_s30  ;;  %v363_v37 = vsel %vm318_vm4, %v360_v28, %v362_v29  ;;  %v440_v38 = vrot.slane %v433_v30, 1  ;;  %v463_v55 = vsel %vm255_vm3, %v460_v43, %v462_v46  ;;  %v678_v28 = vmul.f32 %v676_v13, %v6383_v20 }
  0xef   : > { %713 = vrot.lane.b32.xlu0 %v708_v40, %s10204_s14  ;;  %711 = vrot.lane.b32.xlu1 %v707_v41, %s10204_s14  ;;  %v514_v40 = vstv %s5706_s28  ;;  %v439_v41 = vsel %vm255_vm3, %v437_v32, %v438_v33  ;;  %v679_v32 = vmul.f32 %v676_v13, %v6421_v48  ;;  %s5735_s28 = sld [smem:[#allocation3 + $0xb5]] }
  0xf0   : > { %v515_v53 = vmul.f32 %v514_v40, %v6386_v21  ;;  %v516_v54 = vmul.f32 %v514_v40, %v6383_v20 }
  0xf1   : > { %v686_v39 = vrot.slane %v679_v32, 2 }
  0xf2   : > { %v521_v60 = vrot.slane %v515_v53, 2  ;;  %v522_v61 = vrot.slane %v516_v54, 2 }
  0xf3   : > { %728 = vrot.lane.b32.xlu0 %v723_v44, %s10202_s30  ;;  %726 = vrot.lane.b32.xlu1 %v722_v45, %s10202_s30  ;;  %v493_v44 = vmul.f32 %v492_v31, %v6386_v21  ;;  %v441_v45 = vsel %vm255_vm3, %v438_v33, %v440_v38  ;;  %v776_v33 = vstv %s5721_s12  ;;  %s5744_s12 = sld [smem:[#allocation3 + $0xd9]] }
  0xf4   : > { %v523_v5 = vsel %vm318_vm4, %v521_v60, %v522_v61  ;;  %v778_v46 = vmul.f32 %v776_v33, %v6383_v20 }
  0xf5   : > { %v499_v52 = vrot.slane %v493_v44, 2 }
  0xf6   : > { %v784_v54 = vrot.slane %v778_v46, 1 }
  0xf7   : > { %875 = vrot.lane.b32.xlu0 %v870_v50, %s10204_s14  ;;  %873 = vrot.lane.b32.xlu1 %v869_v51, %s10204_s14  ;;  %v592_v50 = vstv %s5711_s3  ;;  %v461_v51 = vsel %vm255_vm3, %v459_v42, %v460_v43  ;;  %v501_v0 = vsel %vm318_vm4, %v499_v52, %v500_v56  ;;  %v816_v42 = vstv %s5723_s15  ;;  %s5738_s3 = sld [smem:[#allocation3 + $0xb8]]  ;;  %s5747_s15 = sld [smem:[#allocation3 + $0xdc]] }
  0xf8   : > { %v593_v62 = vmul.f32 %v592_v50, %v6386_v21  ;;  %v594_v63 = vmul.f32 %v592_v50, %v6383_v20  ;;  %v595_v3 = vmul.f32 %v592_v50, %v6421_v48  ;;  %v838_v52 = vstv %s5724_s19  ;;  %s5748_s19 = sld [smem:[#allocation3 + $0xdd]] }
  0xf9   : > { %v818_v56 = vmul.f32 %v816_v42, %v6383_v20  ;;  %v819_v60 = vmul.f32 %v816_v42, %v6421_v48 }
  0xfa   : > { %v599_v6 = vrot.slane %v593_v62, 1  ;;  %v602_v10 = vrot.slane %v595_v3, 1 }
  0xfb   : > { %890 = vrot.lane.b32.xlu0 %v885_v58, %s10202_s30  ;;  %888 = vrot.lane.b32.xlu1 %v884_v59, %s10202_s30  ;;  %v517_v58 = vmul.f32 %v514_v40, %v6421_v48  ;;  %v614_v59 = vstv %s5712_s4  ;;  %v756_v40 = vmul.f32 %v754_v24, %v6383_v20  ;;  %v826_v3 = vrot.slane %v819_v60, 2  ;;  %s6566_s4 = sld [smem:[#allocation3 + $0xb6]] }
  0xfc   : > { %v616_v11 = vmul.f32 %v614_v59, %v6383_v20 }
  0xfd   : > { %v524_v2 = vrot.slane %v517_v58, 2  ;;  %v762_v49 = vrot.slane %v756_v40, 1 }
  0xfe   : > { %v622_v19 = vrot.slane %v616_v11, 1 }
  0xff   : > { %279 = vrot.lane.b32.xlu1 %v276_v7, %s10204_s14  ;;  %281 = vrot.lane.b32.xlu0 %v278_v8, %s10204_s14  ;;  %v600_v7 = vrot.slane %v594_v63, 1  ;;  %v615_v8 = vmul.f32 %v614_v59, %v6386_v21  ;;  %v525_v9 = vsel %vm318_vm4, %v522_v61, %v524_v2  ;;  %v916_v61 = vstv %s5729_s17  ;;  %s5745_s17 = sld [smem:[#allocation3 + $0xda]] }
 0x101   : > { %v601_v14 = vsel %vm255_vm3, %v599_v6, %v600_v7  ;;  %v621_v15 = vrot.slane %v615_v8, 1  ;;  %v603_v18 = vsel %vm255_vm3, %v600_v7, %v602_v10  ;;  %v938_v6 = vstv %s5730_s18  ;;  %s5750_s18 = sld [smem:[#allocation3 + $0xdf]] }
 0x102   : > { %v918_v10 = vmul.f32 %v916_v61, %v6383_v20  ;;  %v940_v17 = vmul.f32 %v938_v6, %v6383_v20 }
 0x103   : > { %301 = vrot.lane.b32.xlu1 %v298_v12, %s10202_s30  ;;  %303 = vrot.lane.b32.xlu0 %v300_v16, %s10202_s30  ;;  %v617_v12 = vmul.f32 %v614_v59, %v6421_v48  ;;  %v655_v16 = vmul.f32 %v654_v4, %v6386_v21  ;;  %v623_v29 = vsel %vm255_vm3, %v621_v15, %v622_v19 }
 0x104   : > { %v939_v15 = vmul.f32 %v938_v6, %v6386_v21 }
 0x105   : > { %v624_v22 = vrot.slane %v617_v12, 1  ;;  %v661_v25 = vrot.slane %v655_v16, 2 }
 0x107   : > { %342 = vrot.lane.b32.xlu1 %v339_v23, %s10204_s14  ;;  %344 = vrot.lane.b32.xlu0 %v341_v27, %s10204_s14  ;;  %v657_v23 = vmul.f32 %v654_v4, %v6421_v48  ;;  %v677_v27 = vmul.f32 %v676_v13, %v6386_v21  ;;  %v625_v30 = vsel %vm255_vm3, %v622_v19, %v624_v22  ;;  %v978_v19 = vstv %s5732_s21  ;;  %s5751_s21 = sld [smem:[#allocation3 + $0xe0]] }
 0x108   : > { %v663_v34 = vsel %vm318_vm4, %v661_v25, %v662_v26  ;;  %v840_v4 = vmul.f32 %v838_v52, %v6383_v20 }
 0x109   : > { %v664_v31 = vrot.slane %v657_v23, 2  ;;  %v683_v35 = vrot.slane %v677_v27, 2  ;;  %v946_v27 = vrot.slane %v940_v17, 1 }
 0x10a   : > { %v846_v12 = vrot.slane %v840_v4, 2 }
 0x10b   : > { %364 = vrot.lane.b32.xlu1 %v361_v36, %s10202_s30  ;;  %366 = vrot.lane.b32.xlu0 %v363_v37, %s10202_s30  ;;  %v684_v36 = vrot.slane %v678_v28, 2  ;;  %v755_v37 = vmul.f32 %v754_v24, %v6386_v21  ;;  %v665_v38 = vsel %vm318_vm4, %v662_v26, %v664_v31  ;;  %v945_v26 = vrot.slane %v939_v15, 1 }
 0x10d   : > { %v685_v43 = vsel %vm318_vm4, %v683_v35, %v684_v36  ;;  %v761_v44 = vrot.slane %v755_v37, 1  ;;  %v687_v47 = vsel %vm318_vm4, %v684_v36, %v686_v39  ;;  %v947_v35 = vsel %vm255_vm3, %v945_v26, %v946_v27 }
 0x10f   : > { %442 = vrot.lane.b32.xlu1 %v439_v41, %s10204_s14  ;;  %444 = vrot.lane.b32.xlu0 %v441_v45, %s10204_s14  ;;  %v757_v41 = vmul.f32 %v754_v24, %v6421_v48  ;;  %v777_v45 = vmul.f32 %v776_v33, %v6386_v21  ;;  %v763_v57 = vsel %vm255_vm3, %v761_v44, %v762_v49  ;;  %v924_v24 = vrot.slane %v918_v10, 1 }
 0x111   : > { %v764_v50 = vrot.slane %v757_v41, 1  ;;  %v783_v53 = vrot.slane %v777_v45, 1 }
 0x113   : > { %464 = vrot.lane.b32.xlu1 %v461_v51, %s10202_s30  ;;  %466 = vrot.lane.b32.xlu0 %v463_v55, %s10202_s30  ;;  %v779_v51 = vmul.f32 %v776_v33, %v6421_v48  ;;  %v817_v55 = vmul.f32 %v816_v42, %v6386_v21  ;;  %v765_v58 = vsel %vm255_vm3, %v762_v49, %v764_v50 }
 0x114   : > { %v785_v62 = vsel %vm255_vm3, %v783_v53, %v784_v54  ;;  %v981_v33 = vmul.f32 %v978_v19, %v6421_v48  ;;  %v1030_v53 = vstv %s5735_s28  ;;  %s5756_s28 = sld [smem:[#allocation3 + $0x100]] }
 0x115   : > { %v786_v59 = vrot.slane %v779_v51, 1  ;;  %v823_v63 = vrot.slane %v817_v55, 2 }
 0x116   : > { %v988_v39 = vrot.slane %v981_v33, 2 }
 0x117   : > { %504 = vrot.lane.b32.xlu1 %v501_v0, %s10204_s14  ;;  %506 = vrot.lane.b32.xlu0 %v503_v1, %s10204_s14  ;;  %v824_v0 = vrot.slane %v818_v56, 2  ;;  %v839_v1 = vmul.f32 %v838_v52, %v6386_v21  ;;  %v787_v2 = vsel %vm255_vm3, %v784_v54, %v786_v59  ;;  %v1078_v54 = vstv %s5738_s3  ;;  %s5757_s3 = sld [smem:[#allocation3 + $0x101]] }
 0x118   : > { %v1045_v59 = vstv %s6566_s4  ;;  %v1079_v60 = vmul.f32 %v1078_v54, %v6386_v21  ;;  %s5754_s4 = sld [smem:[#allocation3 + $0xfe]] }
 0x119   : > { %v825_v7 = vsel %vm318_vm4, %v823_v63, %v824_v0  ;;  %v845_v8 = vrot.slane %v839_v1, 2  ;;  %v827_v11 = vsel %vm318_vm4, %v824_v0, %v826_v3  ;;  %v1100_v63 = vstv %s5739_s9  ;;  %s5759_s9 = sld [smem:[#allocation3 + $0x103]] }
 0x11a   : > { %v1140_v0 = vstv %s5741_s10  ;;  %v1046_v3 = vmul.f32 %v1045_v59, %v6386_v21  ;;  %v1047_v4 = vmul.f32 %v1045_v59, %v6383_v20  ;;  %v1103_v10 = vmul.f32 %v1100_v63, %v6421_v48  ;;  %s5760_s10 = sld [smem:[#allocation3 + $0x104]] }
 0x11b   : > { %526 = vrot.lane.b32.xlu1 %v523_v5, %s10202_s30  ;;  %528 = vrot.lane.b32.xlu0 %v525_v9, %s10202_s30  ;;  %v841_v5 = vmul.f32 %v838_v52, %v6421_v48  ;;  %v917_v9 = vmul.f32 %v916_v61, %v6386_v21  ;;  %v847_v22 = vsel %vm318_vm4, %v845_v8, %v846_v12 }
 0x11c   : > { %v1142_v17 = vmul.f32 %v1140_v0, %v6383_v20 }
 0x11d   : > { %v848_v13 = vrot.slane %v841_v5, 2  ;;  %v923_v16 = vrot.slane %v917_v9, 1  ;;  %v1101_v5 = vmul.f32 %v1100_v63, %v6386_v21 }
 0x11f   : > { %604 = vrot.lane.b32.xlu1 %v601_v14, %s10204_s14  ;;  %606 = vrot.lane.b32.xlu0 %v603_v18, %s10204_s14  ;;  %v919_v14 = vmul.f32 %v916_v61, %v6421_v48  ;;  %v941_v18 = vmul.f32 %v938_v6, %v6421_v48  ;;  %v849_v23 = vsel %vm318_vm4, %v846_v12, %v848_v13 }
 0x120   : > { %v925_v31 = vsel %vm255_vm3, %v923_v16, %v924_v24  ;;  %v1080_v61 = vmul.f32 %v1078_v54, %v6383_v20  ;;  %v1102_v6 = vmul.f32 %v1100_v63, %v6383_v20  ;;  %v1141_v16 = vmul.f32 %v1140_v0, %v6386_v21 }
 0x121   : > { %v926_v25 = vrot.slane %v919_v14, 1  ;;  %v948_v28 = vrot.slane %v941_v18, 1  ;;  %v1107_v14 = vrot.slane %v1101_v5, 1 }
 0x122   : > { %v1086_v8 = vrot.slane %v1080_v61, 1  ;;  %v1108_v15 = vrot.slane %v1102_v6, 1 }
 0x123   : > { %626 = vrot.lane.b32.xlu1 %v623_v29, %s10202_s30  ;;  %628 = vrot.lane.b32.xlu0 %v625_v30, %s10202_s30  ;;  %v979_v29 = vmul.f32 %v978_v19, %v6386_v21  ;;  %v980_v30 = vmul.f32 %v978_v19, %v6383_v20  ;;  %v927_v32 = vsel %vm255_vm3, %v924_v24, %v926_v25 }
 0x124   : > { %v949_v36 = vsel %vm255_vm3, %v946_v27, %v948_v28  ;;  %v1109_v26 = vsel %vm255_vm3, %v1107_v14, %v1108_v15  ;;  %v1147_v27 = vrot.slane %v1141_v16, 2  ;;  %v1148_v28 = vrot.slane %v1142_v17, 2 }
 0x125   : > { %v985_v37 = vrot.slane %v979_v29, 2 }
 0x127   : > { %666 = vrot.lane.b32.xlu1 %v663_v34, %s10204_s14  ;;  %668 = vrot.lane.b32.xlu0 %v665_v38, %s10204_s14  ;;  %v1000_v34 = vstv %s5733_s0  ;;  %v986_v38 = vrot.slane %v980_v30, 2  ;;  %s5753_s0 = sld [smem:[#allocation3 + $0xfd]] }
 0x128   : > { %v1001_v40 = vmul.f32 %v1000_v34, %v6386_v21  ;;  %v1002_v41 = vmul.f32 %v1000_v34, %v6383_v20  ;;  %v1003_v42 = vmul.f32 %v1000_v34, %v6421_v48 }
 0x129   : > { %v989_v44 = vsel %vm318_vm4, %v986_v38, %v988_v39 }
 0x12a   : > { %v1007_v45 = vrot.slane %v1001_v40, 2  ;;  %v1008_v46 = vrot.slane %v1002_v41, 2 }
 0x12b   : > { %688 = vrot.lane.b32.xlu1 %v685_v43, %s10202_s30  ;;  %690 = vrot.lane.b32.xlu0 %v687_v47, %s10202_s30  ;;  %v987_v43 = vsel %vm318_vm4, %v985_v37, %v986_v38  ;;  %v1010_v47 = vrot.slane %v1003_v42, 2 }
 0x12c   : > { %v1009_v51 = vsel %vm318_vm4, %v1007_v45, %v1008_v46  ;;  %v1192_v45 = vstv %s5744_s12  ;;  %s5767_s12 = sld [smem:[#allocation3 + $0xd]] }
 0x12d   : > { %v1011_v52 = vsel %vm318_vm4, %v1008_v46, %v1010_v47  ;;  %v1240_v46 = vstv %s5747_s15  ;;  %s5765_s15 = sld [smem:[#allocation3 + $0xb]] }
 0x12e   : > { %v1242_v59 = vmul.f32 %v1240_v46, %v6383_v20 }
 0x12f   : > { %766 = vrot.lane.b32.xlu1 %v763_v57, %s10204_s14  ;;  %768 = vrot.lane.b32.xlu0 %v765_v58, %s10204_s14  ;;  %v1031_v57 = vmul.f32 %v1030_v53, %v6386_v21  ;;  %v1032_v58 = vmul.f32 %v1030_v53, %v6383_v20  ;;  %v1194_v53 = vmul.f32 %v1192_v45, %v6383_v20 }
 0x133   : > { %788 = vrot.lane.b32.xlu1 %v785_v62, %s10202_s30  ;;  %790 = vrot.lane.b32.xlu0 %v787_v2, %s10202_s30  ;;  %v1081_v62 = vmul.f32 %v1078_v54, %v6421_v48  ;;  %v1262_v54 = vstv %s5748_s19  ;;  %s5768_s19 = sld [smem:[#allocation3 + $0xe]] }
 0x134   : > { %v1263_v61 = vmul.f32 %v1262_v54, %v6386_v21  ;;  %v1265_v5 = vmul.f32 %v1262_v54, %v6421_v48 }
 0x135   : > { %v1088_v9 = vrot.slane %v1081_v62, 1 }
 0x136   : > { %v1272_v16 = vrot.slane %v1265_v5, 1  ;;  %v1424_v5 = vstv %s5757_s3  ;;  %s5777_s3 = sld [smem:[#allocation3 + $0x32]] }
 0x137   : > { %828 = vrot.lane.b32.xlu1 %v825_v7, %s10204_s14  ;;  %830 = vrot.lane.b32.xlu0 %v827_v11, %s10204_s14  ;;  %v1085_v7 = vrot.slane %v1079_v60, 1  ;;  %v1162_v11 = vstv %s5742_s11  ;;  %v1089_v19 = vsel %vm255_vm3, %v1086_v8, %v1088_v9  ;;  %v1243_v60 = vmul.f32 %v1240_v46, %v6421_v48  ;;  %s5764_s11 = sld [smem:[#allocation3 + $0xa]] }
 0x138   : > { %v1163_v29 = vmul.f32 %v1162_v11, %v6386_v21  ;;  %v1165_v33 = vmul.f32 %v1162_v11, %v6421_v48  ;;  %v1302_v9 = vstv %s5750_s18  ;;  %s5771_s18 = sld [smem:[#allocation3 + $0x11]] }
 0x139   : > { %v1087_v18 = vsel %vm255_vm3, %v1085_v7, %v1086_v8  ;;  %v1248_v7 = vrot.slane %v1242_v59, 1  ;;  %v1250_v8 = vrot.slane %v1243_v60, 1  ;;  %v1303_v17 = vmul.f32 %v1302_v9, %v6386_v21 }
 0x13a   : > { %v1169_v38 = vrot.slane %v1163_v29, 2  ;;  %v1172_v40 = vrot.slane %v1165_v33, 2  ;;  %v1354_v59 = vstv %s5753_s0  ;;  %v1402_v60 = vstv %s5756_s28  ;;  %s5776_s0 = sld [smem:[#allocation3 + $0x31]]  ;;  %s5774_s28 = sld [smem:[#allocation3 + $0x2f]] }
 0x13b   : > { %850 = vrot.lane.b32.xlu1 %v847_v22, %s10202_s30  ;;  %852 = vrot.lane.b32.xlu0 %v849_v23, %s10202_s30  ;;  %v1110_v22 = vrot.slane %v1103_v10, 1  ;;  %v1143_v23 = vmul.f32 %v1140_v0, %v6421_v48  ;;  %v1269_v10 = vrot.slane %v1263_v61, 1 }
 0x13d   : > { %v1111_v30 = vsel %vm255_vm3, %v1108_v15, %v1110_v22  ;;  %v1251_v22 = vsel %vm255_vm3, %v1248_v7, %v1250_v8  ;;  %v1404_v8 = vmul.f32 %v1402_v60, %v6383_v20 }
 0x13f   : > { %928 = vrot.lane.b32.xlu1 %v925_v31, %s10204_s14  ;;  %930 = vrot.lane.b32.xlu0 %v927_v32, %s10204_s14  ;;  %v1150_v31 = vrot.slane %v1143_v23, 2  ;;  %v1164_v32 = vmul.f32 %v1162_v11, %v6383_v20  ;;  %v1305_v23 = vmul.f32 %v1302_v9, %v6421_v48 }
 0x141   : > { %v1151_v37 = vsel %vm318_vm4, %v1148_v28, %v1150_v31  ;;  %v1170_v39 = vrot.slane %v1164_v32, 2  ;;  %v1309_v31 = vrot.slane %v1303_v17, 2  ;;  %v1312_v33 = vrot.slane %v1305_v23, 2 }
 0x143   : > { %950 = vrot.lane.b32.xlu1 %v947_v35, %s10202_s30  ;;  %952 = vrot.lane.b32.xlu0 %v949_v36, %s10202_s30  ;;  %v1149_v36 = vsel %vm318_vm4, %v1147_v27, %v1148_v28 }
 0x147   : > { %990 = vrot.lane.b32.xlu1 %v987_v43, %s10204_s14  ;;  %992 = vrot.lane.b32.xlu0 %v989_v44, %s10204_s14  ;;  %v1171_v43 = vsel %vm318_vm4, %v1169_v38, %v1170_v39  ;;  %v1173_v44 = vsel %vm318_vm4, %v1170_v39, %v1172_v40 }
 0x149   : > { %v6571_v49 = vpop.permute.xlu1 %223  ;;  %v6573_v50 = vpop.permute.xlu0 %225 }
 0x14b   : > { %1012 = vrot.lane.b32.xlu1 %v1009_v51, %s10202_s30  ;;  %1014 = vrot.lane.b32.xlu0 %v1011_v52, %s10202_s30  ;;  %v1193_v52 = vmul.f32 %v1192_v45, %v6386_v21 }
 0x14d   : > { %v6579_v55 = vpop.permute.xlu1 %238  ;;  %v6581_v56 = vpop.permute.xlu0 %240 }
 0x14f   : > { %1035 = vrot.lane.b32.xlu1 %v1031_v57, %s10204_s14  ;;  %1037 = vrot.lane.b32.xlu0 %v1032_v58, %s10204_s14  ;;  %v1207_v57 = vstv %s5745_s17  ;;  %v1241_v58 = vmul.f32 %v1240_v46, %v6386_v21  ;;  %s5770_s17 = sld [smem:[#allocation3 + $0x10]] }
 0x150   : > { %v1208_v0 = vmul.f32 %v1207_v57, %v6386_v21 }
 0x151   : > { %v6591_v1 = vpop.permute.xlu1 %387  ;;  %v6593_v2 = vpop.permute.xlu0 %389  ;;  %v1247_v6 = vrot.slane %v1241_v58, 1 }
 0x153   : > { %1050 = vrot.lane.b32.xlu1 %v1046_v3, %s10202_s30  ;;  %1052 = vrot.lane.b32.xlu0 %v1047_v4, %s10202_s30  ;;  %v1209_v3 = vmul.f32 %v1207_v57, %v6383_v20  ;;  %v1264_v4 = vmul.f32 %v1262_v54, %v6383_v20 }
 0x155   : > { %v6602_v12 = vpop.permute.xlu1 %402  ;;  %v6604_v13 = vpop.permute.xlu0 %404  ;;  %v1270_v15 = vrot.slane %v1264_v4, 1  ;;  %v1356_v4 = vmul.f32 %v1354_v59, %v6383_v20 }
 0x157   : > { %1090 = vrot.lane.b32.xlu1 %v1087_v18, %s10204_s14  ;;  %1092 = vrot.lane.b32.xlu0 %v1089_v19, %s10204_s14  ;;  %v1304_v18 = vmul.f32 %v1302_v9, %v6383_v20  ;;  %v1249_v19 = vsel %vm255_vm3, %v1247_v6, %v1248_v7  ;;  %v1271_v29 = vsel %vm255_vm3, %v1269_v10, %v1270_v15  ;;  %v1369_v6 = vstv %s5754_s4  ;;  %s5779_s4 = sld [smem:[#allocation3 + $0x34]] }
 0x158   : > { %v1403_v7 = vmul.f32 %v1402_v60, %v6386_v21  ;;  %v1405_v9 = vmul.f32 %v1402_v60, %v6421_v48  ;;  %v1425_v10 = vmul.f32 %v1424_v5, %v6386_v21  ;;  %v1370_v17 = vmul.f32 %v1369_v6, %v6386_v21 }
 0x159   : > { %v6613_v24 = vpop.permute.xlu1 %549  ;;  %v6615_v25 = vpop.permute.xlu0 %551  ;;  %v1310_v32 = vrot.slane %v1304_v18, 2  ;;  %v1371_v18 = vmul.f32 %v1369_v6, %v6383_v20 }
 0x15a   : > { %v1409_v23 = vrot.slane %v1403_v7, 1 }
 0x15b   : > { %1112 = vrot.lane.b32.xlu1 %v1109_v26, %s10202_s30  ;;  %1114 = vrot.lane.b32.xlu0 %v1111_v30, %s10202_s30  ;;  %v1324_v26 = vstv %s5751_s21  ;;  %v1273_v30 = vsel %vm255_vm3, %v1270_v15, %v1272_v16  ;;  %s5773_s21 = sld [smem:[#allocation3 + $0x2e]] }
 0x15c   : > { %v1327_v38 = vmul.f32 %v1324_v26, %v6421_v48 }
 0x15d   : > { %v6624_v34 = vpop.permute.xlu1 %564  ;;  %v6626_v35 = vpop.permute.xlu0 %566 }
 0x15e   : > { %10229 = vst [vmem:[#allocation16_spill] sm:$0xff] %v6626_v35 }
 0x15f   : > { %1152 = vrot.lane.b32.xlu1 %v1149_v36, %s10204_s14  ;;  %1154 = vrot.lane.b32.xlu0 %v1151_v37, %s10204_s14  ;;  %v1325_v36 = vmul.f32 %v1324_v26, %v6386_v21  ;;  %v1326_v37 = vmul.f32 %v1324_v26, %v6383_v20  ;;  %v1410_v26 = vrot.slane %v1404_v8, 1 }
 0x161   : > { %v6632_v41 = vpop.permute.xlu1 %711  ;;  %v6634_v42 = vpop.permute.xlu0 %713  ;;  %v1331_v45 = vrot.slane %v1325_v36, 2  ;;  %v1332_v46 = vrot.slane %v1326_v37, 2 }
 0x162   : > { %10230 = vst [vmem:[#allocation17_spill] sm:$0xff] %v6632_v41  ;;  %10231 = vst [vmem:[#allocation18_spill] sm:$0xff] %v6634_v42 }
 0x163   : > { %1174 = vrot.lane.b32.xlu1 %v1171_v43, %s10202_s30  ;;  %1176 = vrot.lane.b32.xlu0 %v1173_v44, %s10202_s30  ;;  %v1311_v43 = vsel %vm318_vm4, %v1309_v31, %v1310_v32  ;;  %v1313_v44 = vsel %vm318_vm4, %v1310_v32, %v1312_v33  ;;  %v1333_v57 = vsel %vm318_vm4, %v1331_v45, %v1332_v46  ;;  %v1431_v31 = vrot.slane %v1425_v10, 1 }
 0x165   : > { %v6640_v47 = vpop.permute.xlu1 %726  ;;  %v6642_v51 = vpop.permute.xlu0 %728 }
 0x166   : > { %10232 = vst [vmem:[#allocation19_spill] sm:$0xff] %v6640_v47  ;;  %10233 = vst [vmem:[#allocation20_spill] sm:$0xff] %v6642_v51 }
 0x167   : > { %1197 = vrot.lane.b32.xlu1 %v1193_v52, %s10204_s14  ;;  %1199 = vrot.lane.b32.xlu0 %v1194_v53, %s10204_s14  ;;  %v1334_v52 = vrot.slane %v1327_v38, 2 }
 0x169   : > { %v6652_v62 = vpop.permute.xlu1 %873  ;;  %v6654_v63 = vpop.permute.xlu0 %875  ;;  %v1335_v58 = vsel %vm318_vm4, %v1332_v46, %v1334_v52  ;;  %v1486_v52 = vstv %s5760_s10  ;;  %s5782_s10 = sld [smem:[#allocation3 + $0x52]] }
 0x16a   : > { %10234 = vst [vmem:[#allocation21_spill] sm:$0xff] %v6652_v62  ;;  %10235 = vst [vmem:[#allocation22_spill] sm:$0xff] %v6654_v63  ;;  %v1487_v6 = vmul.f32 %v1486_v52, %v6386_v21  ;;  %v1488_v7 = vmul.f32 %v1486_v52, %v6383_v20  ;;  %v1489_v8 = vmul.f32 %v1486_v52, %v6421_v48 }
 0x16b   : > { %1212 = vrot.lane.b32.xlu1 %v1208_v0, %s10202_s30  ;;  %1214 = vrot.lane.b32.xlu0 %v1209_v3, %s10202_s30  ;;  %v1355_v3 = vmul.f32 %v1354_v59, %v6386_v21 }
 0x16d   : > { %v6662_v11 = vpop.permute.xlu1 %888  ;;  %v6664_v14 = vpop.permute.xlu0 %890 }
 0x16e   : > { %10236 = vst [vmem:[#allocation23_spill] sm:$0xff] %v6662_v11  ;;  %10237 = vst [vmem:[#allocation24_spill] sm:$0xff] %v6664_v14 }
 0x16f   : > { %1252 = vrot.lane.b32.xlu1 %v1249_v19, %s10204_s14  ;;  %1254 = vrot.lane.b32.xlu0 %v1251_v22, %s10204_s14  ;;  %v1426_v19 = vmul.f32 %v1424_v5, %v6383_v20  ;;  %v1427_v22 = vmul.f32 %v1424_v5, %v6421_v48 }
 0x171   : > { %v6673_v27 = vpop.permute.xlu1 %279  ;;  %v6675_v28 = vpop.permute.xlu0 %281  ;;  %v1432_v36 = vrot.slane %v1426_v19, 1  ;;  %v1434_v37 = vrot.slane %v1427_v22, 1  ;;  %v5762_v19 = vld [vmem:[%s6358_s20 + $0x18] sm:$0xff] }
 0x172   : > { %10238 = vst [vmem:[#allocation25_spill] sm:$0xff] %v6673_v27  ;;  %10239 = vst [vmem:[#allocation26_spill] sm:$0xff] %v6675_v28  ;;  %v1518_v52 = vrot.slane %v5762_v19, 5 }
 0x173   : > { %1274 = vrot.lane.b32.xlu1 %v1271_v29, %s10202_s30  ;;  %1276 = vrot.lane.b32.xlu0 %v1273_v30, %s10202_s30  ;;  %v1412_v29 = vrot.slane %v1405_v9, 1  ;;  %v1464_v30 = vstv %s5759_s9  ;;  %v1433_v59 = vsel %vm255_vm3, %v1431_v31, %v1432_v36  ;;  %v1435_v60 = vsel %vm255_vm3, %v1432_v36, %v1434_v37  ;;  %s5780_s9 = sld [smem:[#allocation3 + $0x35]] }
 0x174   : > { %v1465_v38 = vmul.f32 %v1464_v30, %v6386_v21  ;;  %v1467_v46 = vmul.f32 %v1464_v30, %v6421_v48  ;;  %v1514_v36 = vrot.slane %v5762_v19, 7 }
 0x175   : > { %v6684_v39 = vpop.permute.xlu1 %301  ;;  %v6686_v40 = vpop.permute.xlu0 %303  ;;  %v1413_v45 = vsel %vm255_vm3, %v1410_v26, %v1412_v29  ;;  %v1496_v29 = vrot.slane %v1489_v8, 2 }
 0x176   : > { %10240 = vst [vmem:[#allocation27_spill] sm:$0xff] %v6684_v39  ;;  %10241 = vst [vmem:[#allocation28_spill] sm:$0xff] %v6686_v40  ;;  %v1474_v5 = vrot.slane %v1467_v46, 2 }
 0x177   : > { %1314 = vrot.lane.b32.xlu1 %v1311_v43, %s10204_s14  ;;  %1316 = vrot.lane.b32.xlu0 %v1313_v44, %s10204_s14  ;;  %v1466_v43 = vmul.f32 %v1464_v30, %v6383_v20  ;;  %v1411_v44 = vsel %vm255_vm3, %v1409_v23, %v1410_v26  ;;  %v1493_v23 = vrot.slane %v1487_v6, 2  ;;  %v1494_v26 = vrot.slane %v1488_v7, 2 }
 0x179   : > { %v6692_v53 = vpop.permute.xlu1 %342  ;;  %v6694_v54 = vpop.permute.xlu0 %344 }
 0x17a   : > { %10242 = vst [vmem:[#allocation29_spill] sm:$0xff] %v6692_v53  ;;  %10243 = vst [vmem:[#allocation30_spill] sm:$0xff] %v6694_v54 }
 0x17b   : > { %1336 = vrot.lane.b32.xlu1 %v1333_v57, %s10202_s30  ;;  %1338 = vrot.lane.b32.xlu0 %v1335_v58, %s10202_s30 }
 0x17d   : > { %v6700_v61 = vpop.permute.xlu1 %364  ;;  %v6702_v0 = vpop.permute.xlu0 %366 }
 0x17e   : > { %10244 = vst [vmem:[#allocation31_spill] sm:$0xff] %v6700_v61  ;;  %10245 = vst [vmem:[#allocation32_spill] sm:$0xff] %v6702_v0 }
 0x17f   : > { %1359 = vrot.lane.b32.xlu1 %v1355_v3, %s10204_s14  ;;  %1361 = vrot.lane.b32.xlu0 %v1356_v4, %s10204_s14  ;;  %v1471_v3 = vrot.slane %v1465_v38, 2  ;;  %v1472_v4 = vrot.slane %v1466_v43, 2  ;;  %v1495_v43 = vsel %vm318_vm4, %v1493_v23, %v1494_v26 }
 0x181   : > { %v6712_v15 = vpop.permute.xlu1 %442  ;;  %v6714_v16 = vpop.permute.xlu0 %444  ;;  %v1475_v22 = vsel %vm318_vm4, %v1472_v4, %v1474_v5 }
 0x182   : > { %10246 = vst [vmem:[#allocation33_spill] sm:$0xff] %v6712_v15  ;;  %10247 = vst [vmem:[#allocation34_spill] sm:$0xff] %v6714_v16 }
 0x183   : > { %1374 = vrot.lane.b32.xlu1 %v1370_v17, %s10202_s30  ;;  %1376 = vrot.lane.b32.xlu0 %v1371_v18, %s10202_s30  ;;  %v1473_v17 = vsel %vm318_vm4, %v1471_v3, %v1472_v4  ;;  %v5761_v18 = vld [vmem:[%s6358_s20 + $0x10] sm:$0xff]  ;;  %v1521_v3 = vsel %vm162_vm0, %v1514_v36, %v1518_v52 }
 0x184   : > { %v1510_v30 = vrot.slane %v5761_v18, 1  ;;  %v1513_v31 = vrot.slane %v5761_v18, 7 }
 0x185   : > { %v6722_v32 = vpop.permute.xlu1 %464  ;;  %v6724_v33 = vpop.permute.xlu0 %466 }
 0x186   : > { %10248 = vst [vmem:[#allocation35_spill] sm:$0xff] %v6722_v32  ;;  %10249 = vst [vmem:[#allocation36_spill] sm:$0xff] %v6724_v33  ;;  %v1515_v46 = vsel %vm162_vm0, %v1513_v31, %v1514_v36  ;;  %v7919_v33 = vstv %s7862_s23  ;;  %s8326_s23 = sld [smem:[#allocation3 + $0x9]] }
 0x187   : > { %1414 = vrot.lane.b32.xlu1 %v1411_v44, %s10204_s14  ;;  %1416 = vrot.lane.b32.xlu0 %v1413_v45, %s10204_s14  ;;  %v1497_v44 = vsel %vm318_vm4, %v1494_v26, %v1496_v29  ;;  %v1520_v45 = vsel %vm162_vm0, %v1510_v30, %v1513_v31 }
 0x189   : > { %v6733_v57 = vpop.permute.xlu1 %504  ;;  %v6735_v58 = vpop.permute.xlu0 %506 }
 0x18a   : > { %10250 = vst [vmem:[#allocation37_spill] sm:$0xff] %v6733_v57  ;;  %10251 = vst [vmem:[#allocation38_spill] sm:$0xff] %v6735_v58  ;;  %v1583_v57 = vstv %s5765_s15  ;;  %s5786_s15 = sld [smem:[#allocation3 + $0x56]] }
 0x18b   : > { %1436 = vrot.lane.b32.xlu1 %v1433_v59, %s10202_s30  ;;  %1438 = vrot.lane.b32.xlu0 %v1435_v60, %s10202_s30 }
 0x18d   : > { %v6744_v9 = vpop.permute.xlu1 %526  ;;  %v6746_v10 = vpop.permute.xlu0 %528 }
 0x18e   : > { %10252 = vst [vmem:[#allocation39_spill] sm:$0xff] %v6744_v9  ;;  %10253 = vst [vmem:[#allocation40_spill] sm:$0xff] %v6746_v10 }
 0x18f   : > { %1476 = vrot.lane.b32.xlu1 %v1473_v17, %s10204_s14  ;;  %1478 = vrot.lane.b32.xlu0 %v1475_v22, %s10204_s14 }
 0x191   : > { %v6754_v37 = vpop.permute.xlu1 %604  ;;  %v6756_v38 = vpop.permute.xlu0 %606 }
 0x192   : > { %10254 = vst [vmem:[#allocation41_spill] sm:$0xff] %v6754_v37  ;;  %10255 = vst [vmem:[#allocation42_spill] sm:$0xff] %v6756_v38 }
 0x193   : > { %1498 = vrot.lane.b32.xlu1 %v1495_v43, %s10202_s30  ;;  %1500 = vrot.lane.b32.xlu0 %v1497_v44, %s10202_s30 }
 0x195   : > { %v6764_v59 = vpop.permute.xlu1 %626  ;;  %v6766_v60 = vpop.permute.xlu0 %628 }
 0x196   : > { %10256 = vst [vmem:[#allocation43_spill] sm:$0xff] %v6764_v59  ;;  %10257 = vst [vmem:[#allocation44_spill] sm:$0xff] %v6766_v60 }
 0x197   : > { %1524 = vrot.lane.b32.xlu1 %v1520_v45, %s10204_s14  ;;  %1526 = vrot.lane.b32.xlu0 %v1515_v46, %s10204_s14 }
 0x199   : > { %v6771_v4 = vpop.permute.xlu1 %666  ;;  %v6773_v5 = vpop.permute.xlu0 %668 }
 0x19a   : > { %10258 = vst [vmem:[#allocation45_spill] sm:$0xff] %v6771_v4  ;;  %10259 = vst [vmem:[#allocation46_spill] sm:$0xff] %v6773_v5 }
 0x19b   : > { %1528 = vrot.lane.b32.xlu1 %v1521_v3, %s10204_s14  ;;  %1533 = vrot.lane.b32.xlu0 %v1520_v45, %s6206_s5 }
 0x19d   : > { %v6777_v6 = vpop.permute.xlu1 %688  ;;  %v6779_v7 = vpop.permute.xlu0 %690 }
 0x19e   : > { %10260 = vst [vmem:[#allocation47_spill] sm:$0xff] %v6777_v6  ;;  %10261 = vst [vmem:[#allocation48_spill] sm:$0xff] %v6779_v7 }
 0x19f   : > { %1535 = vrot.lane.b32.xlu1 %v1515_v46, %s6206_s5  ;;  %1537 = vrot.lane.b32.xlu0 %v1521_v3, %s6206_s5 }
 0x1a1   : > { %v6783_v8 = vpop.permute.xlu1 %766  ;;  %v6785_v17 = vpop.permute.xlu0 %768 }
 0x1a2   : > { %10262 = vst [vmem:[#allocation49_spill] sm:$0xff] %v6783_v8  ;;  %10263 = vst [vmem:[#allocation50_spill] sm:$0xff] %v6785_v17  ;;  %v1616_v17 = vstv %s5767_s12  ;;  %s5783_s12 = sld [smem:[#allocation3 + $0x53]] }
 0x1a3   : > { %1542 = vrot.lane.b32.xlu1 %v1520_v45, %s6207_s16  ;;  %1544 = vrot.lane.b32.xlu0 %v1515_v46, %s6207_s16 }
 0x1a5   : > { %v6789_v18 = vpop.permute.xlu1 %788  ;;  %v6791_v19 = vpop.permute.xlu0 %790 }
 0x1a6   : > { %10264 = vst [vmem:[#allocation51_spill] sm:$0xff] %v6789_v18  ;;  %10265 = vst [vmem:[#allocation52_spill] sm:$0xff] %v6791_v19 }
 0x1a7   : > { %1546 = vrot.lane.b32.xlu1 %v1521_v3, %s6207_s16 }
 0x1a9   : > { %v6794_v22 = vpop.permute.xlu1 %828  ;;  %v6796_v23 = vpop.permute.xlu0 %830 }
 0x1aa   : > { %10266 = vst [vmem:[#allocation53_spill] sm:$0xff] %v6794_v22  ;;  %10267 = vst [vmem:[#allocation54_spill] sm:$0xff] %v6796_v23 }
 0x1ad   : > { %v6798_v26 = vpop.permute.xlu1 %850  ;;  %v6800_v29 = vpop.permute.xlu0 %852 }
 0x1ae   : > { %10268 = vst [vmem:[#allocation55_spill] sm:$0xff] %v6798_v26  ;;  %10269 = vst [vmem:[#allocation56_spill] sm:$0xff] %v6800_v29 }
 0x1b1   : > { %v6802_v30 = vpop.permute.xlu1 %928  ;;  %v6804_v31 = vpop.permute.xlu0 %930 }
 0x1b2   : > { %10270 = vst [vmem:[#allocation57_spill] sm:$0xff] %v6802_v30  ;;  %10271 = vst [vmem:[#allocation58_spill] sm:$0xff] %v6804_v31 }
 0x1b5   : > { %v6806_v36 = vpop.permute.xlu1 %950  ;;  %v6808_v43 = vpop.permute.xlu0 %952 }
 0x1b6   : > { %10272 = vst [vmem:[#allocation59_spill] sm:$0xff] %v6806_v36  ;;  %10273 = vst [vmem:[#allocation60_spill] sm:$0xff] %v6808_v43 }
 0x1b9   : > { %v6810_v44 = vpop.permute.xlu1 %990  ;;  %v6812_v45 = vpop.permute.xlu0 %992 }
 0x1ba   : > { %10274 = vst [vmem:[#allocation61_spill] sm:$0xff] %v6810_v44  ;;  %10275 = vst [vmem:[#allocation62_spill] sm:$0xff] %v6812_v45 }
 0x1bd   : > { %v6814_v46 = vpop.permute.xlu1 %1012  ;;  %v6816_v52 = vpop.permute.xlu0 %1014 }
 0x1be   : > { %10276 = vst [vmem:[#allocation63_spill] sm:$0xff] %v6814_v46  ;;  %10277 = vst [vmem:[#allocation64_spill] sm:$0xff] %v6816_v52 }
 0x1c1   : > { %v6818_v3 = vpop.permute.xlu1 %1035  ;;  %v6820_v26 = vpop.permute.xlu0 %1037 }
 0x1c2   : > { %10278 = vst [vmem:[#allocation65_spill] sm:$0xff] %v6818_v3  ;;  %10279 = vst [vmem:[#allocation66_spill] sm:$0xff] %v6820_v26 }
 0x1c5   : > { %v6822_v29 = vpop.permute.xlu1 %1050  ;;  %v6824_v7 = vpop.permute.xlu0 %1052 }
 0x1c6   : > { %10280 = vst [vmem:[#allocation67_spill] sm:$0xff] %v6822_v29  ;;  %10281 = vst [vmem:[#allocation68_spill] sm:$0xff] %v6824_v7  ;;  %v7909_v7 = vstv %s7856_s26  ;;  %v7916_v29 = vstv %s7860_s24  ;;  %s8328_s24 = sld [smem:[#allocation3 + $0xf]]  ;;  %s8338_s26 = sld [smem:[#allocation3 + $0x2d]] }
 0x1c9   : > { %v6826_v23 = vpop.permute.xlu1 %1090  ;;  %v6828_v22 = vpop.permute.xlu0 %1092 }
 0x1ca   : > { %10282 = vst [vmem:[#allocation69_spill] sm:$0xff] %v6826_v23  ;;  %10283 = vst [vmem:[#allocation70_spill] sm:$0xff] %v6828_v22 }
 0x1cd   : > { %v6830_v6 = vpop.permute.xlu1 %1112  ;;  %v6832_v44 = vpop.permute.xlu0 %1114 }
 0x1ce   : > { %10284 = vst [vmem:[#allocation71_spill] sm:$0xff] %v6830_v6  ;;  %10285 = vst [vmem:[#allocation72_spill] sm:$0xff] %v6832_v44 }
 0x1d1   : > { %v6834_v45 = vpop.permute.xlu1 %1152  ;;  %v6836_v46 = vpop.permute.xlu0 %1154 }
 0x1d2   : > { %10286 = vst [vmem:[#allocation73_spill] sm:$0xff] %v6834_v45  ;;  %10287 = vst [vmem:[#allocation74_spill] sm:$0xff] %v6836_v46 }
 0x1d5   : > { %v6838_v52 = vpop.permute.xlu1 %1174  ;;  %v6840_v5 = vpop.permute.xlu0 %1176 }
 0x1d6   : > { %10288 = vst [vmem:[#allocation75_spill] sm:$0xff] %v6838_v52  ;;  %10289 = vst [vmem:[#allocation76_spill] sm:$0xff] %v6840_v5 }
 0x1d9   : > { %v6842_v10 = vpop.permute.xlu1 %1197  ;;  %v6844_v9 = vpop.permute.xlu0 %1199 }
 0x1da   : > { %10290 = vst [vmem:[#allocation77_spill] sm:$0xff] %v6842_v10  ;;  %10291 = vst [vmem:[#allocation78_spill] sm:$0xff] %v6844_v9 }
 0x1dd   : > { %v6846_v4 = vpop.permute.xlu1 %1212  ;;  %v6848_v0 = vpop.permute.xlu0 %1214 }
 0x1de   : > { %10292 = vst [vmem:[#allocation79_spill] sm:$0xff] %v6846_v4  ;;  %10293 = vst [vmem:[#allocation80_spill] sm:$0xff] %v6848_v0 }
 0x1e1   : > { %v6850_v58 = vpop.permute.xlu1 %1252  ;;  %v6852_v6 = vpop.permute.xlu0 %1254 }
 0x1e2   : > { %10294 = vst [vmem:[#allocation81_spill] sm:$0xff] %v6850_v58  ;;  %10295 = vst [vmem:[#allocation82_spill] sm:$0xff] %v6852_v6 }
 0x1e5   : > { %v6854_v44 = vpop.permute.xlu1 %1274  ;;  %v6856_v45 = vpop.permute.xlu0 %1276 }
 0x1e6   : > { %10296 = vst [vmem:[#allocation83_spill] sm:$0xff] %v6854_v44  ;;  %10297 = vst [vmem:[#allocation84_spill] sm:$0xff] %v6856_v45 }
 0x1e9   : > { %v6858_v46 = vpop.permute.xlu1 %1314  ;;  %v6860_v52 = vpop.permute.xlu0 %1316 }
 0x1ea   : > { %10298 = vst [vmem:[#allocation85_spill] sm:$0xff] %v6858_v46  ;;  %10299 = vst [vmem:[#allocation86_spill] sm:$0xff] %v6860_v52 }
 0x1ed   : > { %v6862_v5 = vpop.permute.xlu1 %1336  ;;  %v6864_v43 = vpop.permute.xlu0 %1338 }
 0x1ee   : > { %10300 = vst [vmem:[#allocation87_spill] sm:$0xff] %v6862_v5  ;;  %10301 = vst [vmem:[#allocation88_spill] sm:$0xff] %v6864_v43 }
 0x1f1   : > { %v6866_v22 = vpop.permute.xlu1 %1359  ;;  %v6868_v36 = vpop.permute.xlu0 %1361 }
 0x1f2   : > { %10302 = vst [vmem:[#allocation89_spill] sm:$0xff] %v6866_v22  ;;  %10303 = vst [vmem:[#allocation90_spill] sm:$0xff] %v6868_v36 }
 0x1f5   : > { %v6870_v19 = vpop.permute.xlu1 %1374  ;;  %v6872_v58 = vpop.permute.xlu0 %1376 }
 0x1f6   : > { %10304 = vst [vmem:[#allocation91_spill] sm:$0xff] %v6870_v19  ;;  %10305 = vst [vmem:[#allocation92_spill] sm:$0xff] %v6872_v58 }
 0x1f9   : > { %v6874_v6 = vpop.permute.xlu1 %1414  ;;  %v6876_v44 = vpop.permute.xlu0 %1416 }
 0x1fa   : > { %10306 = vst [vmem:[#allocation93_spill] sm:$0xff] %v6874_v6  ;;  %10307 = vst [vmem:[#allocation94_spill] sm:$0xff] %v6876_v44 }
 0x1fd   : > { %v6878_v45 = vpop.permute.xlu1 %1436  ;;  %v6880_v46 = vpop.permute.xlu0 %1438 }
 0x1fe   : > { %10308 = vst [vmem:[#allocation95_spill] sm:$0xff] %v6878_v45  ;;  %10309 = vst [vmem:[#allocation96_spill] sm:$0xff] %v6880_v46  ;;  %v1568_v46 = vstv %s5764_s11  ;;  %s5785_s11 = sld [smem:[#allocation3 + $0x55]] }
 0x201   : > { %v6882_v52 = vpop.permute.xlu1 %1476  ;;  %v6884_v5 = vpop.permute.xlu0 %1478 }
 0x202   : > { %10310 = vst [vmem:[#allocation97_spill] sm:$0xff] %v6882_v52  ;;  %10311 = vst [vmem:[#allocation98_spill] sm:$0xff] %v6884_v5 }
 0x205   : > { %v6886_v43 = vpop.permute.xlu1 %1498  ;;  %v6888_v23 = vpop.permute.xlu0 %1500 }
 0x206   : > { %10312 = vst [vmem:[#allocation99_spill] sm:$0xff] %v6886_v43  ;;  %10313 = vst [vmem:[#allocation100_spill] sm:$0xff] %v6888_v23 }
 0x209   : > { %v1525_v31 = vpop.permute.xlu1 %1524  ;;  %v1527_v18 = vpop.permute.xlu0 %1526 }
 0x20d   : > { %v1529_v60 = vpop.permute.xlu1 %1528  ;;  %v1534_v30 = vpop.permute.xlu0 %1533 }
 0x20e   : > { %v1551_v52 = vsel %vm201_vm1, %v1525_v31, %v1534_v30 }
 0x211   : > { %v1536_v44 = vpop.permute.xlu1 %1535  ;;  %v1538_v45 = vpop.permute.xlu0 %1537 }
 0x212   : > { %v1552_v5 = vsel %vm201_vm1, %v1527_v18, %v1536_v44  ;;  %v1638_v18 = vstv %s5768_s19  ;;  %v1553_v31 = vsel %vm201_vm1, %v1529_v60, %v1538_v45  ;;  %v1700_v45 = vstv %s5771_s18  ;;  %s5788_s19 = sld [smem:[#allocation3 + $0x58]]  ;;  %s5791_s18 = sld [smem:[#allocation3 + $0x76]] }
 0x215   : > { %v1543_v6 = vpop.permute.xlu1 %1542  ;;  %v1545_v43 = vpop.permute.xlu0 %1544 }
 0x216   : > { %v6893_v23 = vsel %vm205_vm2, %v1551_v52, %v1543_v6  ;;  %v6896_v8 = vsel %vm205_vm2, %v1552_v5, %v1545_v43  ;;  %v1678_v6 = vstv %s5770_s17  ;;  %s5789_s17 = sld [smem:[#allocation3 + $0x59]] }
 0x217   : > { %10314 = vst [vmem:[#allocation101_spill] sm:$0xff] %v6893_v23  ;;  %10315 = vst [vmem:[#allocation102_spill] sm:$0xff] %v6896_v8  ;;  %v1569_v59 = vmul.f32 %v1568_v46, %v6893_v23  ;;  %v1570_v38 = vmul.f32 %v1568_v46, %v6896_v8  ;;  %v1617_v37 = vmul.f32 %v1616_v17, %v6893_v23 }
 0x218   : > { %v1618_v30 = vmul.f32 %v1616_v17, %v6896_v8  ;;  %v1584_v43 = vmul.f32 %v1583_v57, %v6893_v23  ;;  %v1585_v46 = vmul.f32 %v1583_v57, %v6896_v8  ;;  %v1639_v61 = vmul.f32 %v1638_v18, %v6893_v23 }
 0x219   : > { %v1547_v44 = vpop.permute.xlu1 %1546  ;;  %1573 = vrot.lane.b32.xlu0 %v1569_v59, %s10204_s14  ;;  %1575 = vrot.lane.b32.xlu1 %v1570_v38, %s10204_s14  ;;  %v1623_v54 = vrot.slane %v1617_v37, 1  ;;  %v1640_v60 = vmul.f32 %v1638_v18, %v6896_v8  ;;  %v1679_v57 = vmul.f32 %v1678_v6, %v6893_v23 }
 0x21a   : > { %v6906_v5 = vsel %vm205_vm2, %v1553_v31, %v1547_v44  ;;  %v1624_v58 = vrot.slane %v1618_v30, 1  ;;  %v1645_v44 = vrot.slane %v1639_v61, 1  ;;  %v1702_v61 = vmul.f32 %v1700_v45, %v6896_v8 }
 0x21b   : > { %10316 = vst [vmem:[#allocation103_spill] sm:$0xff] %v6906_v5  ;;  %v1619_v52 = vmul.f32 %v1616_v17, %v6906_v5  ;;  %v1641_v59 = vmul.f32 %v1638_v18, %v6906_v5  ;;  %v1680_v17 = vmul.f32 %v1678_v6, %v6896_v8  ;;  %v1646_v30 = vrot.slane %v1640_v60, 1 }
 0x21c   : > { %v1625_v37 = vsel %vm255_vm3, %v1623_v54, %v1624_v58  ;;  %v1681_v0 = vmul.f32 %v1678_v6, %v6906_v5  ;;  %v1685_v18 = vrot.slane %v1679_v57, 2  ;;  %v1703_v54 = vmul.f32 %v1700_v45, %v6906_v5 }
 0x21d   : > { %1588 = vrot.lane.b32.xlu0 %v1584_v43, %s10202_s30  ;;  %1590 = vrot.lane.b32.xlu1 %v1585_v46, %s10202_s30  ;;  %v1626_v38 = vrot.slane %v1619_v52, 1  ;;  %v1648_v19 = vrot.slane %v1641_v59, 1  ;;  %v1686_v43 = vrot.slane %v1680_v17, 2  ;;  %v1701_v46 = vmul.f32 %v1700_v45, %v6893_v23 }
 0x21e   : > { %v1647_v52 = vsel %vm255_vm3, %v1645_v44, %v1646_v30  ;;  %v1688_v53 = vrot.slane %v1681_v0, 2  ;;  %v1708_v59 = vrot.slane %v1702_v61, 2  ;;  %v1731_v45 = vstv %s5773_s21  ;;  %s5794_s21 = sld [smem:[#allocation3 + $0x79]] }
 0x21f   : > { %v1627_v31 = vsel %vm255_vm3, %v1624_v58, %v1626_v38  ;;  %v1649_v38 = vsel %vm255_vm3, %v1646_v30, %v1648_v19  ;;  %v1707_v58 = vrot.slane %v1701_v46, 2  ;;  %v1687_v6 = vsel %vm318_vm4, %v1685_v18, %v1686_v43 }
 0x220   : > { %v1689_v60 = vsel %vm318_vm4, %v1686_v43, %v1688_v53  ;;  %v1779_v44 = vstv %s5776_s0  ;;  %v1732_v53 = vmul.f32 %v1731_v45, %v6893_v23  ;;  %v1733_v57 = vmul.f32 %v1731_v45, %v6896_v8  ;;  %s5792_s0 = sld [smem:[#allocation3 + $0x77]] }
 0x221   : > { %1628 = vrot.lane.b32.xlu0 %v1625_v37, %s10204_s14  ;;  %1630 = vrot.lane.b32.xlu1 %v1627_v31, %s10204_s14  ;;  %v1710_v31 = vrot.slane %v1703_v54, 2  ;;  %v1709_v0 = vsel %vm318_vm4, %v1707_v58, %v1708_v59  ;;  %v1746_v17 = vstv %s5774_s28  ;;  %v1780_v37 = vmul.f32 %v1779_v44, %v6893_v23  ;;  %s5795_s28 = sld [smem:[#allocation3 + $0x7a]] }
 0x222   : > { %v1781_v30 = vmul.f32 %v1779_v44, %v6896_v8  ;;  %v1782_v18 = vmul.f32 %v1779_v44, %v6906_v5  ;;  %v1801_v43 = vstv %s5777_s3  ;;  %v1841_v46 = vstv %s5779_s4  ;;  %s5797_s3 = sld [smem:[#allocation3 + $0x7c]]  ;;  %s5798_s4 = sld [smem:[#allocation3 + $0x7d]] }
 0x223   : > { %v1711_v19 = vsel %vm318_vm4, %v1708_v59, %v1710_v31  ;;  %v1747_v61 = vmul.f32 %v1746_v17, %v6893_v23  ;;  %v1803_v54 = vmul.f32 %v1801_v43, %v6896_v8  ;;  %v1786_v58 = vrot.slane %v1780_v37, 1 }
 0x224   : > { %v1804_v59 = vmul.f32 %v1801_v43, %v6906_v5  ;;  %v1863_v31 = vstv %s5780_s9  ;;  %v1842_v45 = vmul.f32 %v1841_v46, %v6893_v23  ;;  %v1843_v44 = vmul.f32 %v1841_v46, %v6896_v8  ;;  %s5800_s9 = sld [smem:[#allocation3 + $0x9a]] }
 0x225   : > { %1650 = vrot.lane.b32.xlu0 %v1647_v52, %s10202_s30  ;;  %1652 = vrot.lane.b32.xlu1 %v1649_v38, %s10202_s30  ;;  %v1748_v52 = vmul.f32 %v1746_v17, %v6896_v8  ;;  %v1802_v38 = vmul.f32 %v1801_v43, %v6893_v23  ;;  %v1844_v37 = vmul.f32 %v1841_v46, %v6906_v5 }
 0x226   : > { %v1811_v17 = vrot.slane %v1804_v59, 1  ;;  %v1849_v43 = vrot.slane %v1843_v44, 2  ;;  %v1942_v44 = vstv %s5785_s11  ;;  %s5804_s11 = sld [smem:[#allocation3 + $0x9e]] }
 0x229   : > { %1690 = vrot.lane.b32.xlu0 %v1687_v6, %s10204_s14  ;;  %1692 = vrot.lane.b32.xlu1 %v1689_v60, %s10204_s14  ;;  %v1787_v6 = vrot.slane %v1781_v30, 1  ;;  %v1789_v60 = vrot.slane %v1782_v18, 1  ;;  %v1848_v18 = vrot.slane %v1842_v45, 2  ;;  %v1894_v45 = vstv %s5782_s10  ;;  %s5803_s10 = sld [smem:[#allocation3 + $0x9d]] }
 0x22b   : > { %v1850_v46 = vsel %vm318_vm4, %v1848_v18, %v1849_v43  ;;  %v1945_v18 = vmul.f32 %v1942_v44, %v6906_v5 }
 0x22d   : > { %1712 = vrot.lane.b32.xlu0 %v1709_v0, %s10202_s30  ;;  %1714 = vrot.lane.b32.xlu1 %v1711_v19, %s10202_s30  ;;  %v1808_v0 = vrot.slane %v1802_v38, 1  ;;  %v1809_v19 = vrot.slane %v1803_v54, 1  ;;  %v1851_v38 = vrot.slane %v1844_v37, 2  ;;  %v1865_v54 = vmul.f32 %v1863_v31, %v6896_v8 }
 0x22e   : > { %v1943_v37 = vmul.f32 %v1942_v44, %v6893_v23 }
 0x22f   : > { %v1810_v30 = vsel %vm255_vm3, %v1808_v0, %v1809_v19  ;;  %v1871_v59 = vrot.slane %v1865_v54, 2 }
 0x231   : > { %1736 = vrot.lane.b32.xlu0 %v1732_v53, %s10204_s14  ;;  %1738 = vrot.lane.b32.xlu1 %v1733_v57, %s10204_s14  ;;  %v1788_v53 = vsel %vm255_vm3, %v1786_v58, %v1787_v6  ;;  %v1790_v57 = vsel %vm255_vm3, %v1787_v6, %v1789_v60  ;;  %v1866_v58 = vmul.f32 %v1863_v31, %v6906_v5 }
 0x232   : > { %v1852_v6 = vsel %vm318_vm4, %v1849_v43, %v1851_v38  ;;  %v1964_v43 = vstv %s5786_s15  ;;  %s5806_s15 = sld [smem:[#allocation3 + $0xa0]] }
 0x233   : > { %v1873_v0 = vrot.slane %v1866_v58, 2  ;;  %v1965_v54 = vmul.f32 %v1964_v43, %v6893_v23  ;;  %v1966_v58 = vmul.f32 %v1964_v43, %v6896_v8 }
 0x235   : > { %1751 = vrot.lane.b32.xlu0 %v1747_v61, %s10202_s30  ;;  %1753 = vrot.lane.b32.xlu1 %v1748_v52, %s10202_s30  ;;  %v1864_v61 = vmul.f32 %v1863_v31, %v6893_v23  ;;  %v1812_v52 = vsel %vm255_vm3, %v1809_v19, %v1811_v17  ;;  %v1874_v19 = vsel %vm318_vm4, %v1871_v59, %v1873_v0  ;;  %v1909_v17 = vstv %s5783_s12  ;;  %s5801_s12 = sld [smem:[#allocation3 + $0x9b]] }
 0x236   : > { %v1911_v38 = vmul.f32 %v1909_v17, %v6896_v8  ;;  %v2026_v0 = vstv %s5789_s17  ;;  %s5809_s17 = sld [smem:[#allocation3 + $0xbe]] }
 0x237   : > { %v1870_v60 = vrot.slane %v1864_v61, 2  ;;  %v2004_v61 = vstv %s5788_s19  ;;  %s5807_s19 = sld [smem:[#allocation3 + $0xa1]] }
 0x239   : > { %1791 = vrot.lane.b32.xlu0 %v1788_v53, %s10204_s14  ;;  %1793 = vrot.lane.b32.xlu1 %v1790_v57, %s10204_s14  ;;  %v1872_v31 = vsel %vm318_vm4, %v1870_v60, %v1871_v59  ;;  %v1895_v53 = vmul.f32 %v1894_v45, %v6893_v23  ;;  %v1896_v57 = vmul.f32 %v1894_v45, %v6896_v8  ;;  %v1952_v60 = vrot.slane %v1945_v18, 1 }
 0x23a   : > { %v1967_v59 = vmul.f32 %v1964_v43, %v6906_v5  ;;  %v2005_v45 = vmul.f32 %v2004_v61, %v6893_v23 }
 0x23c   : > { %v2011_v18 = vrot.slane %v2005_v45, 2  ;;  %v2057_v45 = vstv %s5791_s18  ;;  %s5812_s18 = sld [smem:[#allocation3 + $0xc1]] }
 0x23d   : > { %1813 = vrot.lane.b32.xlu0 %v1810_v30, %s10202_s30  ;;  %1815 = vrot.lane.b32.xlu1 %v1812_v52, %s10202_s30  ;;  %v1944_v30 = vmul.f32 %v1942_v44, %v6896_v8  ;;  %v1910_v52 = vmul.f32 %v1909_v17, %v6893_v23  ;;  %v2006_v44 = vmul.f32 %v2004_v61, %v6896_v8  ;;  %v1974_v17 = vrot.slane %v1967_v59, 1 }
 0x23f   : > { %v2012_v43 = vrot.slane %v2006_v44, 2  ;;  %v2105_v44 = vstv %s5794_s21  ;;  %s5813_s21 = sld [smem:[#allocation3 + $0xc2]] }
 0x241   : > { %1853 = vrot.lane.b32.xlu0 %v1850_v46, %s10204_s14  ;;  %1855 = vrot.lane.b32.xlu1 %v1852_v6, %s10204_s14  ;;  %v1949_v46 = vrot.slane %v1943_v37, 1  ;;  %v1950_v6 = vrot.slane %v1944_v30, 1  ;;  %v2007_v37 = vmul.f32 %v2004_v61, %v6906_v5  ;;  %v2013_v61 = vsel %vm318_vm4, %v2011_v18, %v2012_v43 }
 0x242   : > { %v2108_v18 = vmul.f32 %v2105_v44, %v6906_v5 }
 0x245   : > { %1875 = vrot.lane.b32.xlu0 %v1872_v31, %s10202_s30  ;;  %1877 = vrot.lane.b32.xlu1 %v1874_v19, %s10202_s30  ;;  %v1971_v31 = vrot.slane %v1965_v54, 1  ;;  %v1972_v19 = vrot.slane %v1966_v58, 1  ;;  %v2014_v54 = vrot.slane %v2007_v37, 2  ;;  %v2028_v58 = vmul.f32 %v2026_v0, %v6896_v8 }
 0x246   : > { %v2106_v37 = vmul.f32 %v2105_v44, %v6893_v23 }
 0x247   : > { %v1973_v30 = vsel %vm255_vm3, %v1971_v31, %v1972_v19  ;;  %v2034_v59 = vrot.slane %v2028_v58, 2 }
 0x249   : > { %1899 = vrot.lane.b32.xlu0 %v1895_v53, %s10204_s14  ;;  %1901 = vrot.lane.b32.xlu1 %v1896_v57, %s10204_s14  ;;  %v1951_v53 = vsel %vm255_vm3, %v1949_v46, %v1950_v6  ;;  %v1953_v57 = vsel %vm255_vm3, %v1950_v6, %v1952_v60  ;;  %v2029_v46 = vmul.f32 %v2026_v0, %v6906_v5 }
 0x24a   : > { %v2015_v6 = vsel %vm318_vm4, %v2012_v43, %v2014_v54  ;;  %v2127_v43 = vstv %s5795_s28  ;;  %s5815_s28 = sld [smem:[#allocation3 + $0xc4]] }
 0x24b   : > { %v2036_v31 = vrot.slane %v2029_v46, 2  ;;  %v2128_v58 = vmul.f32 %v2127_v43, %v6893_v23  ;;  %v2129_v46 = vmul.f32 %v2127_v43, %v6896_v8 }
 0x24d   : > { %1914 = vrot.lane.b32.xlu0 %v1910_v52, %s10202_s30  ;;  %1916 = vrot.lane.b32.xlu1 %v1911_v38, %s10202_s30  ;;  %v2027_v52 = vmul.f32 %v2026_v0, %v6893_v23  ;;  %v1975_v38 = vsel %vm255_vm3, %v1972_v19, %v1974_v17  ;;  %v2037_v19 = vsel %vm318_vm4, %v2034_v59, %v2036_v31  ;;  %v2072_v17 = vstv %s5792_s0  ;;  %s5810_s0 = sld [smem:[#allocation3 + $0xbf]] }
 0x24e   : > { %v2074_v54 = vmul.f32 %v2072_v17, %v6896_v8  ;;  %v2189_v31 = vstv %s5798_s4  ;;  %s5818_s4 = sld [smem:[#allocation3 + $0xe2]] }
 0x24f   : > { %v2033_v60 = vrot.slane %v2027_v52, 2  ;;  %v2167_v52 = vstv %s5797_s3  ;;  %s5816_s3 = sld [smem:[#allocation3 + $0xc5]] }
 0x251   : > { %1954 = vrot.lane.b32.xlu0 %v1951_v53, %s10204_s14  ;;  %1956 = vrot.lane.b32.xlu1 %v1953_v57, %s10204_s14  ;;  %v2035_v0 = vsel %vm318_vm4, %v2033_v60, %v2034_v59  ;;  %v2058_v53 = vmul.f32 %v2057_v45, %v6893_v23  ;;  %v2059_v57 = vmul.f32 %v2057_v45, %v6896_v8  ;;  %v2115_v60 = vrot.slane %v2108_v18, 1 }
 0x252   : > { %v2130_v59 = vmul.f32 %v2127_v43, %v6906_v5  ;;  %v2168_v45 = vmul.f32 %v2167_v52, %v6893_v23 }
 0x254   : > { %v2174_v18 = vrot.slane %v2168_v45, 2  ;;  %v2220_v45 = vstv %s5800_s9  ;;  %s5821_s9 = sld [smem:[#allocation3 + $0xe5]] }
 0x255   : > { %1976 = vrot.lane.b32.xlu0 %v1973_v30, %s10202_s30  ;;  %1978 = vrot.lane.b32.xlu1 %v1975_v38, %s10202_s30  ;;  %v2107_v30 = vmul.f32 %v2105_v44, %v6896_v8  ;;  %v2073_v38 = vmul.f32 %v2072_v17, %v6893_v23  ;;  %v2169_v44 = vmul.f32 %v2167_v52, %v6896_v8  ;;  %v2137_v17 = vrot.slane %v2130_v59, 1 }
 0x257   : > { %v2175_v43 = vrot.slane %v2169_v44, 2  ;;  %v2268_v44 = vstv %s5803_s10  ;;  %s5822_s10 = sld [smem:[#allocation3 + $0xe6]] }
 0x259   : > { %2016 = vrot.lane.b32.xlu0 %v2013_v61, %s10204_s14  ;;  %2018 = vrot.lane.b32.xlu1 %v2015_v6, %s10204_s14  ;;  %v2112_v61 = vrot.slane %v2106_v37, 1  ;;  %v2113_v6 = vrot.slane %v2107_v30, 1  ;;  %v2170_v37 = vmul.f32 %v2167_v52, %v6906_v5  ;;  %v2176_v52 = vsel %vm318_vm4, %v2174_v18, %v2175_v43 }
 0x25a   : > { %v2270_v18 = vmul.f32 %v2268_v44, %v6896_v8 }
 0x25d   : > { %2038 = vrot.lane.b32.xlu0 %v2035_v0, %s10202_s30  ;;  %2040 = vrot.lane.b32.xlu1 %v2037_v19, %s10202_s30  ;;  %v2134_v0 = vrot.slane %v2128_v58, 1  ;;  %v2135_v19 = vrot.slane %v2129_v46, 1  ;;  %v2177_v58 = vrot.slane %v2170_v37, 2  ;;  %v2191_v46 = vmul.f32 %v2189_v31, %v6896_v8 }
 0x25e   : > { %v2235_v37 = vstv %s5801_s12  ;;  %s5824_s12 = sld [smem:[#allocation3 + $0xe8]] }
 0x25f   : > { %v2136_v30 = vsel %vm255_vm3, %v2134_v0, %v2135_v19  ;;  %v2197_v59 = vrot.slane %v2191_v46, 2 }
 0x261   : > { %2062 = vrot.lane.b32.xlu0 %v2058_v53, %s10204_s14  ;;  %2064 = vrot.lane.b32.xlu1 %v2059_v57, %s10204_s14  ;;  %v2114_v53 = vsel %vm255_vm3, %v2112_v61, %v2113_v6  ;;  %v2116_v57 = vsel %vm255_vm3, %v2113_v6, %v2115_v60  ;;  %v2192_v61 = vmul.f32 %v2189_v31, %v6906_v5 }
 0x262   : > { %v2178_v6 = vsel %vm318_vm4, %v2175_v43, %v2177_v58  ;;  %v2271_v43 = vmul.f32 %v2268_v44, %v6906_v5  ;;  %v2237_v58 = vmul.f32 %v2235_v37, %v6896_v8 }
 0x263   : > { %v2199_v0 = vrot.slane %v2192_v61, 2  ;;  %v2330_v61 = vstv %s5806_s15  ;;  %s5825_s15 = sld [smem:[#allocation3 + $0xe9]] }
 0x265   : > { %2077 = vrot.lane.b32.xlu0 %v2073_v38, %s10202_s30  ;;  %2079 = vrot.lane.b32.xlu1 %v2074_v54, %s10202_s30  ;;  %v2190_v38 = vmul.f32 %v2189_v31, %v6893_v23  ;;  %v2138_v54 = vsel %vm255_vm3, %v2135_v19, %v2137_v17  ;;  %v2200_v19 = vsel %vm318_vm4, %v2197_v59, %v2199_v0  ;;  %v2290_v17 = vstv %s5804_s11  ;;  %s5819_s11 = sld [smem:[#allocation3 + $0xe3]] }
 0x266   : > { %v2292_v46 = vmul.f32 %v2290_v17, %v6896_v8 }
 0x267   : > { %v2196_v60 = vrot.slane %v2190_v38, 2  ;;  %v2291_v38 = vmul.f32 %v2290_v17, %v6893_v23 }
 0x269   : > { %2117 = vrot.lane.b32.xlu0 %v2114_v53, %s10204_s14  ;;  %2119 = vrot.lane.b32.xlu1 %v2116_v57, %s10204_s14  ;;  %v2198_v31 = vsel %vm318_vm4, %v2196_v60, %v2197_v59  ;;  %v2221_v53 = vmul.f32 %v2220_v45, %v6893_v23  ;;  %v2222_v57 = vmul.f32 %v2220_v45, %v6896_v8  ;;  %v2278_v60 = vrot.slane %v2271_v43, 1 }
 0x26a   : > { %v2293_v59 = vmul.f32 %v2290_v17, %v6906_v5  ;;  %v2297_v0 = vrot.slane %v2291_v38, 1  ;;  %v2332_v45 = vmul.f32 %v2330_v61, %v6896_v8  ;;  %v2352_v17 = vstv %s5807_s19  ;;  %s5827_s19 = sld [smem:[#allocation3 + $0x106]] }
 0x26c   : > { %v2338_v43 = vrot.slane %v2332_v45, 2 }
 0x26d   : > { %2139 = vrot.lane.b32.xlu0 %v2136_v30, %s10202_s30  ;;  %2141 = vrot.lane.b32.xlu1 %v2138_v54, %s10202_s30  ;;  %v2269_v30 = vmul.f32 %v2268_v44, %v6893_v23  ;;  %v2236_v54 = vmul.f32 %v2235_v37, %v6893_v23  ;;  %v2333_v44 = vmul.f32 %v2330_v61, %v6906_v5  ;;  %v2300_v37 = vrot.slane %v2293_v59, 1 }
 0x26f   : > { %v2340_v38 = vrot.slane %v2333_v44, 2 }
 0x271   : > { %2179 = vrot.lane.b32.xlu0 %v2176_v52, %s10204_s14  ;;  %2181 = vrot.lane.b32.xlu1 %v2178_v6, %s10204_s14  ;;  %v2275_v52 = vrot.slane %v2269_v30, 1  ;;  %v2276_v6 = vrot.slane %v2270_v18, 1 }
 0x275   : > { %2201 = vrot.lane.b32.xlu0 %v2198_v31, %s10202_s30  ;;  %2203 = vrot.lane.b32.xlu1 %v2200_v19, %s10202_s30  ;;  %v2298_v31 = vrot.slane %v2292_v46, 1  ;;  %v2331_v19 = vmul.f32 %v2330_v61, %v6893_v23  ;;  %v2354_v46 = vmul.f32 %v2352_v17, %v6896_v8  ;;  %v2355_v61 = vmul.f32 %v2352_v17, %v6906_v5 }
 0x277   : > { %v2299_v30 = vsel %vm255_vm3, %v2297_v0, %v2298_v31  ;;  %v2337_v18 = vrot.slane %v2331_v19, 2  ;;  %v2360_v59 = vrot.slane %v2354_v46, 2  ;;  %v2362_v0 = vrot.slane %v2355_v61, 2 }
 0x279   : > { %2225 = vrot.lane.b32.xlu0 %v2221_v53, %s10204_s14  ;;  %2227 = vrot.lane.b32.xlu1 %v2222_v57, %s10204_s14  ;;  %v2277_v53 = vsel %vm255_vm3, %v2275_v52, %v2276_v6  ;;  %v2279_v57 = vsel %vm255_vm3, %v2276_v6, %v2278_v60  ;;  %v2339_v52 = vsel %vm318_vm4, %v2337_v18, %v2338_v43 }
 0x27a   : > { %v2341_v6 = vsel %vm318_vm4, %v2338_v43, %v2340_v38  ;;  %v2363_v44 = vsel %vm318_vm4, %v2360_v59, %v2362_v0  ;;  %v2453_v43 = vstv %s5813_s21  ;;  %v2398_v38 = vstv %s5810_s0  ;;  %s5828_s21 = sld [smem:[#allocation3 + $0x107]]  ;;  %s5833_s0 = sld [smem:[#allocation3 + $0x10c]] }
 0x27b   : > { %v2454_v61 = vmul.f32 %v2453_v43, %v6893_v23  ;;  %v2455_v0 = vmul.f32 %v2453_v43, %v6896_v8 }
 0x27d   : > { %2240 = vrot.lane.b32.xlu0 %v2236_v54, %s10202_s30  ;;  %2242 = vrot.lane.b32.xlu1 %v2237_v58, %s10202_s30  ;;  %v2301_v54 = vsel %vm255_vm3, %v2298_v31, %v2300_v37  ;;  %v2353_v58 = vmul.f32 %v2352_v17, %v6893_v23 }
 0x27f   : > { %v2359_v60 = vrot.slane %v2353_v58, 2 }
 0x281   : > { %2280 = vrot.lane.b32.xlu0 %v2277_v53, %s10204_s14  ;;  %2282 = vrot.lane.b32.xlu1 %v2279_v57, %s10204_s14  ;;  %v2361_v45 = vsel %vm318_vm4, %v2359_v60, %v2360_v59  ;;  %v2383_v53 = vstv %s5809_s17  ;;  %v2431_v57 = vstv %s5812_s18  ;;  %v2399_v60 = vmul.f32 %v2398_v38, %v6893_v23  ;;  %s5830_s17 = sld [smem:[#allocation3 + $0x109]]  ;;  %s5831_s18 = sld [smem:[#allocation3 + $0x10a]] }
 0x282   : > { %v2385_v18 = vmul.f32 %v2383_v53, %v6896_v8  ;;  %v2433_v58 = vmul.f32 %v2431_v57, %v6896_v8  ;;  %v2434_v46 = vmul.f32 %v2431_v57, %v6906_v5  ;;  %v2400_v59 = vmul.f32 %v2398_v38, %v6896_v8 }
 0x285   : > { %2302 = vrot.lane.b32.xlu0 %v2299_v30, %s10202_s30  ;;  %2304 = vrot.lane.b32.xlu1 %v2301_v54, %s10202_s30  ;;  %v2384_v30 = vmul.f32 %v2383_v53, %v6893_v23  ;;  %v2432_v54 = vmul.f32 %v2431_v57, %v6893_v23  ;;  %v2439_v53 = vrot.slane %v2433_v58, 1  ;;  %v2441_v57 = vrot.slane %v2434_v46, 1 }
 0x286   : > { %v2515_v46 = vstv %s5816_s3  ;;  %s5838_s3 = sld [smem:[#allocation3 + $0x13]] }
 0x289   : > { %2342 = vrot.lane.b32.xlu0 %v2339_v52, %s10204_s14  ;;  %2344 = vrot.lane.b32.xlu1 %v2341_v6, %s10204_s14 }
 0x28b   : > { %v7078_v31 = vpop.permute.xlu1 %1575  ;;  %v7080_v19 = vpop.permute.xlu0 %1573 }
 0x28c   : > { %10317 = vst [vmem:[#allocation104_spill] sm:$0xff] %v7078_v31  ;;  %10318 = vst [vmem:[#allocation105_spill] sm:$0xff] %v7080_v19 }
 0x28d   : > { %2364 = vrot.lane.b32.xlu0 %v2361_v45, %s10202_s30  ;;  %2366 = vrot.lane.b32.xlu1 %v2363_v44, %s10202_s30  ;;  %v2456_v45 = vmul.f32 %v2453_v43, %v6906_v5  ;;  %v2438_v44 = vrot.slane %v2432_v54, 1  ;;  %v2442_v54 = vsel %vm255_vm3, %v2439_v53, %v2441_v57  ;;  %v2517_v57 = vmul.f32 %v2515_v46, %v6896_v8 }
 0x28f   : > { %v7086_v37 = vpop.permute.xlu1 %1590  ;;  %v7088_v17 = vpop.permute.xlu0 %1588  ;;  %v2440_v43 = vsel %vm255_vm3, %v2438_v44, %v2439_v53  ;;  %v2516_v53 = vmul.f32 %v2515_v46, %v6893_v23 }
 0x290   : > { %10319 = vst [vmem:[#allocation106_spill] sm:$0xff] %v7086_v37  ;;  %10320 = vst [vmem:[#allocation107_spill] sm:$0xff] %v7088_v17  ;;  %v2461_v17 = vrot.slane %v2455_v0, 1  ;;  %v2463_v37 = vrot.slane %v2456_v45, 1 }
 0x291   : > { %2388 = vrot.lane.b32.xlu0 %v2384_v30, %s10204_s14  ;;  %2390 = vrot.lane.b32.xlu1 %v2385_v18, %s10204_s14  ;;  %v2493_v30 = vstv %s5815_s28  ;;  %v2460_v18 = vrot.slane %v2454_v61, 1  ;;  %s5834_s28 = sld [smem:[#allocation3 + $0x10d]] }
 0x292   : > { %v2494_v38 = vmul.f32 %v2493_v30, %v6893_v23  ;;  %v2495_v19 = vmul.f32 %v2493_v30, %v6896_v8  ;;  %v2496_v58 = vmul.f32 %v2493_v30, %v6906_v5  ;;  %v2464_v0 = vsel %vm255_vm3, %v2461_v17, %v2463_v37 }
 0x293   : > { %v7098_v52 = vpop.permute.xlu1 %1630  ;;  %v7100_v6 = vpop.permute.xlu0 %1628  ;;  %v2518_v30 = vmul.f32 %v2515_v46, %v6906_v5 }
 0x294   : > { %10321 = vst [vmem:[#allocation108_spill] sm:$0xff] %v7098_v52  ;;  %10322 = vst [vmem:[#allocation109_spill] sm:$0xff] %v7100_v6  ;;  %v2500_v45 = vrot.slane %v2494_v38, 2  ;;  %v2503_v44 = vrot.slane %v2496_v58, 2  ;;  %v2523_v38 = vrot.slane %v2517_v57, 2 }
 0x295   : > { %2403 = vrot.lane.b32.xlu0 %v2399_v60, %s10202_s30  ;;  %2405 = vrot.lane.b32.xlu1 %v2400_v59, %s10202_s30  ;;  %v2462_v59 = vsel %vm255_vm3, %v2460_v18, %v2461_v17  ;;  %v2522_v17 = vrot.slane %v2516_v53, 2 }
 0x297   : > { %v7108_v52 = vpop.permute.xlu1 %1652  ;;  %v7110_v6 = vpop.permute.xlu0 %1650 }
 0x298   : > { %10323 = vst [vmem:[#allocation110_spill] sm:$0xff] %v7108_v52  ;;  %10324 = vst [vmem:[#allocation111_spill] sm:$0xff] %v7110_v6  ;;  %v2501_v6 = vrot.slane %v2495_v19, 2 }
 0x299   : > { %2443 = vrot.lane.b32.xlu0 %v2440_v43, %s10204_s14  ;;  %2445 = vrot.lane.b32.xlu1 %v2442_v54, %s10204_s14  ;;  %v2525_v54 = vrot.slane %v2518_v30, 2 }
 0x29a   : > { %v2502_v37 = vsel %vm318_vm4, %v2500_v45, %v2501_v6  ;;  %v2504_v19 = vsel %vm318_vm4, %v2501_v6, %v2503_v44  ;;  %v2546_v45 = vstv %s5818_s4  ;;  %v2594_v6 = vstv %s5821_s9  ;;  %s5841_s4 = sld [smem:[#allocation3 + $0x16]]  ;;  %s5839_s9 = sld [smem:[#allocation3 + $0x14]] }
 0x29b   : > { %v7119_v61 = vpop.permute.xlu1 %1692  ;;  %v7121_v60 = vpop.permute.xlu0 %1690  ;;  %v2547_v57 = vmul.f32 %v2546_v45, %v6893_v23  ;;  %v2548_v30 = vmul.f32 %v2546_v45, %v6896_v8 }
 0x29c   : > { %10325 = vst [vmem:[#allocation112_spill] sm:$0xff] %v7119_v61  ;;  %10326 = vst [vmem:[#allocation113_spill] sm:$0xff] %v7121_v60 }
 0x29d   : > { %2465 = vrot.lane.b32.xlu0 %v2462_v59, %s10202_s30  ;;  %2467 = vrot.lane.b32.xlu1 %v2464_v0, %s10202_s30  ;;  %v2524_v59 = vsel %vm318_vm4, %v2522_v17, %v2523_v38  ;;  %v2526_v0 = vsel %vm318_vm4, %v2523_v38, %v2525_v54  ;;  %v2595_v17 = vmul.f32 %v2594_v6, %v6893_v23 }
 0x29e   : > { %v2596_v38 = vmul.f32 %v2594_v6, %v6896_v8  ;;  %v2597_v54 = vmul.f32 %v2594_v6, %v6906_v5 }
 0x29f   : > { %v7130_v43 = vpop.permute.xlu1 %1714  ;;  %v7132_v18 = vpop.permute.xlu0 %1712  ;;  %v2601_v6 = vrot.slane %v2595_v17, 1 }
 0x2a0   : > { %10327 = vst [vmem:[#allocation114_spill] sm:$0xff] %v7130_v43  ;;  %10328 = vst [vmem:[#allocation115_spill] sm:$0xff] %v7132_v18  ;;  %v2602_v52 = vrot.slane %v2596_v38, 1 }
 0x2a1   : > { %2505 = vrot.lane.b32.xlu0 %v2502_v37, %s10204_s14  ;;  %2507 = vrot.lane.b32.xlu1 %v2504_v19, %s10204_s14  ;;  %v2616_v37 = vstv %s5822_s10  ;;  %v2561_v19 = vstv %s5819_s11  ;;  %s5842_s10 = sld [smem:[#allocation3 + $0x17]]  ;;  %s5844_s11 = sld [smem:[#allocation3 + $0x19]] }
 0x2a2   : > { %v2562_v45 = vmul.f32 %v2561_v19, %v6893_v23  ;;  %v2563_v43 = vmul.f32 %v2561_v19, %v6896_v8  ;;  %v2618_v60 = vmul.f32 %v2616_v37, %v6896_v8  ;;  %v2619_v61 = vmul.f32 %v2616_v37, %v6906_v5 }
 0x2a3   : > { %v7138_v58 = vpop.permute.xlu1 %1738  ;;  %v7140_v46 = vpop.permute.xlu0 %1736 }
 0x2a4   : > { %10329 = vst [vmem:[#allocation116_spill] sm:$0xff] %v7138_v58  ;;  %10330 = vst [vmem:[#allocation117_spill] sm:$0xff] %v7140_v46  ;;  %v2626_v46 = vrot.slane %v2619_v61, 1 }
 0x2a5   : > { %2527 = vrot.lane.b32.xlu0 %v2524_v59, %s10202_s30  ;;  %2529 = vrot.lane.b32.xlu1 %v2526_v0, %s10202_s30  ;;  %v2617_v59 = vmul.f32 %v2616_v37, %v6893_v23  ;;  %v2603_v37 = vsel %vm255_vm3, %v2601_v6, %v2602_v52 }
 0x2a7   : > { %v7146_v44 = vpop.permute.xlu1 %1753  ;;  %v7148_v53 = vpop.permute.xlu0 %1751 }
 0x2a8   : > { %10331 = vst [vmem:[#allocation118_spill] sm:$0xff] %v7146_v44  ;;  %10332 = vst [vmem:[#allocation119_spill] sm:$0xff] %v7148_v53  ;;  %v2656_v53 = vstv %s5824_s12  ;;  %v2624_v44 = vrot.slane %v2618_v60, 1  ;;  %s5845_s12 = sld [smem:[#allocation3 + $0x1a]] }
 0x2a9   : > { %2551 = vrot.lane.b32.xlu0 %v2547_v57, %s10204_s14  ;;  %2553 = vrot.lane.b32.xlu1 %v2548_v30, %s10204_s14  ;;  %v2604_v57 = vrot.slane %v2597_v54, 1  ;;  %v2623_v30 = vrot.slane %v2617_v59, 1  ;;  %v2657_v19 = vmul.f32 %v2656_v53, %v6893_v23  ;;  %v2658_v58 = vmul.f32 %v2656_v53, %v6896_v8 }
 0x2aa   : > { %v2659_v38 = vmul.f32 %v2656_v53, %v6906_v5  ;;  %v2627_v60 = vsel %vm255_vm3, %v2624_v44, %v2626_v46 }
 0x2ab   : > { %v7158_v0 = vpop.permute.xlu1 %1793  ;;  %v7160_v18 = vpop.permute.xlu0 %1791  ;;  %v2605_v17 = vsel %vm255_vm3, %v2602_v52, %v2604_v57  ;;  %v2625_v61 = vsel %vm255_vm3, %v2623_v30, %v2624_v44 }
 0x2ac   : > { %10333 = vst [vmem:[#allocation120_spill] sm:$0xff] %v7158_v0  ;;  %10334 = vst [vmem:[#allocation121_spill] sm:$0xff] %v7160_v18  ;;  %v2666_v6 = vrot.slane %v2659_v38, 2 }
 0x2ad   : > { %2566 = vrot.lane.b32.xlu0 %v2562_v45, %s10202_s30  ;;  %2568 = vrot.lane.b32.xlu1 %v2563_v43, %s10202_s30  ;;  %v2678_v43 = vstv %s5825_s15  ;;  %v2663_v45 = vrot.slane %v2657_v19, 2  ;;  %s5847_s15 = sld [smem:[#allocation3 + $0x37]] }
 0x2ae   : > { %v2679_v52 = vmul.f32 %v2678_v43, %v6893_v23  ;;  %v2680_v53 = vmul.f32 %v2678_v43, %v6896_v8  ;;  %v2681_v57 = vmul.f32 %v2678_v43, %v6906_v5 }
 0x2af   : > { %v7168_v0 = vpop.permute.xlu1 %1815  ;;  %v7170_v18 = vpop.permute.xlu0 %1813 }
 0x2b0   : > { %10335 = vst [vmem:[#allocation122_spill] sm:$0xff] %v7168_v0  ;;  %10336 = vst [vmem:[#allocation123_spill] sm:$0xff] %v7170_v18  ;;  %v2664_v18 = vrot.slane %v2658_v58, 2  ;;  %v2685_v44 = vrot.slane %v2679_v52, 2  ;;  %v2686_v19 = vrot.slane %v2680_v53, 2 }
 0x2b1   : > { %2606 = vrot.lane.b32.xlu0 %v2603_v37, %s10204_s14  ;;  %2608 = vrot.lane.b32.xlu1 %v2605_v17, %s10204_s14  ;;  %v2688_v17 = vrot.slane %v2681_v57, 2 }
 0x2b2   : > { %v2665_v46 = vsel %vm318_vm4, %v2663_v45, %v2664_v18  ;;  %v2667_v58 = vsel %vm318_vm4, %v2664_v18, %v2666_v6  ;;  %v2709_v45 = vstv %s5827_s19  ;;  %v2757_v18 = vstv %s5830_s17  ;;  %s5850_s19 = sld [smem:[#allocation3 + $0x3a]]  ;;  %s5848_s17 = sld [smem:[#allocation3 + $0x38]] }
 0x2b3   : > { %v7179_v54 = vpop.permute.xlu1 %1855  ;;  %v7181_v59 = vpop.permute.xlu0 %1853  ;;  %v2710_v53 = vmul.f32 %v2709_v45, %v6893_v23  ;;  %v2711_v57 = vmul.f32 %v2709_v45, %v6896_v8 }
 0x2b4   : > { %10337 = vst [vmem:[#allocation124_spill] sm:$0xff] %v7179_v54  ;;  %10338 = vst [vmem:[#allocation125_spill] sm:$0xff] %v7181_v59 }
 0x2b5   : > { %2628 = vrot.lane.b32.xlu0 %v2625_v61, %s10202_s30  ;;  %2630 = vrot.lane.b32.xlu1 %v2627_v60, %s10202_s30  ;;  %v2687_v61 = vsel %vm318_vm4, %v2685_v44, %v2686_v19  ;;  %v2689_v60 = vsel %vm318_vm4, %v2686_v19, %v2688_v17  ;;  %v2758_v44 = vmul.f32 %v2757_v18, %v6893_v23 }
 0x2b6   : > { %v2759_v19 = vmul.f32 %v2757_v18, %v6896_v8  ;;  %v2760_v17 = vmul.f32 %v2757_v18, %v6906_v5 }
 0x2b7   : > { %v7190_v37 = vpop.permute.xlu1 %1877  ;;  %v7192_v30 = vpop.permute.xlu0 %1875  ;;  %v2764_v18 = vrot.slane %v2758_v44, 1 }
 0x2b8   : > { %10339 = vst [vmem:[#allocation126_spill] sm:$0xff] %v7190_v37  ;;  %10340 = vst [vmem:[#allocation127_spill] sm:$0xff] %v7192_v30 }
 0x2b9   : > { %2668 = vrot.lane.b32.xlu0 %v2665_v46, %s10204_s14  ;;  %2670 = vrot.lane.b32.xlu1 %v2667_v58, %s10204_s14  ;;  %v2779_v46 = vstv %s5831_s18  ;;  %v2724_v58 = vstv %s5828_s21  ;;  %s5851_s18 = sld [smem:[#allocation3 + $0x3b]]  ;;  %s5853_s21 = sld [smem:[#allocation3 + $0x3d]] }
 0x2ba   : > { %v2725_v45 = vmul.f32 %v2724_v58, %v6893_v23  ;;  %v2726_v37 = vmul.f32 %v2724_v58, %v6896_v8  ;;  %v2781_v59 = vmul.f32 %v2779_v46, %v6896_v8  ;;  %v2782_v54 = vmul.f32 %v2779_v46, %v6906_v5 }
 0x2bb   : > { %v7198_v38 = vpop.permute.xlu1 %1901  ;;  %v7200_v43 = vpop.permute.xlu0 %1899 }
 0x2bc   : > { %10341 = vst [vmem:[#allocation128_spill] sm:$0xff] %v7198_v38  ;;  %10342 = vst [vmem:[#allocation129_spill] sm:$0xff] %v7200_v43  ;;  %v2787_v43 = vrot.slane %v2781_v59, 1  ;;  %v2789_v38 = vrot.slane %v2782_v54, 1 }
 0x2bd   : > { %2690 = vrot.lane.b32.xlu0 %v2687_v61, %s10202_s30  ;;  %2692 = vrot.lane.b32.xlu1 %v2689_v60, %s10202_s30  ;;  %v2780_v61 = vmul.f32 %v2779_v46, %v6893_v23 }
 0x2bf   : > { %v7206_v6 = vpop.permute.xlu1 %1916  ;;  %v7208_v52 = vpop.permute.xlu0 %1914 }
 0x2c0   : > { %10343 = vst [vmem:[#allocation130_spill] sm:$0xff] %v7206_v6  ;;  %10344 = vst [vmem:[#allocation131_spill] sm:$0xff] %v7208_v52  ;;  %v2765_v52 = vrot.slane %v2759_v19, 1  ;;  %v2819_v6 = vstv %s5833_s0  ;;  %s5854_s0 = sld [smem:[#allocation3 + $0x3e]] }
 0x2c1   : > { %2714 = vrot.lane.b32.xlu0 %v2710_v53, %s10204_s14  ;;  %2716 = vrot.lane.b32.xlu1 %v2711_v57, %s10204_s14  ;;  %v2767_v53 = vrot.slane %v2760_v17, 1  ;;  %v2786_v57 = vrot.slane %v2780_v61, 1  ;;  %v2820_v58 = vmul.f32 %v2819_v6, %v6893_v23  ;;  %v2821_v0 = vmul.f32 %v2819_v6, %v6896_v8 }
 0x2c2   : > { %v2766_v46 = vsel %vm255_vm3, %v2764_v18, %v2765_v52  ;;  %v2822_v19 = vmul.f32 %v2819_v6, %v6906_v5  ;;  %v2790_v61 = vsel %vm255_vm3, %v2787_v43, %v2789_v38  ;;  %v5835_v38 = vld [vmem:[%s6358_s20 + $0x20] sm:$0xff] }
 0x2c3   : > { %v7218_v60 = vpop.permute.xlu1 %1956  ;;  %v7220_v30 = vpop.permute.xlu0 %1954  ;;  %v2768_v44 = vsel %vm255_vm3, %v2765_v52, %v2767_v53  ;;  %v2788_v59 = vsel %vm255_vm3, %v2786_v57, %v2787_v43  ;;  %v2827_v18 = vrot.slane %v2821_v0, 2  ;;  %v5836_v43 = vld [vmem:[%s6358_s20 + $0x28] sm:$0xff] }
 0x2c4   : > { %10345 = vst [vmem:[#allocation132_spill] sm:$0xff] %v7218_v60  ;;  %10346 = vst [vmem:[#allocation133_spill] sm:$0xff] %v7220_v30  ;;  %v2829_v52 = vrot.slane %v2822_v19, 2 }
 0x2c5   : > { %2729 = vrot.lane.b32.xlu0 %v2725_v45, %s10202_s30  ;;  %2731 = vrot.lane.b32.xlu1 %v2726_v37, %s10202_s30  ;;  %v2841_v37 = vstv %s5834_s28  ;;  %v2826_v45 = vrot.slane %v2820_v58, 2  ;;  %s5856_s28 = sld [smem:[#allocation3 + $0x5b]] }
 0x2c6   : > { %v2842_v6 = vmul.f32 %v2841_v37, %v6893_v23  ;;  %v2843_v53 = vmul.f32 %v2841_v37, %v6896_v8  ;;  %v2830_v0 = vsel %vm318_vm4, %v2827_v18, %v2829_v52 }
 0x2c7   : > { %v7228_v60 = vpop.permute.xlu1 %1978  ;;  %v7230_v30 = vpop.permute.xlu0 %1976  ;;  %v2828_v57 = vsel %vm318_vm4, %v2826_v45, %v2827_v18 }
 0x2c8   : > { %10347 = vst [vmem:[#allocation134_spill] sm:$0xff] %v7228_v60  ;;  %10348 = vst [vmem:[#allocation135_spill] sm:$0xff] %v7230_v30  ;;  %v2848_v58 = vrot.slane %v2842_v6, 2  ;;  %v2849_v19 = vrot.slane %v2843_v53, 2  ;;  %v2873_v6 = vrot.slane %v5836_v43, 5 }
 0x2c9   : > { %2769 = vrot.lane.b32.xlu0 %v2766_v46, %s10204_s14  ;;  %2771 = vrot.lane.b32.xlu1 %v2768_v44, %s10204_s14  ;;  %v2844_v46 = vmul.f32 %v2841_v37, %v6906_v5  ;;  %v2865_v37 = vrot.slane %v5835_v38, 1 }
 0x2ca   : > { %v2850_v45 = vsel %vm318_vm4, %v2848_v58, %v2849_v19 }
 0x2cb   : > { %v7239_v17 = vpop.permute.xlu1 %2018  ;;  %v7241_v54 = vpop.permute.xlu0 %2016 }
 0x2cc   : > { %10349 = vst [vmem:[#allocation136_spill] sm:$0xff] %v7239_v17  ;;  %10350 = vst [vmem:[#allocation137_spill] sm:$0xff] %v7241_v54  ;;  %v2851_v17 = vrot.slane %v2844_v46, 2 }
 0x2cd   : > { %2791 = vrot.lane.b32.xlu0 %v2788_v59, %s10202_s30  ;;  %2793 = vrot.lane.b32.xlu1 %v2790_v61, %s10202_s30  ;;  %v2868_v59 = vrot.slane %v5835_v38, 7  ;;  %v2869_v61 = vrot.slane %v5836_v43, 7 }
 0x2cf   : > { %v7250_v44 = vpop.permute.xlu1 %2040  ;;  %v7252_v54 = vpop.permute.xlu0 %2038  ;;  %v2875_v18 = vsel %vm162_vm0, %v2865_v37, %v2868_v59  ;;  %v2870_v52 = vsel %vm162_vm0, %v2868_v59, %v2869_v61 }
 0x2d0   : > { %10351 = vst [vmem:[#allocation138_spill] sm:$0xff] %v7250_v44  ;;  %10352 = vst [vmem:[#allocation139_spill] sm:$0xff] %v7252_v54  ;;  %v2852_v54 = vsel %vm318_vm4, %v2849_v19, %v2851_v17 }
 0x2d1   : > { %2831 = vrot.lane.b32.xlu0 %v2828_v57, %s10204_s14  ;;  %2833 = vrot.lane.b32.xlu1 %v2830_v0, %s10204_s14  ;;  %v2876_v57 = vsel %vm162_vm0, %v2869_v61, %v2873_v6 }
 0x2d3   : > { %v7260_v30 = vpop.permute.xlu1 %2064  ;;  %v7262_v44 = vpop.permute.xlu0 %2062 }
 0x2d4   : > { %10353 = vst [vmem:[#allocation140_spill] sm:$0xff] %v7260_v30  ;;  %10354 = vst [vmem:[#allocation141_spill] sm:$0xff] %v7262_v44 }
 0x2d5   : > { %2853 = vrot.lane.b32.xlu0 %v2850_v45, %s10202_s30  ;;  %2855 = vrot.lane.b32.xlu1 %v2852_v54, %s10202_s30 }
 0x2d7   : > { %v7270_v53 = vpop.permute.xlu1 %2079  ;;  %v7272_v46 = vpop.permute.xlu0 %2077 }
 0x2d8   : > { %10355 = vst [vmem:[#allocation142_spill] sm:$0xff] %v7270_v53  ;;  %10356 = vst [vmem:[#allocation143_spill] sm:$0xff] %v7272_v46 }
 0x2d9   : > { %2879 = vrot.lane.b32.xlu0 %v2875_v18, %s10204_s14  ;;  %2881 = vrot.lane.b32.xlu1 %v2870_v52, %s10204_s14 }
 0x2db   : > { %v7277_v17 = vpop.permute.xlu1 %2119  ;;  %v7279_v38 = vpop.permute.xlu0 %2117 }
 0x2dc   : > { %10357 = vst [vmem:[#allocation144_spill] sm:$0xff] %v7277_v17  ;;  %10358 = vst [vmem:[#allocation145_spill] sm:$0xff] %v7279_v38 }
 0x2dd   : > { %2888 = vrot.lane.b32.xlu1 %v2875_v18, %s6206_s5  ;;  %2883 = vrot.lane.b32.xlu0 %v2876_v57, %s10204_s14 }
 0x2df   : > { %v7283_v54 = vpop.permute.xlu1 %2141  ;;  %v7285_v43 = vpop.permute.xlu0 %2139 }
 0x2e0   : > { %10359 = vst [vmem:[#allocation146_spill] sm:$0xff] %v7283_v54  ;;  %10360 = vst [vmem:[#allocation147_spill] sm:$0xff] %v7285_v43 }
 0x2e1   : > { %2892 = vrot.lane.b32.xlu1 %v2876_v57, %s6206_s5  ;;  %2890 = vrot.lane.b32.xlu0 %v2870_v52, %s6206_s5 }
 0x2e3   : > { %v7289_v0 = vpop.permute.xlu1 %2181  ;;  %v7291_v58 = vpop.permute.xlu0 %2179 }
 0x2e4   : > { %10361 = vst [vmem:[#allocation148_spill] sm:$0xff] %v7289_v0  ;;  %10362 = vst [vmem:[#allocation149_spill] sm:$0xff] %v7291_v58 }
 0x2e5   : > { %2899 = vrot.lane.b32.xlu1 %v2870_v52, %s6207_s16  ;;  %2897 = vrot.lane.b32.xlu0 %v2875_v18, %s6207_s16 }
 0x2e7   : > { %v7295_v19 = vpop.permute.xlu1 %2203  ;;  %v7297_v37 = vpop.permute.xlu0 %2201 }
 0x2e8   : > { %10363 = vst [vmem:[#allocation150_spill] sm:$0xff] %v7295_v19  ;;  %10364 = vst [vmem:[#allocation151_spill] sm:$0xff] %v7297_v37 }
 0x2e9   : > { %2901 = vrot.lane.b32.xlu0 %v2876_v57, %s6207_s16 }
 0x2eb   : > { %v7300_v59 = vpop.permute.xlu1 %2227  ;;  %v7302_v61 = vpop.permute.xlu0 %2225 }
 0x2ec   : > { %10365 = vst [vmem:[#allocation152_spill] sm:$0xff] %v7300_v59  ;;  %10366 = vst [vmem:[#allocation153_spill] sm:$0xff] %v7302_v61  ;;  %v2937_v61 = vstv %s5839_s9  ;;  %s5860_s9 = sld [smem:[#allocation3 + $0x5f]] }
 0x2ef   : > { %v7304_v45 = vpop.permute.xlu1 %2242  ;;  %v7306_v6 = vpop.permute.xlu0 %2240 }
 0x2f0   : > { %10367 = vst [vmem:[#allocation154_spill] sm:$0xff] %v7304_v45  ;;  %10368 = vst [vmem:[#allocation155_spill] sm:$0xff] %v7306_v6  ;;  %v2970_v6 = vstv %s5841_s4  ;;  %s5857_s4 = sld [smem:[#allocation3 + $0x5c]] }
 0x2f3   : > { %v7308_v0 = vpop.permute.xlu1 %2282  ;;  %v7310_v58 = vpop.permute.xlu0 %2280 }
 0x2f4   : > { %10369 = vst [vmem:[#allocation156_spill] sm:$0xff] %v7308_v0  ;;  %10370 = vst [vmem:[#allocation157_spill] sm:$0xff] %v7310_v58 }
 0x2f7   : > { %v7312_v52 = vpop.permute.xlu1 %2304  ;;  %v7314_v18 = vpop.permute.xlu0 %2302 }
 0x2f8   : > { %10371 = vst [vmem:[#allocation158_spill] sm:$0xff] %v7312_v52  ;;  %10372 = vst [vmem:[#allocation159_spill] sm:$0xff] %v7314_v18 }
 0x2fb   : > { %v7316_v19 = vpop.permute.xlu1 %2344  ;;  %v7318_v37 = vpop.permute.xlu0 %2342 }
 0x2fc   : > { %10373 = vst [vmem:[#allocation160_spill] sm:$0xff] %v7316_v19  ;;  %10374 = vst [vmem:[#allocation161_spill] sm:$0xff] %v7318_v37 }
 0x2ff   : > { %v7320_v57 = vpop.permute.xlu1 %2366  ;;  %v7322_v43 = vpop.permute.xlu0 %2364 }
 0x300   : > { %10375 = vst [vmem:[#allocation162_spill] sm:$0xff] %v7320_v57  ;;  %10376 = vst [vmem:[#allocation163_spill] sm:$0xff] %v7322_v43 }
 0x303   : > { %v7324_v54 = vpop.permute.xlu1 %2390  ;;  %v7326_v38 = vpop.permute.xlu0 %2388 }
 0x304   : > { %10377 = vst [vmem:[#allocation164_spill] sm:$0xff] %v7324_v54  ;;  %10378 = vst [vmem:[#allocation165_spill] sm:$0xff] %v7326_v38 }
 0x307   : > { %v7328_v17 = vpop.permute.xlu1 %2405  ;;  %v7330_v0 = vpop.permute.xlu0 %2403 }
 0x308   : > { %10379 = vst [vmem:[#allocation166_spill] sm:$0xff] %v7328_v17  ;;  %10380 = vst [vmem:[#allocation167_spill] sm:$0xff] %v7330_v0 }
 0x30b   : > { %v7332_v58 = vpop.permute.xlu1 %2445  ;;  %v7334_v52 = vpop.permute.xlu0 %2443 }
 0x30c   : > { %10381 = vst [vmem:[#allocation168_spill] sm:$0xff] %v7332_v58  ;;  %10382 = vst [vmem:[#allocation169_spill] sm:$0xff] %v7334_v52 }
 0x30f   : > { %v7336_v18 = vpop.permute.xlu1 %2467  ;;  %v7338_v19 = vpop.permute.xlu0 %2465 }
 0x310   : > { %10383 = vst [vmem:[#allocation170_spill] sm:$0xff] %v7336_v18  ;;  %10384 = vst [vmem:[#allocation171_spill] sm:$0xff] %v7338_v19 }
 0x313   : > { %v7340_v37 = vpop.permute.xlu1 %2507  ;;  %v7342_v57 = vpop.permute.xlu0 %2505 }
 0x314   : > { %10385 = vst [vmem:[#allocation172_spill] sm:$0xff] %v7340_v37  ;;  %10386 = vst [vmem:[#allocation173_spill] sm:$0xff] %v7342_v57 }
 0x317   : > { %v7344_v43 = vpop.permute.xlu1 %2529  ;;  %v7346_v54 = vpop.permute.xlu0 %2527 }
 0x318   : > { %10387 = vst [vmem:[#allocation174_spill] sm:$0xff] %v7344_v43  ;;  %10388 = vst [vmem:[#allocation175_spill] sm:$0xff] %v7346_v54 }
 0x31b   : > { %v7348_v38 = vpop.permute.xlu1 %2553  ;;  %v7350_v17 = vpop.permute.xlu0 %2551 }
 0x31c   : > { %10389 = vst [vmem:[#allocation176_spill] sm:$0xff] %v7348_v38  ;;  %10390 = vst [vmem:[#allocation177_spill] sm:$0xff] %v7350_v17 }
 0x31f   : > { %v7352_v0 = vpop.permute.xlu1 %2568  ;;  %v7354_v58 = vpop.permute.xlu0 %2566 }
 0x320   : > { %10391 = vst [vmem:[#allocation178_spill] sm:$0xff] %v7352_v0  ;;  %10392 = vst [vmem:[#allocation179_spill] sm:$0xff] %v7354_v58 }
 0x323   : > { %v7356_v52 = vpop.permute.xlu1 %2608  ;;  %v7358_v18 = vpop.permute.xlu0 %2606 }
 0x324   : > { %10393 = vst [vmem:[#allocation180_spill] sm:$0xff] %v7356_v52  ;;  %10394 = vst [vmem:[#allocation181_spill] sm:$0xff] %v7358_v18 }
 0x327   : > { %v7360_v19 = vpop.permute.xlu1 %2630  ;;  %v7362_v37 = vpop.permute.xlu0 %2628 }
 0x328   : > { %10395 = vst [vmem:[#allocation182_spill] sm:$0xff] %v7360_v19  ;;  %10396 = vst [vmem:[#allocation183_spill] sm:$0xff] %v7362_v37 }
 0x32b   : > { %v7364_v57 = vpop.permute.xlu1 %2670  ;;  %v7366_v43 = vpop.permute.xlu0 %2668 }
 0x32c   : > { %10397 = vst [vmem:[#allocation184_spill] sm:$0xff] %v7364_v57  ;;  %10398 = vst [vmem:[#allocation185_spill] sm:$0xff] %v7366_v43 }
 0x32f   : > { %v7368_v54 = vpop.permute.xlu1 %2692  ;;  %v7370_v38 = vpop.permute.xlu0 %2690 }
 0x330   : > { %10399 = vst [vmem:[#allocation186_spill] sm:$0xff] %v7368_v54  ;;  %10400 = vst [vmem:[#allocation187_spill] sm:$0xff] %v7370_v38 }
 0x333   : > { %v7372_v17 = vpop.permute.xlu1 %2716  ;;  %v7374_v0 = vpop.permute.xlu0 %2714 }
 0x334   : > { %10401 = vst [vmem:[#allocation188_spill] sm:$0xff] %v7372_v17  ;;  %10402 = vst [vmem:[#allocation189_spill] sm:$0xff] %v7374_v0 }
 0x337   : > { %v7376_v58 = vpop.permute.xlu1 %2731  ;;  %v7378_v52 = vpop.permute.xlu0 %2729 }
 0x338   : > { %10403 = vst [vmem:[#allocation190_spill] sm:$0xff] %v7376_v58  ;;  %10404 = vst [vmem:[#allocation191_spill] sm:$0xff] %v7378_v52 }
 0x33b   : > { %v7380_v18 = vpop.permute.xlu1 %2771  ;;  %v7382_v19 = vpop.permute.xlu0 %2769 }
 0x33c   : > { %10405 = vst [vmem:[#allocation192_spill] sm:$0xff] %v7380_v18  ;;  %10406 = vst [vmem:[#allocation193_spill] sm:$0xff] %v7382_v19 }
 0x33f   : > { %v7384_v37 = vpop.permute.xlu1 %2793  ;;  %v7386_v57 = vpop.permute.xlu0 %2791 }
 0x340   : > { %10407 = vst [vmem:[#allocation194_spill] sm:$0xff] %v7384_v37  ;;  %10408 = vst [vmem:[#allocation195_spill] sm:$0xff] %v7386_v57  ;;  %v2922_v57 = vstv %s5838_s3  ;;  %s5859_s3 = sld [smem:[#allocation3 + $0x5e]] }
 0x343   : > { %v7388_v43 = vpop.permute.xlu1 %2833  ;;  %v7390_v54 = vpop.permute.xlu0 %2831 }
 0x344   : > { %10409 = vst [vmem:[#allocation196_spill] sm:$0xff] %v7388_v43  ;;  %10410 = vst [vmem:[#allocation197_spill] sm:$0xff] %v7390_v54 }
 0x347   : > { %v7392_v38 = vpop.permute.xlu1 %2855  ;;  %v7394_v17 = vpop.permute.xlu0 %2853 }
 0x348   : > { %10411 = vst [vmem:[#allocation198_spill] sm:$0xff] %v7392_v38  ;;  %10412 = vst [vmem:[#allocation199_spill] sm:$0xff] %v7394_v17 }
 0x34b   : > { %v2882_v0 = vpop.permute.xlu1 %2881  ;;  %v2880_v58 = vpop.permute.xlu0 %2879 }
 0x34f   : > { %v2889_v52 = vpop.permute.xlu1 %2888  ;;  %v2884_v60 = vpop.permute.xlu0 %2883 }
 0x350   : > { %v2906_v43 = vsel %vm201_vm1, %v2880_v58, %v2889_v52 }
 0x353   : > { %v2893_v19 = vpop.permute.xlu1 %2892  ;;  %v2891_v37 = vpop.permute.xlu0 %2890 }
 0x354   : > { %v2907_v54 = vsel %vm201_vm1, %v2882_v0, %v2891_v37  ;;  %v2992_v0 = vstv %s5842_s10  ;;  %v2908_v37 = vsel %vm201_vm1, %v2884_v60, %v2893_v19  ;;  %v3054_v19 = vstv %s5845_s12  ;;  %s5862_s10 = sld [smem:[#allocation3 + $0x61]]  ;;  %s5865_s12 = sld [smem:[#allocation3 + $0x7f]] }
 0x357   : > { %v2900_v18 = vpop.permute.xlu1 %2899  ;;  %v2898_v38 = vpop.permute.xlu0 %2897 }
 0x358   : > { %v7399_v17 = vsel %vm205_vm2, %v2907_v54, %v2900_v18  ;;  %v7402_v45 = vsel %vm205_vm2, %v2906_v43, %v2898_v38  ;;  %v3032_v43 = vstv %s5844_s11  ;;  %s5863_s11 = sld [smem:[#allocation3 + $0x62]] }
 0x359   : > { %10413 = vst [vmem:[#allocation200_spill] sm:$0xff] %v7399_v17  ;;  %10414 = vst [vmem:[#allocation201_spill] sm:$0xff] %v7402_v45  ;;  %v2924_v46 = vmul.f32 %v2922_v57, %v7399_v17  ;;  %v2923_v53 = vmul.f32 %v2922_v57, %v7402_v45  ;;  %v2971_v59 = vmul.f32 %v2970_v6, %v7402_v45 }
 0x35a   : > { %v2972_v58 = vmul.f32 %v2970_v6, %v7399_v17  ;;  %v2939_v52 = vmul.f32 %v2937_v61, %v7399_v17  ;;  %v2938_v18 = vmul.f32 %v2937_v61, %v7402_v45  ;;  %v2993_v44 = vmul.f32 %v2992_v0, %v7402_v45 }
 0x35b   : > { %2929 = vrot.lane.b32.xlu0 %v2924_v46, %s10204_s14  ;;  %2927 = vrot.lane.b32.xlu1 %v2923_v53, %s10204_s14  ;;  %v2902_v54 = vpop.permute.xlu0 %2901  ;;  %v2977_v30 = vrot.slane %v2971_v59, 1  ;;  %v2994_v60 = vmul.f32 %v2992_v0, %v7399_v17  ;;  %v3033_v61 = vmul.f32 %v3032_v43, %v7402_v45 }
 0x35c   : > { %v7412_v38 = vsel %vm205_vm2, %v2908_v37, %v2902_v54  ;;  %v2978_v31 = vrot.slane %v2972_v58, 1  ;;  %v2999_v54 = vrot.slane %v2993_v44, 1  ;;  %v3056_v44 = vmul.f32 %v3054_v19, %v7399_v17 }
 0x35d   : > { %10415 = vst [vmem:[#allocation202_spill] sm:$0xff] %v7412_v38  ;;  %v2973_v57 = vmul.f32 %v2970_v6, %v7412_v38  ;;  %v2995_v46 = vmul.f32 %v2992_v0, %v7412_v38  ;;  %v3034_v6 = vmul.f32 %v3032_v43, %v7399_v17  ;;  %v3000_v58 = vrot.slane %v2994_v60, 1 }
 0x35e   : > { %v2979_v59 = vsel %vm255_vm3, %v2977_v30, %v2978_v31  ;;  %v3035_v8 = vmul.f32 %v3032_v43, %v7412_v38  ;;  %v3039_v0 = vrot.slane %v3033_v61, 2 }
 0x35f   : > { %2944 = vrot.lane.b32.xlu0 %v2939_v52, %s10202_s30  ;;  %2942 = vrot.lane.b32.xlu1 %v2938_v18, %s10202_s30  ;;  %v2980_v53 = vrot.slane %v2973_v57, 1  ;;  %v3002_v23 = vrot.slane %v2995_v46, 1  ;;  %v3040_v52 = vrot.slane %v3034_v6, 2  ;;  %v3055_v18 = vmul.f32 %v3054_v19, %v7402_v45 }
 0x360   : > { %v3001_v57 = vsel %vm255_vm3, %v2999_v54, %v3000_v58  ;;  %v3042_v5 = vrot.slane %v3035_v8, 2  ;;  %v3062_v46 = vrot.slane %v3056_v44, 2  ;;  %v3132_v54 = vstv %s5850_s19  ;;  %s5866_s19 = sld [smem:[#allocation3 + $0x80]] }
 0x361   : > { %v2981_v37 = vsel %vm255_vm3, %v2978_v31, %v2980_v53  ;;  %v3003_v53 = vsel %vm255_vm3, %v3000_v58, %v3002_v23  ;;  %v3057_v31 = vmul.f32 %v3054_v19, %v7412_v38  ;;  %v3061_v30 = vrot.slane %v3055_v18, 2 }
 0x362   : > { %v3041_v43 = vsel %vm318_vm4, %v3039_v0, %v3040_v52  ;;  %v3043_v60 = vsel %vm318_vm4, %v3040_v52, %v3042_v5  ;;  %v3084_v19 = vstv %s5847_s15  ;;  %v3099_v6 = vstv %s5848_s17  ;;  %s5868_s15 = sld [smem:[#allocation3 + $0x82]]  ;;  %s5869_s17 = sld [smem:[#allocation3 + $0x83]] }
 0x363   : > { %2982 = vrot.lane.b32.xlu1 %v2979_v59, %s10204_s14  ;;  %2984 = vrot.lane.b32.xlu0 %v2981_v37, %s10204_s14  ;;  %v3064_v37 = vrot.slane %v3057_v31, 2  ;;  %v3063_v8 = vsel %vm318_vm4, %v3061_v30, %v3062_v46  ;;  %v3085_v5 = vmul.f32 %v3084_v19, %v7402_v45  ;;  %v3086_v61 = vmul.f32 %v3084_v19, %v7399_v17 }
 0x364   : > { %v3133_v59 = vmul.f32 %v3132_v54, %v7402_v45  ;;  %v3134_v58 = vmul.f32 %v3132_v54, %v7399_v17  ;;  %v3135_v0 = vmul.f32 %v3132_v54, %v7412_v38  ;;  %v3154_v52 = vstv %s5851_s18  ;;  %s5871_s18 = sld [smem:[#allocation3 + $0x85]] }
 0x365   : > { %v3065_v23 = vsel %vm318_vm4, %v3062_v46, %v3064_v37  ;;  %v3194_v18 = vstv %s5853_s21  ;;  %v3100_v44 = vmul.f32 %v3099_v6, %v7402_v45  ;;  %v3156_v31 = vmul.f32 %v3154_v52, %v7399_v17  ;;  %s5872_s21 = sld [smem:[#allocation3 + $0x86]] }
 0x366   : > { %v3139_v30 = vrot.slane %v3133_v59, 1  ;;  %v3157_v46 = vmul.f32 %v3154_v52, %v7412_v38  ;;  %v3216_v37 = vstv %s5854_s0  ;;  %v3195_v19 = vmul.f32 %v3194_v18, %v7402_v45  ;;  %s5874_s0 = sld [smem:[#allocation3 + $0xa3]] }
 0x367   : > { %3004 = vrot.lane.b32.xlu1 %v3001_v57, %s10202_s30  ;;  %3006 = vrot.lane.b32.xlu0 %v3003_v53, %s10202_s30  ;;  %v3101_v57 = vmul.f32 %v3099_v6, %v7399_v17  ;;  %v3155_v53 = vmul.f32 %v3154_v52, %v7402_v45  ;;  %v3196_v54 = vmul.f32 %v3194_v18, %v7399_v17 }
 0x368   : > { %v3164_v6 = vrot.slane %v3157_v46, 1  ;;  %v3197_v59 = vmul.f32 %v3194_v18, %v7412_v38 }
 0x369   : > { %v3202_v52 = vrot.slane %v3196_v54, 2  ;;  %v3294_v54 = vstv %s5859_s3  ;;  %s5878_s3 = sld [smem:[#allocation3 + $0xa7]] }
 0x36b   : > { %3044 = vrot.lane.b32.xlu1 %v3041_v43, %s10204_s14  ;;  %3046 = vrot.lane.b32.xlu0 %v3043_v60, %s10204_s14  ;;  %v3140_v43 = vrot.slane %v3134_v58, 1  ;;  %v3142_v60 = vrot.slane %v3135_v0, 1  ;;  %v3201_v0 = vrot.slane %v3195_v19, 2  ;;  %v3246_v19 = vstv %s5856_s28  ;;  %s5877_s28 = sld [smem:[#allocation3 + $0xa6]] }
 0x36d   : > { %v3203_v18 = vsel %vm318_vm4, %v3201_v0, %v3202_v52  ;;  %v3297_v0 = vmul.f32 %v3294_v54, %v7412_v38 }
 0x36f   : > { %3066 = vrot.lane.b32.xlu1 %v3063_v8, %s10202_s30  ;;  %3068 = vrot.lane.b32.xlu0 %v3065_v23, %s10202_s30  ;;  %v3161_v8 = vrot.slane %v3155_v53, 1  ;;  %v3162_v23 = vrot.slane %v3156_v31, 1  ;;  %v3204_v53 = vrot.slane %v3197_v59, 2  ;;  %v3218_v31 = vmul.f32 %v3216_v37, %v7399_v17 }
 0x370   : > { %v3295_v59 = vmul.f32 %v3294_v54, %v7402_v45 }
 0x371   : > { %v3163_v58 = vsel %vm255_vm3, %v3161_v8, %v3162_v23  ;;  %v3224_v46 = vrot.slane %v3218_v31, 2 }
 0x373   : > { %3089 = vrot.lane.b32.xlu1 %v3085_v5, %s10204_s14  ;;  %3091 = vrot.lane.b32.xlu0 %v3086_v61, %s10204_s14  ;;  %v3141_v5 = vsel %vm255_vm3, %v3139_v30, %v3140_v43  ;;  %v3143_v61 = vsel %vm255_vm3, %v3140_v43, %v3142_v60  ;;  %v3219_v30 = vmul.f32 %v3216_v37, %v7412_v38 }
 0x374   : > { %v3205_v43 = vsel %vm318_vm4, %v3202_v52, %v3204_v53  ;;  %v3316_v52 = vstv %s5860_s9  ;;  %s5880_s9 = sld [smem:[#allocation3 + $0xa9]] }
 0x375   : > { %v3226_v8 = vrot.slane %v3219_v30, 2  ;;  %v3317_v31 = vmul.f32 %v3316_v52, %v7402_v45  ;;  %v3318_v30 = vmul.f32 %v3316_v52, %v7399_v17 }
 0x377   : > { %3104 = vrot.lane.b32.xlu1 %v3100_v44, %s10202_s30  ;;  %3106 = vrot.lane.b32.xlu0 %v3101_v57, %s10202_s30  ;;  %v3217_v44 = vmul.f32 %v3216_v37, %v7402_v45  ;;  %v3165_v57 = vsel %vm255_vm3, %v3162_v23, %v3164_v6  ;;  %v3227_v23 = vsel %vm318_vm4, %v3224_v46, %v3226_v8  ;;  %v3261_v6 = vstv %s5857_s4  ;;  %s5875_s4 = sld [smem:[#allocation3 + $0xa4]] }
 0x378   : > { %v3263_v53 = vmul.f32 %v3261_v6, %v7399_v17  ;;  %v3378_v8 = vstv %s5863_s11  ;;  %s5883_s11 = sld [smem:[#allocation3 + $0xc7]] }
 0x379   : > { %v3223_v60 = vrot.slane %v3217_v44, 2  ;;  %v3356_v44 = vstv %s5862_s10  ;;  %s5881_s10 = sld [smem:[#allocation3 + $0xaa]] }
 0x37b   : > { %3144 = vrot.lane.b32.xlu1 %v3141_v5, %s10204_s14  ;;  %3146 = vrot.lane.b32.xlu0 %v3143_v61, %s10204_s14  ;;  %v3225_v37 = vsel %vm318_vm4, %v3223_v60, %v3224_v46  ;;  %v3247_v5 = vmul.f32 %v3246_v19, %v7402_v45  ;;  %v3248_v61 = vmul.f32 %v3246_v19, %v7399_v17  ;;  %v3304_v60 = vrot.slane %v3297_v0, 1 }
 0x37c   : > { %v3319_v46 = vmul.f32 %v3316_v52, %v7412_v38  ;;  %v3357_v19 = vmul.f32 %v3356_v44, %v7402_v45 }
 0x37e   : > { %v3363_v0 = vrot.slane %v3357_v19, 2  ;;  %v3408_v19 = vstv %s5865_s12  ;;  %s5886_s12 = sld [smem:[#allocation3 + $0xca]] }
 0x37f   : > { %3166 = vrot.lane.b32.xlu1 %v3163_v58, %s10202_s30  ;;  %3168 = vrot.lane.b32.xlu0 %v3165_v57, %s10202_s30  ;;  %v3296_v58 = vmul.f32 %v3294_v54, %v7399_v17  ;;  %v3262_v57 = vmul.f32 %v3261_v6, %v7402_v45  ;;  %v3358_v54 = vmul.f32 %v3356_v44, %v7399_v17  ;;  %v3326_v6 = vrot.slane %v3319_v46, 1 }
 0x381   : > { %v3364_v52 = vrot.slane %v3358_v54, 2  ;;  %v3456_v54 = vstv %s5868_s15  ;;  %s5887_s15 = sld [smem:[#allocation3 + $0xcb]] }
 0x383   : > { %3206 = vrot.lane.b32.xlu1 %v3203_v18, %s10204_s14  ;;  %3208 = vrot.lane.b32.xlu0 %v3205_v43, %s10204_s14  ;;  %v3301_v18 = vrot.slane %v3295_v59, 1  ;;  %v3302_v43 = vrot.slane %v3296_v58, 1  ;;  %v3359_v59 = vmul.f32 %v3356_v44, %v7412_v38  ;;  %v3365_v44 = vsel %vm318_vm4, %v3363_v0, %v3364_v52 }
 0x384   : > { %v3459_v0 = vmul.f32 %v3456_v54, %v7412_v38 }
 0x387   : > { %3228 = vrot.lane.b32.xlu1 %v3225_v37, %s10202_s30  ;;  %3230 = vrot.lane.b32.xlu0 %v3227_v23, %s10202_s30  ;;  %v3323_v37 = vrot.slane %v3317_v31, 1  ;;  %v3324_v23 = vrot.slane %v3318_v30, 1  ;;  %v3366_v31 = vrot.slane %v3359_v59, 2  ;;  %v3380_v30 = vmul.f32 %v3378_v8, %v7399_v17 }
 0x388   : > { %v3457_v59 = vmul.f32 %v3456_v54, %v7402_v45 }
 0x389   : > { %v3325_v58 = vsel %vm255_vm3, %v3323_v37, %v3324_v23  ;;  %v3386_v46 = vrot.slane %v3380_v30, 2 }
 0x38b   : > { %3251 = vrot.lane.b32.xlu1 %v3247_v5, %s10204_s14  ;;  %3253 = vrot.lane.b32.xlu0 %v3248_v61, %s10204_s14  ;;  %v3303_v5 = vsel %vm255_vm3, %v3301_v18, %v3302_v43  ;;  %v3305_v61 = vsel %vm255_vm3, %v3302_v43, %v3304_v60  ;;  %v3381_v18 = vmul.f32 %v3378_v8, %v7412_v38 }
 0x38c   : > { %v3367_v43 = vsel %vm318_vm4, %v3364_v52, %v3366_v31  ;;  %v3478_v52 = vstv %s5869_s17  ;;  %s5889_s17 = sld [smem:[#allocation3 + $0xcd]] }
 0x38d   : > { %v3388_v37 = vrot.slane %v3381_v18, 2  ;;  %v3479_v30 = vmul.f32 %v3478_v52, %v7402_v45  ;;  %v3480_v18 = vmul.f32 %v3478_v52, %v7399_v17 }
 0x38f   : > { %3266 = vrot.lane.b32.xlu1 %v3262_v57, %s10202_s30  ;;  %3268 = vrot.lane.b32.xlu0 %v3263_v53, %s10202_s30  ;;  %v3379_v57 = vmul.f32 %v3378_v8, %v7402_v45  ;;  %v3327_v53 = vsel %vm255_vm3, %v3324_v23, %v3326_v6  ;;  %v3389_v23 = vsel %vm318_vm4, %v3386_v46, %v3388_v37  ;;  %v3423_v6 = vstv %s5866_s19  ;;  %s5884_s19 = sld [smem:[#allocation3 + $0xc8]] }
 0x390   : > { %v3425_v31 = vmul.f32 %v3423_v6, %v7399_v17  ;;  %v3540_v37 = vstv %s5872_s21  ;;  %s5892_s21 = sld [smem:[#allocation3 + $0xeb]] }
 0x391   : > { %v3385_v60 = vrot.slane %v3379_v57, 2  ;;  %v3518_v57 = vstv %s5871_s18  ;;  %s5890_s18 = sld [smem:[#allocation3 + $0xce]] }
 0x393   : > { %3306 = vrot.lane.b32.xlu1 %v3303_v5, %s10204_s14  ;;  %3308 = vrot.lane.b32.xlu0 %v3305_v61, %s10204_s14  ;;  %v3387_v8 = vsel %vm318_vm4, %v3385_v60, %v3386_v46  ;;  %v3409_v5 = vmul.f32 %v3408_v19, %v7402_v45  ;;  %v3410_v61 = vmul.f32 %v3408_v19, %v7399_v17  ;;  %v3466_v60 = vrot.slane %v3459_v0, 1 }
 0x394   : > { %v3481_v46 = vmul.f32 %v3478_v52, %v7412_v38  ;;  %v3519_v19 = vmul.f32 %v3518_v57, %v7402_v45 }
 0x396   : > { %v3525_v0 = vrot.slane %v3519_v19, 2  ;;  %v3570_v19 = vstv %s5874_s0  ;;  %s5895_s0 = sld [smem:[#allocation3 + $0xee]] }
 0x397   : > { %3328 = vrot.lane.b32.xlu1 %v3325_v58, %s10202_s30  ;;  %3330 = vrot.lane.b32.xlu0 %v3327_v53, %s10202_s30  ;;  %v3458_v58 = vmul.f32 %v3456_v54, %v7399_v17  ;;  %v3424_v53 = vmul.f32 %v3423_v6, %v7402_v45  ;;  %v3520_v54 = vmul.f32 %v3518_v57, %v7399_v17  ;;  %v3488_v6 = vrot.slane %v3481_v46, 1 }
 0x399   : > { %v3526_v52 = vrot.slane %v3520_v54, 2  ;;  %v3618_v54 = vstv %s5877_s28  ;;  %s5896_s28 = sld [smem:[#allocation3 + $0xef]] }
 0x39b   : > { %3368 = vrot.lane.b32.xlu1 %v3365_v44, %s10204_s14  ;;  %3370 = vrot.lane.b32.xlu0 %v3367_v43, %s10204_s14  ;;  %v3463_v44 = vrot.slane %v3457_v59, 1  ;;  %v3464_v43 = vrot.slane %v3458_v58, 1  ;;  %v3521_v59 = vmul.f32 %v3518_v57, %v7412_v38  ;;  %v3527_v57 = vsel %vm318_vm4, %v3525_v0, %v3526_v52 }
 0x39c   : > { %v3620_v0 = vmul.f32 %v3618_v54, %v7399_v17 }
 0x39f   : > { %3390 = vrot.lane.b32.xlu1 %v3387_v8, %s10202_s30  ;;  %3392 = vrot.lane.b32.xlu0 %v3389_v23, %s10202_s30  ;;  %v3485_v8 = vrot.slane %v3479_v30, 1  ;;  %v3486_v23 = vrot.slane %v3480_v18, 1  ;;  %v3528_v30 = vrot.slane %v3521_v59, 2  ;;  %v3542_v18 = vmul.f32 %v3540_v37, %v7399_v17 }
 0x3a0   : > { %v3585_v59 = vstv %s5875_s4  ;;  %s5898_s4 = sld [smem:[#allocation3 + $0xf1]] }
 0x3a1   : > { %v3487_v58 = vsel %vm255_vm3, %v3485_v8, %v3486_v23  ;;  %v3548_v46 = vrot.slane %v3542_v18, 2 }
 0x3a3   : > { %3413 = vrot.lane.b32.xlu1 %v3409_v5, %s10204_s14  ;;  %3415 = vrot.lane.b32.xlu0 %v3410_v61, %s10204_s14  ;;  %v3465_v5 = vsel %vm255_vm3, %v3463_v44, %v3464_v43  ;;  %v3467_v61 = vsel %vm255_vm3, %v3464_v43, %v3466_v60  ;;  %v3543_v44 = vmul.f32 %v3540_v37, %v7412_v38 }
 0x3a4   : > { %v3529_v43 = vsel %vm318_vm4, %v3526_v52, %v3528_v30  ;;  %v3621_v52 = vmul.f32 %v3618_v54, %v7412_v38  ;;  %v3587_v30 = vmul.f32 %v3585_v59, %v7399_v17 }
 0x3a5   : > { %v3550_v8 = vrot.slane %v3543_v44, 2  ;;  %v3680_v44 = vstv %s5880_s9  ;;  %s5899_s9 = sld [smem:[#allocation3 + $0xf2]] }
 0x3a7   : > { %3428 = vrot.lane.b32.xlu1 %v3424_v53, %s10202_s30  ;;  %3430 = vrot.lane.b32.xlu0 %v3425_v31, %s10202_s30  ;;  %v3541_v53 = vmul.f32 %v3540_v37, %v7402_v45  ;;  %v3489_v31 = vsel %vm255_vm3, %v3486_v23, %v3488_v6  ;;  %v3551_v23 = vsel %vm318_vm4, %v3548_v46, %v3550_v8  ;;  %v3640_v6 = vstv %s5878_s3  ;;  %s5893_s3 = sld [smem:[#allocation3 + $0xec]] }
 0x3a8   : > { %v3642_v18 = vmul.f32 %v3640_v6, %v7399_v17 }
 0x3a9   : > { %v3547_v60 = vrot.slane %v3541_v53, 2  ;;  %v3641_v53 = vmul.f32 %v3640_v6, %v7402_v45 }
 0x3ab   : > { %3468 = vrot.lane.b32.xlu1 %v3465_v5, %s10204_s14  ;;  %3470 = vrot.lane.b32.xlu0 %v3467_v61, %s10204_s14  ;;  %v3549_v37 = vsel %vm318_vm4, %v3547_v60, %v3548_v46  ;;  %v3571_v5 = vmul.f32 %v3570_v19, %v7402_v45  ;;  %v3572_v61 = vmul.f32 %v3570_v19, %v7399_v17  ;;  %v3628_v60 = vrot.slane %v3621_v52, 1 }
 0x3ac   : > { %v3643_v46 = vmul.f32 %v3640_v6, %v7412_v38  ;;  %v3647_v8 = vrot.slane %v3641_v53, 1  ;;  %v3682_v19 = vmul.f32 %v3680_v44, %v7399_v17  ;;  %v3702_v6 = vstv %s5881_s10  ;;  %s5901_s10 = sld [smem:[#allocation3 + $0x10f]] }
 0x3ae   : > { %v3688_v52 = vrot.slane %v3682_v19, 2 }
 0x3af   : > { %3490 = vrot.lane.b32.xlu1 %v3487_v58, %s10202_s30  ;;  %3492 = vrot.lane.b32.xlu0 %v3489_v31, %s10202_s30  ;;  %v3619_v58 = vmul.f32 %v3618_v54, %v7402_v45  ;;  %v3586_v31 = vmul.f32 %v3585_v59, %v7402_v45  ;;  %v3683_v54 = vmul.f32 %v3680_v44, %v7412_v38  ;;  %v3650_v59 = vrot.slane %v3643_v46, 1 }
 0x3b1   : > { %v3690_v53 = vrot.slane %v3683_v54, 2 }
 0x3b3   : > { %3530 = vrot.lane.b32.xlu1 %v3527_v57, %s10204_s14  ;;  %3532 = vrot.lane.b32.xlu0 %v3529_v43, %s10204_s14  ;;  %v3625_v57 = vrot.slane %v3619_v58, 1  ;;  %v3626_v43 = vrot.slane %v3620_v0, 1 }
 0x3b7   : > { %3552 = vrot.lane.b32.xlu1 %v3549_v37, %s10202_s30  ;;  %3554 = vrot.lane.b32.xlu0 %v3551_v23, %s10202_s30  ;;  %v3648_v37 = vrot.slane %v3642_v18, 1  ;;  %v3681_v23 = vmul.f32 %v3680_v44, %v7402_v45  ;;  %v3704_v18 = vmul.f32 %v3702_v6, %v7399_v17  ;;  %v3705_v44 = vmul.f32 %v3702_v6, %v7412_v38 }
 0x3b9   : > { %v3649_v58 = vsel %vm255_vm3, %v3647_v8, %v3648_v37  ;;  %v3687_v0 = vrot.slane %v3681_v23, 2  ;;  %v3710_v46 = vrot.slane %v3704_v18, 2  ;;  %v3712_v8 = vrot.slane %v3705_v44, 2 }
 0x3bb   : > { %3575 = vrot.lane.b32.xlu1 %v3571_v5, %s10204_s14  ;;  %3577 = vrot.lane.b32.xlu0 %v3572_v61, %s10204_s14  ;;  %v3627_v5 = vsel %vm255_vm3, %v3625_v57, %v3626_v43  ;;  %v3629_v61 = vsel %vm255_vm3, %v3626_v43, %v3628_v60  ;;  %v3689_v57 = vsel %vm318_vm4, %v3687_v0, %v3688_v52 }
 0x3bc   : > { %v3691_v43 = vsel %vm318_vm4, %v3688_v52, %v3690_v53  ;;  %v3713_v54 = vsel %vm318_vm4, %v3710_v46, %v3712_v8  ;;  %v3802_v52 = vstv %s5887_s15  ;;  %v3747_v53 = vstv %s5884_s19  ;;  %s5902_s15 = sld [smem:[#allocation3 + $0x110]]  ;;  %s5907_s19 = sld [smem:[#allocation3 + $0x115]] }
 0x3bd   : > { %v3803_v44 = vmul.f32 %v3802_v52, %v7402_v45  ;;  %v3804_v8 = vmul.f32 %v3802_v52, %v7399_v17 }
 0x3bf   : > { %3590 = vrot.lane.b32.xlu1 %v3586_v31, %s10202_s30  ;;  %3592 = vrot.lane.b32.xlu0 %v3587_v30, %s10202_s30  ;;  %v3651_v31 = vsel %vm255_vm3, %v3648_v37, %v3650_v59  ;;  %v3703_v30 = vmul.f32 %v3702_v6, %v7402_v45 }
 0x3c1   : > { %v3709_v60 = vrot.slane %v3703_v30, 2 }
 0x3c3   : > { %3630 = vrot.lane.b32.xlu1 %v3627_v5, %s10204_s14  ;;  %3632 = vrot.lane.b32.xlu0 %v3629_v61, %s10204_s14  ;;  %v3711_v19 = vsel %vm318_vm4, %v3709_v60, %v3710_v46  ;;  %v3732_v5 = vstv %s5883_s11  ;;  %v3780_v61 = vstv %s5886_s12  ;;  %v3748_v60 = vmul.f32 %v3747_v53, %v7402_v45  ;;  %s5904_s11 = sld [smem:[#allocation3 + $0x112]]  ;;  %s5905_s12 = sld [smem:[#allocation3 + $0x113]] }
 0x3c4   : > { %v3734_v0 = vmul.f32 %v3732_v5, %v7399_v17  ;;  %v3782_v30 = vmul.f32 %v3780_v61, %v7399_v17  ;;  %v3783_v18 = vmul.f32 %v3780_v61, %v7412_v38  ;;  %v3749_v46 = vmul.f32 %v3747_v53, %v7399_v17 }
 0x3c7   : > { %3652 = vrot.lane.b32.xlu1 %v3649_v58, %s10202_s30  ;;  %3654 = vrot.lane.b32.xlu0 %v3651_v31, %s10202_s30  ;;  %v3733_v58 = vmul.f32 %v3732_v5, %v7402_v45  ;;  %v3781_v31 = vmul.f32 %v3780_v61, %v7402_v45  ;;  %v3788_v5 = vrot.slane %v3782_v30, 1  ;;  %v3790_v61 = vrot.slane %v3783_v18, 1 }
 0x3c8   : > { %v3864_v18 = vstv %s5890_s18  ;;  %s7808_s18 = sld [smem:[#allocation3 + $0x24]] }
 0x3cb   : > { %3692 = vrot.lane.b32.xlu1 %v3689_v57, %s10204_s14  ;;  %3694 = vrot.lane.b32.xlu0 %v3691_v43, %s10204_s14 }
 0x3cd   : > { %v7584_v37 = vpop.permute.xlu1 %2927  ;;  %v7586_v23 = vpop.permute.xlu0 %2929 }
 0x3ce   : > { %10416 = vst [vmem:[#allocation203_spill] sm:$0xff] %v7584_v37  ;;  %10417 = vst [vmem:[#allocation204_spill] sm:$0xff] %v7586_v23 }
 0x3cf   : > { %3714 = vrot.lane.b32.xlu1 %v3711_v19, %s10202_s30  ;;  %3716 = vrot.lane.b32.xlu0 %v3713_v54, %s10202_s30  ;;  %v3805_v19 = vmul.f32 %v3802_v52, %v7412_v38  ;;  %v3787_v54 = vrot.slane %v3781_v31, 1  ;;  %v3791_v31 = vsel %vm255_vm3, %v3788_v5, %v3790_v61  ;;  %v3866_v61 = vmul.f32 %v3864_v18, %v7399_v17 }
 0x3d1   : > { %v7592_v59 = vpop.permute.xlu1 %2942  ;;  %v7594_v6 = vpop.permute.xlu0 %2944  ;;  %v3789_v52 = vsel %vm255_vm3, %v3787_v54, %v3788_v5  ;;  %v3865_v5 = vmul.f32 %v3864_v18, %v7402_v45 }
 0x3d2   : > { %10418 = vst [vmem:[#allocation205_spill] sm:$0xff] %v7592_v59  ;;  %10419 = vst [vmem:[#allocation206_spill] sm:$0xff] %v7594_v6  ;;  %v3810_v6 = vrot.slane %v3804_v8, 1  ;;  %v3812_v59 = vrot.slane %v3805_v19, 1 }
 0x3d3   : > { %3737 = vrot.lane.b32.xlu1 %v3733_v58, %s10204_s14  ;;  %3739 = vrot.lane.b32.xlu0 %v3734_v0, %s10204_s14  ;;  %v3842_v58 = vstv %s5889_s17  ;;  %v3809_v0 = vrot.slane %v3803_v44, 1  ;;  %s5908_s17 = sld [smem:[#allocation3 + $0x116]] }
 0x3d4   : > { %v3843_v53 = vmul.f32 %v3842_v58, %v7402_v45  ;;  %v3844_v23 = vmul.f32 %v3842_v58, %v7399_v17  ;;  %v3845_v30 = vmul.f32 %v3842_v58, %v7412_v38  ;;  %v3813_v8 = vsel %vm255_vm3, %v3810_v6, %v3812_v59 }
 0x3d5   : > { %v7604_v57 = vpop.permute.xlu1 %2982  ;;  %v7606_v43 = vpop.permute.xlu0 %2984  ;;  %v3867_v58 = vmul.f32 %v3864_v18, %v7412_v38 }
 0x3d6   : > { %10420 = vst [vmem:[#allocation207_spill] sm:$0xff] %v7604_v57  ;;  %10421 = vst [vmem:[#allocation208_spill] sm:$0xff] %v7606_v43  ;;  %v3849_v19 = vrot.slane %v3843_v53, 2  ;;  %v3852_v54 = vrot.slane %v3845_v30, 2  ;;  %v3872_v53 = vrot.slane %v3866_v61, 2 }
 0x3d7   : > { %3752 = vrot.lane.b32.xlu1 %v3748_v60, %s10202_s30  ;;  %3754 = vrot.lane.b32.xlu0 %v3749_v46, %s10202_s30  ;;  %v3811_v46 = vsel %vm255_vm3, %v3809_v0, %v3810_v6  ;;  %v3871_v6 = vrot.slane %v3865_v5, 2 }
 0x3d9   : > { %v7614_v57 = vpop.permute.xlu1 %3004  ;;  %v7616_v43 = vpop.permute.xlu0 %3006 }
 0x3da   : > { %10422 = vst [vmem:[#allocation209_spill] sm:$0xff] %v7614_v57  ;;  %10423 = vst [vmem:[#allocation210_spill] sm:$0xff] %v7616_v43  ;;  %v3850_v43 = vrot.slane %v3844_v23, 2  ;;  %v4004_v57 = vstv %s5898_s4  ;;  %s7822_s4 = sld [smem:[#allocation3 + $0x27]] }
 0x3db   : > { %3792 = vrot.lane.b32.xlu1 %v3789_v52, %s10204_s14  ;;  %3794 = vrot.lane.b32.xlu0 %v3791_v31, %s10204_s14  ;;  %v3874_v31 = vrot.slane %v3867_v58, 2 }
 0x3dc   : > { %v3851_v59 = vsel %vm318_vm4, %v3849_v19, %v3850_v43  ;;  %v3853_v23 = vsel %vm318_vm4, %v3850_v43, %v3852_v54  ;;  %v3894_v19 = vstv %s5892_s21  ;;  %v3942_v43 = vstv %s5895_s0  ;;  %s7810_s21 = sld [smem:[#allocation3 + $0x48]] }
 0x3dd   : > { %v7625_v44 = vpop.permute.xlu1 %3044  ;;  %v7627_v60 = vpop.permute.xlu0 %3046  ;;  %v3895_v61 = vmul.f32 %v3894_v19, %v7402_v45  ;;  %v3896_v58 = vmul.f32 %v3894_v19, %v7399_v17  ;;  %s7818_s0 = sld [smem:[#allocation3 + $0x90]] }
 0x3de   : > { %10424 = vst [vmem:[#allocation211_spill] sm:$0xff] %v7625_v44  ;;  %10425 = vst [vmem:[#allocation212_spill] sm:$0xff] %v7627_v60 }
 0x3df   : > { %3814 = vrot.lane.b32.xlu1 %v3811_v46, %s10202_s30  ;;  %3816 = vrot.lane.b32.xlu0 %v3813_v8, %s10202_s30  ;;  %v3873_v46 = vsel %vm318_vm4, %v3871_v6, %v3872_v53  ;;  %v3875_v8 = vsel %vm318_vm4, %v3872_v53, %v3874_v31  ;;  %v3943_v6 = vmul.f32 %v3942_v43, %v7402_v45 }
 0x3e0   : > { %v3944_v53 = vmul.f32 %v3942_v43, %v7399_v17  ;;  %v3945_v31 = vmul.f32 %v3942_v43, %v7412_v38 }
 0x3e1   : > { %v7636_v52 = vpop.permute.xlu1 %3066  ;;  %v7638_v0 = vpop.permute.xlu0 %3068  ;;  %v3949_v43 = vrot.slane %v3943_v6, 1 }
 0x3e2   : > { %10426 = vst [vmem:[#allocation213_spill] sm:$0xff] %v7636_v52  ;;  %10427 = vst [vmem:[#allocation214_spill] sm:$0xff] %v7638_v0 }
 0x3e3   : > { %3854 = vrot.lane.b32.xlu1 %v3851_v59, %s10204_s14  ;;  %3856 = vrot.lane.b32.xlu0 %v3853_v23, %s10204_s14  ;;  %v3964_v59 = vstv %s5896_s28  ;;  %v3909_v23 = vstv %s5893_s3  ;;  %s5692_s28 = sld [smem:[#allocation3 + $0x3]]  ;;  %s7820_s3 = sld [smem:[#allocation3 + $0x6]] }
 0x3e4   : > { %v3910_v19 = vmul.f32 %v3909_v23, %v7402_v45  ;;  %v3911_v52 = vmul.f32 %v3909_v23, %v7399_v17  ;;  %v3966_v60 = vmul.f32 %v3964_v59, %v7399_v17  ;;  %v3967_v44 = vmul.f32 %v3964_v59, %v7412_v38 }
 0x3e5   : > { %v7644_v30 = vpop.permute.xlu1 %3089  ;;  %v7646_v18 = vpop.permute.xlu0 %3091  ;;  %v4005_v23 = vmul.f32 %v4004_v57, %v7402_v45 }
 0x3e6   : > { %10428 = vst [vmem:[#allocation215_spill] sm:$0xff] %v7644_v30  ;;  %10429 = vst [vmem:[#allocation216_spill] sm:$0xff] %v7646_v18  ;;  %v3974_v18 = vrot.slane %v3967_v44, 1  ;;  %v4006_v30 = vmul.f32 %v4004_v57, %v7399_v17 }
 0x3e7   : > { %3876 = vrot.lane.b32.xlu1 %v3873_v46, %s10202_s30  ;;  %3878 = vrot.lane.b32.xlu0 %v3875_v8, %s10202_s30  ;;  %v3965_v46 = vmul.f32 %v3964_v59, %v7402_v45 }
 0x3e9   : > { %v7652_v54 = vpop.permute.xlu1 %3104  ;;  %v7654_v5 = vpop.permute.xlu0 %3106 }
 0x3ea   : > { %10430 = vst [vmem:[#allocation217_spill] sm:$0xff] %v7652_v54  ;;  %10431 = vst [vmem:[#allocation218_spill] sm:$0xff] %v7654_v5  ;;  %v3950_v5 = vrot.slane %v3944_v53, 1  ;;  %v3972_v54 = vrot.slane %v3966_v60, 1  ;;  %v4007_v53 = vmul.f32 %v4004_v57, %v7412_v38 }
 0x3eb   : > { %3899 = vrot.lane.b32.xlu1 %v3895_v61, %s10204_s14  ;;  %3901 = vrot.lane.b32.xlu0 %v3896_v58, %s10204_s14  ;;  %v3952_v61 = vrot.slane %v3945_v31, 1  ;;  %v3971_v58 = vrot.slane %v3965_v46, 1 }
 0x3ec   : > { %v3951_v59 = vsel %vm255_vm3, %v3949_v43, %v3950_v5  ;;  %v3975_v60 = vsel %vm255_vm3, %v3972_v54, %v3974_v18  ;;  %v4014_v43 = vrot.slane %v4007_v53, 2 }
 0x3ed   : > { %v7664_v8 = vpop.permute.xlu1 %3144  ;;  %v7666_v0 = vpop.permute.xlu0 %3146  ;;  %v3953_v6 = vsel %vm255_vm3, %v3950_v5, %v3952_v61  ;;  %v3973_v44 = vsel %vm255_vm3, %v3971_v58, %v3972_v54 }
 0x3ee   : > { %10432 = vst [vmem:[#allocation219_spill] sm:$0xff] %v7664_v8  ;;  %10433 = vst [vmem:[#allocation220_spill] sm:$0xff] %v7666_v0 }
 0x3ef   : > { %3914 = vrot.lane.b32.xlu1 %v3910_v19, %s10202_s30  ;;  %3916 = vrot.lane.b32.xlu0 %v3911_v52, %s10202_s30  ;;  %v4026_v52 = vstv %s5899_s9  ;;  %v4011_v19 = vrot.slane %v4005_v23, 2  ;;  %s7826_s9 = sld [smem:[#allocation3 + $0x4b]] }
 0x3f0   : > { %v4027_v5 = vmul.f32 %v4026_v52, %v7402_v45  ;;  %v4028_v57 = vmul.f32 %v4026_v52, %v7399_v17  ;;  %v4029_v61 = vmul.f32 %v4026_v52, %v7412_v38 }
 0x3f1   : > { %v7674_v8 = vpop.permute.xlu1 %3166  ;;  %v7676_v0 = vpop.permute.xlu0 %3168 }
 0x3f2   : > { %10434 = vst [vmem:[#allocation221_spill] sm:$0xff] %v7674_v8  ;;  %10435 = vst [vmem:[#allocation222_spill] sm:$0xff] %v7676_v0  ;;  %v4012_v0 = vrot.slane %v4006_v30, 2  ;;  %v4033_v54 = vrot.slane %v4027_v5, 2  ;;  %v4034_v23 = vrot.slane %v4028_v57, 2 }
 0x3f3   : > { %3954 = vrot.lane.b32.xlu1 %v3951_v59, %s10204_s14  ;;  %3956 = vrot.lane.b32.xlu0 %v3953_v6, %s10204_s14  ;;  %v4036_v6 = vrot.slane %v4029_v61, 2 }
 0x3f4   : > { %v4013_v18 = vsel %vm318_vm4, %v4011_v19, %v4012_v0  ;;  %v4015_v30 = vsel %vm318_vm4, %v4012_v0, %v4014_v43  ;;  %v4056_v19 = vstv %s5901_s10  ;;  %v4104_v0 = vstv %s5904_s11  ;;  %s7828_s10 = sld [smem:[#allocation3 + $0x4e]]  ;;  %s7830_s11 = sld [smem:[#allocation3 + $0x6f]] }
 0x3f5   : > { %v7685_v31 = vpop.permute.xlu1 %3206  ;;  %v7687_v46 = vpop.permute.xlu0 %3208  ;;  %v4057_v57 = vmul.f32 %v4056_v19, %v7402_v45  ;;  %v4058_v61 = vmul.f32 %v4056_v19, %v7399_v17 }
 0x3f6   : > { %10436 = vst [vmem:[#allocation223_spill] sm:$0xff] %v7685_v31  ;;  %10437 = vst [vmem:[#allocation224_spill] sm:$0xff] %v7687_v46 }
 0x3f7   : > { %3976 = vrot.lane.b32.xlu1 %v3973_v44, %s10202_s30  ;;  %3978 = vrot.lane.b32.xlu0 %v3975_v60, %s10202_s30  ;;  %v4035_v44 = vsel %vm318_vm4, %v4033_v54, %v4034_v23  ;;  %v4037_v60 = vsel %vm318_vm4, %v4034_v23, %v4036_v6  ;;  %v4105_v54 = vmul.f32 %v4104_v0, %v7402_v45 }
 0x3f8   : > { %v4106_v23 = vmul.f32 %v4104_v0, %v7399_v17  ;;  %v4107_v6 = vmul.f32 %v4104_v0, %v7412_v38 }
 0x3f9   : > { %v7696_v59 = vpop.permute.xlu1 %3228  ;;  %v7698_v58 = vpop.permute.xlu0 %3230  ;;  %v4111_v0 = vrot.slane %v4105_v54, 1 }
 0x3fa   : > { %10438 = vst [vmem:[#allocation225_spill] sm:$0xff] %v7696_v59  ;;  %10439 = vst [vmem:[#allocation226_spill] sm:$0xff] %v7698_v58  ;;  %v4112_v8 = vrot.slane %v4106_v23, 1 }
 0x3fb   : > { %4016 = vrot.lane.b32.xlu1 %v4013_v18, %s10204_s14  ;;  %4018 = vrot.lane.b32.xlu0 %v4015_v30, %s10204_s14  ;;  %v4126_v18 = vstv %s5905_s12  ;;  %v4071_v30 = vstv %s5902_s15  ;;  %s7836_s12 = sld [smem:[#allocation3 + $0x72]]  ;;  %s7838_s15 = sld [smem:[#allocation3 + $0x93]] }
 0x3fc   : > { %v4072_v19 = vmul.f32 %v4071_v30, %v7402_v45  ;;  %v4073_v59 = vmul.f32 %v4071_v30, %v7399_v17  ;;  %v4128_v46 = vmul.f32 %v4126_v18, %v7399_v17  ;;  %v4129_v31 = vmul.f32 %v4126_v18, %v7412_v38 }
 0x3fd   : > { %v7704_v53 = vpop.permute.xlu1 %3251  ;;  %v7706_v52 = vpop.permute.xlu0 %3253 }
 0x3fe   : > { %10440 = vst [vmem:[#allocation227_spill] sm:$0xff] %v7704_v53  ;;  %10441 = vst [vmem:[#allocation228_spill] sm:$0xff] %v7706_v52  ;;  %v4136_v52 = vrot.slane %v4129_v31, 1 }
 0x3ff   : > { %4038 = vrot.lane.b32.xlu1 %v4035_v44, %s10202_s30  ;;  %4040 = vrot.lane.b32.xlu0 %v4037_v60, %s10202_s30  ;;  %v4127_v44 = vmul.f32 %v4126_v18, %v7402_v45  ;;  %v4113_v18 = vsel %vm255_vm3, %v4111_v0, %v4112_v8 }
 0x401   : > { %v7712_v43 = vpop.permute.xlu1 %3266  ;;  %v7714_v5 = vpop.permute.xlu0 %3268 }
 0x402   : > { %10442 = vst [vmem:[#allocation229_spill] sm:$0xff] %v7712_v43  ;;  %10443 = vst [vmem:[#allocation230_spill] sm:$0xff] %v7714_v5  ;;  %v4166_v5 = vstv %s5907_s19  ;;  %v4134_v43 = vrot.slane %v4128_v46, 1  ;;  %s7840_s19 = sld [smem:[#allocation3 + $0x96]] }
 0x403   : > { %4061 = vrot.lane.b32.xlu1 %v4057_v57, %s10204_s14  ;;  %4063 = vrot.lane.b32.xlu0 %v4058_v61, %s10204_s14  ;;  %v4114_v57 = vrot.slane %v4107_v6, 1  ;;  %v4133_v61 = vrot.slane %v4127_v44, 1  ;;  %v4167_v30 = vmul.f32 %v4166_v5, %v7402_v45  ;;  %v4168_v53 = vmul.f32 %v4166_v5, %v7399_v17 }
 0x404   : > { %v4169_v23 = vmul.f32 %v4166_v5, %v7412_v38  ;;  %v4137_v44 = vsel %vm255_vm3, %v4134_v43, %v4136_v52  ;;  %v5909_v52 = vld [vmem:[%s6358_s20 + $0x30] sm:$0xff] }
 0x405   : > { %v7724_v60 = vpop.permute.xlu1 %3306  ;;  %v7726_v58 = vpop.permute.xlu0 %3308  ;;  %v4115_v54 = vsel %vm255_vm3, %v4112_v8, %v4114_v57  ;;  %v4135_v46 = vsel %vm255_vm3, %v4133_v61, %v4134_v43  ;;  %v4174_v0 = vrot.slane %v4168_v53, 2  ;;  %v5910_v43 = vld [vmem:[%s6358_s20 + $0x38] sm:$0xff]  ;;  %s7806_s20 = sld [smem:[#allocation3]] }
 0x406   : > { %10444 = vst [vmem:[#allocation231_spill] sm:$0xff] %v7724_v60  ;;  %10445 = vst [vmem:[#allocation232_spill] sm:$0xff] %v7726_v58  ;;  %v4176_v8 = vrot.slane %v4169_v23, 2 }
 0x407   : > { %4076 = vrot.lane.b32.xlu1 %v4072_v19, %s10202_s30  ;;  %4078 = vrot.lane.b32.xlu0 %v4073_v59, %s10202_s30  ;;  %v4188_v59 = vstv %s5908_s17  ;;  %v4173_v19 = vrot.slane %v4167_v30, 2  ;;  %s7842_s17 = sld [smem:[#allocation3 + $0xb4]] }
 0x408   : > { %v4189_v5 = vmul.f32 %v4188_v59, %v7402_v45  ;;  %v4190_v57 = vmul.f32 %v4188_v59, %v7399_v17  ;;  %v4177_v53 = vsel %vm318_vm4, %v4174_v0, %v4176_v8 }
 0x409   : > { %v7734_v60 = vpop.permute.xlu1 %3328  ;;  %v7736_v58 = vpop.permute.xlu0 %3330  ;;  %v4175_v61 = vsel %vm318_vm4, %v4173_v19, %v4174_v0 }
 0x40a   : > { %10446 = vst [vmem:[#allocation233_spill] sm:$0xff] %v7734_v60  ;;  %10447 = vst [vmem:[#allocation234_spill] sm:$0xff] %v7736_v58  ;;  %v4195_v30 = vrot.slane %v4189_v5, 2  ;;  %v4196_v23 = vrot.slane %v4190_v57, 2  ;;  %v4220_v5 = vrot.slane %v5910_v43, 5 }
 0x40b   : > { %4116 = vrot.lane.b32.xlu1 %v4113_v18, %s10204_s14  ;;  %4118 = vrot.lane.b32.xlu0 %v4115_v54, %s10204_s14  ;;  %v4191_v18 = vmul.f32 %v4188_v59, %v7412_v38  ;;  %v4212_v59 = vrot.slane %v5909_v52, 1  ;;  %v7901_v38 = vstv %s7850_s29  ;;  %s8340_s29 = sld [smem:[#allocation3 + $0x30]] }
 0x40c   : > { %v4197_v19 = vsel %vm318_vm4, %v4195_v30, %v4196_v23 }
 0x40d   : > { %v7745_v6 = vpop.permute.xlu1 %3368  ;;  %v7747_v31 = vpop.permute.xlu0 %3370 }
 0x40e   : > { %10448 = vst [vmem:[#allocation235_spill] sm:$0xff] %v7745_v6  ;;  %10449 = vst [vmem:[#allocation236_spill] sm:$0xff] %v7747_v31  ;;  %v4198_v6 = vrot.slane %v4191_v18, 2 }
 0x40f   : > { %4138 = vrot.lane.b32.xlu1 %v4135_v46, %s10202_s30  ;;  %4140 = vrot.lane.b32.xlu0 %v4137_v44, %s10202_s30  ;;  %v4215_v46 = vrot.slane %v5909_v52, 7  ;;  %v4216_v44 = vrot.slane %v5910_v43, 7 }
 0x411   : > { %v7756_v54 = vpop.permute.xlu1 %3390  ;;  %v7758_v31 = vpop.permute.xlu0 %3392  ;;  %v4222_v0 = vsel %vm162_vm0, %v4212_v59, %v4215_v46  ;;  %v4217_v8 = vsel %vm162_vm0, %v4215_v46, %v4216_v44 }
 0x412   : > { %10450 = vst [vmem:[#allocation237_spill] sm:$0xff] %v7756_v54  ;;  %10451 = vst [vmem:[#allocation238_spill] sm:$0xff] %v7758_v31  ;;  %v4199_v31 = vsel %vm318_vm4, %v4196_v23, %v4198_v6 }
 0x413   : > { %4178 = vrot.lane.b32.xlu1 %v4175_v61, %s10204_s14  ;;  %4180 = vrot.lane.b32.xlu0 %v4177_v53, %s10204_s14  ;;  %v4223_v61 = vsel %vm162_vm0, %v4216_v44, %v4220_v5 }
 0x415   : > { %v7766_v58 = vpop.permute.xlu1 %3413  ;;  %v7768_v54 = vpop.permute.xlu0 %3415 }
 0x416   : > { %10452 = vst [vmem:[#allocation239_spill] sm:$0xff] %v7766_v58  ;;  %10453 = vst [vmem:[#allocation240_spill] sm:$0xff] %v7768_v54 }
 0x417   : > { %4200 = vrot.lane.b32.xlu1 %v4197_v19, %s10202_s30  ;;  %4202 = vrot.lane.b32.xlu0 %v4199_v31, %s10202_s30  ;;  %s7844_s30 = sld [smem:[#allocation3 + $0xb7]] }
 0x419   : > { %v7776_v57 = vpop.permute.xlu1 %3428  ;;  %v7778_v18 = vpop.permute.xlu0 %3430 }
 0x41a   : > { %10454 = vst [vmem:[#allocation241_spill] sm:$0xff] %v7776_v57  ;;  %10455 = vst [vmem:[#allocation242_spill] sm:$0xff] %v7778_v18  ;;  %v7881_v18 = vstv %s7830_s11  ;;  %v7884_v57 = vstv %s7836_s12  ;;  %s8520_s11 = sld [smem:[#allocation3 + $0x1d]]  ;;  %s8522_s12 = sld [smem:[#allocation3 + $0x20]] }
 0x41b   : > { %4226 = vrot.lane.b32.xlu1 %v4222_v0, %s10204_s14  ;;  %4228 = vrot.lane.b32.xlu0 %v4217_v8, %s10204_s14 }
 0x41d   : > { %v7783_v6 = vpop.permute.xlu1 %3468  ;;  %v7785_v52 = vpop.permute.xlu0 %3470  ;;  %v7894_v58 = vstv %s7844_s30  ;;  %s8356_s30 = sld [smem:[#allocation3 + $0x54]] }
 0x41e   : > { %10456 = vst [vmem:[#allocation243_spill] sm:$0xff] %v7783_v6  ;;  %10457 = vst [vmem:[#allocation244_spill] sm:$0xff] %v7785_v52  ;;  %v574_v52 = vstv %s7826_s9  ;;  %v636_v6 = vstv %s7828_s10  ;;  %s8500_s9 = sld [smem:[#allocation3 + $0x1c]]  ;;  %s8504_s10 = sld [smem:[#allocation3 + $0x1f]] }
 0x41f   : > { %4230 = vrot.lane.b32.xlu1 %v4223_v61, %s10204_s14  ;;  %4235 = vrot.lane.b32.xlu0 %v4222_v0, %s6206_s5  ;;  %s7846_s14 = sld [smem:[#allocation3 + $0xba]]  ;;  %v577_v51 = vmul.f32 %v574_v52, %v6421_v48 }
 0x421   : > { %v7789_v31 = vpop.permute.xlu1 %3490  ;;  %v7791_v43 = vpop.permute.xlu0 %3492  ;;  %v584_v35 = vrot.slane %v577_v51, 1  ;;  %v739_v51 = vmul.f32 %v7881_v18, %v6421_v48 }
 0x422   : > { %10458 = vst [vmem:[#allocation245_spill] sm:$0xff] %v7789_v31  ;;  %10459 = vst [vmem:[#allocation246_spill] sm:$0xff] %v7791_v43  ;;  %v412_v43 = vstv %s7822_s4  ;;  %s8408_s4 = sld [smem:[#allocation3 + $0xbd]] }
 0x423   : > { %4237 = vrot.lane.b32.xlu1 %v4217_v8, %s6206_s5  ;;  %4239 = vrot.lane.b32.xlu0 %v4223_v61, %s6206_s5  ;;  %s7812_s5 = sld [smem:[#allocation3 + $0x6c]]  ;;  %v413_v11 = vmul.f32 %v412_v43, %v6386_v21  ;;  %v414_v63 = vmul.f32 %v412_v43, %v6383_v20 }
 0x425   : > { %v7795_v53 = vpop.permute.xlu1 %3530  ;;  %v7797_v30 = vpop.permute.xlu0 %3532  ;;  %v7897_v60 = vstv %s7846_s14  ;;  %v420_v41 = vrot.slane %v414_v63, 1  ;;  %v738_v63 = vmul.f32 %v7881_v18, %v6383_v20  ;;  %s8350_s14 = sld [smem:[#allocation3 + $0x51]] }
 0x426   : > { %10460 = vst [vmem:[#allocation247_spill] sm:$0xff] %v7795_v53  ;;  %10461 = vst [vmem:[#allocation248_spill] sm:$0xff] %v7797_v30  ;;  %v311_v53 = vstv %s7820_s3  ;;  %s8398_s3 = sld [smem:[#allocation3 + $0x9f]] }
 0x427   : > { %4244 = vrot.lane.b32.xlu1 %v4222_v0, %s6207_s16  ;;  %4246 = vrot.lane.b32.xlu0 %v4217_v8, %s6207_s16  ;;  %v312_v3 = vmul.f32 %v311_v53, %v6386_v21  ;;  %v313_v16 = vmul.f32 %v311_v53, %v6383_v20 }
 0x429   : > { %v7801_v23 = vpop.permute.xlu1 %3552  ;;  %v7803_v59 = vpop.permute.xlu0 %3554  ;;  %v319_v62 = vrot.slane %v312_v3, 2  ;;  %v320_v40 = vrot.slane %v313_v16, 2  ;;  %v737_v16 = vmul.f32 %v7881_v18, %v6386_v21 }
 0x42a   : > { %10462 = vst [vmem:[#allocation249_spill] sm:$0xff] %v7801_v23  ;;  %10463 = vst [vmem:[#allocation250_spill] sm:$0xff] %v7803_v59  ;;  %v861_v59 = vstv %s7818_s0  ;;  %s8386_s0 = sld [smem:[#allocation3 + $0x99]] }
 0x42b   : > { %4248 = vrot.lane.b32.xlu1 %v4223_v61, %s6207_s16  ;;  %s7824_s16 = sld [smem:[#allocation3 + $0x2a]]  ;;  %v248_v61 = vstv %s5692_s28  ;;  %s8396_s28 = sld [smem:[#allocation3 + $0x9c]] }
 0x42c   : > { %v250_v30 = vmul.f32 %v248_v61, %v6383_v20  ;;  %v251_v4 = vmul.f32 %v248_v61, %v6421_v48 }
 0x42d   : > { %v7814_v46 = vpop.permute.xlu1 %3575  ;;  %v7816_v44 = vpop.permute.xlu0 %3577 }
 0x42e   : > { %10464 = vst [vmem:[#allocation251_spill] sm:$0xff] %v7814_v46  ;;  %10465 = vst [vmem:[#allocation252_spill] sm:$0xff] %v7816_v44  ;;  %v249_v46 = vmul.f32 %v248_v61, %v6386_v21  ;;  %v257_v22 = vrot.slane %v250_v30, 1 }
 0x430   : > { %v256_v36 = vrot.slane %v249_v46, 1 }
 0x431   : > { %v7832_v19 = vpop.permute.xlu1 %3590  ;;  %v7834_v0 = vpop.permute.xlu0 %3592  ;;  %v474_v31 = vstv %s7824_s16  ;;  %s8420_s16 = sld [smem:[#allocation3 + $0xc0]] }
 0x432   : > { %10466 = vst [vmem:[#allocation253_spill] sm:$0xff] %v7832_v19  ;;  %10467 = vst [vmem:[#allocation254_spill] sm:$0xff] %v7834_v0  ;;  %v211_v0 = vstv %s7806_s20  ;;  %v699_v19 = vstv %s7812_s5  ;;  %v7953_v14 = vsel %vm255_vm3, %v256_v36, %v257_v22  ;;  %v477_v36 = vmul.f32 %v474_v31, %v6421_v48  ;;  %s8358_s20 = sld [smem:[#allocation3 + $0x57]]  ;;  %s8384_s5 = sld [smem:[#allocation3 + $0x7b]] }
 0x433   : > { %v7912_v9 = vmul.f32 %v211_v0, %v6386_v21  ;;  %v7922_v37 = vmul.f32 %v211_v0, %v6383_v20  ;;  %v7937_v54 = vmul.f32 %v699_v19, %v6386_v21  ;;  %v7943_v0 = vmul.f32 %v861_v59, %v6386_v21 }
 0x434   : > { %v484_v39 = vrot.slane %v477_v36, 2  ;;  %v744_v36 = vrot.slane %v738_v63, 1 }
 0x435   : > { %v7852_v8 = vpop.permute.xlu1 %3630  ;;  %v7854_v5 = vpop.permute.xlu0 %3632  ;;  %10474 = vst [vmem:[#allocation261_spill] sm:$0xff] %v7937_v54  ;;  %10476 = vst [vmem:[#allocation263_spill] sm:$0xff] %v7943_v0  ;;  %v638_v0 = vmul.f32 %v636_v6, %v6383_v20 }
 0x436   : > { %10468 = vst [vmem:[#allocation255_spill] sm:$0xff] %v7852_v8  ;;  %10469 = vst [vmem:[#allocation256_spill] sm:$0xff] %v7854_v5  ;;  %v375_v8 = vstv %s7808_s18  ;;  %v537_v5 = vstv %s7810_s21  ;;  %s8372_s18 = sld [smem:[#allocation3 + $0x75]]  ;;  %s8374_s21 = sld [smem:[#allocation3 + $0x78]] }
 0x437   : > { %v7928_v30 = vmul.f32 %v375_v8, %v6383_v20  ;;  %v7931_v46 = vmul.f32 %v537_v5, %v6386_v21  ;;  %v7934_v61 = vmul.f32 %v537_v5, %v6383_v20  ;;  %v259_v5 = vrot.slane %v251_v4, 1 }
 0x438   : > { %v575_v4 = vmul.f32 %v574_v52, %v6386_v21  ;;  %v644_v3 = vrot.slane %v638_v0, 2 }
 0x439   : > { %v7869_v23 = vpop.permute.xlu1 %3652  ;;  %v7871_v44 = vpop.permute.xlu0 %3654 }
 0x43a   : > { %10470 = vst [vmem:[#allocation257_spill] sm:$0xff] %v7869_v23  ;;  %10471 = vst [vmem:[#allocation258_spill] sm:$0xff] %v7871_v44  ;;  %v7887_v23 = vstv %s7838_s15  ;;  %v7890_v44 = vstv %s7840_s19  ;;  %v581_v28 = vrot.slane %v575_v4, 1  ;;  %s8545_s15 = sld [smem:[#allocation3 + $0x22]]  ;;  %s8578_s19 = sld [smem:[#allocation3 + $0x23]] }
 0x43d   : > { %v7903_v17 = vpop.permute.xlu1 %3692  ;;  %v7905_v45 = vpop.permute.xlu0 %3694 }
 0x43e   : > { %10472 = vst [vmem:[#allocation259_spill] sm:$0xff] %v7903_v17  ;;  %10473 = vst [vmem:[#allocation260_spill] sm:$0xff] %v7905_v45  ;;  %v7925_v17 = vmul.f32 %v375_v8, %v6386_v21  ;;  %v7940_v45 = vmul.f32 %v699_v19, %v6383_v20  ;;  %v7950_v8 = vmul.f32 %v861_v59, %v6383_v20 }
 0x43f   : > { %v314_v19 = vmul.f32 %v311_v53, %v6421_v48  ;;  %v476_v59 = vmul.f32 %v474_v31, %v6383_v20  ;;  %v637_v53 = vmul.f32 %v636_v6, %v6386_v21 }
 0x440   : > { %10475 = vst [vmem:[#allocation262_spill] sm:$0xff] %v7940_v45  ;;  %10479 = vst [vmem:[#allocation266_spill] sm:$0xff] %v7950_v8  ;;  %v576_v8 = vmul.f32 %v574_v52, %v6383_v20  ;;  %v419_v45 = vrot.slane %v413_v11, 1  ;;  %v7986_v11 = vsel %vm318_vm4, %v319_v62, %v320_v40  ;;  %v801_v62 = vmul.f32 %v7884_v57, %v6421_v48 }
 0x441   : > { %v7945_v10 = vpop.permute.xlu1 %3714  ;;  %v7947_v26 = vpop.permute.xlu0 %3716  ;;  %v322_v42 = vrot.slane %v314_v19, 2  ;;  %v482_v15 = vrot.slane %v476_v59, 2  ;;  %v743_v59 = vrot.slane %v737_v16, 1 }
 0x442   : > { %10477 = vst [vmem:[#allocation264_spill] sm:$0xff] %v7945_v10  ;;  %10478 = vst [vmem:[#allocation265_spill] sm:$0xff] %v7947_v26  ;;  %v415_v10 = vmul.f32 %v412_v43, %v6421_v48  ;;  %v475_v26 = vmul.f32 %v474_v31, %v6386_v21  ;;  %v7973_v43 = vsel %vm255_vm3, %v257_v22, %v259_v5  ;;  %v808_v4 = vrot.slane %v801_v62, 2 }
 0x443   : > { %v639_v31 = vmul.f32 %v636_v6, %v6421_v48  ;;  %v7996_v6 = vsel %vm255_vm3, %v419_v45, %v420_v41 }
 0x444   : > { %v422_v54 = vrot.slane %v415_v10, 1  ;;  %v481_v52 = vrot.slane %v475_v26, 2  ;;  %v7989_v10 = vsel %vm318_vm4, %v320_v40, %v322_v42  ;;  %v799_v26 = vmul.f32 %v7884_v57, %v6386_v21 }
 0x445   : > { %v7968_v47 = vpop.permute.xlu1 %3737  ;;  %v7970_v32 = vpop.permute.xlu0 %3739  ;;  %v646_v5 = vrot.slane %v639_v31, 2  ;;  %v8009_v40 = vsel %vm318_vm4, %v482_v15, %v484_v39  ;;  %v746_v39 = vrot.slane %v739_v51, 1  ;;  %v962_v31 = vmul.f32 %v7890_v44, %v6383_v20 }
 0x446   : > { %10480 = vst [vmem:[#allocation267_spill] sm:$0xff] %v7968_v47  ;;  %10481 = vst [vmem:[#allocation268_spill] sm:$0xff] %v7970_v32  ;;  %v582_v47 = vrot.slane %v576_v8, 1  ;;  %v643_v32 = vrot.slane %v637_v53, 2  ;;  %v7999_v0 = vsel %vm255_vm3, %v420_v41, %v422_v54  ;;  %v800_v8 = vmul.f32 %v7884_v57, %v6383_v20 }
 0x447   : > { %v8006_v42 = vsel %vm318_vm4, %v481_v52, %v482_v15  ;;  %v8025_v57 = vsel %vm318_vm4, %v644_v3, %v646_v5  ;;  %v805_v15 = vrot.slane %v799_v26, 2  ;;  %v901_v53 = vmul.f32 %v7887_v23, %v6421_v48 }
 0x448   : > { %v8012_v18 = vsel %vm255_vm3, %v581_v28, %v582_v47  ;;  %v8015_v45 = vsel %vm255_vm3, %v582_v47, %v584_v35  ;;  %v8022_v19 = vsel %vm318_vm4, %v643_v32, %v644_v3  ;;  %10486 = vst [vmem:[#allocation273_spill] sm:$0xff] %v8025_v57  ;;  %v899_v28 = vmul.f32 %v7887_v23, %v6386_v21 }
 0x449   : > { %v7977_v27 = vpop.permute.xlu1 %3752  ;;  %v7979_v22 = vpop.permute.xlu0 %3754  ;;  %v900_v35 = vmul.f32 %v7887_v23, %v6383_v20  ;;  %v806_v47 = vrot.slane %v800_v8, 2  ;;  %v961_v32 = vmul.f32 %v7890_v44, %v6386_v21  ;;  %v963_v52 = vmul.f32 %v7890_v44, %v6421_v48 }
 0x44a   : > { %10482 = vst [vmem:[#allocation269_spill] sm:$0xff] %v7977_v27  ;;  %10483 = vst [vmem:[#allocation270_spill] sm:$0xff] %v7979_v22  ;;  %v1061_v3 = vmul.f32 %v7894_v58, %v6386_v21  ;;  %v1062_v5 = vmul.f32 %v7894_v58, %v6383_v20  ;;  %v8048_v23 = vsel %vm255_vm3, %v743_v59, %v744_v36  ;;  %v905_v62 = vrot.slane %v899_v28, 1 }
 0x44b   : > { %v1063_v51 = vmul.f32 %v7894_v58, %v6421_v48  ;;  %v1123_v26 = vmul.f32 %v7897_v60, %v6386_v21  ;;  %v1124_v44 = vmul.f32 %v7897_v60, %v6383_v20  ;;  %v8057_v8 = vsel %vm255_vm3, %v744_v36, %v746_v39 }
 0x44c   : > { %v8062_v59 = vsel %vm318_vm4, %v805_v15, %v806_v47  ;;  %v8065_v58 = vsel %vm318_vm4, %v806_v47, %v808_v4  ;;  %v968_v22 = vrot.slane %v962_v31, 2  ;;  %v970_v27 = vrot.slane %v963_v52, 2 }
 0x44d   : > { %v8017_v41 = vpop.permute.xlu1 %3792  ;;  %v8019_v54 = vpop.permute.xlu0 %3794  ;;  %v1067_v57 = vrot.slane %v1061_v3, 1  ;;  %v1068_v36 = vrot.slane %v1062_v5, 1  ;;  %v1130_v15 = vrot.slane %v1124_v44, 2  ;;  %v1223_v47 = vmul.f32 %v7901_v38, %v6386_v21 }
 0x44e   : > { %10484 = vst [vmem:[#allocation271_spill] sm:$0xff] %v8017_v41  ;;  %10485 = vst [vmem:[#allocation272_spill] sm:$0xff] %v8019_v54  ;;  %v906_v54 = vrot.slane %v900_v35, 1  ;;  %v967_v41 = vrot.slane %v961_v32, 2  ;;  %v1129_v35 = vrot.slane %v1123_v26, 2  ;;  %v1224_v52 = vmul.f32 %v7901_v38, %v6383_v20 }
 0x44f   : > { %v1225_v26 = vmul.f32 %v7901_v38, %v6421_v48  ;;  %v1285_v44 = vmul.f32 %v7909_v7, %v6386_v21 }
 0x450   : > { %v8074_v4 = vsel %vm255_vm3, %v905_v62, %v906_v54  ;;  %v8096_v62 = vsel %vm318_vm4, %v967_v41, %v968_v22 }
 0x451   : > { %v8043_v16 = vpop.permute.xlu1 %3814  ;;  %v8045_v63 = vpop.permute.xlu0 %3816 }
 0x452   : > { %10487 = vst [vmem:[#allocation274_spill] sm:$0xff] %v8043_v16  ;;  %10488 = vst [vmem:[#allocation275_spill] sm:$0xff] %v8045_v63  ;;  %v1125_v63 = vmul.f32 %v7897_v60, %v6421_v48  ;;  %v908_v16 = vrot.slane %v901_v53, 1  ;;  %v1070_v60 = vrot.slane %v1063_v51, 1  ;;  %v10491_v53 = vstv %s7842_s17  ;;  %s10625_s17 = smov 127  }
 0x453   : > { %v8079_v32 = vmul.f32 %v10491_v53, %v6386_v21  ;;  %v10492_v5 = vmov %v10491_v53  ;;  %v10493_v53 = vstv %s7848_s1  ;;  %s8310_s1 = sld [smem:[#allocation3 + $0xc]] }
 0x454   : > { %v1132_v31 = vrot.slane %v1125_v63, 2  ;;  %v8084_v3 = vsel %vm255_vm3, %v906_v54, %v908_v16  ;;  %v8089_v51 = vmul.f32 %v10492_v5, %v6383_v20  ;;  %v8099_v63 = vsel %vm318_vm4, %v968_v22, %v970_v27 }
 0x455   : > { %v8067_v39 = vpop.permute.xlu1 %3854  ;;  %v8069_v28 = vpop.permute.xlu0 %3856  ;;  %v8104_v54 = vmul.f32 %v10493_v53, %v6386_v21  ;;  %v10494_v16 = vmov %v10493_v53  ;;  %v8119_v41 = vsel %vm255_vm3, %v1068_v36, %v1070_v60  ;;  %v8122_v27 = vsel %vm318_vm4, %v1129_v35, %v1130_v15 }
 0x456   : > { %10489 = vst [vmem:[#allocation276_spill] sm:$0xff] %v8067_v39  ;;  %10490 = vst [vmem:[#allocation277_spill] sm:$0xff] %v8069_v28  ;;  %v8109_v5 = vmul.f32 %v10494_v16, %v6383_v20  ;;  %v8116_v39 = vsel %vm255_vm3, %v1067_v57, %v1068_v36  ;;  %v1229_v22 = vrot.slane %v1223_v47, 1  ;;  %v8125_v53 = vsel %vm318_vm4, %v1130_v15, %v1132_v31 }
 0x457   : > { %10497 = vst [vmem:[#allocation280_spill] sm:$0xff] %v8122_v27  ;;  %10498 = vst [vmem:[#allocation281_spill] sm:$0xff] %v8125_v53  ;;  %v1230_v16 = vrot.slane %v1224_v52, 1  ;;  %v229_v57 = vadd.f32 %v6571_v49, %v7912_v9  ;;  %v1232_v36 = vrot.slane %v1225_v26, 1  ;;  %v1291_v60 = vrot.slane %v1285_v44, 2 }
 0x458   : > { %v1385_v35 = vmul.f32 %v7916_v29, %v6386_v21  ;;  %v230_v15 = vadd.f32 %v6573_v50, %v7922_v37  ;;  %v1386_v47 = vmul.f32 %v7916_v29, %v6383_v20  ;;  %v1387_v31 = vmul.f32 %v7916_v29, %v6421_v48 }
 0x459   : > { %v8111_v28 = vpop.permute.xlu1 %3876  ;;  %v8113_v38 = vpop.permute.xlu0 %3878  ;;  %v244_v9 = vadd.f32 %v6579_v55, %v229_v57  ;;  %v393_v26 = vadd.f32 %v6591_v1, %v7925_v17  ;;  %v10501_v50 = vstv %s7858_s7  ;;  %v1448_v44 = vmul.f32 %v7919_v33, %v6383_v20  ;;  %s8348_s7 = sld [smem:[#allocation3 + $0x33]] }
 0x45a   : > { %10495 = vst [vmem:[#allocation278_spill] sm:$0xff] %v8111_v28  ;;  %10496 = vst [vmem:[#allocation279_spill] sm:$0xff] %v8113_v38  ;;  %v1286_v28 = vmul.f32 %v7909_v7, %v6383_v20  ;;  %v1287_v38 = vmul.f32 %v7909_v7, %v6421_v48  ;;  %v1447_v7 = vmul.f32 %v7919_v33, %v6386_v21  ;;  %v10502_v27 = vmov %v10501_v50 }
 0x45b   : > { %v8153_v37 = vmul.f32 %v10501_v50, %v6386_v21  ;;  %v245_v29 = vadd.f32 %v6581_v56, %v230_v15  ;;  %v1449_v55 = vmul.f32 %v7919_v33, %v6421_v48  ;;  %v408_v57 = vadd.f32 %v6602_v12, %v393_v26 }
 0x45c   : > { %v1292_v53 = vrot.slane %v1286_v28, 2  ;;  %v8167_v1 = vsel %vm255_vm3, %v1229_v22, %v1230_v16  ;;  %v8170_v21 = vsel %vm255_vm3, %v1230_v16, %v1232_v36  ;;  %v1294_v17 = vrot.slane %v1287_v38, 2 }
 0x45d   : > { %v8143_v52 = vpop.permute.xlu1 %3899  ;;  %v8145_v49 = vpop.permute.xlu0 %3901  ;;  %v1391_v50 = vrot.slane %v1385_v35, 1  ;;  %v1394_v56 = vrot.slane %v1387_v31, 1  ;;  %v1453_v28 = vrot.slane %v1447_v7, 2  ;;  %v394_v48 = vadd.f32 %v6593_v2, %v7928_v30  ;;  %v10505_v2 = vld [vmem:[#allocation25_spill] sm:$0xff]  ;;  %v10507_v31 = vld [vmem:[#allocation26_spill] sm:$0xff] }
 0x45e   : > { %10499 = vst [vmem:[#allocation282_spill] sm:$0xff] %v8143_v52  ;;  %10500 = vst [vmem:[#allocation283_spill] sm:$0xff] %v8145_v49  ;;  %v8161_v52 = vmul.f32 %v10502_v27, %v6383_v20  ;;  %v1392_v49 = vrot.slane %v1386_v47, 1  ;;  %v555_v12 = vadd.f32 %v6613_v24, %v7931_v46  ;;  %v263_v33 = vadd.f32 %v7953_v14, %v244_v9  ;;  %v10506_v46 = vld [vmem:[#allocation16_spill] sm:$0xff]  ;;  %v10511_v9 = vld [vmem:[#allocation33_spill] sm:$0xff] }
 0x45f   : > { %v1454_v27 = vrot.slane %v1448_v44, 2  ;;  %v556_v38 = vadd.f32 %v6615_v25, %v7934_v61  ;;  %v264_v22 = vadd.f32 %v7973_v43, %v245_v29  ;;  %v8185_v16 = vsel %vm318_vm4, %v1291_v60, %v1292_v53  ;;  %v10512_v29 = vld [vmem:[#allocation261_spill] sm:$0xff] }
 0x460   : > { %v1456_v36 = vrot.slane %v1449_v55, 2  ;;  %v409_v35 = vadd.f32 %v6604_v13, %v394_v48  ;;  %v570_v47 = vadd.f32 %v6624_v34, %v555_v12  ;;  %v285_v30 = vadd.f32 %v10505_v2, %v263_v33  ;;  %v10510_v13 = vld [vmem:[#allocation27_spill] sm:$0xff]  ;;  %v10513_v55 = vld [vmem:[#allocation17_spill] sm:$0xff]  ;;  %v10516_v48 = vld [vmem:[#allocation28_spill] sm:$0xff] }
 0x461   : > { %v8172_v15 = vpop.permute.xlu1 %3914  ;;  %v8174_v20 = vpop.permute.xlu0 %3916  ;;  %v426_v24 = vadd.f32 %v7996_v6, %v408_v57  ;;  %v571_v14 = vadd.f32 %v10506_v46, %v556_v38  ;;  %v286_v7 = vadd.f32 %v10507_v31, %v264_v22  ;;  %v8194_v25 = vsel %vm318_vm4, %v1292_v53, %v1294_v17  ;;  %v10514_v57 = vld [vmem:[#allocation262_spill] sm:$0xff]  ;;  %v10517_v38 = vld [vmem:[#allocation263_spill] sm:$0xff]  ;;  %v10518_v22 = vld [vmem:[#allocation21_spill] sm:$0xff] }
 0x462   : > { %10503 = vst [vmem:[#allocation284_spill] sm:$0xff] %v8172_v15  ;;  %10504 = vst [vmem:[#allocation285_spill] sm:$0xff] %v8174_v20  ;;  %v8197_v61 = vsel %vm255_vm3, %v1391_v50, %v1392_v49  ;;  %v307_v34 = vadd.f32 %v10510_v13, %v285_v30  ;;  %v1395_v6 = vsel %vm255_vm3, %v1392_v49, %v1394_v56  ;;  %v10515_v17 = vld [vmem:[#allocation18_spill] sm:$0xff]  ;;  %v10519_v49 = vld [vmem:[#allocation35_spill] sm:$0xff]  ;;  %v4401_v20 = vstv %s8578_s19  ;;  %s8924_s19 = sld [smem:[#allocation3 + $0x5d]] }
 0x463   : > { %v448_v26 = vadd.f32 %v10511_v9, %v426_v24  ;;  %v8207_v44 = vsel %vm318_vm4, %v1453_v28, %v1454_v27  ;;  %v717_v53 = vadd.f32 %v10513_v55, %v10512_v29  ;;  %v718_v50 = vadd.f32 %v10515_v17, %v10514_v57  ;;  %v10520_v24 = vld [vmem:[#allocation19_spill] sm:$0xff]  ;;  %v10521_v31 = vld [vmem:[#allocation20_spill] sm:$0xff]  ;;  %v10522_v9 = vld [vmem:[#allocation266_spill] sm:$0xff] }
 0x464   : > { %v308_v12 = vadd.f32 %v10516_v48, %v286_v7  ;;  %v8215_v33 = vsel %vm318_vm4, %v1454_v27, %v1456_v36  ;;  %v879_v2 = vadd.f32 %v10518_v22, %v10517_v38  ;;  %v427_v30 = vadd.f32 %v7999_v0, %v409_v35  ;;  %v10523_v29 = vld [vmem:[#allocation22_spill] sm:$0xff]  ;;  %v10526_v57 = vld [vmem:[#allocation23_spill] sm:$0xff] }
 0x465   : > { %v8199_v43 = vpop.permute.xlu1 %3954  ;;  %v8201_v60 = vpop.permute.xlu0 %3956  ;;  %v470_v56 = vadd.f32 %v10519_v49, %v448_v26  ;;  %v588_v28 = vadd.f32 %v8012_v18, %v570_v47  ;;  %v732_v46 = vadd.f32 %v10520_v24, %v717_v53  ;;  %v733_v13 = vadd.f32 %v10521_v31, %v718_v50  ;;  %v10527_v35 = vld [vmem:[#allocation34_spill] sm:$0xff]  ;;  %v10528_v18 = vld [vmem:[#allocation65_spill] sm:$0xff]  ;;  %v10529_v53 = vld [vmem:[#allocation24_spill] sm:$0xff] }
 0x466   : > { %10508 = vst [vmem:[#allocation25_spill] sm:$0xff] %v8199_v43  ;;  %10509 = vst [vmem:[#allocation16_spill] sm:$0xff] %v8201_v60  ;;  %v880_v55 = vadd.f32 %v10523_v29, %v10522_v9  ;;  %v589_v7 = vadd.f32 %v8015_v45, %v571_v14  ;;  %v894_v17 = vadd.f32 %v10526_v57, %v879_v2  ;;  %v10530_v38 = vld [vmem:[#allocation66_spill] sm:$0xff]  ;;  %v10531_v14 = vld [vmem:[#allocation77_spill] sm:$0xff] }
 0x467   : > { %v326_v0 = vadd.f32 %v7986_v11, %v307_v34  ;;  %v449_v26 = vadd.f32 %v10527_v35, %v427_v30  ;;  %v1041_v47 = vadd.f32 %v10528_v18, %v8079_v32  ;;  %v327_v48 = vadd.f32 %v7989_v10, %v308_v12  ;;  %v10532_v49 = vld [vmem:[#allocation36_spill] sm:$0xff]  ;;  %v10533_v11 = vld [vmem:[#allocation67_spill] sm:$0xff]  ;;  %v10534_v30 = vld [vmem:[#allocation78_spill] sm:$0xff] }
 0x468   : > { %v895_v50 = vadd.f32 %v10529_v53, %v880_v55  ;;  %v1042_v45 = vadd.f32 %v10530_v38, %v8089_v51  ;;  %v1203_v22 = vadd.f32 %v10531_v14, %v8104_v54  ;;  %v488_v2 = vadd.f32 %v8006_v42, %v470_v56  ;;  %v10535_v32 = vld [vmem:[#allocation68_spill] sm:$0xff]  ;;  %v10536_v29 = vld [vmem:[#allocation79_spill] sm:$0xff]  ;;  %v10537_v10 = vld [vmem:[#allocation89_spill] sm:$0xff] }
 0x469   : > { %v8227_v27 = vpop.permute.xlu1 %3976  ;;  %v8229_v36 = vpop.permute.xlu0 %3978  ;;  %v471_v24 = vadd.f32 %v10532_v49, %v449_v26  ;;  %v1056_v34 = vadd.f32 %v10533_v11, %v1041_v47  ;;  %v1204_v31 = vadd.f32 %v10534_v30, %v8109_v5  ;;  %v1365_v12 = vadd.f32 %v10537_v10, %v8153_v37  ;;  %v10538_v51 = vld [vmem:[#allocation90_spill] sm:$0xff]  ;;  %v10541_v42 = vld [vmem:[#allocation29_spill] sm:$0xff]  ;;  %v10542_v18 = vld [vmem:[#allocation80_spill] sm:$0xff] }
 0x46a   : > { %10524 = vst [vmem:[#allocation26_spill] sm:$0xff] %v8227_v27  ;;  %10525 = vst [vmem:[#allocation27_spill] sm:$0xff] %v8229_v36  ;;  %v1057_v9 = vadd.f32 %v10535_v32, %v1042_v45  ;;  %v1218_v55 = vadd.f32 %v10536_v29, %v1203_v22  ;;  %v1366_v57 = vadd.f32 %v10538_v51, %v8161_v52  ;;  %v10543_v37 = vld [vmem:[#allocation91_spill] sm:$0xff]  ;;  %v10544_v14 = vld [vmem:[#allocation92_spill] sm:$0xff] }
 0x46b   : > { %v348_v56 = vadd.f32 %v10541_v42, %v326_v0  ;;  %v750_v26 = vadd.f32 %v8048_v23, %v732_v46  ;;  %v751_v5 = vadd.f32 %v8057_v8, %v733_v13  ;;  %v1219_v47 = vadd.f32 %v10542_v18, %v1204_v31  ;;  %v10545_v22 = vld [vmem:[#allocation30_spill] sm:$0xff]  ;;  %v10546_v11 = vld [vmem:[#allocation31_spill] sm:$0xff]  ;;  %v10547_v0 = vld [vmem:[#allocation41_spill] sm:$0xff] }
 0x46c   : > { %v912_v53 = vadd.f32 %v8074_v4, %v894_v17  ;;  %v913_v38 = vadd.f32 %v8084_v3, %v895_v50  ;;  %v1380_v45 = vadd.f32 %v10543_v37, %v1365_v12  ;;  %v1381_v52 = vadd.f32 %v10544_v14, %v1366_v57  ;;  %v10548_v8 = vld [vmem:[#allocation37_spill] sm:$0xff]  ;;  %v10552_v29 = vld [vmem:[#allocation43_spill] sm:$0xff]  ;;  %v10558_v42 = vld [vmem:[#allocation58_spill] sm:$0xff] }
 0x46d   : > { %v8253_v54 = vpop.permute.xlu1 %4016  ;;  %v8255_v35 = vpop.permute.xlu0 %4018  ;;  %v349_v49 = vadd.f32 %v10545_v22, %v327_v48  ;;  %v8267_v30 = vadd.f32 %v10546_v11, %v348_v56  ;;  %v610_v32 = vadd.f32 %v10547_v0, %v588_v28  ;;  %v1074_v23 = vadd.f32 %v8116_v39, %v1056_v34  ;;  %v10551_v48 = vld [vmem:[#allocation42_spill] sm:$0xff]  ;;  %v10553_v12 = vld [vmem:[#allocation49_spill] sm:$0xff]  ;;  %v10560_v37 = vld [vmem:[#allocation52_spill] sm:$0xff] }
 0x46e   : > { %10539 = vst [vmem:[#allocation33_spill] sm:$0xff] %v8253_v54  ;;  %10540 = vst [vmem:[#allocation261_spill] sm:$0xff] %v8255_v35  ;;  %v510_v46 = vadd.f32 %v10548_v8, %v488_v2  ;;  %v489_v13 = vadd.f32 %v8009_v40, %v471_v24  ;;  %v1075_v4 = vadd.f32 %v8119_v41, %v1057_v9  ;;  %v10554_v34 = vld [vmem:[#allocation50_spill] sm:$0xff]  ;;  %v10555_v51 = vld [vmem:[#allocation57_spill] sm:$0xff] }
 0x46f   : > { %v1236_v3 = vadd.f32 %v8167_v1, %v1218_v55  ;;  %v611_v31 = vadd.f32 %v10551_v48, %v589_v7  ;;  %v632_v10 = vadd.f32 %v10552_v29, %v610_v32  ;;  %v772_v28 = vadd.f32 %v10553_v12, %v750_v26  ;;  %v10556_v1 = vld [vmem:[#allocation44_spill] sm:$0xff]  ;;  %v10557_v55 = vld [vmem:[#allocation51_spill] sm:$0xff]  ;;  %v10559_v7 = vld [vmem:[#allocation69_spill] sm:$0xff] }
 0x470   : > { %v1237_v39 = vadd.f32 %v8170_v21, %v1219_v47  ;;  %v773_v2 = vadd.f32 %v10554_v34, %v751_v5  ;;  %v934_v40 = vadd.f32 %v10555_v51, %v912_v53  ;;  %v1398_v41 = vadd.f32 %v8197_v61, %v1380_v45  ;;  %v10561_v26 = vld [vmem:[#allocation59_spill] sm:$0xff]  ;;  %v10562_v21 = vld [vmem:[#allocation70_spill] sm:$0xff]  ;;  %v10563_v5 = vld [vmem:[#allocation81_spill] sm:$0xff] }
 0x471   : > { %v8275_v17 = vpop.permute.xlu1 %4038  ;;  %v8277_v50 = vpop.permute.xlu0 %4040  ;;  %v1399_v24 = vadd.f32 %v1395_v6, %v1381_v52  ;;  %v633_v9 = vadd.f32 %v10556_v1, %v611_v31  ;;  %v794_v57 = vadd.f32 %v10557_v55, %v772_v28  ;;  %v935_v56 = vadd.f32 %v10558_v42, %v913_v38  ;;  %v10566_v45 = vld [vmem:[#allocation60_spill] sm:$0xff]  ;;  %v10567_v0 = vld [vmem:[#allocation71_spill] sm:$0xff]  ;;  %v10568_v32 = vld [vmem:[#allocation82_spill] sm:$0xff] }
 0x472   : > { %10549 = vst [vmem:[#allocation17_spill] sm:$0xff] %v8275_v17  ;;  %10550 = vst [vmem:[#allocation262_spill] sm:$0xff] %v8277_v50  ;;  %v1096_v18 = vadd.f32 %v10559_v7, %v1074_v23  ;;  %v795_v14 = vadd.f32 %v10560_v37, %v773_v2  ;;  %v956_v22 = vadd.f32 %v10561_v26, %v934_v40  ;;  %v10569_v8 = vld [vmem:[#allocation72_spill] sm:$0xff]  ;;  %v10570_v31 = vld [vmem:[#allocation83_spill] sm:$0xff] }
 0x473   : > { %v1097_v47 = vadd.f32 %v10562_v21, %v1075_v4  ;;  %v1258_v11 = vadd.f32 %v10563_v5, %v1236_v3  ;;  %v650_v6 = vadd.f32 %v8022_v19, %v632_v10  ;;  %v957_v52 = vadd.f32 %v10566_v45, %v935_v56  ;;  %v10571_v12 = vld [vmem:[#allocation93_spill] sm:$0xff]  ;;  %v10572_v28 = vld [vmem:[#allocation94_spill] sm:$0xff]  ;;  %v10575_v10 = vld [vmem:[#allocation84_spill] sm:$0xff] }
 0x474   : > { %v1118_v38 = vadd.f32 %v10567_v0, %v1096_v18  ;;  %v1259_v23 = vadd.f32 %v10568_v32, %v1237_v39  ;;  %v1420_v4 = vadd.f32 %v10571_v12, %v1398_v41  ;;  %v1421_v3 = vadd.f32 %v10572_v28, %v1399_v24  ;;  %v10573_v34 = vld [vmem:[#allocation38_spill] sm:$0xff]  ;;  %v10574_v51 = vld [vmem:[#allocation273_spill] sm:$0xff]  ;;  %v10576_v42 = vld [vmem:[#allocation95_spill] sm:$0xff] }
 0x475   : > { %v8294_v53 = vpop.permute.xlu1 %4061  ;;  %v8296_v61 = vpop.permute.xlu0 %4063  ;;  %v1119_v48 = vadd.f32 %v10569_v8, %v1097_v47  ;;  %v1280_v29 = vadd.f32 %v10570_v31, %v1258_v11  ;;  %v511_v2 = vadd.f32 %v10573_v34, %v489_v13  ;;  %v651_v40 = vadd.f32 %v10574_v51, %v633_v9  ;;  %v10577_v7 = vld [vmem:[#allocation96_spill] sm:$0xff]  ;;  %v10585_v47 = vld [vmem:[#allocation281_spill] sm:$0xff] }
 0x476   : > { %10564 = vst [vmem:[#allocation18_spill] sm:$0xff] %v8294_v53  ;;  %10565 = vst [vmem:[#allocation28_spill] sm:$0xff] %v8296_v61  ;;  %v812_v19 = vadd.f32 %v8062_v59, %v794_v57  ;;  %v1281_v1 = vadd.f32 %v10575_v10, %v1259_v23  ;;  %v813_v39 = vadd.f32 %v8065_v58, %v795_v14  ;;  %v10580_v13 = vld [vmem:[#allocation32_spill] sm:$0xff]  ;;  %v10581_v59 = vld [vmem:[#allocation45_spill] sm:$0xff] }
 0x477   : > { %v974_v55 = vadd.f32 %v8096_v62, %v956_v22  ;;  %v1442_v56 = vadd.f32 %v10576_v42, %v1420_v4  ;;  %v1443_v41 = vadd.f32 %v10577_v7, %v1421_v3  ;;  %v8321_v9 = vadd.f32 %v10580_v13, %v349_v49  ;;  %v10582_v26 = vld [vmem:[#allocation280_spill] sm:$0xff]  ;;  %v10583_v58 = vld [vmem:[#allocation39_spill] sm:$0xff]  ;;  %v10595_v3 = vld [vmem:[#allocation62_spill] sm:$0xff] }
 0x478   : > { %v672_v57 = vadd.f32 %v10581_v59, %v650_v6  ;;  %v975_v37 = vadd.f32 %v8099_v63, %v957_v52  ;;  %v1136_v21 = vadd.f32 %v10582_v26, %v1118_v38  ;;  %v8331_v62 = vadd.f32 %v10583_v58, %v510_v46  ;;  %v10584_v14 = vld [vmem:[#allocation40_spill] sm:$0xff]  ;;  %v10586_v63 = vld [vmem:[#allocation46_spill] sm:$0xff]  ;;  %v10587_v6 = vld [vmem:[#allocation47_spill] sm:$0xff] }
 0x479   : > { %v8316_v18 = vpop.permute.xlu1 %4076  ;;  %v8318_v24 = vpop.permute.xlu0 %4078  ;;  %v8334_v22 = vadd.f32 %v10584_v14, %v511_v2  ;;  %v1137_v5 = vadd.f32 %v10585_v47, %v1119_v48  ;;  %v1298_v49 = vadd.f32 %v8185_v16, %v1280_v29  ;;  %v673_v11 = vadd.f32 %v10586_v63, %v651_v40  ;;  %v10588_v52 = vld [vmem:[#allocation53_spill] sm:$0xff]  ;;  %v10589_v38 = vld [vmem:[#allocation54_spill] sm:$0xff]  ;;  %v10594_v4 = vld [vmem:[#allocation55_spill] sm:$0xff] }
 0x47a   : > { %10578 = vst [vmem:[#allocation263_spill] sm:$0xff] %v8316_v18  ;;  %10579 = vst [vmem:[#allocation21_spill] sm:$0xff] %v8318_v24  ;;  %v8344_v45 = vadd.f32 %v10587_v6, %v672_v57  ;;  %v834_v0 = vadd.f32 %v10588_v52, %v812_v19  ;;  %v1299_v46 = vadd.f32 %v8194_v25, %v1281_v1  ;;  %v10590_v16 = vld [vmem:[#allocation61_spill] sm:$0xff]  ;;  %v10593_v25 = vld [vmem:[#allocation48_spill] sm:$0xff]  ;;  %v1598_v57 = vstv %s8310_s1  ;;  %s10626_s1 = smov 126  }
 0x47b   : > { %v835_v32 = vadd.f32 %v10589_v38, %v813_v39  ;;  %v996_v23 = vadd.f32 %v10590_v16, %v974_v55  ;;  %v1460_v8 = vadd.f32 %v8207_v44, %v1442_v56  ;;  %v1461_v48 = vadd.f32 %v8215_v33, %v1443_v41  ;;  %v10596_v44 = vld [vmem:[#allocation73_spill] sm:$0xff]  ;;  %v10597_v33 = vld [vmem:[#allocation56_spill] sm:$0xff]  ;;  %v10598_v40 = vld [vmem:[#allocation63_spill] sm:$0xff] }
 0x47c   : > { %v8365_v12 = vadd.f32 %v10593_v25, %v673_v11  ;;  %v8368_v28 = vadd.f32 %v10594_v4, %v834_v0  ;;  %v997_v34 = vadd.f32 %v10595_v3, %v975_v37  ;;  %v1158_v2 = vadd.f32 %v10596_v44, %v1136_v21  ;;  %v10599_v10 = vld [vmem:[#allocation74_spill] sm:$0xff]  ;;  %v10600_v39 = vld [vmem:[#allocation85_spill] sm:$0xff]  ;;  %v10601_v42 = vld [vmem:[#allocation64_spill] sm:$0xff] }
 0x47d   : > { %v8360_v31 = vpop.permute.xlu1 %4116  ;;  %v8362_v29 = vpop.permute.xlu0 %4118  ;;  %v8377_v51 = vadd.f32 %v10597_v33, %v835_v32  ;;  %v8380_v19 = vadd.f32 %v10598_v40, %v996_v23  ;;  %v1159_v1 = vadd.f32 %v10599_v10, %v1137_v5  ;;  %v1320_v55 = vadd.f32 %v10600_v39, %v1298_v49  ;;  %v10602_v7 = vld [vmem:[#allocation75_spill] sm:$0xff]  ;;  %v10603_v13 = vld [vmem:[#allocation86_spill] sm:$0xff]  ;;  %v10604_v37 = vld [vmem:[#allocation76_spill] sm:$0xff] }
 0x47e   : > { %10591 = vst [vmem:[#allocation35_spill] sm:$0xff] %v8360_v31  ;;  %10592 = vst [vmem:[#allocation19_spill] sm:$0xff] %v8362_v29  ;;  %v8389_v56 = vadd.f32 %v10601_v42, %v997_v34  ;;  %v8392_v41 = vadd.f32 %v10602_v7, %v1158_v2  ;;  %v1321_v59 = vadd.f32 %v10603_v13, %v1299_v46  ;;  %v10605_v21 = vld [vmem:[#allocation87_spill] sm:$0xff]  ;;  %v10607_v14 = vld [vmem:[#allocation97_spill] sm:$0xff]  ;;  %v1561_v0 = vstv %s8326_s23  ;;  %s8656_s23 = sld [smem:[#allocation3 + $0x40]] }
 0x47f   : > { %v8401_v26 = vadd.f32 %v10604_v37, %v1159_v1  ;;  %v8404_v58 = vadd.f32 %v10605_v21, %v1320_v55  ;;  %v1482_v47 = vadd.f32 %v10607_v14, %v1460_v8  ;;  %v10608_v5 = vld [vmem:[#allocation98_spill] sm:$0xff]  ;;  %v10611_v6 = vld [vmem:[#allocation88_spill] sm:$0xff]  ;;  %v10612_v46 = vld [vmem:[#allocation103_spill] sm:$0xff]  ;;  %v1660_v32 = vstv %s8328_s24  ;;  %s8665_s24 = sld [smem:[#allocation3 + $0x43]] }
 0x480   : > { %v1483_v49 = vadd.f32 %v10608_v5, %v1461_v48  ;;  %v8415_v52 = vadd.f32 %v10611_v6, %v1321_v59  ;;  %v1601_v38 = vmul.f32 %v1598_v57, %v10612_v46  ;;  %v10613_v16 = vld [vmem:[#allocation99_spill] sm:$0xff]  ;;  %v10615_v8 = vld [vmem:[#allocation100_spill] sm:$0xff]  ;;  %v10617_v25 = vld [vmem:[#allocation102_spill] sm:$0xff]  ;;  %v1724_v44 = vstv %s8338_s26  ;;  %s8677_s26 = sld [smem:[#allocation3 + $0x41]] }
 0x481   : > { %10606 = vst [vmem:[#allocation20_spill] sm:$0xff] %v8404_v58  ;;  %v8410_v63 = vpop.permute.xlu1 %4138  ;;  %v8412_v11 = vpop.permute.xlu0 %4140  ;;  %v8423_v23 = vadd.f32 %v10613_v16, %v1482_v47  ;;  %v1600_v4 = vmul.f32 %v1598_v57, %v10617_v25  ;;  %v10618_v3 = vld [vmem:[#allocation101_spill] sm:$0xff]  ;;  %v1761_v2 = vstv %s8340_s29  ;;  %v1823_v33 = vstv %s8348_s7  ;;  %s8681_s29 = sld [smem:[#allocation3 + $0x44]]  ;;  %s8702_s7 = sld [smem:[#allocation3 + $0x46]] }
 0x482   : > { %10609 = vst [vmem:[#allocation266_spill] sm:$0xff] %v8410_v63  ;;  %10610 = vst [vmem:[#allocation22_spill] sm:$0xff] %v8412_v11  ;;  %v8426_v48 = vadd.f32 %v10615_v8, %v1483_v49  ;;  %v1599_v34 = vmul.f32 %v1598_v57, %v10618_v3  ;;  %v1887_v40 = vstv %s8350_s14  ;;  %v1662_v10 = vmul.f32 %v1660_v32, %v10617_v25  ;;  %s8739_s14 = sld [smem:[#allocation3 + $0x47]] }
 0x483   : > { %10614 = vst [vmem:[#allocation23_spill] sm:$0xff] %v8423_v23  ;;  %v1663_v1 = vmul.f32 %v1660_v32, %v10612_v46  ;;  %v1661_v39 = vmul.f32 %v1660_v32, %v10618_v3  ;;  %v1924_v55 = vstv %s8356_s30  ;;  %v1563_v13 = vmul.f32 %v1561_v0, %v10617_v25  ;;  %s8796_s30 = sld [smem:[#allocation3 + $0x64]] }
 0x484   : > { %10616 = vst [vmem:[#allocation34_spill] sm:$0xff] %v8426_v48  ;;  %v1562_v59 = vmul.f32 %v1561_v0, %v10618_v3  ;;  %v1608_v57 = vrot.slane %v1601_v38, 1  ;;  %v1986_v37 = vstv %s8358_s20  ;;  %v1606_v21 = vrot.slane %v1600_v4, 1  ;;  %s8806_s20 = sld [smem:[#allocation3 + $0x67]] }
 0x485   : > { %v8438_v42 = vpop.permute.xlu1 %4178  ;;  %v8440_v7 = vpop.permute.xlu0 %4180  ;;  %v1605_v14 = vrot.slane %v1599_v34, 1  ;;  %v2050_v47 = vstv %s8372_s18  ;;  %v2087_v5 = vstv %s8374_s21  ;;  %v8448_v49 = vstv %s8384_s5  ;;  %s8816_s18 = sld [smem:[#allocation3 + $0x65]]  ;;  %s8819_s21 = sld [smem:[#allocation3 + $0x68]] }
 0x486   : > { %10619 = vst [vmem:[#allocation65_spill] sm:$0xff] %v8438_v42  ;;  %10620 = vst [vmem:[#allocation24_spill] sm:$0xff] %v8440_v7  ;;  %v8452_v32 = vstv %s8396_s28  ;;  %v8455_v16 = vstv %s8398_s3  ;;  %v1668_v8 = vrot.slane %v1662_v10, 2  ;;  %v1670_v7 = vrot.slane %v1663_v1, 2  ;;  %s8824_s5 = sld [smem:[#allocation3 + $0xc3]]  ;;  %s8853_s28 = sld [smem:[#allocation3 + $0xe1]] }
 0x487   : > { %v1667_v50 = vrot.slane %v1661_v39, 2  ;;  %v8463_v38 = vadd.f32 %v1563_v13, %v8321_v9  ;;  %v8466_v4 = vadd.f32 %v1562_v59, %v8267_v30  ;;  %v8469_v34 = vsel %vm255_vm3, %v1606_v21, %v1608_v57  ;;  %s8855_s3 = sld [smem:[#allocation3 + $0x12]] }
 0x488   : > { %v8472_v6 = vstv %s8420_s16  ;;  %v8475_v10 = vsel %vm255_vm3, %v1605_v14, %v1606_v21  ;;  %v1726_v1 = vmul.f32 %v1724_v44, %v10617_v25  ;;  %v1763_v39 = vmul.f32 %v1761_v2, %v10617_v25  ;;  %s8866_s16 = sld [smem:[#allocation3 + $0x6b]] }
 0x489   : > { %v8458_v42 = vpop.permute.xlu1 %4200  ;;  %v8460_v0 = vpop.permute.xlu0 %4202  ;;  %v1764_v17 = vmul.f32 %v1761_v2, %v10612_v46  ;;  %v1762_v9 = vmul.f32 %v1761_v2, %v10618_v3  ;;  %v1825_v13 = vmul.f32 %v1823_v33, %v10617_v25  ;;  %v1826_v30 = vmul.f32 %v1823_v33, %v10612_v46 }
 0x48a   : > { %10621 = vst [vmem:[#allocation66_spill] sm:$0xff] %v8458_v42  ;;  %10622 = vst [vmem:[#allocation77_spill] sm:$0xff] %v8460_v0  ;;  %v1824_v59 = vmul.f32 %v1823_v33, %v10618_v3  ;;  %v8485_v57 = vsel %vm318_vm4, %v1668_v8, %v1670_v7  ;;  %v8488_v21 = vsel %vm318_vm4, %v1667_v50, %v1668_v8  ;;  %v1769_v63 = vrot.slane %v1763_v39, 1 }
 0x48b   : > { %v1926_v14 = vmul.f32 %v1924_v55, %v10617_v25  ;;  %v1927_v0 = vmul.f32 %v1924_v55, %v10612_v46  ;;  %v1725_v2 = vmul.f32 %v1724_v44, %v10618_v3  ;;  %v1925_v54 = vmul.f32 %v1924_v55, %v10618_v3 }
 0x48c   : > { %v1988_v11 = vmul.f32 %v1986_v37, %v10617_v25  ;;  %v1989_v33 = vmul.f32 %v1986_v37, %v10612_v46  ;;  %v8497_v7 = vadd.f32 %v1726_v1, %v8334_v22  ;;  %v1771_v50 = vrot.slane %v1764_v17, 1 }
 0x48d   : > { %v4227_v42 = vpop.permute.xlu1 %4226  ;;  %v4229_v35 = vpop.permute.xlu0 %4228  ;;  %v1987_v8 = vmul.f32 %v1986_v37, %v10618_v3  ;;  %v1768_v29 = vrot.slane %v1762_v9, 1  ;;  %v1831_v36 = vrot.slane %v1825_v13, 2  ;;  %v1833_v27 = vrot.slane %v1826_v30, 2 }
 0x48e   : > { %v1830_v31 = vrot.slane %v1824_v59, 2  ;;  %v1889_v44 = vmul.f32 %v1887_v40, %v10617_v25  ;;  %v1888_v55 = vmul.f32 %v1887_v40, %v10618_v3  ;;  %v1932_v60 = vrot.slane %v1926_v14, 1 }
 0x48f   : > { %v1934_v43 = vrot.slane %v1927_v0, 1  ;;  %v1931_v22 = vrot.slane %v1925_v54, 1  ;;  %v1994_v17 = vrot.slane %v1988_v11, 2  ;;  %v1996_v1 = vrot.slane %v1989_v33, 2 }
 0x490   : > { %v2090_v37 = vmul.f32 %v2087_v5, %v10612_v46  ;;  %v1993_v39 = vrot.slane %v1987_v8, 2  ;;  %v2052_v9 = vmul.f32 %v2050_v47, %v10617_v25  ;;  %v2089_v13 = vmul.f32 %v2087_v5, %v10617_v25 }
 0x491   : > { %v4231_v24 = vpop.permute.xlu1 %4230  ;;  %v4236_v18 = vpop.permute.xlu0 %4235  ;;  %v2088_v30 = vmul.f32 %v2087_v5, %v10618_v3  ;;  %v8511_v40 = vadd.f32 %v1725_v2, %v8331_v62  ;;  %v8514_v0 = vsel %vm255_vm3, %v1769_v63, %v1771_v50  ;;  %v8517_v59 = vsel %vm255_vm3, %v1768_v29, %v1769_v63 }
 0x492   : > { %v2051_v54 = vmul.f32 %v2050_v47, %v10618_v3  ;;  %v8525_v11 = vsel %vm318_vm4, %v1831_v36, %v1833_v27  ;;  %v8528_v5 = vsel %vm318_vm4, %v1830_v31, %v1831_v36  ;;  %v8531_v62 = vadd.f32 %v1889_v44, %v8365_v12 }
 0x493   : > { %v8534_v14 = vadd.f32 %v1888_v55, %v8344_v45  ;;  %v8537_v47 = vsel %vm255_vm3, %v1932_v60, %v1934_v43  ;;  %v8540_v2 = vsel %vm255_vm3, %v1931_v22, %v1932_v60  ;;  %v8543_v27 = vsel %vm318_vm4, %v1994_v17, %v1996_v1 }
 0x494   : > { %v2097_v36 = vrot.slane %v2090_v37, 1  ;;  %v8548_v31 = vsel %vm318_vm4, %v1993_v39, %v1994_v17  ;;  %v8551_v45 = vadd.f32 %v2052_v9, %v8377_v51  ;;  %v2095_v12 = vrot.slane %v2089_v13, 1 }
 0x495   : > { %v4238_v29 = vpop.permute.xlu1 %4237  ;;  %v4240_v63 = vpop.permute.xlu0 %4239  ;;  %v2094_v43 = vrot.slane %v2088_v30, 1  ;;  %v8554_v33 = vadd.f32 %v2051_v54, %v8368_v28  ;;  %v2151_v60 = vmul.f32 %v8448_v49, %v10617_v25  ;;  %v2152_v50 = vmul.f32 %v8448_v49, %v10612_v46 }
 0x496   : > { %v4269_v8 = vstv %s8500_s9  ;;  %v2150_v44 = vmul.f32 %v8448_v49, %v10618_v3  ;;  %v4253_v51 = vsel %vm201_vm1, %v4227_v42, %v4236_v18  ;;  %v4254_v55 = vsel %vm201_vm1, %v4229_v35, %v4238_v29  ;;  %s8886_s9 = sld [smem:[#allocation3 + $0x18]] }
 0x497   : > { %v4317_v17 = vstv %s8504_s10  ;;  %v8567_v1 = vsel %vm255_vm3, %v2095_v12, %v2097_v36  ;;  %v10623_v37 = vstv %s8386_s0  ;;  %v8581_v35 = vsel %vm255_vm3, %v2094_v43, %v2095_v12  ;;  %s8832_s0 = sld [smem:[#allocation3 + $0x6a]]  ;;  %s8888_s10 = sld [smem:[#allocation3 + $0x36]] }
 0x498   : > { %v2215_v39 = vmul.f32 %v10623_v37, %v10617_v25  ;;  %v10624_v18 = vmov %v10623_v37  ;;  %v4284_v54 = vstv %s8520_s11  ;;  %v4255_v12 = vsel %vm201_vm1, %v4231_v24, %v4240_v63  ;;  %s8895_s11 = sld [smem:[#allocation3 + $0x39]] }
 0x499   : > { %v4245_v22 = vpop.permute.xlu1 %4244  ;;  %v4247_v28 = vpop.permute.xlu0 %4246  ;;  %v2214_v42 = vmul.f32 %v10624_v18, %v10618_v3 }
 0x49a   : > { %v8573_v9 = vsel %vm205_vm2, %v4253_v51, %v4245_v22  ;;  %v8576_v13 = vsel %vm205_vm2, %v4254_v55, %v4247_v28  ;;  %v4339_v51 = vstv %s8522_s12  ;;  %v2157_v55 = vrot.slane %v2151_v60, 2  ;;  %s8897_s12 = sld [smem:[#allocation3 + $0x3c]] }
 0x49b   : > { %v4270_v49 = vmul.f32 %v4269_v8, %v8573_v9  ;;  %v4271_v30 = vmul.f32 %v4269_v8, %v8576_v13  ;;  %v4318_v29 = vmul.f32 %v4317_v17, %v8573_v9  ;;  %v4319_v36 = vmul.f32 %v4317_v17, %v8576_v13 }
 0x49c   : > { %v2159_v22 = vrot.slane %v2152_v50, 2  ;;  %v2156_v28 = vrot.slane %v2150_v44, 2  ;;  %v8596_v37 = vadd.f32 %v2215_v39, %v8389_v56  ;;  %v8600_v8 = vmul.f32 %v8452_v32, %v10617_v25 }
 0x49d   : > { %v4249_v43 = vpop.permute.xlu1 %4248  ;;  %4274 = vrot.lane.b32.xlu0 %v4270_v49, %s10625_s17  ;;  %4276 = vrot.lane.b32.xlu1 %v4271_v30, %s10625_s17  ;;  %v4379_v60 = vstv %s8545_s15  ;;  %v4285_v50 = vmul.f32 %v4284_v54, %v8573_v9  ;;  %v4286_v24 = vmul.f32 %v4284_v54, %v8576_v13  ;;  %v4340_v44 = vmul.f32 %v4339_v51, %v8573_v9  ;;  %s8915_s15 = sld [smem:[#allocation3 + $0x5a]] }
 0x49e   : > { %v8603_v18 = vsel %vm205_vm2, %v4255_v12, %v4249_v43  ;;  %v4324_v49 = vrot.slane %v4318_v29, 1  ;;  %v4325_v56 = vrot.slane %v4319_v36, 1  ;;  %v4341_v39 = vmul.f32 %v4339_v51, %v8576_v13  ;;  %v10627_v29 = vld [vmem:[#allocation104_spill] sm:$0xff] }
 0x49f   : > { %v4320_v63 = vmul.f32 %v4317_v17, %v8603_v18  ;;  %v4342_v30 = vmul.f32 %v4339_v51, %v8603_v18  ;;  %v8613_v61 = vadd.f32 %v2214_v42, %v8380_v19  ;;  %v2253_v12 = vmul.f32 %v8452_v32, %v10612_v46  ;;  %v10628_v51 = vld [vmem:[#allocation105_spill] sm:$0xff]  ;;  %v10629_v19 = vld [vmem:[#allocation116_spill] sm:$0xff] }
 0x4a0   : > { %v8619_v54 = vmul.f32 %v8452_v32, %v10618_v3  ;;  %v1580_v36 = vadd.f32 %v10627_v29, %v8463_v38  ;;  %v1579_v43 = vadd.f32 %v10628_v51, %v8466_v4  ;;  %v1743_v42 = vadd.f32 %v10629_v19, %v8497_v7 }
 0x4a1   : > { %4289 = vrot.lane.b32.xlu0 %v4285_v50, %s10626_s1  ;;  %4291 = vrot.lane.b32.xlu1 %v4286_v24, %s10626_s1  ;;  %v4327_v17 = vrot.slane %v4320_v63, 1  ;;  %v4346_v53 = vrot.slane %v4340_v44, 1  ;;  %v4380_v32 = vmul.f32 %v4379_v60, %v8573_v9  ;;  %v4381_v50 = vmul.f32 %v4379_v60, %v8576_v13 }
 0x4a2   : > { %v4326_v24 = vsel %vm255_vm3, %v4324_v49, %v4325_v56  ;;  %v4347_v63 = vrot.slane %v4341_v39, 1  ;;  %v4349_v23 = vrot.slane %v4342_v30, 1  ;;  %v4382_v38 = vmul.f32 %v4379_v60, %v8603_v18  ;;  %v10630_v49 = vld [vmem:[#allocation106_spill] sm:$0xff]  ;;  %v10631_v39 = vld [vmem:[#allocation107_spill] sm:$0xff]  ;;  %v10632_v60 = vld [vmem:[#allocation117_spill] sm:$0xff] }
 0x4a3   : > { %v4328_v15 = vsel %vm255_vm3, %v4325_v56, %v4327_v17  ;;  %v8636_v29 = vsel %vm318_vm4, %v2157_v55, %v2159_v22  ;;  %v8639_v4 = vsel %vm318_vm4, %v2156_v28, %v2157_v55  ;;  %v2258_v7 = vrot.slane %v8600_v8, 1  ;;  %v10633_v17 = vld [vmem:[#allocation118_spill] sm:$0xff] }
 0x4a4   : > { %v2315_v44 = vmul.f32 %v8455_v16, %v10612_v46  ;;  %v1595_v56 = vadd.f32 %v10630_v49, %v1580_v36  ;;  %v1594_v30 = vadd.f32 %v10631_v39, %v1579_v43  ;;  %v1742_v22 = vadd.f32 %v10632_v60, %v8511_v40 }
 0x4a5   : > { %4329 = vrot.lane.b32.xlu0 %v4326_v24, %s10625_s17  ;;  %4331 = vrot.lane.b32.xlu1 %v4328_v15, %s10625_s17  ;;  %v1758_v51 = vadd.f32 %v10633_v17, %v1743_v42  ;;  %v4386_v55 = vrot.slane %v4380_v32, 2  ;;  %v4387_v28 = vrot.slane %v4381_v50, 2  ;;  %v4402_v8 = vmul.f32 %v4401_v20, %v8573_v9 }
 0x4a6   : > { %v4403_v19 = vmul.f32 %v4401_v20, %v8576_v13  ;;  %v4348_v24 = vsel %vm255_vm3, %v4346_v53, %v4347_v63  ;;  %v4350_v15 = vsel %vm255_vm3, %v4347_v63, %v4349_v23  ;;  %v4389_v36 = vrot.slane %v4382_v38, 2  ;;  %v10634_v53 = vld [vmem:[#allocation119_spill] sm:$0xff] }
 0x4a7   : > { %v4404_v43 = vmul.f32 %v4401_v20, %v8603_v18  ;;  %v2260_v40 = vrot.slane %v2253_v12, 1  ;;  %v2257_v42 = vrot.slane %v8619_v54, 1  ;;  %v2314_v32 = vmul.f32 %v8455_v16, %v10617_v25 }
 0x4a8   : > { %v2313_v50 = vmul.f32 %v8455_v16, %v10618_v3  ;;  %v1757_v23 = vadd.f32 %v10634_v53, %v1742_v22  ;;  %v2322_v20 = vrot.slane %v2315_v44, 2  ;;  %v10635_v63 = vstv %s8408_s4  ;;  %s8864_s4 = sld [smem:[#allocation3 + $0x15]] }
 0x4a9   : > { %4351 = vrot.lane.b32.xlu0 %v4348_v24, %s10626_s1  ;;  %4353 = vrot.lane.b32.xlu1 %v4350_v15, %s10626_s1  ;;  %v2378_v12 = vmul.f32 %v10635_v63, %v10617_v25  ;;  %v10636_v54 = vmov %v10635_v63  ;;  %v1613_v49 = vadd.f32 %v8469_v34, %v1595_v56  ;;  %v1612_v39 = vadd.f32 %v8475_v10, %v1594_v30  ;;  %v10643_v63 = vld [vmem:[#allocation111_spill] sm:$0xff] }
 0x4aa   : > { %v2377_v38 = vmul.f32 %v10636_v54, %v10618_v3  ;;  %v1776_v16 = vadd.f32 %v8514_v0, %v1758_v51  ;;  %v4408_v60 = vrot.slane %v4402_v8, 2  ;;  %v4388_v17 = vsel %vm318_vm4, %v4386_v55, %v4387_v28  ;;  %v10639_v55 = vld [vmem:[#allocation108_spill] sm:$0xff]  ;;  %v10640_v8 = vld [vmem:[#allocation109_spill] sm:$0xff] }
 0x4ab   : > { %v4390_v22 = vsel %vm318_vm4, %v4387_v28, %v4389_v36  ;;  %v4409_v44 = vrot.slane %v4403_v19, 2  ;;  %v4411_v24 = vrot.slane %v4404_v43, 2  ;;  %v8684_v15 = vsel %vm255_vm3, %v2258_v7, %v2260_v40  ;;  %v10644_v54 = vld [vmem:[#allocation121_spill] sm:$0xff] }
 0x4ac   : > { %v2320_v53 = vrot.slane %v2314_v32, 2  ;;  %v2319_v34 = vrot.slane %v2313_v50, 2  ;;  %v8688_v10 = vmul.f32 %v8472_v6, %v10617_v25  ;;  %v1775_v0 = vadd.f32 %v8517_v59, %v1757_v23 }
 0x4ad   : > { %4391 = vrot.lane.b32.xlu0 %v4388_v17, %s10625_s17  ;;  %4393 = vrot.lane.b32.xlu1 %v4390_v22, %s10625_s17  ;;  %v8694_v56 = vsel %vm255_vm3, %v2257_v42, %v2258_v7  ;;  %v8697_v30 = vadd.f32 %v2378_v12, %v8401_v26  ;;  %v8700_v51 = vadd.f32 %v2377_v38, %v8392_v41  ;;  %v10641_v7 = vld [vmem:[#allocation120_spill] sm:$0xff]  ;;  %v4431_v40 = vstv %s8656_s23  ;;  %v10642_v42 = vld [vmem:[#allocation110_spill] sm:$0xff]  ;;  %s8926_s23 = sld [smem:[#allocation3 + $0x60]] }
 0x4ae   : > { %v1635_v28 = vadd.f32 %v10639_v55, %v1613_v49  ;;  %v1634_v19 = vadd.f32 %v10640_v8, %v1612_v39  ;;  %v8707_v36 = vsel %vm318_vm4, %v2320_v53, %v2322_v20  ;;  %v8711_v59 = vmul.f32 %v8472_v6, %v10612_v46  ;;  %v10645_v49 = vld [vmem:[#allocation122_spill] sm:$0xff]  ;;  %v10649_v8 = vld [vmem:[#allocation131_spill] sm:$0xff] }
 0x4af   : > { %10637 = vst [vmem:[#allocation36_spill] sm:$0xff] %v8697_v30  ;;  %10638 = vst [vmem:[#allocation67_spill] sm:$0xff] %v8700_v51  ;;  %v1798_v26 = vadd.f32 %v10641_v7, %v1776_v16  ;;  %v4410_v43 = vsel %vm318_vm4, %v4408_v60, %v4409_v44  ;;  %v4412_v41 = vsel %vm318_vm4, %v4409_v44, %v4411_v24  ;;  %v4479_v20 = vstv %s8665_s24  ;;  %v10646_v16 = vld [vmem:[#allocation128_spill] sm:$0xff]  ;;  %s8938_s24 = sld [smem:[#allocation3 + $0x7e]] }
 0x4b0   : > { %v8718_v32 = vadd.f32 %v10642_v42, %v1635_v28  ;;  %v8721_v50 = vsel %vm318_vm4, %v2319_v34, %v2320_v53  ;;  %v8725_v23 = vmul.f32 %v8472_v6, %v10618_v3  ;;  %v8731_v12 = vadd.f32 %v10643_v63, %v1634_v19  ;;  %v10647_v6 = vld [vmem:[#allocation129_spill] sm:$0xff]  ;;  %v10648_v28 = vld [vmem:[#allocation130_spill] sm:$0xff]  ;;  %v10650_v7 = vld [vmem:[#allocation140_spill] sm:$0xff] }
 0x4b1   : > { %4413 = vrot.lane.b32.xlu0 %v4410_v43, %s10626_s1  ;;  %4415 = vrot.lane.b32.xlu1 %v4412_v41, %s10626_s1  ;;  %v1797_v38 = vadd.f32 %v10644_v54, %v1775_v0  ;;  %v8735_v39 = vadd.f32 %v10645_v49, %v1798_v26  ;;  %v1906_v60 = vadd.f32 %v10646_v16, %v8531_v62  ;;  %v4446_v24 = vstv %s8677_s26  ;;  %v10651_v26 = vld [vmem:[#allocation141_spill] sm:$0xff]  ;;  %v10652_v41 = vld [vmem:[#allocation152_spill] sm:$0xff]  ;;  %s8951_s26 = sld [smem:[#allocation3 + $0x88]] }
 0x4b2   : > { %v1905_v17 = vadd.f32 %v10647_v6, %v8534_v14  ;;  %v4432_v22 = vmul.f32 %v4431_v40, %v8573_v9  ;;  %v4433_v44 = vmul.f32 %v4431_v40, %v8576_v13  ;;  %v4480_v53 = vmul.f32 %v4479_v20, %v8573_v9  ;;  %v10653_v42 = vld [vmem:[#allocation153_spill] sm:$0xff] }
 0x4b3   : > { %v4481_v34 = vmul.f32 %v4479_v20, %v8576_v13  ;;  %v4482_v0 = vmul.f32 %v4479_v20, %v8603_v18  ;;  %v4501_v55 = vstv %s8681_s29  ;;  %v1921_v62 = vadd.f32 %v10648_v28, %v1906_v60  ;;  %s8957_s29 = sld [smem:[#allocation3 + $0x8b]] }
 0x4b4   : > { %v1920_v19 = vadd.f32 %v10649_v8, %v1905_v17  ;;  %v2069_v14 = vadd.f32 %v10650_v7, %v8551_v45  ;;  %v2068_v43 = vadd.f32 %v10651_v26, %v8554_v33  ;;  %v2232_v40 = vadd.f32 %v10652_v41, %v8596_v37  ;;  %v10656_v8 = vld [vmem:[#allocation154_spill] sm:$0xff]  ;;  %v10657_v26 = vld [vmem:[#allocation155_spill] sm:$0xff] }
 0x4b5   : > { %4436 = vrot.lane.b32.xlu0 %v4432_v22, %s10625_s17  ;;  %4438 = vrot.lane.b32.xlu1 %v4433_v44, %s10625_s17  ;;  %v2231_v20 = vadd.f32 %v10653_v42, %v8613_v61  ;;  %v4541_v63 = vstv %s8702_s7  ;;  %v4447_v54 = vmul.f32 %v4446_v24, %v8573_v9  ;;  %v4448_v49 = vmul.f32 %v4446_v24, %v8576_v13  ;;  %v10654_v61 = vld [vmem:[#allocation142_spill] sm:$0xff]  ;;  %v10655_v24 = vld [vmem:[#allocation143_spill] sm:$0xff]  ;;  %s8972_s7 = sld [smem:[#allocation3 + $0x89]] }
 0x4b6   : > { %v4502_v45 = vmul.f32 %v4501_v55, %v8573_v9  ;;  %v4503_v16 = vmul.f32 %v4501_v55, %v8576_v13  ;;  %v4486_v60 = vrot.slane %v4480_v53, 1  ;;  %v4487_v6 = vrot.slane %v4481_v34, 1  ;;  %v10658_v42 = vld [vmem:[#allocation123_spill] sm:$0xff] }
 0x4b7   : > { %v4489_v17 = vrot.slane %v4482_v0, 1  ;;  %v4504_v33 = vmul.f32 %v4501_v55, %v8603_v18  ;;  %v1939_v37 = vadd.f32 %v8537_v47, %v1921_v62  ;;  %v1938_v22 = vadd.f32 %v8540_v2, %v1920_v19 }
 0x4b8   : > { %v2084_v44 = vadd.f32 %v10654_v61, %v2069_v14  ;;  %v2083_v28 = vadd.f32 %v10655_v24, %v2068_v43  ;;  %v2247_v7 = vadd.f32 %v10656_v8, %v2232_v40  ;;  %v2246_v53 = vadd.f32 %v10657_v26, %v2231_v20  ;;  %v10662_v8 = vld [vmem:[#allocation135_spill] sm:$0xff]  ;;  %v10663_v26 = vld [vmem:[#allocation144_spill] sm:$0xff] }
 0x4b9   : > { %4451 = vrot.lane.b32.xlu0 %v4447_v54, %s10626_s1  ;;  %4453 = vrot.lane.b32.xlu1 %v4448_v49, %s10626_s1  ;;  %v4563_v34 = vstv %s8739_s14  ;;  %v4508_v0 = vrot.slane %v4502_v45, 1  ;;  %v4509_v41 = vrot.slane %v4503_v16, 1  ;;  %v4542_v55 = vmul.f32 %v4541_v63, %v8573_v9  ;;  %v10659_v54 = vld [vmem:[#allocation132_spill] sm:$0xff]  ;;  %v10660_v49 = vld [vmem:[#allocation133_spill] sm:$0xff]  ;;  %s8975_s14 = sld [smem:[#allocation3 + $0x8c]] }
 0x4ba   : > { %v4543_v47 = vmul.f32 %v4541_v63, %v8576_v13  ;;  %v4488_v2 = vsel %vm255_vm3, %v4486_v60, %v4487_v6  ;;  %v4490_v62 = vsel %vm255_vm3, %v4487_v6, %v4489_v17  ;;  %v4511_v19 = vrot.slane %v4504_v33, 1 }
 0x4bb   : > { %v4544_v14 = vmul.f32 %v4541_v63, %v8603_v18  ;;  %v1819_v43 = vadd.f32 %v10658_v42, %v1797_v38  ;;  %v1961_v40 = vadd.f32 %v10659_v54, %v1939_v37  ;;  %v1960_v20 = vadd.f32 %v10660_v49, %v1938_v22  ;;  %v10670_v54 = vld [vmem:[#allocation147_spill] sm:$0xff]  ;;  %v10671_v49 = vld [vmem:[#allocation158_spill] sm:$0xff] }
 0x4bc   : > { %v2102_v45 = vadd.f32 %v8567_v1, %v2084_v44  ;;  %v2101_v16 = vadd.f32 %v8581_v35, %v2083_v28  ;;  %v2265_v60 = vadd.f32 %v8684_v15, %v2247_v7  ;;  %v2264_v6 = vadd.f32 %v8694_v56, %v2246_v53  ;;  %v10661_v44 = vld [vmem:[#allocation134_spill] sm:$0xff] }
 0x4bd   : > { %4491 = vrot.lane.b32.xlu0 %v4488_v2, %s10625_s17  ;;  %4493 = vrot.lane.b32.xlu1 %v4490_v62, %s10625_s17  ;;  %v4510_v63 = vsel %vm255_vm3, %v4508_v0, %v4509_v41  ;;  %v4548_v17 = vrot.slane %v4542_v55, 2  ;;  %v4549_v38 = vrot.slane %v4543_v47, 2  ;;  %v4564_v33 = vmul.f32 %v4563_v34, %v8573_v9  ;;  %v10667_v47 = vld [vmem:[#allocation112_spill] sm:$0xff]  ;;  %v10668_v62 = vld [vmem:[#allocation113_spill] sm:$0xff] }
 0x4be   : > { %v4512_v37 = vsel %vm255_vm3, %v4509_v41, %v4511_v19  ;;  %v4551_v22 = vrot.slane %v4544_v14, 2  ;;  %v4565_v61 = vmul.f32 %v4563_v34, %v8576_v13  ;;  %v4566_v24 = vmul.f32 %v4563_v34, %v8603_v18  ;;  %v10666_v34 = vld [vmem:[#allocation157_spill] sm:$0xff]  ;;  %v10669_v14 = vld [vmem:[#allocation146_spill] sm:$0xff] }
 0x4bf   : > { %v1675_v1 = vadd.f32 %v8485_v57, %v8718_v32  ;;  %v1674_v35 = vadd.f32 %v8488_v21, %v8731_v12  ;;  %v1838_v15 = vadd.f32 %v8525_v11, %v8735_v39  ;;  %v1837_v56 = vadd.f32 %v8528_v5, %v1819_v43  ;;  %v10664_v32 = vld [vmem:[#allocation145_spill] sm:$0xff]  ;;  %v10665_v21 = vld [vmem:[#allocation156_spill] sm:$0xff] }
 0x4c0   : > { %v1983_v28 = vadd.f32 %v10661_v44, %v1961_v40  ;;  %v1982_v7 = vadd.f32 %v10662_v8, %v1960_v20  ;;  %v2124_v57 = vadd.f32 %v10663_v26, %v2102_v45  ;;  %v2123_v53 = vadd.f32 %v10664_v32, %v2101_v16  ;;  %v10672_v45 = vld [vmem:[#allocation159_spill] sm:$0xff] }
 0x4c1   : > { %4513 = vrot.lane.b32.xlu0 %v4510_v63, %s10626_s1  ;;  %4515 = vrot.lane.b32.xlu1 %v4512_v37, %s10626_s1  ;;  %v2287_v12 = vadd.f32 %v10665_v21, %v2265_v60  ;;  %v2286_v11 = vadd.f32 %v10666_v34, %v2264_v6  ;;  %v4550_v39 = vsel %vm318_vm4, %v4548_v17, %v4549_v38  ;;  %v4570_v41 = vrot.slane %v4564_v33, 2  ;;  %v10673_v60 = vld [vmem:[#allocation114_spill] sm:$0xff]  ;;  %v10674_v63 = vld [vmem:[#allocation124_spill] sm:$0xff] }
 0x4c2   : > { %v4552_v0 = vsel %vm318_vm4, %v4549_v38, %v4551_v22  ;;  %v4571_v5 = vrot.slane %v4565_v61, 2  ;;  %v4573_v55 = vrot.slane %v4566_v24, 2  ;;  %v1697_v2 = vadd.f32 %v10667_v47, %v1675_v1  ;;  %v10675_v38 = vld [vmem:[#allocation125_spill] sm:$0xff]  ;;  %v10676_v22 = vld [vmem:[#allocation115_spill] sm:$0xff] }
 0x4c3   : > { %v1696_v19 = vadd.f32 %v10668_v62, %v1674_v35  ;;  %v2146_v42 = vadd.f32 %v10669_v14, %v2124_v57  ;;  %v2001_v43 = vadd.f32 %v8543_v27, %v1983_v28  ;;  %v2145_v40 = vadd.f32 %v10670_v54, %v2123_v53  ;;  %v10677_v35 = vld [vmem:[#allocation126_spill] sm:$0xff]  ;;  %v10678_v28 = vld [vmem:[#allocation127_spill] sm:$0xff]  ;;  %v10684_v62 = vld [vmem:[#allocation149_spill] sm:$0xff] }
 0x4c4   : > { %v2309_v20 = vadd.f32 %v10671_v49, %v2287_v12  ;;  %v2308_v16 = vadd.f32 %v10672_v45, %v2286_v11  ;;  %v8835_v6 = vadd.f32 %v10673_v60, %v1697_v2  ;;  %v1860_v17 = vadd.f32 %v10674_v63, %v1838_v15  ;;  %v10685_v14 = vld [vmem:[#allocation160_spill] sm:$0xff] }
 0x4c5   : > { %4553 = vrot.lane.b32.xlu0 %v4550_v39, %s10625_s17  ;;  %4555 = vrot.lane.b32.xlu1 %v4552_v0, %s10625_s17  ;;  %v1859_v33 = vadd.f32 %v10675_v38, %v1837_v56  ;;  %v2000_v37 = vadd.f32 %v8548_v31, %v1982_v7  ;;  %v8841_v27 = vadd.f32 %v10676_v22, %v1696_v19  ;;  %v4593_v1 = vstv %s8796_s30  ;;  %v10679_v56 = vld [vmem:[#allocation136_spill] sm:$0xff]  ;;  %v10688_v22 = vld [vmem:[#allocation151_spill] sm:$0xff]  ;;  %s8991_s30 = sld [smem:[#allocation3 + $0x8e]] }
 0x4c6   : > { %v4572_v61 = vsel %vm318_vm4, %v4570_v41, %v4571_v5  ;;  %v4574_v24 = vsel %vm318_vm4, %v4571_v5, %v4573_v55  ;;  %v8847_v44 = vadd.f32 %v10677_v35, %v1860_v17  ;;  %v2164_v15 = vadd.f32 %v8636_v29, %v2146_v42  ;;  %v10680_v29 = vld [vmem:[#allocation137_spill] sm:$0xff]  ;;  %v10682_v41 = vld [vmem:[#allocation139_spill] sm:$0xff]  ;;  %v10683_v55 = vld [vmem:[#allocation148_spill] sm:$0xff] }
 0x4c7   : > { %v8850_v8 = vadd.f32 %v10678_v28, %v1859_v33  ;;  %v4641_v31 = vstv %s8806_s20  ;;  %v2023_v7 = vadd.f32 %v10679_v56, %v2001_v43  ;;  %v2163_v26 = vadd.f32 %v8639_v4, %v2145_v40  ;;  %v10686_v43 = vld [vmem:[#allocation161_spill] sm:$0xff]  ;;  %v10687_v33 = vld [vmem:[#allocation150_spill] sm:$0xff]  ;;  %v10690_v28 = vld [vmem:[#allocation163_spill] sm:$0xff]  ;;  %s9002_s20 = sld [smem:[#allocation3 + $0x81]] }
 0x4c8   : > { %v2327_v57 = vadd.f32 %v8707_v36, %v2309_v20  ;;  %v2326_v32 = vadd.f32 %v8721_v50, %v2308_v16  ;;  %v2022_v53 = vadd.f32 %v10680_v29, %v2000_v37  ;;  %v4594_v21 = vmul.f32 %v4593_v1, %v8573_v9  ;;  %v10681_v50 = vld [vmem:[#allocation138_spill] sm:$0xff] }
 0x4c9   : > { %4575 = vrot.lane.b32.xlu0 %v4572_v61, %s10626_s1  ;;  %4577 = vrot.lane.b32.xlu1 %v4574_v24, %s10626_s1  ;;  %v4595_v12 = vmul.f32 %v4593_v1, %v8576_v13  ;;  %v4608_v34 = vstv %s8816_s18  ;;  %v4642_v11 = vmul.f32 %v4641_v31, %v8573_v9  ;;  %v4643_v4 = vmul.f32 %v4641_v31, %v8576_v13  ;;  %v10689_v24 = vld [vmem:[#allocation162_spill] sm:$0xff]  ;;  %s9007_s18 = sld [smem:[#allocation3 + $0x8f]] }
 0x4ca   : > { %v4644_v36 = vmul.f32 %v4641_v31, %v8603_v18  ;;  %v4663_v39 = vstv %s8819_s21  ;;  %v8877_v0 = vadd.f32 %v10681_v50, %v2023_v7  ;;  %v8880_v5 = vadd.f32 %v10682_v41, %v2022_v53  ;;  %s9028_s21 = sld [smem:[#allocation3 + $0x84]] }
 0x4cb   : > { %v2186_v47 = vadd.f32 %v10683_v55, %v2164_v15  ;;  %v8884_v2 = vstv %s8824_s5  ;;  %v2185_v19 = vadd.f32 %v10684_v62, %v2163_v26  ;;  %v2349_v42 = vadd.f32 %v10685_v14, %v2327_v57  ;;  %s9080_s5 = sld [smem:[#allocation3 + $0xa2]] }
 0x4cc   : > { %v2348_v54 = vadd.f32 %v10686_v43, %v2326_v32  ;;  %v4703_v40 = vstv %s8832_s0  ;;  %v4609_v49 = vmul.f32 %v4608_v34, %v8573_v9  ;;  %v4610_v20 = vmul.f32 %v4608_v34, %v8576_v13  ;;  %s9095_s0 = sld [smem:[#allocation3 + $0xac]] }
 0x4cd   : > { %4598 = vrot.lane.b32.xlu0 %v4594_v21, %s10625_s17  ;;  %4600 = vrot.lane.b32.xlu1 %v4595_v12, %s10625_s17  ;;  %v4664_v45 = vmul.f32 %v4663_v39, %v8573_v9  ;;  %v4665_v16 = vmul.f32 %v4663_v39, %v8576_v13  ;;  %v4648_v60 = vrot.slane %v4642_v11, 1  ;;  %v4649_v63 = vrot.slane %v4643_v4, 1  ;;  %v10691_v11 = vld [vmem:[#allocation201_spill] sm:$0xff] }
 0x4ce   : > { %v4651_v17 = vrot.slane %v4644_v36, 1  ;;  %v4666_v38 = vmul.f32 %v4663_v39, %v8603_v18  ;;  %v8906_v37 = vadd.f32 %v10687_v33, %v2186_v47  ;;  %v8909_v61 = vadd.f32 %v10688_v22, %v2185_v19  ;;  %v10692_v36 = vld [vmem:[#allocation200_spill] sm:$0xff]  ;;  %v10693_v47 = vld [vmem:[#allocation202_spill] sm:$0xff] }
 0x4cf   : > { %v8912_v1 = vadd.f32 %v10689_v24, %v2349_v42  ;;  %v8920_v15 = vadd.f32 %v10690_v28, %v2348_v54  ;;  %v2915_v31 = vstv %s8855_s3  ;;  %v2952_v56 = vstv %s8864_s4  ;;  %s9099_s3 = sld [smem:[#allocation3 + $0xaf]]  ;;  %s9115_s4 = sld [smem:[#allocation3 + $0xad]] }
 0x4d0   : > { %v4725_v7 = vstv %s8866_s16  ;;  %v4670_v26 = vrot.slane %v4664_v45, 1  ;;  %v4671_v57 = vrot.slane %v4665_v16, 1  ;;  %v4704_v32 = vmul.f32 %v4703_v40, %v8573_v9  ;;  %s9118_s16 = sld [smem:[#allocation3 + $0xb0]] }
 0x4d1   : > { %4613 = vrot.lane.b32.xlu0 %v4609_v49, %s10626_s1  ;;  %4615 = vrot.lane.b32.xlu1 %v4610_v20, %s10626_s1  ;;  %v4705_v29 = vmul.f32 %v4703_v40, %v8576_v13  ;;  %v4650_v53 = vsel %vm255_vm3, %v4648_v60, %v4649_v63  ;;  %v4652_v21 = vsel %vm255_vm3, %v4649_v63, %v4651_v17  ;;  %v4673_v12 = vrot.slane %v4666_v38, 1 }
 0x4d2   : > { %v4706_v34 = vmul.f32 %v4703_v40, %v8603_v18  ;;  %v2953_v4 = vmul.f32 %v2952_v56, %v10691_v11  ;;  %v2954_v39 = vmul.f32 %v2952_v56, %v10692_v36  ;;  %v3014_v50 = vstv %s8886_s9  ;;  %s9126_s9 = sld [smem:[#allocation3 + $0xa5]] }
 0x4d3   : > { %v3077_v41 = vstv %s8888_s10  ;;  %v2916_v55 = vmul.f32 %v2915_v31, %v10691_v11  ;;  %v2955_v62 = vmul.f32 %v2952_v56, %v10693_v47  ;;  %v3114_v19 = vstv %s8895_s11  ;;  %s9133_s10 = sld [smem:[#allocation3 + $0xb2]]  ;;  %s9194_s11 = sld [smem:[#allocation3 + $0xb3]] }
 0x4d4   : > { %v3176_v14 = vstv %s8897_s12  ;;  %v4672_v42 = vsel %vm255_vm3, %v4670_v26, %v4671_v57  ;;  %v4710_v43 = vrot.slane %v4704_v32, 2  ;;  %v4711_v54 = vrot.slane %v4705_v29, 2  ;;  %s9206_s12 = sld [smem:[#allocation3 + $0x1b]] }
 0x4d5   : > { %4653 = vrot.lane.b32.xlu0 %v4650_v53, %s10625_s17  ;;  %4655 = vrot.lane.b32.xlu1 %v4652_v21, %s10625_s17  ;;  %v4726_v40 = vmul.f32 %v4725_v7, %v8573_v9  ;;  %v4674_v49 = vsel %vm255_vm3, %v4671_v57, %v4673_v12  ;;  %v4713_v20 = vrot.slane %v4706_v34, 2  ;;  %v4727_v45 = vmul.f32 %v4725_v7, %v8576_v13 }
 0x4d6   : > { %v4728_v16 = vmul.f32 %v4725_v7, %v8603_v18  ;;  %v2917_v60 = vmul.f32 %v2915_v31, %v10692_v36  ;;  %v2959_v63 = vrot.slane %v2953_v4, 1  ;;  %v2960_v17 = vrot.slane %v2954_v39, 1 }
 0x4d7   : > { %v3239_v38 = vstv %s8915_s15  ;;  %v8960_v33 = vadd.f32 %v2916_v55, %v8841_v27  ;;  %v2962_v22 = vrot.slane %v2955_v62, 1  ;;  %v8963_v24 = vstv %s8924_s19  ;;  %s9221_s15 = sld [smem:[#allocation3 + $0x1e]]  ;;  %s9225_s19 = sld [smem:[#allocation3 + $0xd0]] }
 0x4d8   : > { %v8966_v28 = vstv %s8926_s23  ;;  %v3015_v31 = vmul.f32 %v3014_v50, %v10691_v11  ;;  %v3016_v56 = vmul.f32 %v3014_v50, %v10692_v36  ;;  %v3017_v7 = vmul.f32 %v3014_v50, %v10693_v47  ;;  %s9254_s23 = sld [smem:[#allocation3 + $0xf4]] }
 0x4d9   : > { %4675 = vrot.lane.b32.xlu0 %v4672_v42, %s10626_s1  ;;  %4677 = vrot.lane.b32.xlu1 %v4674_v49, %s10626_s1  ;;  %v4712_v26 = vsel %vm318_vm4, %v4710_v43, %v4711_v54  ;;  %v4714_v57 = vsel %vm318_vm4, %v4711_v54, %v4713_v20  ;;  %v4732_v27 = vrot.slane %v4726_v40, 2  ;;  %v4733_v32 = vrot.slane %v4727_v45, 2 }
 0x4da   : > { %v4735_v29 = vrot.slane %v4728_v16, 2  ;;  %v8978_v53 = vadd.f32 %v2917_v60, %v8835_v6  ;;  %v8981_v21 = vsel %vm255_vm3, %v2959_v63, %v2960_v17  ;;  %v3115_v12 = vmul.f32 %v3114_v19, %v10691_v11 }
 0x4db   : > { %v3116_v4 = vmul.f32 %v3114_v19, %v10692_v36  ;;  %v3117_v39 = vmul.f32 %v3114_v19, %v10693_v47  ;;  %v3177_v50 = vmul.f32 %v3176_v14, %v10691_v11  ;;  %v3178_v6 = vmul.f32 %v3176_v14, %v10692_v36 }
 0x4dc   : > { %v8994_v55 = vsel %vm255_vm3, %v2960_v17, %v2962_v22  ;;  %v3021_v62 = vrot.slane %v3015_v31, 2  ;;  %v3022_v42 = vrot.slane %v3016_v56, 2  ;;  %v3024_v43 = vrot.slane %v3017_v7, 2 }
 0x4dd   : > { %4715 = vrot.lane.b32.xlu0 %v4712_v26, %s10625_s17  ;;  %4717 = vrot.lane.b32.xlu1 %v4714_v57, %s10625_s17  ;;  %v3078_v54 = vmul.f32 %v3077_v41, %v10691_v11  ;;  %v4734_v40 = vsel %vm318_vm4, %v4732_v27, %v4733_v32  ;;  %v4736_v49 = vsel %vm318_vm4, %v4733_v32, %v4735_v29  ;;  %v4755_v19 = vstv %s8951_s26  ;;  %s9275_s26 = sld [smem:[#allocation3 + $0x118]] }
 0x4de   : > { %v3079_v20 = vmul.f32 %v3077_v41, %v10692_v36  ;;  %v3121_v45 = vrot.slane %v3115_v12, 1  ;;  %v3179_v16 = vmul.f32 %v3176_v14, %v10693_v47  ;;  %v4803_v60 = vstv %s8957_s29  ;;  %s9280_s29 = sld [smem:[#allocation3 + $0xe4]] }
 0x4df   : > { %v3122_v63 = vrot.slane %v3116_v4, 1  ;;  %v3124_v17 = vrot.slane %v3117_v39, 1  ;;  %v3183_v22 = vrot.slane %v3177_v50, 2  ;;  %v3184_v31 = vrot.slane %v3178_v6, 2 }
 0x4e0   : > { %v9010_v56 = vsel %vm318_vm4, %v3021_v62, %v3022_v42  ;;  %v4756_v41 = vmul.f32 %v4755_v19, %v8573_v9  ;;  %v4757_v14 = vmul.f32 %v4755_v19, %v8576_v13  ;;  %v4770_v7 = vstv %s8972_s7  ;;  %s9303_s7 = sld [smem:[#allocation3 + $0xd1]] }
 0x4e1   : > { %4737 = vrot.lane.b32.xlu0 %v4734_v40, %s10626_s1  ;;  %4739 = vrot.lane.b32.xlu1 %v4736_v49, %s10626_s1  ;;  %v4804_v26 = vmul.f32 %v4803_v60, %v8573_v9  ;;  %v4805_v57 = vmul.f32 %v4803_v60, %v8576_v13  ;;  %v4806_v27 = vmul.f32 %v4803_v60, %v8603_v18  ;;  %v4825_v32 = vstv %s8975_s14  ;;  %s9316_s14 = sld [smem:[#allocation3 + $0xf5]] }
 0x4e2   : > { %v9020_v29 = vsel %vm318_vm4, %v3022_v42, %v3024_v43  ;;  %v9023_v12 = vadd.f32 %v3078_v54, %v8850_v8  ;;  %v9026_v4 = vadd.f32 %v3079_v20, %v8847_v44  ;;  %v3186_v39 = vrot.slane %v3179_v16, 2 }
 0x4e3   : > { %v9033_v50 = vsel %vm255_vm3, %v3121_v45, %v3122_v63  ;;  %v9036_v6 = vsel %vm255_vm3, %v3122_v63, %v3124_v17  ;;  %v9039_v8 = vsel %vm318_vm4, %v3183_v22, %v3184_v31  ;;  %v4865_v44 = vstv %s8991_s30  ;;  %s9326_s30 = sld [smem:[#allocation3 + $0xd3]] }
 0x4e4   : > { %v4771_v62 = vmul.f32 %v4770_v7, %v8573_v9  ;;  %v4772_v42 = vmul.f32 %v4770_v7, %v8576_v13  ;;  %v4826_v43 = vmul.f32 %v4825_v32, %v8573_v9  ;;  %v4827_v54 = vmul.f32 %v4825_v32, %v8576_v13 }
 0x4e5   : > { %4760 = vrot.lane.b32.xlu0 %v4756_v41, %s10625_s17  ;;  %4762 = vrot.lane.b32.xlu1 %v4757_v14, %s10625_s17  ;;  %v4810_v40 = vrot.slane %v4804_v26, 1  ;;  %v4811_v49 = vrot.slane %v4805_v57, 1  ;;  %v4813_v19 = vrot.slane %v4806_v27, 1  ;;  %v4828_v20 = vmul.f32 %v4825_v32, %v8603_v18 }
 0x4e6   : > { %v9048_v45 = vsel %vm318_vm4, %v3184_v31, %v3186_v39  ;;  %v3240_v16 = vmul.f32 %v3239_v38, %v10691_v11  ;;  %v3241_v60 = vmul.f32 %v3239_v38, %v10692_v36  ;;  %v3438_v63 = vstv %s9002_s20  ;;  %s9336_s20 = sld [smem:[#allocation3 + $0x119]] }
 0x4e7   : > { %v3277_v17 = vmul.f32 %v8963_v24, %v10691_v11  ;;  %v3278_v22 = vmul.f32 %v8963_v24, %v10692_v36  ;;  %v3279_v31 = vmul.f32 %v8963_v24, %v10693_v47  ;;  %v4887_v41 = vstv %s9007_s18  ;;  %s9338_s18 = sld [smem:[#allocation3 + $0x3f]] }
 0x4e8   : > { %v4832_v14 = vrot.slane %v4826_v43, 1  ;;  %v4833_v7 = vrot.slane %v4827_v54, 1  ;;  %v4866_v38 = vmul.f32 %v4865_v44, %v8573_v9  ;;  %v4867_v26 = vmul.f32 %v4865_v44, %v8576_v13 }
 0x4e9   : > { %4775 = vrot.lane.b32.xlu0 %v4771_v62, %s10626_s1  ;;  %4777 = vrot.lane.b32.xlu1 %v4772_v42, %s10626_s1  ;;  %v4812_v57 = vsel %vm255_vm3, %v4810_v40, %v4811_v49  ;;  %v4814_v27 = vsel %vm255_vm3, %v4811_v49, %v4813_v19  ;;  %v4835_v32 = vrot.slane %v4828_v20, 1  ;;  %v4868_v39 = vmul.f32 %v4865_v44, %v8603_v18 }
 0x4ea   : > { %v3339_v62 = vmul.f32 %v8966_v28, %v10691_v11  ;;  %v3340_v24 = vmul.f32 %v8966_v28, %v10692_v36  ;;  %v3341_v42 = vmul.f32 %v8966_v28, %v10693_v47  ;;  %v9078_v43 = vstv %s9028_s21  ;;  %s9354_s21 = sld [smem:[#allocation3 + $0xf7]] }
 0x4eb   : > { %v9085_v54 = vadd.f32 %v3240_v16, %v8880_v5  ;;  %v9088_v44 = vadd.f32 %v3241_v60, %v8877_v0  ;;  %v3283_v40 = vrot.slane %v3277_v17, 1  ;;  %v3284_v49 = vrot.slane %v3278_v22, 1 }
 0x4ec   : > { %v4834_v19 = vsel %vm255_vm3, %v4832_v14, %v4833_v7  ;;  %v4872_v28 = vrot.slane %v4866_v38, 2  ;;  %v4873_v20 = vrot.slane %v4867_v26, 2  ;;  %v4888_v35 = vmul.f32 %v4887_v41, %v8573_v9 }
 0x4ed   : > { %4815 = vrot.lane.b32.xlu0 %v4812_v57, %s10625_s17  ;;  %4817 = vrot.lane.b32.xlu1 %v4814_v27, %s10625_s17  ;;  %v4836_v34 = vsel %vm255_vm3, %v4833_v7, %v4835_v32  ;;  %v4875_v57 = vrot.slane %v4868_v39, 2  ;;  %v4889_v27 = vmul.f32 %v4887_v41, %v8576_v13  ;;  %v4890_v5 = vmul.f32 %v4887_v41, %v8603_v18  ;;  %v10696_v32 = vld [vmem:[#allocation204_spill] sm:$0xff] }
 0x4ee   : > { %v3286_v0 = vrot.slane %v3279_v31, 1  ;;  %v3345_v16 = vrot.slane %v3339_v62, 2  ;;  %v3346_v60 = vrot.slane %v3340_v24, 2  ;;  %v3348_v17 = vrot.slane %v3341_v42, 2  ;;  %v10695_v31 = vld [vmem:[#allocation203_spill] sm:$0xff] }
 0x4ef   : > { %v10694_v22 = vstv %s8938_s24  ;;  %v3439_v7 = vmul.f32 %v3438_v63, %v10691_v11  ;;  %v3440_v41 = vmul.f32 %v3438_v63, %v10692_v36  ;;  %v3441_v38 = vmul.f32 %v3438_v63, %v10693_v47  ;;  %v10698_v63 = vld [vmem:[#allocation205_spill] sm:$0xff]  ;;  %s9265_s24 = sld [smem:[#allocation3 + $0x21]] }
 0x4f0   : > { %v3402_v14 = vmul.f32 %v10694_v22, %v10691_v11  ;;  %v2933_v26 = vadd.f32 %v10695_v31, %v8960_v33  ;;  %v2934_v39 = vadd.f32 %v10696_v32, %v8978_v53  ;;  %v4874_v24 = vsel %vm318_vm4, %v4872_v28, %v4873_v20  ;;  %v10699_v33 = vld [vmem:[#allocation206_spill] sm:$0xff] }
 0x4f1   : > { %4837 = vrot.lane.b32.xlu0 %v4834_v19, %s10626_s1  ;;  %4839 = vrot.lane.b32.xlu1 %v4836_v34, %s10626_s1  ;;  %v10697_v34 = vmov %v10694_v22  ;;  %v4876_v42 = vsel %vm318_vm4, %v4873_v20, %v4875_v57  ;;  %v4894_v19 = vrot.slane %v4888_v35, 2  ;;  %v4895_v22 = vrot.slane %v4889_v27, 2 }
 0x4f2   : > { %v3403_v62 = vmul.f32 %v10697_v34, %v10692_v36  ;;  %v4897_v51 = vrot.slane %v4890_v5, 2  ;;  %v2948_v30 = vadd.f32 %v10698_v63, %v2933_v26  ;;  %v2949_v31 = vadd.f32 %v10699_v33, %v2934_v39  ;;  %v10702_v63 = vld [vmem:[#allocation208_spill] sm:$0xff] }
 0x4f3   : > { %v9123_v53 = vsel %vm255_vm3, %v3283_v40, %v3284_v49  ;;  %v3563_v32 = vstv %s9080_s5  ;;  %v9131_v35 = vsel %vm255_vm3, %v3284_v49, %v3286_v0  ;;  %v3445_v28 = vrot.slane %v3439_v7, 1  ;;  %s9360_s5 = sld [smem:[#allocation3 + $0x42]] }
 0x4f4   : > { %v3446_v20 = vrot.slane %v3440_v41, 1  ;;  %v3448_v57 = vrot.slane %v3441_v38, 1  ;;  %v9136_v40 = vsel %vm318_vm4, %v3345_v16, %v3346_v60  ;;  %v9139_v27 = vsel %vm318_vm4, %v3346_v60, %v3348_v17 }
 0x4f5   : > { %4877 = vrot.lane.b32.xlu0 %v4874_v24, %s10625_s17  ;;  %4879 = vrot.lane.b32.xlu1 %v4876_v42, %s10625_s17  ;;  %v9142_v5 = vadd.f32 %v3402_v14, %v8909_v61  ;;  %v9145_v26 = vadd.f32 %v3403_v62, %v8906_v37  ;;  %v9149_v49 = vmul.f32 %v9078_v43, %v10691_v11  ;;  %v4917_v16 = vstv %s9095_s0  ;;  %s9389_s0 = sld [smem:[#allocation3 + $0x11b]] }
 0x4f6   : > { %v4896_v0 = vsel %vm318_vm4, %v4894_v19, %v4895_v22  ;;  %v4898_v7 = vsel %vm318_vm4, %v4895_v22, %v4897_v51  ;;  %v2966_v41 = vadd.f32 %v8981_v21, %v2948_v30  ;;  %v2967_v60 = vadd.f32 %v8994_v55, %v2949_v31  ;;  %v10700_v55 = vld [vmem:[#allocation215_spill] sm:$0xff]  ;;  %v10703_v31 = vld [vmem:[#allocation216_spill] sm:$0xff] }
 0x4f7   : > { %v9158_v61 = vmul.f32 %v9078_v43, %v10692_v36  ;;  %v4965_v37 = vstv %s9099_s3  ;;  %v9164_v17 = vsel %vm255_vm3, %v3445_v28, %v3446_v20  ;;  %v9167_v51 = vsel %vm255_vm3, %v3446_v20, %v3448_v57  ;;  %v10701_v19 = vld [vmem:[#allocation207_spill] sm:$0xff]  ;;  %v10704_v20 = vld [vmem:[#allocation217_spill] sm:$0xff]  ;;  %s9393_s3 = sld [smem:[#allocation3 + $0xd4]] }
 0x4f8   : > { %v9171_v30 = vmul.f32 %v9078_v43, %v10693_v47  ;;  %v9174_v21 = vmul.f32 %v3563_v32, %v10691_v11  ;;  %v3095_v14 = vadd.f32 %v10700_v55, %v9023_v12  ;;  %v4918_v38 = vmul.f32 %v4917_v16, %v8573_v9 }
 0x4f9   : > { %4899 = vrot.lane.b32.xlu0 %v4896_v0, %s10626_s1  ;;  %4901 = vrot.lane.b32.xlu1 %v4898_v7, %s10626_s1  ;;  %v4919_v39 = vmul.f32 %v4917_v16, %v8576_v13  ;;  %v4932_v34 = vstv %s9115_s4  ;;  %v4966_v62 = vmul.f32 %v4965_v37, %v8573_v9  ;;  %v4967_v24 = vmul.f32 %v4965_v37, %v8576_v13  ;;  %v10705_v0 = vld [vmem:[#allocation227_spill] sm:$0xff]  ;;  %v10706_v16 = vld [vmem:[#allocation228_spill] sm:$0xff]  ;;  %s5689_s4 = sshll.u32 %s6354_s13, 7 }
 0x4fa   : > { %v4968_v42 = vmul.f32 %v4965_v37, %v8603_v18  ;;  %v4987_v43 = vstv %s9118_s16  ;;  %v2988_v22 = vadd.f32 %v10701_v19, %v2966_v41  ;;  %v2989_v33 = vadd.f32 %v10702_v63, %v2967_v60  ;;  %s9409_s16 = sld [smem:[#allocation3 + $0x45]] }
 0x4fb   : > { %v3096_v12 = vadd.f32 %v10703_v31, %v9026_v4  ;;  %v9190_v28 = vstv %s9126_s9  ;;  %v3110_v57 = vadd.f32 %v10704_v20, %v3095_v14  ;;  %v3257_v7 = vadd.f32 %v10705_v0, %v9085_v54  ;;  %v10707_v54 = vld [vmem:[#allocation209_spill] sm:$0xff]  ;;  %v10708_v20 = vld [vmem:[#allocation210_spill] sm:$0xff]  ;;  %s9428_s9 = sld [smem:[#allocation3 + $0xf8]] }
 0x4fc   : > { %v3258_v41 = vadd.f32 %v10706_v16, %v9088_v44  ;;  %v5027_v60 = vstv %s9133_s10  ;;  %v4933_v37 = vmul.f32 %v4932_v34, %v8573_v9  ;;  %v4934_v4 = vmul.f32 %v4932_v34, %v8576_v13  ;;  %v10709_v34 = vld [vmem:[#allocation218_spill] sm:$0xff]  ;;  %s9432_s10 = scalar_lea.vmem [#allocation7], %s5689_s4  ;;  %s9689_s4 = sld [smem:[#allocation3 + $0xae]] }
 0x4fd   : > { %4922 = vrot.lane.b32.xlu0 %v4918_v38, %s10625_s17  ;;  %4924 = vrot.lane.b32.xlu1 %v4919_v39, %s10625_s17  ;;  %v4988_v55 = vmul.f32 %v4987_v43, %v8573_v9  ;;  %v4989_v38 = vmul.f32 %v4987_v43, %v8576_v13  ;;  %v4972_v39 = vrot.slane %v4966_v62, 1  ;;  %v4973_v19 = vrot.slane %v4967_v24, 1  ;;  %v10710_v24 = vld [vmem:[#allocation229_spill] sm:$0xff] }
 0x4fe   : > { %v4975_v14 = vrot.slane %v4968_v42, 1  ;;  %v4990_v63 = vmul.f32 %v4987_v43, %v8603_v18  ;;  %v3010_v31 = vadd.f32 %v10707_v54, %v2988_v22  ;;  %v3011_v44 = vadd.f32 %v10708_v20, %v2989_v33  ;;  %v10711_v43 = vld [vmem:[#allocation230_spill] sm:$0xff] }
 0x4ff   : > { %v3507_v0 = vrot.slane %v9149_v49, 2  ;;  %v9213_v16 = vmul.f32 %v3563_v32, %v10692_v36  ;;  %v3111_v48 = vadd.f32 %v10709_v34, %v3096_v12  ;;  %v3128_v62 = vadd.f32 %v9033_v50, %v3110_v57 }
 0x500   : > { %v3272_v42 = vadd.f32 %v10710_v24, %v3257_v7  ;;  %v3273_v58 = vadd.f32 %v10711_v43, %v3258_v41  ;;  %v4994_v22 = vrot.slane %v4988_v55, 1  ;;  %v4995_v33 = vrot.slane %v4989_v38, 1  ;;  %v10712_v38 = vld [vmem:[#allocation219_spill] sm:$0xff] }
 0x501   : > { %4937 = vrot.lane.b32.xlu0 %v4933_v37, %s10626_s1  ;;  %4939 = vrot.lane.b32.xlu1 %v4934_v4, %s10626_s1  ;;  %v5028_v32 = vmul.f32 %v5027_v60, %v8573_v9  ;;  %v5029_v54 = vmul.f32 %v5027_v60, %v8576_v13  ;;  %v4974_v37 = vsel %vm255_vm3, %v4972_v39, %v4973_v19  ;;  %v4997_v50 = vrot.slane %v4990_v63, 1 }
 0x502   : > { %v4976_v12 = vsel %vm255_vm3, %v4973_v19, %v4975_v14  ;;  %v5030_v57 = vmul.f32 %v5027_v60, %v8603_v18  ;;  %v3028_v7 = vadd.f32 %v9010_v56, %v3010_v31  ;;  %v3029_v41 = vadd.f32 %v9020_v29, %v3011_v44 }
 0x503   : > { %v9234_v4 = vmul.f32 %v9190_v28, %v10691_v11  ;;  %v9239_v55 = vstv %s9194_s11  ;;  %v3150_v39 = vadd.f32 %v10712_v38, %v3128_v62  ;;  %v3129_v19 = vadd.f32 %v9036_v6, %v3111_v48  ;;  %v10714_v6 = vld [vmem:[#allocation212_spill] sm:$0xff]  ;;  %s9441_s11 = sld [smem:[#allocation3 + $0x11c]] }
 0x504   : > { %v3290_v60 = vadd.f32 %v9123_v53, %v3272_v42  ;;  %v3291_v56 = vadd.f32 %v9131_v35, %v3273_v58  ;;  %v4996_v29 = vsel %vm255_vm3, %v4994_v22, %v4995_v33  ;;  %v5034_v14 = vrot.slane %v5028_v32, 2  ;;  %v10713_v58 = vld [vmem:[#allocation211_spill] sm:$0xff]  ;;  %v10715_v42 = vld [vmem:[#allocation220_spill] sm:$0xff]  ;;  %v10716_v22 = vld [vmem:[#allocation221_spill] sm:$0xff] }
 0x505   : > { %4977 = vrot.lane.b32.xlu0 %v4974_v37, %s10625_s17  ;;  %4979 = vrot.lane.b32.xlu1 %v4976_v12, %s10625_s17  ;;  %v5035_v63 = vrot.slane %v5029_v54, 2  ;;  %v4262_v31 = vstv %s9206_s12  ;;  %v4998_v20 = vsel %vm255_vm3, %v4995_v33, %v4997_v50  ;;  %v5037_v44 = vrot.slane %v5030_v57, 2  ;;  %v10717_v32 = vld [vmem:[#allocation231_spill] sm:$0xff]  ;;  %v10718_v12 = vld [vmem:[#allocation232_spill] sm:$0xff]  ;;  %s9444_s12 = sld [smem:[#allocation3 + $0x63]] }
 0x506   : > { %v5050_v34 = vmul.f32 %v9239_v55, %v8573_v9  ;;  %v9252_v62 = vmul.f32 %v9239_v55, %v8576_v13  ;;  %v3050_v48 = vadd.f32 %v10713_v58, %v3028_v7  ;;  %v3051_v53 = vadd.f32 %v10714_v6, %v3029_v41  ;;  %v10722_v58 = vld [vmem:[#allocation233_spill] sm:$0xff] }
 0x507   : > { %v3508_v35 = vrot.slane %v9158_v61, 2  ;;  %v9261_v24 = vadd.f32 %v9174_v21, %v8920_v15  ;;  %v3151_v43 = vadd.f32 %v10715_v42, %v3129_v19  ;;  %v3172_v33 = vadd.f32 %v10716_v22, %v3150_v39  ;;  %v10723_v42 = vld [vmem:[#allocation234_spill] sm:$0xff]  ;;  %v10727_v61 = vld [vmem:[#allocation236_spill] sm:$0xff] }
 0x508   : > { %v3312_v54 = vadd.f32 %v10717_v32, %v3290_v60  ;;  %v4299_v37 = vstv %s9221_s15  ;;  %v3313_v50 = vadd.f32 %v10718_v12, %v3291_v56  ;;  %v4264_v57 = vmul.f32 %v4262_v31, %v8576_v13  ;;  %s9460_s15 = sld [smem:[#allocation3 + $0xd6]] }
 0x509   : > { %4999 = vrot.lane.b32.xlu0 %v4996_v29, %s10626_s1  ;;  %5001 = vrot.lane.b32.xlu1 %v4998_v20, %s10626_s1  ;;  %v4263_v15 = vmul.f32 %v4262_v31, %v8573_v9  ;;  %v5079_v21 = vstv %s9225_s19  ;;  %v5036_v7 = vsel %vm318_vm4, %v5034_v14, %v5035_v63  ;;  %v5038_v41 = vsel %vm318_vm4, %v5035_v63, %v5037_v44  ;;  %v10719_v14 = vld [vmem:[#allocation213_spill] sm:$0xff]  ;;  %v10720_v31 = vld [vmem:[#allocation214_spill] sm:$0xff]  ;;  %s9473_s19 = sld [smem:[#allocation3 + $0xfa]] }
 0x50a   : > { %v5056_v38 = vrot.slane %v5050_v34, 2  ;;  %v5057_v19 = vrot.slane %v9252_v62, 2  ;;  %v3510_v39 = vrot.slane %v9171_v30, 2  ;;  %v4301_v60 = vmul.f32 %v4299_v37, %v8576_v13  ;;  %v10721_v44 = vld [vmem:[#allocation222_spill] sm:$0xff] }
 0x50b   : > { %v4302_v56 = vmul.f32 %v4299_v37, %v8603_v18  ;;  %v4300_v29 = vmul.f32 %v4299_v37, %v8573_v9  ;;  %v3072_v63 = vadd.f32 %v10719_v14, %v3050_v48  ;;  %v3073_v20 = vadd.f32 %v10720_v31, %v3051_v53 }
 0x50c   : > { %v3173_v34 = vadd.f32 %v10721_v44, %v3151_v43  ;;  %v3334_v6 = vadd.f32 %v10722_v58, %v3312_v54  ;;  %v3190_v30 = vadd.f32 %v9039_v8, %v3172_v33  ;;  %v3335_v22 = vadd.f32 %v10723_v42, %v3313_v50 }
 0x50d   : > { %5039 = vrot.lane.b32.xlu0 %v5036_v7, %s10625_s17  ;;  %5041 = vrot.lane.b32.xlu1 %v5038_v41, %s10625_s17  ;;  %v9296_v32 = vadd.f32 %v9213_v16, %v8912_v1  ;;  %v5080_v37 = vmul.f32 %v5079_v21, %v8573_v9  ;;  %v4266_v48 = vadd.f32 %v4264_v57, %v3073_v20  ;;  %v5241_v43 = vstv %s9254_s23  ;;  %s9477_s23 = sld [smem:[#allocation3 + $0x66]] }
 0x50e   : > { %v4265_v41 = vadd.f32 %v4263_v15, %v3072_v63  ;;  %v5058_v53 = vsel %vm318_vm4, %v5056_v38, %v5057_v19  ;;  %v4307_v1 = vrot.slane %v4301_v60, 1  ;;  %v4309_v8 = vrot.slane %v4302_v56, 1 }
 0x50f   : > { %v4277_v12 = vpop.permute.xlu1 %4276  ;;  %v4275_v7 = vpop.permute.xlu0 %4274  ;;  %v4306_v16 = vrot.slane %v4300_v29, 1  ;;  %v4361_v33 = vstv %s9265_s24  ;;  %v3191_v54 = vadd.f32 %v9048_v45, %v3173_v34  ;;  %v3352_v50 = vadd.f32 %v9136_v40, %v3334_v6  ;;  %s9498_s24 = sld [smem:[#allocation3 + $0x11e]] }
 0x510   : > { %v4281_v57 = vadd.f32 %v4277_v12, %v4266_v48  ;;  %v4280_v15 = vadd.f32 %v4275_v7, %v4265_v41  ;;  %v3353_v38 = vadd.f32 %v9139_v27, %v3335_v22  ;;  %v5081_v31 = vmul.f32 %v5079_v21, %v8576_v13 }
 0x511   : > { %5061 = vrot.lane.b32.xlu0 %v5058_v53, %s10626_s1  ;;  %5084 = vrot.lane.b32.xlu1 %v5080_v37, %s10625_s17  ;;  %v5242_v20 = vmul.f32 %v5241_v43, %v8573_v9  ;;  %v5403_v44 = vstv %s9275_s26  ;;  %v4363_v29 = vmul.f32 %v4361_v33, %v8576_v13  ;;  %v4364_v58 = vmul.f32 %v4361_v33, %v8603_v18  ;;  %v10724_v53 = vld [vmem:[#allocation223_spill] sm:$0xff]  ;;  %s9515_s26 = sld [smem:[#allocation3 + $0x69]] }
 0x512   : > { %v9319_v45 = vstv %s9280_s29  ;;  %v4310_v40 = vsel %vm255_vm3, %v4307_v1, %v4309_v8  ;;  %v4308_v27 = vsel %vm255_vm3, %v4306_v16, %v4307_v1  ;;  %v4362_v21 = vmul.f32 %v4361_v33, %v8573_v9  ;;  %v10725_v8 = vld [vmem:[#allocation224_spill] sm:$0xff]  ;;  %v10726_v16 = vld [vmem:[#allocation235_spill] sm:$0xff]  ;;  %s9517_s29 = sld [smem:[#allocation3 + $0xd7]] }
 0x513   : > { %v4292_v14 = vpop.permute.xlu1 %4291  ;;  %v4290_v63 = vpop.permute.xlu0 %4289  ;;  %v9330_v34 = vmul.f32 %v9190_v28, %v10692_v36  ;;  %v9334_v6 = vmul.f32 %v9190_v28, %v10693_v47  ;;  %v9345_v12 = vsel %vm318_vm4, %v3507_v0, %v3508_v35  ;;  %v9350_v7 = vsel %vm318_vm4, %v3508_v35, %v3510_v39 }
 0x514   : > { %v4296_v60 = vadd.f32 %v4292_v14, %v4281_v57  ;;  %v4295_v56 = vadd.f32 %v4290_v63, %v4280_v15  ;;  %v5243_v48 = vmul.f32 %v5241_v43, %v8576_v13  ;;  %v5404_v41 = vmul.f32 %v5403_v44, %v8573_v9  ;;  %v10728_v15 = vld [vmem:[#allocation225_spill] sm:$0xff] }
 0x515   : > { %5086 = vrot.lane.b32.xlu0 %v5081_v31, %s10625_s17  ;;  %5246 = vrot.lane.b32.xlu1 %v5242_v20, %s10625_s17  ;;  %v3212_v1 = vadd.f32 %v10724_v53, %v3190_v30  ;;  %v3213_v49 = vadd.f32 %v10725_v8, %v3191_v54  ;;  %v3374_v0 = vadd.f32 %v10726_v16, %v3352_v50  ;;  %v5094_v33 = vstv %s9303_s7  ;;  %v10729_v30 = vld [vmem:[#allocation226_spill] sm:$0xff]  ;;  %v10730_v31 = vld [vmem:[#allocation237_spill] sm:$0xff]  ;;  %s9527_s7 = sld [smem:[#allocation3 + $0xe7]] }
 0x516   : > { %v4314_v42 = vadd.f32 %v4310_v40, %v4296_v60  ;;  %v4313_v22 = vadd.f32 %v4308_v27, %v4295_v56  ;;  %v3375_v35 = vadd.f32 %v10727_v61, %v3353_v38  ;;  %v4369_v39 = vrot.slane %v4363_v29, 2  ;;  %v10731_v38 = vld [vmem:[#allocation238_spill] sm:$0xff]  ;;  %v10732_v27 = vld [vmem:[#allocation239_spill] sm:$0xff] }
 0x517   : > { %v4332_v28 = vpop.permute.xlu1 %4331  ;;  %v4330_v37 = vpop.permute.xlu0 %4329  ;;  %v4371_v43 = vrot.slane %v4364_v58, 2  ;;  %v4368_v57 = vrot.slane %v4362_v21, 2  ;;  %v9366_v14 = vadd.f32 %v10728_v15, %v3212_v1  ;;  %v9369_v54 = vadd.f32 %v10729_v30, %v3213_v49 }
 0x518   : > { %v4336_v50 = vadd.f32 %v4332_v28, %v4314_v42  ;;  %v4335_v63 = vadd.f32 %v4330_v37, %v4313_v22  ;;  %v9372_v20 = vadd.f32 %v10730_v31, %v3374_v0  ;;  %v9375_v60 = vadd.f32 %v10731_v38, %v3375_v35  ;;  %v10733_v37 = vld [vmem:[#allocation240_spill] sm:$0xff] }
 0x519   : > { %5248 = vrot.lane.b32.xlu0 %v5243_v48, %s10625_s17  ;;  %5408 = vrot.lane.b32.xlu1 %v5404_v41, %s10625_s17  ;;  %v5405_v58 = vmul.f32 %v5403_v44, %v8576_v13  ;;  %v5095_v40 = vmul.f32 %v5094_v33, %v8573_v9  ;;  %v3419_v21 = vadd.f32 %v10732_v27, %v9142_v5  ;;  %v5256_v28 = vstv %s9316_s14  ;;  %s9543_s14 = sld [smem:[#allocation3 + $0xfb]] }
 0x51a   : > { %v3420_v48 = vadd.f32 %v10733_v37, %v9145_v26  ;;  %v4372_v44 = vsel %vm318_vm4, %v4369_v39, %v4371_v43  ;;  %v4370_v41 = vsel %vm318_vm4, %v4368_v57, %v4369_v39  ;;  %v5127_v53 = vstv %s9326_s30  ;;  %v10734_v26 = vld [vmem:[#allocation241_spill] sm:$0xff]  ;;  %s9555_s30 = sld [smem:[#allocation3 + $0x11f]] }
 0x51b   : > { %v4354_v56 = vpop.permute.xlu1 %4353  ;;  %v4352_v29 = vpop.permute.xlu0 %4351  ;;  %v5418_v8 = vstv %s9336_s20  ;;  %v4424_v49 = vstv %s9338_s18  ;;  %v3434_v16 = vadd.f32 %v10734_v26, %v3419_v21  ;;  %v5096_v35 = vmul.f32 %v5094_v33, %v8576_v13  ;;  %s9566_s20 = sld [smem:[#allocation3 + $0x105]]  ;;  %s9573_s18 = sld [smem:[#allocation3 + $0x87]] }
 0x51c   : > { %v4358_v42 = vadd.f32 %v4354_v56, %v4336_v50  ;;  %v4357_v22 = vadd.f32 %v4352_v29, %v4335_v63  ;;  %v5257_v43 = vmul.f32 %v5256_v28, %v8573_v9  ;;  %v5289_v15 = vstv %s9354_s21  ;;  %s9583_s21 = sld [smem:[#allocation3 + $0x108]] }
 0x51d   : > { %5410 = vrot.lane.b32.xlu0 %v5405_v58, %s10625_s17  ;;  %5099 = vrot.lane.b32.xlu1 %v5095_v40, %s10626_s1  ;;  %v5258_v39 = vmul.f32 %v5256_v28, %v8576_v13  ;;  %v5128_v57 = vmul.f32 %v5127_v53, %v8573_v9  ;;  %v5129_v30 = vmul.f32 %v5127_v53, %v8576_v13  ;;  %v4461_v50 = vstv %s9360_s5  ;;  %s9592_s5 = sld [smem:[#allocation3 + $0x8a]] }
 0x51e   : > { %v4376_v5 = vadd.f32 %v4372_v44, %v4358_v42  ;;  %v4375_v1 = vadd.f32 %v4370_v41, %v4357_v22  ;;  %v5419_v63 = vmul.f32 %v5418_v8, %v8573_v9  ;;  %v4426_v33 = vmul.f32 %v4424_v49, %v8576_v13 }
 0x51f   : > { %v4394_v0 = vpop.permute.xlu1 %4393  ;;  %v4392_v61 = vpop.permute.xlu0 %4391  ;;  %v5130_v31 = vmul.f32 %v5127_v53, %v8603_v18  ;;  %v5290_v29 = vmul.f32 %v5289_v15, %v8573_v9  ;;  %v9413_v58 = vmul.f32 %v5289_v15, %v8576_v13  ;;  %v4425_v21 = vmul.f32 %v4424_v49, %v8573_v9 }
 0x520   : > { %v4398_v38 = vadd.f32 %v4394_v0, %v4376_v5  ;;  %v4397_v56 = vadd.f32 %v4392_v61, %v4375_v1  ;;  %v4463_v42 = vmul.f32 %v4461_v50, %v8576_v13  ;;  %v4464_v22 = vmul.f32 %v4461_v50, %v8603_v18  ;;  %v10735_v5 = vld [vmem:[#allocation242_spill] sm:$0xff] }
 0x521   : > { %5101 = vrot.lane.b32.xlu0 %v5096_v35, %s10626_s1  ;;  %5261 = vrot.lane.b32.xlu1 %v5257_v43, %s10626_s1  ;;  %v4462_v28 = vmul.f32 %v4461_v50, %v8573_v9  ;;  %v5134_v41 = vrot.slane %v5128_v57, 1  ;;  %v5135_v53 = vrot.slane %v5129_v30, 1  ;;  %v9420_v1 = vadd.f32 %v10735_v5, %v3420_v48 }
 0x522   : > { %v5137_v26 = vrot.slane %v5130_v31, 1  ;;  %v9425_v49 = vmul.f32 %v5289_v15, %v8603_v18  ;;  %v5451_v0 = vstv %s9389_s0  ;;  %v5420_v48 = vmul.f32 %v5418_v8, %v8576_v13  ;;  %s9605_s0 = sld [smem:[#allocation3 + $0xa8]] }
 0x523   : > { %v4416_v40 = vpop.permute.xlu1 %4415  ;;  %v4414_v27 = vpop.permute.xlu0 %4413  ;;  %v5296_v61 = vrot.slane %v5290_v29, 1  ;;  %v5297_v35 = vrot.slane %v9413_v58, 1  ;;  %v5149_v43 = vstv %s9393_s3  ;;  %v4428_v15 = vadd.f32 %v4426_v33, %v9369_v54  ;;  %s9687_s3 = sld [smem:[#allocation3 + $0xab]] }
 0x524   : > { %v4420_v37 = vadd.f32 %v4416_v40, %v4398_v38  ;;  %v4419_v44 = vadd.f32 %v4414_v27, %v4397_v56  ;;  %v4469_v30 = vrot.slane %v4463_v42, 1  ;;  %v4471_v50 = vrot.slane %v4464_v22, 1 }
 0x525   : > { %5263 = vrot.lane.b32.xlu0 %v5258_v39, %s10626_s1  ;;  %5423 = vrot.lane.b32.xlu1 %v5419_v63, %s10626_s1  ;;  %v4468_v63 = vrot.slane %v4462_v28, 1  ;;  %v4427_v31 = vadd.f32 %v4425_v21, %v9366_v14  ;;  %v5136_v8 = vsel %vm255_vm3, %v5134_v41, %v5135_v53  ;;  %v5452_v38 = vmul.f32 %v5451_v0, %v8573_v9 }
 0x526   : > { %5557 = vst.msk [vmem:[%s9432_s10 + $0x8] sm:$0xff] %vm5555_vm5, %v4420_v37  ;;  %5556 = vst.msk [vmem:[%s9432_s10] sm:$0xff] %vm5555_vm5, %v4419_v44  ;;  %v5453_v56 = vmul.f32 %v5451_v0, %v8576_v13  ;;  %v9451_v29 = vadd.f32 %v9164_v17, %v3434_v16  ;;  %v5138_v54 = vsel %vm255_vm3, %v5135_v53, %v5137_v26  ;;  %v5299_v33 = vrot.slane %v9425_v49, 1 }
 0x527   : > { %v4439_v39 = vpop.permute.xlu1 %4438  ;;  %v4437_v57 = vpop.permute.xlu0 %4436  ;;  %v4523_v58 = vstv %s9409_s16  ;;  %v5298_v27 = vsel %vm255_vm3, %v5296_v61, %v5297_v35  ;;  %v5454_v21 = vmul.f32 %v5451_v0, %v8603_v18  ;;  %v4472_v42 = vsel %vm255_vm3, %v4469_v30, %v4471_v50  ;;  %s9829_s16 = sld [smem:[#allocation3 + $0xc6]] }
 0x528   : > { %v4443_v40 = vadd.f32 %v4439_v39, %v4428_v15  ;;  %v4442_v14 = vadd.f32 %v4437_v57, %v4427_v31  ;;  %v4470_v22 = vsel %vm255_vm3, %v4468_v63, %v4469_v30  ;;  %v5150_v28 = vmul.f32 %v5149_v43, %v8573_v9 }
 0x529   : > { %5425 = vrot.lane.b32.xlu0 %v5420_v48, %s10626_s1  ;;  %5139 = vrot.lane.b32.xlu1 %v5136_v8, %s10625_s17  ;;  %v5151_v37 = vmul.f32 %v5149_v43, %v8576_v13  ;;  %v5458_v53 = vrot.slane %v5452_v38, 1  ;;  %v5459_v5 = vrot.slane %v5453_v56, 1  ;;  %v4525_v26 = vmul.f32 %v4523_v58, %v8576_v13 }
 0x52a   : > { %v4526_v49 = vmul.f32 %v4523_v58, %v8603_v18  ;;  %v4524_v0 = vmul.f32 %v4523_v58, %v8573_v9  ;;  %v5311_v48 = vstv %s9428_s9  ;;  %v5461_v39 = vrot.slane %v5454_v21, 1  ;;  %s9831_s9 = sld [smem:[#allocation3 + $0xc9]] }
 0x52b   : > { %v4454_v17 = vpop.permute.xlu1 %4453  ;;  %v4452_v16 = vpop.permute.xlu0 %4451  ;;  %v5473_v57 = vstv %s9441_s11  ;;  %v5156_v63 = vrot.slane %v5150_v28, 1  ;;  %v5157_v31 = vrot.slane %v5151_v37, 1  ;;  %v5152_v8 = vmul.f32 %v5149_v43, %v8603_v18  ;;  %s9848_s11 = sld [smem:[#allocation3 + $0xea]] }
 0x52c   : > { %v4458_v44 = vadd.f32 %v4454_v17, %v4443_v40  ;;  %v4457_v41 = vadd.f32 %v4452_v16, %v4442_v14  ;;  %v4586_v38 = vstv %s9444_s12  ;;  %v5300_v56 = vsel %vm255_vm3, %v5297_v35, %v5299_v33  ;;  %s9859_s12 = sld [smem:[#allocation3 + $0xed]] }
 0x52d   : > { %5141 = vrot.lane.b32.xlu0 %v5138_v54, %s10625_s17  ;;  %5301 = vrot.lane.b32.xlu1 %v5298_v27, %s10625_s17  ;;  %v5460_v54 = vsel %vm255_vm3, %v5458_v53, %v5459_v5  ;;  %v5312_v58 = vmul.f32 %v5311_v48, %v8573_v9  ;;  %v5313_v40 = vmul.f32 %v5311_v48, %v8576_v13  ;;  %v4531_v14 = vrot.slane %v4525_v26, 2 }
 0x52e   : > { %v4476_v61 = vadd.f32 %v4472_v42, %v4458_v44  ;;  %v4475_v15 = vadd.f32 %v4470_v22, %v4457_v41  ;;  %v4533_v27 = vrot.slane %v4526_v49, 2  ;;  %v4530_v21 = vrot.slane %v4524_v0, 2 }
 0x52f   : > { %v4494_v30 = vpop.permute.xlu1 %4493  ;;  %v4492_v50 = vpop.permute.xlu0 %4491  ;;  %v5314_v43 = vmul.f32 %v5311_v48, %v8603_v18  ;;  %v5462_v42 = vsel %vm255_vm3, %v5459_v5, %v5461_v39  ;;  %v5189_v35 = vstv %s9460_s15  ;;  %v5158_v28 = vsel %vm255_vm3, %v5156_v63, %v5157_v31  ;;  %s9861_s15 = sld [smem:[#allocation3 + $0x10e]] }
 0x530   : > { %v4498_v17 = vadd.f32 %v4494_v30, %v4476_v61  ;;  %v4497_v16 = vadd.f32 %v4492_v50, %v4475_v15  ;;  %v5159_v37 = vrot.slane %v5152_v8, 1  ;;  %v5474_v44 = vmul.f32 %v5473_v57, %v8573_v9 }
 0x531   : > { %5303 = vrot.lane.b32.xlu0 %v5300_v56, %s10625_s17  ;;  %5463 = vrot.lane.b32.xlu1 %v5460_v54, %s10625_s17  ;;  %v9491_v41 = vmul.f32 %v5473_v57, %v8576_v13  ;;  %v5318_v49 = vrot.slane %v5312_v58, 1  ;;  %v5319_v0 = vrot.slane %v5313_v40, 1  ;;  %v4534_v5 = vsel %vm318_vm4, %v4531_v14, %v4533_v27 }
 0x532   : > { %v4532_v48 = vsel %vm318_vm4, %v4530_v21, %v4531_v14  ;;  %v5321_v61 = vrot.slane %v5314_v43, 1  ;;  %v5476_v15 = vmul.f32 %v5473_v57, %v8603_v18  ;;  %v3453_v39 = vadd.f32 %v9167_v51, %v9420_v1 }
 0x533   : > { %v4516_v33 = vpop.permute.xlu1 %4515  ;;  %v4514_v22 = vpop.permute.xlu0 %4513  ;;  %v5351_v63 = vstv %s9473_s19  ;;  %v5160_v54 = vsel %vm255_vm3, %v5157_v31, %v5159_v37  ;;  %v5480_v58 = vrot.slane %v5474_v44, 1  ;;  %v5481_v40 = vrot.slane %v9491_v41, 1  ;;  %s9863_s19 = sld [smem:[#allocation3 + $0xcc]] }
 0x534   : > { %v4520_v53 = vadd.f32 %v4516_v33, %v4498_v17  ;;  %v4519_v26 = vadd.f32 %v4514_v22, %v4497_v16  ;;  %v4623_v27 = vstv %s9477_s23  ;;  %v5320_v14 = vsel %vm255_vm3, %v5318_v49, %v5319_v0  ;;  %s9871_s23 = sld [smem:[#allocation3 + $0x111]] }
 0x535   : > { %5465 = vrot.lane.b32.xlu0 %v5462_v42, %s10625_s17  ;;  %5161 = vrot.lane.b32.xlu1 %v5158_v28, %s10626_s1  ;;  %v4588_v57 = vmul.f32 %v4586_v38, %v8576_v13  ;;  %v5190_v21 = vmul.f32 %v5189_v35, %v8573_v9  ;;  %v5191_v43 = vmul.f32 %v5189_v35, %v8576_v13  ;;  %v5483_v31 = vrot.slane %v5476_v15, 1 }
 0x536   : > { %v4538_v30 = vadd.f32 %v4534_v5, %v4520_v53  ;;  %v4537_v50 = vadd.f32 %v4532_v48, %v4519_v26  ;;  %v5322_v51 = vsel %vm255_vm3, %v5319_v0, %v5321_v61  ;;  %v4587_v1 = vmul.f32 %v4586_v38, %v8573_v9  ;;  %v10736_v5 = vld [vmem:[#allocation243_spill] sm:$0xff]  ;;  %v10737_v61 = vld [vmem:[#allocation244_spill] sm:$0xff] }
 0x537   : > { %v4556_v8 = vpop.permute.xlu1 %4555  ;;  %v4554_v56 = vpop.permute.xlu0 %4553  ;;  %v5192_v17 = vmul.f32 %v5189_v35, %v8603_v18  ;;  %v5352_v33 = vmul.f32 %v5351_v63, %v8573_v9  ;;  %v9521_v22 = vmul.f32 %v5351_v63, %v8576_v13  ;;  %v5482_v38 = vsel %vm255_vm3, %v5480_v58, %v5481_v40 }
 0x538   : > { %v4560_v16 = vadd.f32 %v4556_v8, %v4538_v30  ;;  %v4559_v42 = vadd.f32 %v4554_v56, %v4537_v50  ;;  %v4625_v35 = vmul.f32 %v4623_v27, %v8576_v13  ;;  %v4626_v44 = vmul.f32 %v4623_v27, %v8603_v18 }
 0x539   : > { %5163 = vrot.lane.b32.xlu0 %v5160_v54, %s10626_s1  ;;  %5323 = vrot.lane.b32.xlu1 %v5320_v14, %s10626_s1  ;;  %v4624_v41 = vmul.f32 %v4623_v27, %v8573_v9  ;;  %v5196_v49 = vrot.slane %v5190_v21, 2  ;;  %v5197_v0 = vrot.slane %v5191_v43, 2  ;;  %v3474_v48 = vadd.f32 %v10736_v5, %v9451_v29 }
 0x53a   : > { %v3475_v15 = vadd.f32 %v10737_v61, %v3453_v39  ;;  %v5199_v30 = vrot.slane %v5192_v17, 2  ;;  %v5513_v50 = vstv %s9498_s24  ;;  %v4590_v8 = vadd.f32 %v4588_v57, %v9375_v60  ;;  %s9880_s24 = sld [smem:[#allocation3 + $0xf0]] }
 0x53b   : > { %v4578_v28 = vpop.permute.xlu1 %4577  ;;  %v4576_v37 = vpop.permute.xlu0 %4575  ;;  %v4589_v56 = vadd.f32 %v4587_v1, %v9372_v20  ;;  %v5358_v54 = vrot.slane %v5352_v33, 2  ;;  %v5359_v58 = vrot.slane %v9521_v22, 2  ;;  %v4631_v27 = vrot.slane %v4625_v35, 1  ;;  %v10738_v1 = vld [vmem:[#allocation245_spill] sm:$0xff] }
 0x53c   : > { %v4582_v53 = vadd.f32 %v4578_v28, %v4560_v16  ;;  %v4581_v26 = vadd.f32 %v4576_v37, %v4559_v42  ;;  %v4633_v14 = vrot.slane %v4626_v44, 1  ;;  %v4630_v21 = vrot.slane %v4624_v41, 1 }
 0x53d   : > { %5325 = vrot.lane.b32.xlu0 %v5322_v51, %s10626_s1  ;;  %5485 = vrot.lane.b32.xlu1 %v5482_v38, %s10626_s1  ;;  %v5354_v43 = vmul.f32 %v5351_v63, %v8603_v18  ;;  %v5484_v51 = vsel %vm255_vm3, %v5481_v40, %v5483_v31  ;;  %v5198_v60 = vsel %vm318_vm4, %v5196_v49, %v5197_v0  ;;  %v4685_v42 = vstv %s9515_s26  ;;  %s9918_s26 = sld [smem:[#allocation3 + $0x114]] }
 0x53e   : > { %5984 = vst.msk [vmem:[%s9432_s10 + $0x18] sm:$0xff] %vm5555_vm5, %v4582_v53  ;;  %5983 = vst.msk [vmem:[%s9432_s10 + $0x10] sm:$0xff] %vm5555_vm5, %v4581_v26  ;;  %v5514_v20 = vmul.f32 %v5513_v50, %v8573_v9  ;;  %v5515_v57 = vmul.f32 %v5513_v50, %v8576_v13  ;;  %v3496_v17 = vadd.f32 %v10738_v1, %v3474_v48  ;;  %v5211_v63 = vstv %s9517_s29  ;;  %s9979_s29 = sld [smem:[#allocation3 + $0xcf]] }
 0x53f   : > { %v4601_v29 = vpop.permute.xlu1 %4600  ;;  %v4599_v39 = vpop.permute.xlu0 %4598  ;;  %v5200_v16 = vsel %vm318_vm4, %v5197_v0, %v5199_v30  ;;  %v5516_v33 = vmul.f32 %v5513_v50, %v8603_v18  ;;  %v5052_v22 = vmul.f32 %v9239_v55, %v8603_v18  ;;  %v5360_v38 = vsel %vm318_vm4, %v5358_v54, %v5359_v58  ;;  %v10739_v54 = vld [vmem:[#allocation246_spill] sm:$0xff] }
 0x540   : > { %v4605_v40 = vadd.f32 %v4601_v29, %v4590_v8  ;;  %v4604_v31 = vadd.f32 %v4599_v39, %v4589_v56  ;;  %v4634_v35 = vsel %vm255_vm3, %v4631_v27, %v4633_v14  ;;  %v4632_v44 = vsel %vm255_vm3, %v4630_v21, %v4631_v27 }
 0x541   : > { %5487 = vrot.lane.b32.xlu0 %v5484_v51, %s10626_s1  ;;  %5201 = vrot.lane.b32.xlu1 %v5198_v60, %s10625_s17  ;;  %v5361_v41 = vrot.slane %v5354_v43, 2  ;;  %v5520_v49 = vrot.slane %v5514_v20, 2  ;;  %v5521_v0 = vrot.slane %v5515_v57, 2  ;;  %v9564_v5 = vstv %s9527_s7  ;;  %s9991_s7 = sld [smem:[#allocation3 + $0xf3]] }
 0x542   : > { %v4687_v55 = vmul.f32 %v4685_v42, %v8576_v13  ;;  %v4688_v48 = vmul.f32 %v4685_v42, %v8603_v18  ;;  %v4686_v61 = vmul.f32 %v4685_v42, %v8573_v9  ;;  %v5523_v8 = vrot.slane %v5516_v33, 2 }
 0x543   : > { %v4616_v28 = vpop.permute.xlu1 %4615  ;;  %v4614_v37 = vpop.permute.xlu0 %4613  ;;  %v5059_v56 = vrot.slane %v5052_v22, 2  ;;  %v3497_v29 = vadd.f32 %v10739_v54, %v3475_v15  ;;  %v3514_v39 = vadd.f32 %v9345_v12, %v3496_v17  ;;  %v5212_v21 = vmul.f32 %v5211_v63, %v8573_v9 }
 0x544   : > { %v4620_v53 = vadd.f32 %v4616_v28, %v4605_v40  ;;  %v4619_v26 = vadd.f32 %v4614_v37, %v4604_v31  ;;  %v5373_v43 = vstv %s9543_s14  ;;  %v5362_v51 = vsel %vm318_vm4, %v5359_v58, %v5361_v41  ;;  %s9993_s14 = sld [smem:[#allocation3 + $0xd2]] }
 0x545   : > { %5203 = vrot.lane.b32.xlu0 %v5200_v16, %s10625_s17  ;;  %5363 = vrot.lane.b32.xlu1 %v5360_v38, %s10625_s17  ;;  %v5522_v60 = vsel %vm318_vm4, %v5520_v49, %v5521_v0  ;;  %v5213_v20 = vmul.f32 %v5211_v63, %v8576_v13  ;;  %v5214_v57 = vmul.f32 %v5211_v63, %v8603_v18  ;;  %v4693_v12 = vrot.slane %v4687_v55, 2  ;;  %v10740_v49 = vld [vmem:[#allocation247_spill] sm:$0xff] }
 0x546   : > { %v4638_v30 = vadd.f32 %v4634_v35, %v4620_v53  ;;  %v4637_v50 = vadd.f32 %v4632_v44, %v4619_v26  ;;  %v4695_v15 = vrot.slane %v4688_v48, 2  ;;  %v4692_v1 = vrot.slane %v4686_v61, 2 }
 0x547   : > { %v4656_v27 = vpop.permute.xlu1 %4655  ;;  %v4654_v14 = vpop.permute.xlu0 %4653  ;;  %v5535_v17 = vstv %s9555_s30  ;;  %v5524_v58 = vsel %vm318_vm4, %v5521_v0, %v5523_v8  ;;  %v5060_v40 = vsel %vm318_vm4, %v5057_v19, %v5059_v56  ;;  %v5218_v33 = vrot.slane %v5212_v21, 2  ;;  %s9997_s30 = sld [smem:[#allocation3 + $0xf6]] }
 0x548   : > { %v4660_v16 = vadd.f32 %v4656_v27, %v4638_v30  ;;  %v4659_v42 = vadd.f32 %v4654_v14, %v4637_v50  ;;  %v5374_v22 = vmul.f32 %v5373_v43, %v8573_v9  ;;  %v5375_v28 = vmul.f32 %v5373_v43, %v8576_v13 }
 0x549   : > { %5365 = vrot.lane.b32.xlu0 %v5362_v51, %s10625_s17  ;;  %5525 = vrot.lane.b32.xlu1 %v5522_v60, %s10625_s17  ;;  %v5376_v37 = vmul.f32 %v5373_v43, %v8603_v18  ;;  %v5219_v44 = vrot.slane %v5213_v20, 2  ;;  %v5221_v41 = vrot.slane %v5214_v57, 2  ;;  %v2702_v53 = vstv %s9566_s20  ;;  %v10741_v43 = vld [vmem:[#allocation248_spill] sm:$0xff]  ;;  %v10742_v60 = vld [vmem:[#allocation251_spill] sm:$0xff]  ;;  %s10001_s20 = sld [smem:[#allocation3 + $0x117]] }
 0x54a   : > { %v3515_v62 = vadd.f32 %v9350_v7, %v3497_v29  ;;  %v4696_v19 = vsel %vm318_vm4, %v4693_v12, %v4695_v15  ;;  %v4694_v26 = vsel %vm318_vm4, %v4692_v1, %v4693_v12  ;;  %v3536_v0 = vadd.f32 %v10740_v49, %v3514_v39  ;;  %v10743_v57 = vld [vmem:[#allocation252_spill] sm:$0xff] }
 0x54b   : > { %v4678_v63 = vpop.permute.xlu1 %4677  ;;  %v4676_v31 = vpop.permute.xlu0 %4675  ;;  %v4748_v61 = vstv %s9573_s18  ;;  %v5380_v8 = vrot.slane %v5374_v22, 2  ;;  %v5381_v7 = vrot.slane %v5375_v28, 2  ;;  %v5383_v56 = vrot.slane %v5376_v37, 2  ;;  %s10003_s18 = sld [smem:[#allocation3 + $0x11a]] }
 0x54c   : > { %v4682_v38 = vadd.f32 %v4678_v63, %v4660_v16  ;;  %v4681_v35 = vadd.f32 %v4676_v31, %v4659_v42  ;;  %v5536_v54 = vmul.f32 %v5535_v17, %v8573_v9  ;;  %v5220_v29 = vsel %vm318_vm4, %v5218_v33, %v5219_v44 }
 0x54d   : > { %5527 = vrot.lane.b32.xlu0 %v5524_v58, %s10625_s17  ;;  %5063 = vrot.lane.b32.xlu1 %v5060_v40, %s10626_s1  ;;  %v5222_v27 = vsel %vm318_vm4, %v5219_v44, %v5221_v41  ;;  %v5537_v14 = vmul.f32 %v5535_v17, %v8576_v13  ;;  %v5538_v39 = vmul.f32 %v5535_v17, %v8603_v18  ;;  %v9613_v21 = vstv %s9583_s21  ;;  %s9622_s17 = sld [smem:[#allocation3 + $0x8d]]  ;;  %v10744_v41 = vld [vmem:[#allocation249_spill] sm:$0xff] }
 0x54e   : > { %v4700_v55 = vadd.f32 %v4696_v19, %v4682_v38  ;;  %v4699_v48 = vadd.f32 %v4694_v26, %v4681_v35  ;;  %v3537_v51 = vadd.f32 %v10741_v43, %v3515_v62  ;;  %v3581_v20 = vadd.f32 %v10742_v60, %v9261_v24  ;;  %v10745_v19 = vld [vmem:[#allocation250_spill] sm:$0xff]  ;;  %s10028_s21 = sld [smem:[#allocation3 + $0xd5]] }
 0x54f   : > { %v4718_v30 = vpop.permute.xlu1 %4717  ;;  %v4716_v50 = vpop.permute.xlu0 %4715  ;;  %v3582_v12 = vadd.f32 %v10743_v57, %v9296_v32  ;;  %v4750_v17 = vmul.f32 %v4748_v61, %v8576_v13  ;;  %v4785_v16 = vstv %s9592_s5  ;;  %v5382_v40 = vsel %vm318_vm4, %v5380_v8, %v5381_v7  ;;  %s10045_s5 = sld [smem:[#allocation3 + $0xf9]] }
 0x550   : > { %v4722_v15 = vadd.f32 %v4718_v30, %v4700_v55  ;;  %v4721_v1 = vadd.f32 %v4716_v50, %v4699_v48  ;;  %v5384_v24 = vsel %vm318_vm4, %v5381_v7, %v5383_v56  ;;  %v4749_v63 = vmul.f32 %v4748_v61, %v8573_v9  ;;  %v10746_v48 = vld [vmem:[#allocation253_spill] sm:$0xff]  ;;  %v10747_v30 = vld [vmem:[#allocation254_spill] sm:$0xff] }
 0x551   : > { %5223 = vrot.lane.b32.xlu0 %v5220_v29, %s10626_s1  ;;  %5225 = vrot.lane.b32.xlu1 %v5222_v27, %s10626_s1  ;;  %v5542_v32 = vrot.slane %v5536_v54, 2  ;;  %v5543_v22 = vrot.slane %v5537_v14, 2  ;;  %v5545_v28 = vrot.slane %v5538_v39, 2  ;;  %v2421_v37 = vrot.slane %v8688_v10, 1 }
 0x552   : > { %v4787_v38 = vmul.f32 %v4785_v16, %v8576_v13  ;;  %v4788_v35 = vmul.f32 %v4785_v16, %v8603_v18  ;;  %v4786_v44 = vmul.f32 %v4785_v16, %v8573_v9  ;;  %v3558_v62 = vadd.f32 %v10744_v41, %v3536_v0 }
 0x553   : > { %v4740_v42 = vpop.permute.xlu1 %4739  ;;  %v4738_v58 = vpop.permute.xlu0 %4737  ;;  %v3559_v26 = vadd.f32 %v10745_v19, %v3537_v51  ;;  %v3607_v49 = vrot.slane %v9234_v4, 1  ;;  %v3608_v55 = vrot.slane %v9330_v34, 1  ;;  %v3596_v61 = vadd.f32 %v10746_v48, %v3581_v20 }
 0x554   : > { %v4744_v31 = vadd.f32 %v4740_v42, %v4722_v15  ;;  %v4743_v33 = vadd.f32 %v4738_v58, %v4721_v1  ;;  %v3597_v50 = vadd.f32 %v10747_v30, %v3582_v12  ;;  %v3610_v8 = vrot.slane %v9334_v6, 1 }
 0x555   : > { %5385 = vrot.lane.b32.xlu0 %v5382_v40, %s10626_s1  ;;  %5387 = vrot.lane.b32.xlu1 %v5384_v24, %s10626_s1  ;;  %v3662_v7 = vstv %s9605_s0  ;;  %v4752_v54 = vadd.f32 %v4750_v17, %v3559_v26  ;;  %v4751_v29 = vadd.f32 %v4749_v63, %v3558_v62  ;;  %v5544_v4 = vsel %vm318_vm4, %v5542_v32, %v5543_v22  ;;  %s10065_s0 = sld [smem:[#allocation3 + $0x11d]] }
 0x556   : > { %5986 = vst.msk [vmem:[%s9432_s10 + $0x28] sm:$0xff] %vm5555_vm5, %v4744_v31  ;;  %5985 = vst.msk [vmem:[%s9432_s10 + $0x20] sm:$0xff] %vm5555_vm5, %v4743_v33  ;;  %v5546_v34 = vsel %vm318_vm4, %v5543_v22, %v5545_v28  ;;  %v4793_v27 = vrot.slane %v4787_v38, 1  ;;  %v4795_v14 = vrot.slane %v4788_v35, 1  ;;  %v4792_v39 = vrot.slane %v4786_v44, 1 }
 0x557   : > { %v4763_v56 = vpop.permute.xlu1 %4762  ;;  %v4761_v0 = vpop.permute.xlu0 %4760  ;;  %v4847_v43 = vstv %s9622_s17  ;;  %v9654_v6 = vmul.f32 %v8884_v2, %v10617_v25  ;;  %v3609_v51 = vsel %vm255_vm3, %v3607_v49, %v3608_v55  ;;  %v2423_v57 = vrot.slane %v8711_v59, 1  ;;  %s6003_s17 = sshll.u32 %s6191_s25, 11  ;;  %s5580_s25 = scalar_lea.sflag [#allocation6], %s6354_s13 }
 0x558   : > { %v4767_v60 = vadd.f32 %v4763_v56, %v4752_v54  ;;  %v4766_v20 = vadd.f32 %v4761_v0, %v4751_v29  ;;  %v3614_v12 = vadd.f32 %v3609_v51, %v3596_v61  ;;  %v3611_v15 = vsel %vm255_vm3, %v3608_v55, %v3610_v8  ;;  %v10751_v8 = vld [vmem:[#allocation256_spill] sm:$0xff]  ;;  %v10753_v51 = vld [vmem:[#allocation258_spill] sm:$0xff] }
 0x559   : > { %5547 = vrot.lane.b32.xlu0 %v5544_v4, %s10626_s1  ;;  %5549 = vrot.lane.b32.xlu1 %v5546_v34, %s10626_s1  ;;  %v3663_v1 = vmul.f32 %v3662_v7, %v10691_v11  ;;  %v3615_v42 = vadd.f32 %v3611_v15, %v3597_v50  ;;  %v4849_v24 = vmul.f32 %v4847_v43, %v8576_v13  ;;  %v2420_v35 = vrot.slane %v8725_v23, 1  ;;  %s9683_s1 = sld [smem:[#allocation3 + $0x10b]]  ;;  %v10750_v23 = vld [vmem:[#allocation255_spill] sm:$0xff] }
 0x55a   : > { %v4796_v63 = vsel %vm255_vm3, %v4793_v27, %v4795_v14  ;;  %v4794_v32 = vsel %vm255_vm3, %v4792_v39, %v4793_v27  ;;  %v4850_v59 = vmul.f32 %v4847_v43, %v8603_v18  ;;  %v4848_v31 = vmul.f32 %v4847_v43, %v8573_v9  ;;  %v10752_v39 = vld [vmem:[#allocation257_spill] sm:$0xff] }
 0x55b   : > { %v4778_v17 = vpop.permute.xlu1 %4777  ;;  %v4776_v16 = vpop.permute.xlu0 %4775  ;;  %v3664_v33 = vmul.f32 %v3662_v7, %v10692_v36  ;;  %v3665_v22 = vmul.f32 %v3662_v7, %v10693_v47  ;;  %v9670_v44 = vmul.f32 %v8884_v2, %v10612_v46  ;;  %v9674_v41 = vmul.f32 %v8884_v2, %v10618_v3 }
 0x55c   : > { %v4782_v58 = vadd.f32 %v4778_v17, %v4767_v60  ;;  %v4781_v40 = vadd.f32 %v4776_v16, %v4766_v20  ;;  %v10748_v62 = vstv %s8853_s28  ;;  %v2483_v55 = vrot.slane %v9654_v6, 2  ;;  %s9744_s28 = sld [smem:[#allocation3 + $0xb1]] }
 0x55d   : > { %v2541_v19 = vmul.f32 %v10748_v62, %v10617_v25  ;;  %v10749_v48 = vmov %v10748_v62  ;;  %v3636_v30 = vadd.f32 %v10750_v23, %v3614_v12  ;;  %v3669_v50 = vrot.slane %v3663_v1, 2  ;;  %v10754_v62 = vld [vmem:[#allocation20_spill] sm:$0xff] }
 0x55e   : > { %v4800_v28 = vadd.f32 %v4796_v63, %v4782_v58  ;;  %v4799_v38 = vadd.f32 %v4794_v32, %v4781_v40  ;;  %v2540_v61 = vmul.f32 %v10749_v48, %v10618_v3  ;;  %v3637_v7 = vadd.f32 %v10751_v8, %v3615_v42 }
 0x55f   : > { %v4818_v26 = vpop.permute.xlu1 %4817  ;;  %v4816_v49 = vpop.permute.xlu0 %4815  ;;  %v4855_v56 = vrot.slane %v4849_v24, 2  ;;  %v4857_v2 = vrot.slane %v4850_v59, 2  ;;  %v4854_v0 = vrot.slane %v4848_v31, 2  ;;  %v3670_v54 = vrot.slane %v3664_v33, 2 }
 0x560   : > { %v3672_v29 = vrot.slane %v3665_v22, 2  ;;  %v4822_v4 = vadd.f32 %v4818_v26, %v4800_v28  ;;  %v4821_v34 = vadd.f32 %v4816_v49, %v4799_v38  ;;  %v9694_v27 = vsel %vm255_vm3, %v2421_v37, %v2423_v57 }
 0x561   : > { %v9698_v14 = vmul.f32 %v9319_v45, %v10617_v25  ;;  %v3658_v43 = vadd.f32 %v10752_v39, %v3636_v30  ;;  %v3659_v60 = vadd.f32 %v10753_v51, %v3637_v7  ;;  %v2485_v15 = vrot.slane %v9670_v44, 2  ;;  %v10757_v51 = vld [vmem:[#allocation34_spill] sm:$0xff] }
 0x562   : > { %v9705_v1 = vmul.f32 %v9319_v45, %v10612_v46  ;;  %v2482_v57 = vrot.slane %v9674_v41, 2  ;;  %v2543_v42 = vadd.f32 %v2541_v19, %v8415_v52  ;;  %v4858_v58 = vsel %vm318_vm4, %v4855_v56, %v4857_v2 }
 0x563   : > { %v4840_v20 = vpop.permute.xlu1 %4839  ;;  %v4838_v12 = vpop.permute.xlu0 %4837  ;;  %v4856_v40 = vsel %vm318_vm4, %v4854_v0, %v4855_v56  ;;  %v3671_v24 = vsel %vm318_vm4, %v3669_v50, %v3670_v54  ;;  %v3673_v63 = vsel %vm318_vm4, %v3670_v54, %v3672_v29  ;;  %v9716_v31 = vsel %vm255_vm3, %v2420_v35, %v2421_v37  ;;  %v10755_v56 = vld [vmem:[#allocation259_spill] sm:$0xff]  ;;  %v10756_v0 = vld [vmem:[#allocation260_spill] sm:$0xff] }
 0x564   : > { %v4844_v17 = vadd.f32 %v4840_v20, %v4822_v4  ;;  %v4843_v16 = vadd.f32 %v4838_v12, %v4821_v34  ;;  %v9720_v52 = vmul.f32 %v9319_v45, %v10618_v3  ;;  %v3676_v33 = vadd.f32 %v3671_v24, %v3658_v43  ;;  %v10760_v24 = vld [vmem:[#allocation23_spill] sm:$0xff] }
 0x565   : > { %v3677_v22 = vadd.f32 %v3673_v63, %v3659_v60  ;;  %v2542_v19 = vadd.f32 %v2540_v61, %v10754_v62  ;;  %v2584_v26 = vrot.slane %v9698_v14, 1  ;;  %v2586_v49 = vrot.slane %v9705_v1, 1 }
 0x566   : > { %v4862_v32 = vadd.f32 %v4858_v58, %v4844_v17  ;;  %v4861_v59 = vadd.f32 %v4856_v40, %v4843_v16  ;;  %v9726_v48 = vstv %s9683_s1  ;;  %v9730_v10 = vmul.f32 %v9564_v5, %v10617_v25  ;;  %v10758_v16 = vld [vmem:[#allocation36_spill] sm:$0xff]  ;;  %s5596_s1 = sshll.u32 %s9432_s10, 4  ;;  %s10139_s1 = int_to_ptr.vmem [resolvable:$true] %s5596_s1 }
 0x567   : > { %v4880_v28 = vpop.permute.xlu1 %4879  ;;  %v4878_v38 = vpop.permute.xlu0 %4877  ;;  %v9734_v45 = vmul.f32 %v9564_v5, %v10612_v46  ;;  %v2704_v37 = vmul.f32 %v2702_v53, %v10617_v25  ;;  %v4910_v35 = vstv %s9687_s3  ;;  %v2703_v61 = vmul.f32 %v2702_v53, %v10618_v3  ;;  %v10759_v58 = vld [vmem:[#allocation164_spill] sm:$0xff] }
 0x568   : > { %v4884_v23 = vadd.f32 %v4880_v28, %v4862_v32  ;;  %v4883_v30 = vadd.f32 %v4878_v38, %v4861_v59  ;;  %v4947_v50 = vstv %s9689_s4  ;;  %v2583_v8 = vrot.slane %v9720_v52, 1  ;;  %v10761_v32 = vld [vmem:[#allocation264_spill] sm:$0xff]  ;;  %v10762_v52 = vld [vmem:[#allocation265_spill] sm:$0xff] }
 0x569   : > { %v9749_v7 = vmul.f32 %v9613_v21, %v10617_v25  ;;  %v3698_v2 = vadd.f32 %v10755_v56, %v3676_v33  ;;  %v3699_v54 = vadd.f32 %v10756_v0, %v3677_v22  ;;  %v4912_v39 = vmul.f32 %v4910_v35, %v8576_v13  ;;  %v10763_v22 = vld [vmem:[#allocation67_spill] sm:$0xff]  ;;  %v10764_v28 = vld [vmem:[#allocation165_spill] sm:$0xff]  ;;  %v10766_v56 = vld [vmem:[#allocation176_spill] sm:$0xff] }
 0x56a   : > { %v4911_v43 = vmul.f32 %v4910_v35, %v8573_v9  ;;  %v2706_v60 = vadd.f32 %v2704_v37, %v10757_v51  ;;  %v4949_v20 = vmul.f32 %v4947_v50, %v8576_v13  ;;  %v4950_v12 = vmul.f32 %v4947_v50, %v8603_v18 }
 0x56b   : > { %v4902_v29 = vpop.permute.xlu1 %4901  ;;  %v4900_v4 = vpop.permute.xlu0 %4899  ;;  %v4948_v17 = vmul.f32 %v4947_v50, %v8573_v9  ;;  %v2395_v40 = vadd.f32 %v10759_v58, %v10758_v16  ;;  %v2705_v63 = vadd.f32 %v2703_v61, %v10760_v24  ;;  %v3720_v59 = vadd.f32 %v10761_v32, %v3698_v2  ;;  %v10768_v16 = vld [vmem:[#allocation188_spill] sm:$0xff] }
 0x56c   : > { %v4906_v53 = vadd.f32 %v4902_v29, %v4884_v23  ;;  %v4905_v34 = vadd.f32 %v4900_v4, %v4883_v30  ;;  %v3721_v33 = vadd.f32 %v10762_v52, %v3699_v54  ;;  %v2394_v38 = vadd.f32 %v10764_v28, %v10763_v22  ;;  %v10765_v30 = vld [vmem:[#allocation166_spill] sm:$0xff]  ;;  %v10767_v29 = vld [vmem:[#allocation177_spill] sm:$0xff] }
 0x56d   : > { %v2742_v62 = vmul.f32 %v9613_v21, %v10612_v46  ;;  %v2747_v37 = vrot.slane %v9749_v7, 1  ;;  %v2740_v35 = vmul.f32 %v9613_v21, %v10618_v3  ;;  %v2410_v50 = vadd.f32 %v10765_v30, %v2395_v40  ;;  %v10769_v21 = vld [vmem:[#allocation167_spill] sm:$0xff]  ;;  %v10770_v22 = vld [vmem:[#allocation178_spill] sm:$0xff] }
 0x56e   : > { %5988 = vst.msk [vmem:[%s9432_s10 + $0x38] sm:$0xff] %vm5555_vm5, %v4906_v53  ;;  %5987 = vst.msk [vmem:[%s9432_s10 + $0x30] sm:$0xff] %vm5555_vm5, %v4905_v34  ;;  %v2558_v2 = vadd.f32 %v10766_v56, %v2543_v42  ;;  %v4914_v0 = vadd.f32 %v4912_v39, %v3721_v33  ;;  %v4913_v54 = vadd.f32 %v4911_v43, %v3720_v59  ;;  %v4955_v53 = vrot.slane %v4949_v20, 1  ;;  %v10771_v40 = vld [vmem:[#allocation179_spill] sm:$0xff]  ;;  %v10772_v59 = vld [vmem:[#allocation189_spill] sm:$0xff] }
 0x56f   : > { %v4925_v61 = vpop.permute.xlu1 %4924  ;;  %v4923_v23 = vpop.permute.xlu0 %4922  ;;  %v2557_v4 = vadd.f32 %v10767_v29, %v2542_v19  ;;  %v4957_v34 = vrot.slane %v4950_v12, 1  ;;  %v4954_v51 = vrot.slane %v4948_v17, 1  ;;  %v2721_v58 = vadd.f32 %v10768_v16, %v2706_v60  ;;  %v10773_v20 = vld [vmem:[#allocation190_spill] sm:$0xff] }
 0x570   : > { %v4929_v24 = vadd.f32 %v4925_v61, %v4914_v0  ;;  %v4928_v7 = vadd.f32 %v4923_v23, %v4913_v54  ;;  %v9780_v32 = vstv %s9744_s28  ;;  %v2409_v52 = vadd.f32 %v10769_v21, %v2394_v38  ;;  %s10137_s28 = scalar_lea.hbm %s10194_s2, %s6003_s17 }
 0x571   : > { %v2573_v28 = vadd.f32 %v10770_v22, %v2558_v2  ;;  %v2572_v30 = vadd.f32 %v10771_v40, %v2557_v4  ;;  %v2749_v42 = vrot.slane %v2742_v62, 1  ;;  %v2720_v19 = vadd.f32 %v10772_v59, %v2705_v63  ;;  %v10774_v4 = vld [vmem:[#allocation191_spill] sm:$0xff]  ;;  %v10778_v59 = vld [vmem:[#allocation180_spill] sm:$0xff] }
 0x572   : > { %v2736_v12 = vadd.f32 %v10773_v20, %v2721_v58  ;;  %v4958_v60 = vsel %vm255_vm3, %v4955_v53, %v4957_v34  ;;  %v4956_v61 = vsel %vm255_vm3, %v4954_v51, %v4955_v53  ;;  %v9791_v38 = vmul.f32 %v9780_v32, %v8576_v13 }
 0x573   : > { %v4940_v39 = vpop.permute.xlu1 %4939  ;;  %v4938_v43 = vpop.permute.xlu0 %4937  ;;  %v5010_v23 = vmul.f32 %v9780_v32, %v8573_v9  ;;  %v2428_v62 = vadd.f32 %v9694_v27, %v2410_v50  ;;  %v2746_v56 = vrot.slane %v2740_v35, 1  ;;  %v2587_v0 = vsel %vm255_vm3, %v2584_v26, %v2586_v49 }
 0x574   : > { %v4944_v17 = vadd.f32 %v4940_v39, %v4929_v24  ;;  %v4943_v33 = vadd.f32 %v4938_v43, %v4928_v7  ;;  %v2585_v54 = vsel %vm255_vm3, %v2583_v8, %v2584_v26  ;;  %v2639_v29 = vmul.f32 %v9564_v5, %v10618_v3  ;;  %v10775_v26 = vld [vmem:[#allocation168_spill] sm:$0xff]  ;;  %v10777_v39 = vld [vmem:[#allocation170_spill] sm:$0xff] }
 0x575   : > { %v2735_v53 = vadd.f32 %v10774_v4, %v2720_v19  ;;  %v2427_v35 = vadd.f32 %v9716_v31, %v2409_v52  ;;  %v2591_v50 = vadd.f32 %v2587_v0, %v2573_v28  ;;  %v2750_v1 = vsel %vm255_vm3, %v2747_v37, %v2749_v42  ;;  %v10785_v0 = vld [vmem:[#allocation194_spill] sm:$0xff] }
 0x576   : > { %v4962_v2 = vadd.f32 %v4958_v60, %v4944_v17  ;;  %v4961_v63 = vadd.f32 %v4956_v61, %v4943_v33  ;;  %v2590_v16 = vadd.f32 %v2585_v54, %v2572_v30  ;;  %v2754_v49 = vadd.f32 %v2750_v1, %v2736_v12  ;;  %v10776_v30 = vld [vmem:[#allocation169_spill] sm:$0xff]  ;;  %v10781_v17 = vld [vmem:[#allocation171_spill] sm:$0xff] }
 0x577   : > { %v4980_v34 = vpop.permute.xlu1 %4979  ;;  %v4978_v27 = vpop.permute.xlu0 %4977  ;;  %v5017_v14 = vrot.slane %v9791_v38, 2  ;;  %v5016_v58 = vrot.slane %v5010_v23, 2  ;;  %v2450_v8 = vadd.f32 %v10775_v26, %v2428_v62  ;;  %v2748_v5 = vsel %vm255_vm3, %v2746_v56, %v2747_v37  ;;  %v10783_v62 = vld [vmem:[#allocation183_spill] sm:$0xff] }
 0x578   : > { %v9809_v51 = vadd.f32 %v4980_v34, %v4962_v2  ;;  %v2804_v24 = vmul.f32 %v9726_v48, %v10612_v46  ;;  %v4983_v7 = vadd.f32 %v4978_v27, %v4961_v63  ;;  %v2646_v31 = vrot.slane %v9730_v10, 2  ;;  %v10779_v10 = vld [vmem:[#allocation181_spill] sm:$0xff] }
 0x579   : > { %v2648_v21 = vrot.slane %v9734_v45, 2  ;;  %v2753_v52 = vadd.f32 %v2748_v5, %v2735_v53  ;;  %v2803_v22 = vmul.f32 %v9726_v48, %v10617_v25  ;;  %v2449_v42 = vadd.f32 %v10776_v30, %v2427_v35  ;;  %v10780_v45 = vld [vmem:[#allocation192_spill] sm:$0xff]  ;;  %v10784_v2 = vld [vmem:[#allocation193_spill] sm:$0xff] }
 0x57a   : > { %v2472_v43 = vadd.f32 %v10777_v39, %v2450_v8  ;;  %v2802_v37 = vmul.f32 %v9726_v48, %v10618_v3  ;;  %v2613_v19 = vadd.f32 %v10778_v59, %v2591_v50  ;;  %v2612_v20 = vadd.f32 %v10779_v10, %v2590_v16  ;;  %v10782_v48 = vld [vmem:[#allocation182_spill] sm:$0xff]  ;;  %v10786_v16 = vld [vmem:[#allocation195_spill] sm:$0xff] }
 0x57b   : > { %v9820_v28 = vpop.permute.xlu1 %5001  ;;  %v5000_v40 = vpop.permute.xlu0 %4999  ;;  %v2776_v12 = vadd.f32 %v10780_v45, %v2754_v49  ;;  %v5018_v25 = vsel %vm318_vm4, %v5016_v58, %v5017_v14  ;;  %v2471_v33 = vadd.f32 %v10781_v17, %v2449_v42  ;;  %v2645_v60 = vrot.slane %v2639_v29, 2  ;;  %v10789_v42 = vld [vmem:[#allocation174_spill] sm:$0xff] }
 0x57c   : > { %v5005_v46 = vadd.f32 %v5000_v40, %v4983_v7  ;;  %v2811_v61 = vrot.slane %v2804_v24, 2  ;;  %v2635_v23 = vadd.f32 %v10782_v48, %v2613_v19  ;;  %v2634_v56 = vadd.f32 %v10783_v62, %v2612_v20  ;;  %v10787_v7 = vld [vmem:[#allocation172_spill] sm:$0xff]  ;;  %v10788_v40 = vld [vmem:[#allocation173_spill] sm:$0xff] }
 0x57d   : > { %v2775_v63 = vadd.f32 %v10784_v2, %v2753_v52  ;;  %v2798_v54 = vadd.f32 %v10785_v0, %v2776_v12  ;;  %v2486_v34 = vsel %vm318_vm4, %v2483_v55, %v2485_v15  ;;  %v2809_v29 = vrot.slane %v2803_v22, 2  ;;  %v10792_v19 = vld [vmem:[#allocation196_spill] sm:$0xff]  ;;  %v10796_v2 = vld [vmem:[#allocation187_spill] sm:$0xff]  ;;  %v10797_v0 = vld [vmem:[#allocation198_spill] sm:$0xff] }
 0x57e   : > { %v5023_v3 = vadd.f32 %v5018_v25, %v5005_v46  ;;  %v2808_v27 = vrot.slane %v2802_v37, 2  ;;  %v2490_v35 = vadd.f32 %v2486_v34, %v2472_v43  ;;  %v2484_v50 = vsel %vm318_vm4, %v2482_v57, %v2483_v55  ;;  %v10790_v43 = vld [vmem:[#allocation184_spill] sm:$0xff]  ;;  %v10791_v46 = vld [vmem:[#allocation185_spill] sm:$0xff] }
 0x57f   : > { %v9841_v4 = vpop.permute.xlu1 %5041  ;;  %v5040_v53 = vpop.permute.xlu0 %5039  ;;  %v2649_v1 = vsel %vm318_vm4, %v2646_v31, %v2648_v21  ;;  %v2797_v49 = vadd.f32 %v10786_v16, %v2775_v63  ;;  %v2489_v44 = vadd.f32 %v2484_v50, %v2471_v33  ;;  %v2647_v58 = vsel %vm318_vm4, %v2645_v60, %v2646_v31  ;;  %v10793_v60 = vld [vmem:[#allocation175_spill] sm:$0xff] }
 0x580   : > { %v2812_v15 = vsel %vm318_vm4, %v2809_v29, %v2811_v61  ;;  %v5045_v6 = vadd.f32 %v5040_v53, %v5023_v3  ;;  %v2653_v41 = vadd.f32 %v2649_v1, %v2635_v23  ;;  %v2652_v26 = vadd.f32 %v2647_v58, %v2634_v56  ;;  %v10794_v3 = vld [vmem:[#allocation186_spill] sm:$0xff]  ;;  %v10795_v23 = vld [vmem:[#allocation197_spill] sm:$0xff] }
 0x581   : > { %v2816_v55 = vadd.f32 %v2812_v15, %v2798_v54  ;;  %v2810_v5 = vsel %vm318_vm4, %v2808_v27, %v2809_v29  ;;  %v2512_v31 = vadd.f32 %v10787_v7, %v2490_v35  ;;  %v3725_v52 = vstv %s9829_s16  ;;  %v10798_v29 = vld [vmem:[#allocation199_spill] sm:$0xff]  ;;  %s6115_s16 = scalar_lea.vmem %s10139_s1, 2048 }
 0x582   : > { %v2815_v21 = vadd.f32 %v2810_v5, %v2797_v49  ;;  %v3762_v22 = vstv %s9831_s9  ;;  %v2511_v30 = vadd.f32 %v10788_v40, %v2489_v44  ;;  %v2675_v37 = vadd.f32 %v10790_v43, %v2653_v41  ;;  %p6116_p13 = scmp.ne.s32.totalorder %s10139_s1, %s6115_s16  ;;  %s6209_s9 = smov [#allocation7]  }
 0x583   : > { %v9865_v57 = vpop.permute.xlu1 %5084  ;;  %v5062_v8 = vpop.permute.xlu0 %5061  ;;  %v2534_v39 = vadd.f32 %v10789_v42, %v2512_v31  ;;  %v2674_v59 = vadd.f32 %v10791_v46, %v2652_v26  ;;  %v2838_v10 = vadd.f32 %v10792_v19, %v2816_v55  ;;  %v3726_v12 = vmul.f32 %v3725_v52, %v10691_v11 }
 0x584   : > { %v5067_v24 = vadd.f32 %v5062_v8, %v5045_v6  ;;  %v3727_v25 = vmul.f32 %v3725_v52, %v10692_v36  ;;  %v3763_v17 = vmul.f32 %v3762_v22, %v10691_v11  ;;  %v3887_v33 = vstv %s9848_s11  ;;  %p6117_p2 = pnand %p6116_p13, %p10835_p0  ;;  %s6119_s11 = sshll.u32 %s6209_s9, 4  ;;  %s6120_s11 = int_to_ptr.vmem [resolvable:$false] %s6119_s11 }
 0x585   : > { %v2533_v61 = vadd.f32 %v10793_v60, %v2511_v30  ;;  %v2697_v48 = vadd.f32 %v10794_v3, %v2675_v37  ;;  %v2837_v62 = vadd.f32 %v10795_v23, %v2815_v21  ;;  %v3764_v56 = vmul.f32 %v3762_v22, %v10692_v36  ;;  %p6122_p11 = scmp.lt.s32.totalorder %s10139_s1, %s6120_s11 }
 0x586   : > { %5989 = vst.msk [vmem:[%s9432_s10 + $0x40] sm:$0xff] %vm5555_vm5, %v5067_v24  ;;  %v2696_v63 = vadd.f32 %v10796_v2, %v2674_v59  ;;  %v2860_v54 = vadd.f32 %v10797_v0, %v2838_v10  ;;  %v3924_v53 = vstv %s9859_s12  ;;  %v4049_v34 = vstv %s9861_s15  ;;  %v10799_v59 = vld [vmem:[#allocation267_spill] sm:$0xff]  ;;  %v10800_v10 = vld [vmem:[#allocation268_spill] sm:$0xff]  ;;  %p6118_p5 = pneg %p6117_p2  ;;  %s6121_s12 = scalar_lea.vmem %s6120_s11, 4096 }
 0x587   : > { %v9882_v20 = vpop.permute.xlu1 %5246  ;;  %v9884_v45 = vpop.permute.xlu0 %5086  ;;  %v2859_v27 = vadd.f32 %v10798_v29, %v2837_v62  ;;  %v3765_v35 = vmul.f32 %v3762_v22, %v10693_v47  ;;  %v3824_v50 = vstv %s9863_s19  ;;  %v3888_v1 = vmul.f32 %v3887_v33, %v10691_v11  ;;  %v10802_v62 = vld [vmem:[#allocation269_spill] sm:$0xff]  ;;  %p6123_p4 = scmp.lt.s32.totalorder %s6121_s12, %s6115_s16 }
 0x588   : > { %v3728_v44 = vadd.f32 %v3726_v12, %v2533_v61  ;;  %v3729_v58 = vadd.f32 %v3727_v25, %v2534_v39  ;;  %v3769_v15 = vrot.slane %v3763_v17, 1  ;;  %v3889_v6 = vmul.f32 %v3887_v33, %v10692_v36  ;;  %v10801_v33 = vld [vmem:[#allocation282_spill] sm:$0xff] }
 0x589   : > { %v3770_v41 = vrot.slane %v3764_v56, 1  ;;  %v3925_v26 = vmul.f32 %v3924_v53, %v10691_v11  ;;  %v4050_v55 = vmul.f32 %v4049_v34, %v10691_v11  ;;  %v4086_v8 = vstv %s9871_s23  ;;  %v10803_v56 = vld [vmem:[#allocation270_spill] sm:$0xff]  ;;  %p6124_p7 = por %p6123_p4, %p6122_p11 }
 0x58a   : > { %v9911_v5 = vmul.f32 %v3824_v50, %v10691_v11  ;;  %v9914_v24 = vmul.f32 %v3824_v50, %v10692_v36  ;;  %v3926_v7 = vmul.f32 %v3924_v53, %v10692_v36  ;;  %v4051_v31 = vmul.f32 %v4049_v34, %v10692_v36 }
 0x58b   : > { %v9902_v16 = vpop.permute.xlu1 %5408  ;;  %v9904_v49 = vpop.permute.xlu0 %5248  ;;  %v3772_v21 = vrot.slane %v3765_v35, 1  ;;  %v9921_v52 = vmul.f32 %v3824_v50, %v10693_v47  ;;  %v3890_v22 = vadd.f32 %v3888_v1, %v2696_v63  ;;  %v3986_v40 = vstv %s9880_s24  ;;  %v10804_v63 = vld [vmem:[#allocation283_spill] sm:$0xff]  ;;  %p6125_p10 = pnand %p6124_p7, %p6118_p5 }
 0x58c   : > { %v3891_v39 = vadd.f32 %v3889_v6, %v2697_v48  ;;  %v3927_v43 = vmul.f32 %v3924_v53, %v10693_v47  ;;  %v4087_v37 = vmul.f32 %v4086_v8, %v10691_v11  ;;  %v4088_v46 = vmul.f32 %v4086_v8, %v10692_v36  ;;  %v10805_v53 = vld [vmem:[#allocation18_spill] sm:$0xff]  ;;  %v10807_v6 = vld [vmem:[#allocation285_spill] sm:$0xff] }
 0x58d   : > { %v3743_v19 = vadd.f32 %v10799_v59, %v3728_v44  ;;  %v3744_v12 = vadd.f32 %v10800_v10, %v3729_v58  ;;  %v3931_v25 = vrot.slane %v3925_v26, 1  ;;  %v4052_v17 = vadd.f32 %v4050_v55, %v2859_v27  ;;  %v10806_v27 = vld [vmem:[#allocation284_spill] sm:$0xff] }
 0x58e   : > { %v3905_v60 = vadd.f32 %v10801_v33, %v3890_v22  ;;  %v3932_v61 = vrot.slane %v3926_v7, 1  ;;  %v4053_v3 = vadd.f32 %v4051_v31, %v2860_v54  ;;  %v4089_v23 = vmul.f32 %v4086_v8, %v10693_v47  ;;  %v10808_v55 = vld [vmem:[#allocation28_spill] sm:$0xff]  ;;  %v10809_v7 = vld [vmem:[#allocation263_spill] sm:$0xff] }
 0x58f   : > { %v9924_v30 = vpop.permute.xlu1 %5099  ;;  %v9926_v42 = vpop.permute.xlu0 %5410  ;;  %v3758_v48 = vadd.f32 %v10802_v62, %v3743_v19  ;;  %v3759_v2 = vadd.f32 %v10803_v56, %v3744_v12  ;;  %v3906_v0 = vadd.f32 %v10804_v63, %v3891_v39  ;;  %v4067_v34 = vadd.f32 %v10805_v53, %v4052_v17  ;;  %v10812_v53 = vld [vmem:[#allocation272_spill] sm:$0xff] }
 0x590   : > { %v3920_v50 = vadd.f32 %v10806_v27, %v3905_v60  ;;  %v3934_v1 = vrot.slane %v3927_v43, 1  ;;  %v4093_v44 = vrot.slane %v4087_v37, 1  ;;  %v4094_v54 = vrot.slane %v4088_v46, 1  ;;  %v10810_v37 = vld [vmem:[#allocation21_spill] sm:$0xff] }
 0x591   : > { %v3771_v58 = vsel %vm255_vm3, %v3769_v15, %v3770_v41  ;;  %v3921_v26 = vadd.f32 %v10807_v6, %v3906_v0  ;;  %v4068_v8 = vadd.f32 %v10808_v55, %v4053_v3  ;;  %v4082_v31 = vadd.f32 %v10809_v7, %v4067_v34  ;;  %v10811_v0 = vld [vmem:[#allocation271_spill] sm:$0xff]  ;;  %v10816_v55 = vld [vmem:[#allocation16_spill] sm:$0xff] }
 0x592   : > { %v3773_v22 = vsel %vm255_vm3, %v3770_v41, %v3772_v21  ;;  %v3987_v39 = vmul.f32 %v3986_v40, %v10691_v11  ;;  %v4096_v59 = vrot.slane %v4089_v23, 1  ;;  %v4148_v19 = vstv %s9918_s26  ;;  %v10817_v7 = vld [vmem:[#allocation35_spill] sm:$0xff] }
 0x593   : > { %v9939_v29 = vpop.permute.xlu1 %5261  ;;  %v9941_v35 = vpop.permute.xlu0 %5101  ;;  %v3776_v10 = vadd.f32 %v3771_v58, %v3758_v48  ;;  %v3777_v12 = vadd.f32 %v3773_v22, %v3759_v2  ;;  %v3933_v43 = vsel %vm255_vm3, %v3931_v25, %v3932_v61  ;;  %v4083_v46 = vadd.f32 %v10810_v37, %v4068_v8  ;;  %v10820_v37 = vld [vmem:[#allocation19_spill] sm:$0xff] }
 0x594   : > { %v3938_v33 = vadd.f32 %v3933_v43, %v3920_v50  ;;  %v3935_v60 = vsel %vm255_vm3, %v3932_v61, %v3934_v1  ;;  %v3988_v3 = vmul.f32 %v3986_v40, %v10692_v36  ;;  %v4095_v41 = vsel %vm255_vm3, %v4093_v44, %v4094_v54  ;;  %v10813_v1 = vld [vmem:[#allocation25_spill] sm:$0xff]  ;;  %v10819_v43 = vld [vmem:[#allocation27_spill] sm:$0xff] }
 0x595   : > { %v3831_v21 = vrot.slane %v9911_v5, 2  ;;  %v3832_v23 = vrot.slane %v9914_v24, 2  ;;  %v3939_v62 = vadd.f32 %v3935_v60, %v3921_v26  ;;  %v4100_v48 = vadd.f32 %v4095_v41, %v4082_v31 }
 0x596   : > { %v3989_v25 = vmul.f32 %v3986_v40, %v10693_v47  ;;  %v4097_v56 = vsel %vm255_vm3, %v4094_v54, %v4096_v59  ;;  %v4149_v2 = vmul.f32 %v4148_v19, %v10691_v11  ;;  %v4150_v63 = vmul.f32 %v4148_v19, %v10692_v36  ;;  %v10814_v11 = vld [vmem:[#allocation274_spill] sm:$0xff]  ;;  %v10815_v36 = vld [vmem:[#allocation275_spill] sm:$0xff] }
 0x597   : > { %v9953_v17 = vpop.permute.xlu1 %5423  ;;  %v9955_v15 = vpop.permute.xlu0 %5263  ;;  %v3798_v61 = vadd.f32 %v10811_v0, %v3776_v10  ;;  %v3799_v34 = vadd.f32 %v10812_v53, %v3777_v12  ;;  %v3834_v27 = vrot.slane %v9921_v52, 2  ;;  %v4101_v50 = vadd.f32 %v4097_v56, %v4083_v46  ;;  %v10818_v52 = vld [vmem:[#allocation26_spill] sm:$0xff] }
 0x598   : > { %v3960_v44 = vadd.f32 %v10813_v1, %v3938_v33  ;;  %v3993_v40 = vrot.slane %v3987_v39, 2  ;;  %v3994_v58 = vrot.slane %v3988_v3, 2  ;;  %v4151_v54 = vmul.f32 %v4148_v19, %v10693_v47  ;;  %v10821_v47 = vld [vmem:[#allocation266_spill] sm:$0xff]  ;;  %v10823_v1 = vld [vmem:[#allocation276_spill] sm:$0xff] }
 0x599   : > { %v3820_v6 = vadd.f32 %v10814_v11, %v3798_v61  ;;  %v3821_v26 = vadd.f32 %v10815_v36, %v3799_v34  ;;  %v3961_v8 = vadd.f32 %v10816_v55, %v3939_v62  ;;  %v4122_v31 = vadd.f32 %v10817_v7, %v4100_v48  ;;  %v10826_v55 = vld [vmem:[#allocation278_spill] sm:$0xff]  ;;  %v10827_v7 = vld [vmem:[#allocation279_spill] sm:$0xff] }
 0x59a   : > { %v3982_v22 = vadd.f32 %v10818_v52, %v3960_v44  ;;  %v3996_v59 = vrot.slane %v3989_v25, 2  ;;  %v4155_v10 = vrot.slane %v4149_v2, 2  ;;  %v4156_v12 = vrot.slane %v4150_v63, 2  ;;  %v10822_v2 = vld [vmem:[#allocation22_spill] sm:$0xff]  ;;  %v10828_v52 = vld [vmem:[#allocation261_spill] sm:$0xff] }
 0x59b   : > { %v9969_v5 = vpop.permute.xlu1 %5139  ;;  %v9971_v24 = vpop.permute.xlu0 %5425  ;;  %v3983_v39 = vadd.f32 %v10819_v43, %v3961_v8  ;;  %v4123_v46 = vadd.f32 %v10820_v37, %v4101_v50  ;;  %v4144_v19 = vadd.f32 %v10821_v47, %v4122_v31  ;;  %v3833_v3 = vsel %vm318_vm4, %v3831_v21, %v3832_v23 }
 0x59c   : > { %v3835_v41 = vsel %vm318_vm4, %v3832_v23, %v3834_v27  ;;  %v4158_v62 = vrot.slane %v4151_v54, 2  ;;  %v3838_v48 = vadd.f32 %v3833_v3, %v3820_v6  ;;  %v3995_v56 = vsel %vm318_vm4, %v3993_v40, %v3994_v58  ;;  %v10824_v40 = vld [vmem:[#allocation277_spill] sm:$0xff] }
 0x59d   : > { %v3839_v25 = vadd.f32 %v3835_v41, %v3821_v26  ;;  %v4145_v63 = vadd.f32 %v10822_v2, %v4123_v46  ;;  %v4000_v0 = vadd.f32 %v3995_v56, %v3982_v22  ;;  %v3997_v61 = vsel %vm318_vm4, %v3994_v58, %v3996_v59  ;;  %v10825_v6 = vld [vmem:[#allocation33_spill] sm:$0xff]  ;;  %v10832_v41 = vld [vmem:[#allocation24_spill] sm:$0xff] }
 0x59e   : > { %v4157_v21 = vsel %vm318_vm4, %v4155_v10, %v4156_v12  ;;  %v4001_v23 = vadd.f32 %v3997_v61, %v3983_v39  ;;  %v4159_v50 = vsel %vm318_vm4, %v4156_v12, %v4158_v62  ;;  %v3860_v44 = vadd.f32 %v10823_v1, %v3838_v48  ;;  %v10829_v59 = vld [vmem:[#allocation65_spill] sm:$0xff]  ;;  %v10833_v48 = vld [vmem:[#allocation66_spill] sm:$0xff] }
 0x59f   : > { %v9985_v33 = vpop.permute.xlu1 %5301  ;;  %v9987_v60 = vpop.permute.xlu0 %5141  ;;  %v4162_v53 = vadd.f32 %v4157_v21, %v4144_v19  ;;  %v3861_v58 = vadd.f32 %v10824_v40, %v3839_v25  ;;  %v4163_v54 = vadd.f32 %v4159_v50, %v4145_v63  ;;  %v5072_v11 = vstv %s9979_s29  ;;  %v10830_v39 = vld [vmem:[#allocation17_spill] sm:$0xff]  ;;  %v10831_v19 = vld [vmem:[#allocation262_spill] sm:$0xff] }
 0x5a0   : > { %v4022_v36 = vadd.f32 %v10825_v6, %v4000_v0  ;;  %v5012_v26 = vmul.f32 %v9780_v32, %v8603_v18  ;;  %v3882_v8 = vadd.f32 %v10826_v55, %v3860_v44  ;;  %v4023_v22 = vadd.f32 %v10828_v52, %v4001_v23  ;;  %v10834_v21 = vld [vmem:[#allocation77_spill] sm:$0xff] }
 0x5a1   : > { %v3883_v31 = vadd.f32 %v10827_v7, %v3861_v58  ;;  %v4184_v10 = vadd.f32 %v10829_v59, %v4162_v53  ;;  %v5073_v46 = vmul.f32 %v5072_v11, %v8573_v9  ;;  %v5234_v47 = vstv %s9991_s7 }
 0x5a2   : > { %v4044_v37 = vadd.f32 %v10830_v39, %v4022_v36  ;;  %v5109_v32 = vstv %s9993_s14  ;;  %v4045_v3 = vadd.f32 %v10831_v19, %v4023_v22  ;;  %v4185_v62 = vadd.f32 %v10832_v41, %v4163_v54 }
 0x5a3   : > { %v10005_v34 = vpop.permute.xlu1 %5463  ;;  %v10007_v27 = vpop.permute.xlu0 %5303  ;;  %v4206_v25 = vadd.f32 %v10833_v48, %v4184_v10  ;;  %v5271_v56 = vstv %s9997_s30  ;;  %v5019_v2 = vrot.slane %v5012_v26, 2  ;;  %v5074_v63 = vmul.f32 %v5072_v11, %v8576_v13 }
 0x5a4   : > { %v5396_v0 = vstv %s10001_s20  ;;  %v5433_v61 = vstv %s10003_s18  ;;  %v4207_v23 = vadd.f32 %v10834_v21, %v4185_v62  ;;  %v5235_v53 = vmul.f32 %v5234_v47, %v8573_v9 }
 0x5a5   : > { %v5236_v50 = vmul.f32 %v5234_v47, %v8576_v13  ;;  %v5110_v1 = vmul.f32 %v5109_v32, %v8573_v9  ;;  %v5075_v58 = vadd.f32 %v5073_v46, %v3882_v8  ;;  %v5111_v54 = vmul.f32 %v5109_v32, %v8576_v13 }
 0x5a6   : > { %v5272_v11 = vmul.f32 %v5271_v56, %v8573_v9  ;;  %v5273_v6 = vmul.f32 %v5271_v56, %v8576_v13  ;;  %v5397_v36 = vmul.f32 %v5396_v0, %v8573_v9  ;;  %v5112_v26 = vmul.f32 %v5109_v32, %v8603_v18 }
 0x5a7   : > { %v10020_v12 = vpop.permute.xlu1 %5161  ;;  %v10022_v43 = vpop.permute.xlu0 %5465  ;;  %v5434_v55 = vmul.f32 %v5433_v61, %v8573_v9  ;;  %v5435_v7 = vmul.f32 %v5433_v61, %v8576_v13  ;;  %v5020_v52 = vsel %vm318_vm4, %v5017_v14, %v5019_v2  ;;  %v5076_v8 = vadd.f32 %v5074_v63, %v3883_v31 }
 0x5a8   : > { %v5398_v22 = vmul.f32 %v5396_v0, %v8576_v13  ;;  %v5274_v59 = vmul.f32 %v5271_v56, %v8603_v18  ;;  %v5237_v10 = vadd.f32 %v5235_v53, %v4044_v37  ;;  %v5238_v39 = vadd.f32 %v5236_v50, %v4045_v3 }
 0x5a9   : > { %v5116_v46 = vrot.slane %v5110_v1, 1  ;;  %v5436_v47 = vmul.f32 %v5433_v61, %v8603_v18  ;;  %v5117_v41 = vrot.slane %v5111_v54, 1  ;;  %v5278_v62 = vrot.slane %v5272_v11, 1 }
 0x5aa   : > { %v5279_v48 = vrot.slane %v5273_v6, 1  ;;  %v5171_v38 = vstv %s10028_s21  ;;  %v5399_v14 = vadd.f32 %v5397_v36, %v4206_v25  ;;  %v5119_v31 = vrot.slane %v5112_v26, 1 }
 0x5ab   : > { %v10041_v44 = vpop.permute.xlu1 %5323  ;;  %v10043_v40 = vpop.permute.xlu0 %5163  ;;  %v5440_v2 = vrot.slane %v5434_v55, 1  ;;  %v5441_v63 = vrot.slane %v5435_v7, 1  ;;  %v5090_v37 = vadd.f32 %v9865_v57, %v5075_v58  ;;  %v5091_v3 = vadd.f32 %v9884_v45, %v5076_v8 }
 0x5ac   : > { %v5400_v56 = vadd.f32 %v5398_v22, %v4207_v23  ;;  %v5281_v0 = vrot.slane %v5274_v59, 1  ;;  %v5443_v61 = vrot.slane %v5436_v47, 1  ;;  %v5172_v21 = vmul.f32 %v5171_v38, %v8573_v9 }
 0x5ad   : > { %v5173_v53 = vmul.f32 %v5171_v38, %v8576_v13  ;;  %v5333_v25 = vstv %s10045_s5  ;;  %v5105_v54 = vadd.f32 %v9924_v30, %v5090_v37  ;;  %v5106_v11 = vadd.f32 %v9941_v35, %v5091_v3 }
 0x5ae   : > { %v5118_v57 = vsel %vm255_vm3, %v5116_v46, %v5117_v41  ;;  %v5280_v45 = vsel %vm255_vm3, %v5278_v62, %v5279_v48  ;;  %v5252_v23 = vadd.f32 %v9882_v20, %v5237_v10  ;;  %v5120_v58 = vsel %vm255_vm3, %v5117_v41, %v5119_v31 }
 0x5af   : > { %v10060_v32 = vpop.permute.xlu1 %5485  ;;  %v10062_v19 = vpop.permute.xlu0 %5325  ;;  %v5442_v6 = vsel %vm255_vm3, %v5440_v2, %v5441_v63  ;;  %v5174_v36 = vmul.f32 %v5171_v38, %v8603_v18  ;;  %v5006_v26 = vadd.f32 %v9820_v28, %v9809_v51  ;;  %v5253_v55 = vadd.f32 %v9904_v49, %v5238_v39 }
 0x5b0   : > { %v5282_v30 = vsel %vm255_vm3, %v5279_v48, %v5281_v0  ;;  %v5334_v35 = vmul.f32 %v5333_v25, %v8573_v9  ;;  %v5267_v7 = vadd.f32 %v9939_v29, %v5252_v23  ;;  %v5444_v20 = vsel %vm255_vm3, %v5441_v63, %v5443_v61 }
 0x5b1   : > { %v5178_v8 = vrot.slane %v5172_v21, 2  ;;  %v5179_v22 = vrot.slane %v5173_v53, 2  ;;  %v5268_v46 = vadd.f32 %v9955_v15, %v5253_v55  ;;  %v5123_v47 = vadd.f32 %v5118_v57, %v5105_v54 }
 0x5b2   : > { %v5124_v41 = vadd.f32 %v5120_v58, %v5106_v11  ;;  %v5335_v51 = vmul.f32 %v5333_v25, %v8576_v13  ;;  %v5414_v28 = vadd.f32 %v9902_v16, %v5399_v14  ;;  %v5415_v49 = vadd.f32 %v9926_v42, %v5400_v56 }
 0x5b3   : > { %v10071_v50 = vpop.permute.xlu1 %5201  ;;  %v10073_v1 = vpop.permute.xlu0 %5487  ;;  %v5181_v39 = vrot.slane %v5174_v36, 2  ;;  %v5495_v62 = vstv %s10065_s0  ;;  %v5024_v48 = vadd.f32 %v5020_v52, %v5006_v26  ;;  %v5145_v29 = vadd.f32 %v9969_v5, %v5123_v47 }
 0x5b4   : > { %v5146_v38 = vadd.f32 %v9987_v60, %v5124_v41  ;;  %v5340_v31 = vrot.slane %v5334_v35, 2  ;;  %v5429_v2 = vadd.f32 %v9953_v17, %v5414_v28  ;;  %v5430_v15 = vadd.f32 %v9971_v24, %v5415_v49 }
 0x5b5   : > { %v5285_v63 = vadd.f32 %v5280_v45, %v5267_v7  ;;  %v5336_v3 = vmul.f32 %v5333_v25, %v8603_v18  ;;  %v5286_v16 = vadd.f32 %v5282_v30, %v5268_v46  ;;  %v5167_v42 = vadd.f32 %v10020_v12, %v5145_v29 }
 0x5b6   : > { %v5168_v14 = vadd.f32 %v10043_v40, %v5146_v38  ;;  %v5496_v52 = vmul.f32 %v5495_v62, %v8573_v9  ;;  %v5180_v60 = vsel %vm318_vm4, %v5178_v8, %v5179_v22  ;;  %v5341_v56 = vrot.slane %v5335_v51, 2 }
 0x5b7   : > { %v5364_v59 = vpop.permute.xlu1 %5363  ;;  %v5204_v10 = vpop.permute.xlu0 %5203  ;;  %v5307_v5 = vadd.f32 %v9985_v33, %v5285_v63  ;;  %v5497_v17 = vmul.f32 %v5495_v62, %v8576_v13  ;;  %v5046_v24 = vadd.f32 %v9841_v4, %v5024_v48  ;;  %v5308_v61 = vadd.f32 %v10007_v27, %v5286_v16 }
 0x5b8   : > { %v5182_v21 = vsel %vm318_vm4, %v5179_v22, %v5181_v39  ;;  %v5498_v53 = vmul.f32 %v5495_v62, %v8603_v18  ;;  %v5447_v12 = vadd.f32 %v5442_v6, %v5429_v2  ;;  %v5448_v25 = vadd.f32 %v5444_v20, %v5430_v15 }
 0x5b9   : > { %v5329_v9 = vadd.f32 %v10041_v44, %v5307_v5  ;;  %v5343_v40 = vrot.slane %v5336_v3, 2  ;;  %v5330_v11 = vadd.f32 %v10062_v19, %v5308_v61  ;;  %v5185_v57 = vadd.f32 %v5180_v60, %v5167_v42 }
 0x5ba   : > { %v5186_v13 = vadd.f32 %v5182_v21, %v5168_v14  ;;  %v5469_v4 = vadd.f32 %v10005_v34, %v5447_v12  ;;  %v5502_v27 = vrot.slane %v5496_v52, 2  ;;  %v5503_v23 = vrot.slane %v5497_v17, 2 }
 0x5bb   : > { %v5526_v37 = vpop.permute.xlu1 %5525  ;;  %v5366_v0 = vpop.permute.xlu0 %5365  ;;  %v5470_v58 = vadd.f32 %v10022_v43, %v5448_v25  ;;  %v5207_v18 = vadd.f32 %v10071_v50, %v5185_v57  ;;  %v5342_v6 = vsel %vm318_vm4, %v5340_v31, %v5341_v56  ;;  %v5344_v26 = vsel %vm318_vm4, %v5341_v56, %v5343_v40 }
 0x5bc   : > { %v5208_v44 = vadd.f32 %v5204_v10, %v5186_v13  ;;  %v5491_v19 = vadd.f32 %v10060_v32, %v5469_v4  ;;  %v5347_v36 = vadd.f32 %v5342_v6, %v5329_v9  ;;  %v5505_v55 = vrot.slane %v5498_v53, 2 }
 0x5bd   : > { %v5492_v35 = vadd.f32 %v10073_v1, %v5470_v58  ;;  %v5348_v43 = vadd.f32 %v5344_v26, %v5330_v11  ;;  %v5504_v32 = vsel %vm318_vm4, %v5502_v27, %v5503_v23 }
 0x5be   : > { %v5369_v20 = vadd.f32 %v5364_v59, %v5347_v36  ;;  %v5506_v22 = vsel %vm318_vm4, %v5503_v23, %v5505_v55  ;;  %v5509_v1 = vadd.f32 %v5504_v32, %v5491_v19 }
 0x5bf   : > { %v5064_v33 = vpop.permute.xlu1 %5063  ;;  %v5528_v54 = vpop.permute.xlu0 %5527  ;;  %v5370_v8 = vadd.f32 %v5366_v0, %v5348_v43  ;;  %v5510_v47 = vadd.f32 %v5506_v22, %v5492_v35 }
 0x5c0   : > { %v5068_v45 = vadd.f32 %v5064_v33, %v5046_v24  ;;  %v5531_v51 = vadd.f32 %v5526_v37, %v5509_v1 }
 0x5c1   : > { %v5532_v28 = vadd.f32 %v5528_v54, %v5510_v47 }
 0x5c2   : > { %5990 = vst.msk [vmem:[%s9432_s10 + $0x48] sm:$0xff] %vm5555_vm5, %v5068_v45 }
 0x5c3   : > { %v5226_v34 = vpop.permute.xlu1 %5225  ;;  %v5224_v30 = vpop.permute.xlu0 %5223 }
 0x5c4   : > { %v5230_v50 = vadd.f32 %v5226_v34, %v5208_v44  ;;  %v5229_v7 = vadd.f32 %v5224_v30, %v5207_v18 }
 0x5c6   : > { %5992 = vst.msk [vmem:[%s9432_s10 + $0x58] sm:$0xff] %vm5555_vm5, %v5230_v50  ;;  %5991 = vst.msk [vmem:[%s9432_s10 + $0x50] sm:$0xff] %vm5555_vm5, %v5229_v7 }
 0x5c7   : > { %v5388_v10 = vpop.permute.xlu1 %5387  ;;  %v5386_v46 = vpop.permute.xlu0 %5385 }
 0x5c8   : > { %v5392_v41 = vadd.f32 %v5388_v10, %v5370_v8  ;;  %v5391_v59 = vadd.f32 %v5386_v46, %v5369_v20 }
 0x5ca   : > { %5994 = vst.msk [vmem:[%s9432_s10 + $0x68] sm:$0xff] %vm5555_vm5, %v5392_v41  ;;  %5993 = vst.msk [vmem:[%s9432_s10 + $0x60] sm:$0xff] %vm5555_vm5, %v5391_v59 }
 0x5cb   : > { %v5550_v49 = vpop.permute.xlu1 %5549  ;;  %v5548_v39 = vpop.permute.xlu0 %5547 }
 0x5cc   : > { %v5554_v62 = vadd.f32 %v5550_v49, %v5532_v28  ;;  %v5553_v48 = vadd.f32 %v5548_v39, %v5531_v51 }
 0x5ce   : > { %5996 = vst.msk [vmem:[%s9432_s10 + $0x78] sm:$0xff] %vm5555_vm5, %v5554_v62  ;;  %5995 = vst.msk [vmem:[%s9432_s10 + $0x70] sm:$0xff] %vm5555_vm5, %v5553_v48 }
 0x5cf   : > { %6128 = shalt.err (!%p6125_p10)
}
 0x5d0   : > { %s6129_s10 = scalar_lea.hbm %s10137_s28, 2048  ;;  %s6133_s23 = scalar_lea.hbm %s10194_s2, 4096 }
 0x5d1   : > { %p6130_p9 = scmp.ne.s32.totalorder %s10137_s28, %s6129_s10  ;;  %p6134_p3 = scmp.lt.u32.totalorder %s10137_s28, %s10194_s2 }
 0x5d2   : > { %p6135_p6 = scmp.lt.u32.totalorder %s6133_s23, %s6129_s10  ;;  %p6137_p13 = scmp.lt.u32.totalorder %s6129_s10, %s10137_s28 }
 0x5d3   : > { %p6131_p12 = pnand %p6130_p9, %p10835_p0 }
 0x5d4   : > { %p6136_p8 = por %p6135_p6, %p6134_p3 }
 0x5d5   : > { %p6132_p1 = pneg %p6131_p12 }
 0x5d6   : > { %p6138_p2 = por %p6137_p13, %p6136_p8 }
 0x5d8   : > { %p6139_p5 = pnand %p6138_p2, %p6132_p1 }
 0x5da   : > { %6142 = shalt.err (!%p6139_p5)
}
 0x5db   : > { %s6210_s29 = smov 128   ;;  %s6211_s7 = smov 8  }
 0x5dc   : > { %6006 = dma.vmem_to_hbm [thread:$0]  (%p10835_p0), %s10139_s1, 2048, %s10137_s28, %s5580_s25, %s6210_s29, %s6210_s29, %s6211_s7  }
 0x5dd PF: > { %s5611_s14 = sand.u32 1, %s6179_s22   ;;  %p10836_p11 = scmp.ne.s32.totalorder %s10225_s8, 0 }
 0x5de   : > { %p10837_p4 = scmp.ge.s32.totalorder %s6199_s27, 2  ;;  %s5612_s30 = scalar_lea.sflag [#allocation6], %s5611_s14 }
 0x5e0   : > { %p6013_p7 = pnand %p10837_p4, %p10836_p11 }
 0x5e2   : > { %6174 = dma.done.wait (!%p6013_p7), %s5612_s30, 2048  }
 0x5e3   : > { %6176 = vsyncadd (!%p6013_p7), %s5612_s30, 4294965248  ;;  %s22_s27 = sadd.s32 1, %s6199_s27   ;;  %s10838_s22 = sld [smem:[#allocation11_spill]] }
 0x5e4   : > { %p19_p10 = scmp.ge.s32.totalorder %s22_s27, 4   ;;  %s10839_s23 = sld [smem:[#allocation12_spill]] }
 0x5e5   : > { %s10840_s24 = sld [smem:[#allocation15_spill]]  ;;  %s10841_s25 = sld [smem:[#allocation13_spill]] }
 0x5e6   : > { %s10842_s26 = sld [smem:[#allocation14_spill]]  ;;  %21 = sbr.rel (!%p19_p10) target bundleno = 21 (0x15), region = 79 }
 0x5ed   :  { %5617 = vsyncpa [#allocation5], 1 }
 0x5ee   :  { %5619 = vsyncpa [#allocation5 + $0x1], 1 }
 0x5ef   :  { %5620 = vsyncpa [#allocation6], 1 }
 0x5f0   :  { %5622 = vsyncpa [#allocation6 + $0x1], 1 }

</bundles_post_ra>
